<compile_context>
chip_gen: v7x
topology: tpu7x:2x2x1
jax: 0.10.0
libtpu: 0.0.40
codegen_flags: <defaults>
</compile_context>

<pallas_src>
import functools
import math

import jax
import jax.numpy as jnp
from jax.experimental import pallas as pl
from jax.experimental.pallas import tpu as pltpu

_EPS = 1e-5                      # PyTorch InstanceNorm2d default (affine=False)
_VMEM_LIMIT = 32 * 1024 * 1024   # safe on v5e/v6e/v7x; tiles below use < 5 MiB


def _round_up(x, m):
    return (x + m - 1) // m * m


def _pick_tile(padded, cap, unit):
    """Largest multiple of `unit` dividing `padded` that is <= cap.

    `padded` is assumed to already be a multiple of `unit`.
    """
    if padded <= cap:
        return padded
    t = cap - (cap % unit)
    while padded % t:
        t -= unit
    return t


def _pick_hw_tile(hw, cap=2048):
    """HW tile for instance-norm: divides hw, multiple of 8 (or full plane)."""
    if hw <= cap:
        return hw
    d = cap - (cap % 8)
    while d >= 8:
        if hw % d == 0:
            return d
        d -= 8
    return hw  # fallback: full plane


# ---------------------------------------------------------------------------
# Tiled GEMM (+bias, optional fused tanh) Pallas kernel
# ---------------------------------------------------------------------------
def _matmul_bias_kernel(a_ref, w_ref, b_ref, o_ref, acc_ref, *, act):
    k = pl.program_id(2)

    @pl.when(k == 0)
    def _():
        acc_ref[...] = jnp.zeros_like(acc_ref)

    acc_ref[...] += jnp.dot(
        a_ref[...], w_ref[...], preferred_element_type=jnp.float32
    )

    @pl.when(k == pl.num_programs(2) - 1)
    def _():
        out = acc_ref[...] + b_ref[...]
        if act == "tanh":
            out = jnp.tanh(out)
        o_ref[...] = out.astype(o_ref.dtype)


def matmul_bias(a, w_mat, b, act="none", out_dtype=jnp.bfloat16):
    """out = act(a @ w_mat + b). a:(M,K), w_mat:(K,N) bf16, b:(N,) f32."""
    M, K = a.shape
    K2, N = w_mat.shape
    assert K == K2

    tm = min(256, _round_up(M, 8))
    Mp = _round_up(M, tm)
    Np = _round_up(N, 128)
    tn = _pick_tile(Np, 256, 128)
    Kp = _round_up(K, 128)
    tk = _pick_tile(Kp, 1024, 128)

    a_p = jnp.pad(a.astype(jnp.bfloat16), ((0, Mp - M), (0, Kp - K)))
    w_p = jnp.pad(w_mat.astype(jnp.bfloat16), ((0, Kp - K), (0, Np - N)))
    b_p = jnp.pad(b.astype(jnp.float32), (0, Np - N)).reshape(1, Np)

    out_bytes = Mp * Np * jnp.dtype(out_dtype).itemsize
    cost = pl.CostEstimate(
        flops=2 * Mp * Np * Kp,
        transcendentals=Mp * Np if act == "tanh" else 0,
        bytes_accessed=a_p.size * 2 + w_p.size * 2 + b_p.size * 4 + out_bytes,
    )

    out = pl.pallas_call(
        functools.partial(_matmul_bias_kernel, act=act),
        out_shape=jax.ShapeDtypeStruct((Mp, Np), out_dtype),
        grid=(Mp // tm, Np // tn, Kp // tk),
        in_specs=[
            pl.BlockSpec((tm, tk), lambda i, j, k: (i, k)),
            pl.BlockSpec((tk, tn), lambda i, j, k: (k, j)),
            pl.BlockSpec((1, tn), lambda i, j, k: (0, j)),
        ],
        out_specs=pl.BlockSpec((tm, tn), lambda i, j, k: (i, j)),
        scratch_shapes=[pltpu.VMEM((tm, tn), jnp.float32)],
        compiler_params=pltpu.CompilerParams(
            dimension_semantics=("parallel", "parallel", "arbitrary"),
            vmem_limit_bytes=_VMEM_LIMIT,
        ),
        cost_estimate=cost,
    )(a_p, w_p, b_p)

    if Mp != M or Np != N:
        out = out[:M, :N]
    return out


# ---------------------------------------------------------------------------
# Instance norm: pass 1 (tiled sum / sumsq) + pass 2 (normalize, fused epilogue)
# ---------------------------------------------------------------------------
def _in_stats_kernel(x_ref, s_ref, q_ref):
    t = pl.program_id(1)

    @pl.when(t == 0)
    def _():
        s_ref[...] = jnp.zeros_like(s_ref)
        q_ref[...] = jnp.zeros_like(q_ref)

    x = x_ref[...].astype(jnp.float32)
    s_ref[...] += jnp.sum(x, axis=1, keepdims=True)
    q_ref[...] += jnp.sum(x * x, axis=1, keepdims=True)


def _in_apply_kernel(x_ref, s_ref, q_ref, o_ref, *, act, inv_hw):
    x = x_ref[...].astype(jnp.float32)
    mean = s_ref[...] * inv_hw
    var = jnp.maximum(q_ref[...] * inv_hw - mean * mean, 0.0)
    y = (x - mean) * jax.lax.rsqrt(var + _EPS)
    if act == "relu":
        y = jnp.maximum(y, 0.0)
    o_ref[...] = y.astype(o_ref.dtype)


def _in_apply_res_kernel(x_ref, r_ref, s_ref, q_ref, o_ref, *, inv_hw):
    x = x_ref[...].astype(jnp.float32)
    mean = s_ref[...] * inv_hw
    var = jnp.maximum(q_ref[...] * inv_hw - mean * mean, 0.0)
    y = (x - mean) * jax.lax.rsqrt(var + _EPS)
    o_ref[...] = (r_ref[...].astype(jnp.float32) + y).astype(o_ref.dtype)


def _instance_norm_stats(x2, thw):
    N, HW, C = x2.shape
    return pl.pallas_call(
        _in_stats_kernel,
        out_shape=(
            jax.ShapeDtypeStruct((N, 1, C), jnp.float32),
            jax.ShapeDtypeStruct((N, 1, C), jnp.float32),
        ),
        grid=(N, HW // thw),
        in_specs=[pl.BlockSpec((1, thw, C), lambda n, t: (n, t, 0))],
        out_specs=(
            pl.BlockSpec((1, 1, C), lambda n, t: (n, 0, 0)),
            pl.BlockSpec((1, 1, C), lambda n, t: (n, 0, 0)),
        ),
        compiler_params=pltpu.CompilerParams(
            dimension_semantics=("parallel", "arbitrary"),
            vmem_limit_bytes=_VMEM_LIMIT,
        ),
    )(x2)


def instance_norm(x_nhwc, act="none", residual=None, out_dtype=jnp.bfloat16):
    """InstanceNorm2d (biased var, eps=1e-5) + optional ReLU or residual add."""
    N, H, W, C = x_nhwc.shape
    HW = H * W
    thw = _pick_hw_tile(HW)
    x2 = x_nhwc.reshape(N, HW, C)
    s, q = _instance_norm_stats(x2, thw)
    inv_hw = 1.0 / float(HW)

    cparams = pltpu.CompilerParams(
        dimension_semantics=("parallel", "parallel"),
        vmem_limit_bytes=_VMEM_LIMIT,
    )
    x_spec = pl.BlockSpec((1, thw, C), lambda n, t: (n, t, 0))
    st_spec = pl.BlockSpec((1, 1, C), lambda n, t: (n, 0, 0))

    if residual is None:
        out = pl.pallas_call(
            functools.partial(_in_apply_kernel, act=act, inv_hw=inv_hw),
            out_shape=jax.ShapeDtypeStruct((N, HW, C), out_dtype),
            grid=(N, HW // thw),
            in_specs=[x_spec, st_spec, st_spec],
            out_specs=pl.BlockSpec((1, thw, C), lambda n, t: (n, t, 0)),
            compiler_params=cparams,
        )(x2, s, q)
    else:
        r2 = residual.reshape(N, HW, C)
        out = pl.pallas_call(
            functools.partial(_in_apply_res_kernel, inv_hw=inv_hw),
            out_shape=jax.ShapeDtypeStruct((N, HW, C), out_dtype),
            grid=(N, HW // thw),
            in_specs=[x_spec,
                      pl.BlockSpec((1, thw, C), lambda n, t: (n, t, 0)),
                      st_spec, st_spec],
            out_specs=pl.BlockSpec((1, thw, C), lambda n, t: (n, t, 0)),
            compiler_params=cparams,
        )(x2, r2, s, q)
    return out.reshape(N, H, W, C)


# ---------------------------------------------------------------------------
# Conv glue (padding + im2col in JAX, GEMM in Pallas)
# ---------------------------------------------------------------------------
def _im2col(x, kh, kw, stride):
    """x: padded NHWC -> patches (N, Ho, Wo, kh*kw*C) ordered (kh, kw, C).

    kh, kw, stride are static Python ints (never traced).
    """
    N, H, W, C = x.shape
    Ho = (H - kh) // stride + 1
    Wo = (W - kw) // stride + 1
    cols = []
    for di in range(kh):
        for dj in range(kw):
            cols.append(
                x[:, di: di + (Ho - 1) * stride + 1: stride,
                     dj: dj + (Wo - 1) * stride + 1: stride, :]
            )
    patches = jnp.stack(cols, axis=3)  # (N, Ho, Wo, kh*kw, C)
    return patches.reshape(N, Ho, Wo, kh * kw * C), Ho, Wo


def conv2d(x_nhwc, layer, *, k, stride=1, pad=0, pad_mode="zero", act="none",
           out_dtype=jnp.bfloat16):
    """layer: dict with precomputed w_mat (k*k*cin, cout) bf16, b (cout,) f32.

    `k` (kernel size) is passed statically at the call site so it is never a
    traced value under jax.jit.
    """
    w_mat, b = layer["w_mat"], layer["b"]
    cout = w_mat.shape[1]
    x = x_nhwc.astype(jnp.bfloat16)
    if pad > 0:
        mode = "reflect" if pad_mode == "reflect" else "constant"
        x = jnp.pad(x, ((0, 0), (pad, pad), (pad, pad), (0, 0)), mode=mode)
    N, _, _, cin = x.shape
    assert w_mat.shape[0] == k * k * cin, (w_mat.shape, k, cin)
    patches, Ho, Wo = _im2col(x, k, k, stride)
    a = patches.reshape(N * Ho * Wo, k * k * cin)
    out = matmul_bias(a, w_mat, b, act=act, out_dtype=out_dtype)
    return out.reshape(N, Ho, Wo, cout)


def nearest_upsample_x2(x_nhwc):
    # TODO(synk): fuse the nearest x2 upsample into the following conv's input
    # index_map instead of materializing a 4x tensor in HBM.
    return jnp.repeat(jnp.repeat(x_nhwc, 2, axis=1), 2, axis=2)


# ---------------------------------------------------------------------------
# GeneratorResNet parameters + forward
# ---------------------------------------------------------------------------
def _init_conv(key, cin, cout, k):
    kw_key, kb_key = jax.random.split(key)
    fan_in = cin * k * k
    w = jax.random.normal(kw_key, (cout, cin, k, k), jnp.float32) / math.sqrt(fan_in)
    b = jax.random.normal(kb_key, (cout,), jnp.float32) * 0.01
    # Precompute the (kh*kw*cin, cout) GEMM layout + bf16 cast once.
    # Only arrays live in the params pytree (kernel size is static per layer).
    w_mat = jnp.transpose(w, (2, 3, 1, 0)).reshape(k * k * cin, cout)
    return {"w_mat": w_mat.astype(jnp.bfloat16), "b": b}


def init_generator_params(key, in_channels, out_channels, num_residual_blocks):
    n_convs = 6 + 2 * num_residual_blocks
    keys = iter(jax.random.split(key, n_convs))
    params = {
        "c1": _init_conv(next(keys), in_channels, 64, 7),
        "d1": _init_conv(next(keys), 64, 128, 3),
        "d2": _init_conv(next(keys), 128, 256, 3),
        "res": [
            (_init_conv(next(keys), 256, 256, 3), _init_conv(next(keys), 256, 256, 3))
            for _ in range(num_residual_blocks)
        ],
        "u1": _init_conv(next(keys), 256, 128, 3),
        "u2": _init_conv(next(keys), 128, 64, 3),
        "out": _init_conv(next(keys), 64, out_channels, 7),
    }
    return params


def generator_forward(params, x_nchw):
    # NCHW -> NHWC (bf16 activations between layers; f32 stats / accumulators)
    x = jnp.transpose(x_nchw, (0, 2, 3, 1)).astype(jnp.bfloat16)

    # Initial block: ReflectionPad(3) + Conv7 + IN + ReLU
    y = conv2d(x, params["c1"], k=7, stride=1, pad=3, pad_mode="reflect")
    y = instance_norm(y, act="relu")

    # Downsampling: Conv3 s2 p1 (zero) + IN + ReLU, x2
    for name in ("d1", "d2"):
        y = conv2d(y, params[name], k=3, stride=2, pad=1, pad_mode="zero")
        y = instance_norm(y, act="relu")

    # Residual blocks
    for blk1, blk2 in params["res"]:
        r = y
        t = conv2d(y, blk1, k=3, stride=1, pad=1, pad_mode="reflect")
        t = instance_norm(t, act="relu")
        t = conv2d(t, blk2, k=3, stride=1, pad=1, pad_mode="reflect")
        y = instance_norm(t, residual=r)

    # Upsampling: nearest x2 + Conv3 s1 p1 (zero) + IN + ReLU, x2
    for name in ("u1", "u2"):
        y = nearest_upsample_x2(y)
        y = conv2d(y, params[name], k=3, stride=1, pad=1, pad_mode="zero")
        y = instance_norm(y, act="relu")

    # Output: ReflectionPad(3) + Conv7 + Tanh (tanh fused into the GEMM epilogue;
    # Cout=3 is padded to a lane-dense 128-wide output tile inside matmul_bias)
    y = conv2d(y, params["out"], k=7, stride=1, pad=3, pad_mode="reflect",
               act="tanh", out_dtype=jnp.float32)

    return jnp.transpose(y, (0, 3, 1, 2))  # back to NCHW


# ---------------------------------------------------------------------------
if __name__ == "__main__":
    key = jax.random.PRNGKey(0)
    pkey, xkey = jax.random.split(key)

    in_shape = (3, 16, 16)   # (C, H, W)
    out_shape = (3, 16, 16)
    num_residual_blocks = 2
    batch = 2

    params = init_generator_params(pkey, in_shape[0], out_shape[0],
                                   num_residual_blocks)
    x = jax.random.normal(xkey, (batch, *in_shape), jnp.float32)

    fwd = jax.jit(generator_forward)
    y = fwd(params, x)
    jax.block_until_ready(y)

    assert y.shape == (batch, out_shape[0], in_shape[1], in_shape[2]), y.shape
    assert jnp.all(jnp.isfinite(y))
    assert float(jnp.max(jnp.abs(y))) <= 1.0 + 1e-6  # tanh output range
    print("KERNEL_OK")
</pallas_src>

<mosaic_0001>
module attributes {stable_mosaic.version = 11 : i64} {
  func.func @_matmul_bias_kernel(%arg0: i32, %arg1: i32, %arg2: i32, %arg3: memref<256x256xbf16, #tpu.memory_space<vmem>>, %arg4: memref<256x128xbf16, #tpu.memory_space<vmem>>, %arg5: memref<1x128xf32, #tpu.memory_space<vmem>>, %arg6: memref<256x128xbf16, #tpu.memory_space<vmem>>, %arg7: memref<256x128xf32, #tpu.memory_space<vmem>>) attributes {dimension_semantics = [#tpu.dimension_semantics<parallel>, #tpu.dimension_semantics<parallel>, #tpu.dimension_semantics<arbitrary>], iteration_bounds = array<i64: 2, 1, 1>, scalar_prefetch = 0 : i64, scratch_operands = 1 : i64, tpu.core_type = #tpu.core_type<tc>, window_params = [{transform_indices = @transform_0, window_bounds = array<i64: 256, 256>}, {transform_indices = @transform_1, window_bounds = array<i64: 256, 128>}, {transform_indices = @transform_2, window_bounds = array<i64: 1, 128>}, {transform_indices = @transform_3, window_bounds = array<i64: 256, 128>}]} {
    %c0_i32 = arith.constant 0 : i32
    %0 = arith.cmpi eq, %arg2, %c0_i32 : i32
    %1 = arith.extui %0 : i1 to i32
    %c0_i32_0 = arith.constant 0 : i32
    %2 = arith.cmpi ne, %1, %c0_i32_0 : i32
    scf.if %2 {
      %cst_10 = arith.constant 0.000000e+00 : f32
      %12 = vector.broadcast %cst_10 : f32 to vector<256x128xf32>
      %c0_11 = arith.constant 0 : index
      %c0_12 = arith.constant 0 : index
      %13 = vector.load %arg7[%c0_11, %c0_12] : memref<256x128xf32, #tpu.memory_space<vmem>>, vector<256x128xf32>
      tpu.vector_store %arg7[%c0_11, %c0_12], %12 {strides = array<i32>} : memref<256x128xf32, #tpu.memory_space<vmem>>, vector<256x128xf32>,
    } else {
    }
    %c0 = arith.constant 0 : index
    %c0_1 = arith.constant 0 : index
    %3 = vector.load %arg7[%c0, %c0_1] : memref<256x128xf32, #tpu.memory_space<vmem>>, vector<256x128xf32>
    %c0_2 = arith.constant 0 : index
    %c0_3 = arith.constant 0 : index
    %4 = vector.load %arg3[%c0_2, %c0_3] : memref<256x256xbf16, #tpu.memory_space<vmem>>, vector<256x256xbf16>
    %c0_4 = arith.constant 0 : index
    %c0_5 = arith.constant 0 : index
    %5 = vector.load %arg4[%c0_4, %c0_5] : memref<256x128xbf16, #tpu.memory_space<vmem>>, vector<256x128xbf16>
    %cst = arith.constant dense<0.000000e+00> : vector<256x128xf32>
    %6 = tpu.matmul %4, %5, %cst {dimension_numbers = #tpu.dot_dimension_numbers<[1], [0], [0], [1], [0, 0, 1, 1], [], []>} : vector<256x256xbf16>, vector<256x128xbf16>, vector<256x128xf32> -> vector<256x128xf32>
    %7 = arith.addf %3, %6 : vector<256x128xf32>
    %c0_6 = arith.constant 0 : index
    %c0_7 = arith.constant 0 : index
    %8 = vector.load %arg7[%c0_6, %c0_7] : memref<256x128xf32, #tpu.memory_space<vmem>>, vector<256x128xf32>
    tpu.vector_store %arg7[%c0_6, %c0_7], %7 {strides = array<i32>} : memref<256x128xf32, #tpu.memory_space<vmem>>, vector<256x128xf32>,
    %c0_i32_8 = arith.constant 0 : i32
    %9 = arith.cmpi eq, %arg2, %c0_i32_8 : i32
    %10 = arith.extui %9 : i1 to i32
    %c0_i32_9 = arith.constant 0 : i32
    %11 = arith.cmpi ne, %10, %c0_i32_9 : i32
    scf.if %11 {
      %c0_10 = arith.constant 0 : index
      %c0_11 = arith.constant 0 : index
      %12 = vector.load %arg7[%c0_10, %c0_11] : memref<256x128xf32, #tpu.memory_space<vmem>>, vector<256x128xf32>
      %c0_12 = arith.constant 0 : index
      %c0_13 = arith.constant 0 : index
      %13 = vector.load %arg5[%c0_12, %c0_13] : memref<1x128xf32, #tpu.memory_space<vmem>>, vector<1x128xf32>
      %14 = vector.broadcast %13 : vector<1x128xf32> to vector<256x128xf32>
      %15 = arith.addf %12, %14 : vector<256x128xf32>
      %16 = arith.truncf %15 : vector<256x128xf32> to vector<256x128xbf16>
      %c0_14 = arith.constant 0 : index
      %c0_15 = arith.constant 0 : index
      %17 = vector.load %arg6[%c0_14, %c0_15] : memref<256x128xbf16, #tpu.memory_space<vmem>>, vector<256x128xbf16>
      tpu.vector_store %arg6[%c0_14, %c0_15], %16 {strides = array<i32>} : memref<256x128xbf16, #tpu.memory_space<vmem>>, vector<256x128xbf16>,
    } else {
    }
    return
  }
  func.func @transform_0(%arg0: i32, %arg1: i32, %arg2: i32) -> (i32, i32) {
    %c0_i32 = arith.constant 0 : i32
    return %arg0, %arg2 : i32, i32
  }
  func.func @transform_1(%arg0: i32, %arg1: i32, %arg2: i32) -> (i32, i32) {
    %c0_i32 = arith.constant 0 : i32
    return %arg2, %arg1 : i32, i32
  }
  func.func @transform_2(%arg0: i32, %arg1: i32, %arg2: i32) -> (i32, i32) {
    %c0_i32 = arith.constant 0 : i32
    %c0_i32_0 = arith.constant 0 : i32
    return %c0_i32, %arg1 : i32, i32
  }
  func.func @transform_3(%arg0: i32, %arg1: i32, %arg2: i32) -> (i32, i32) {
    %c0_i32 = arith.constant 0 : i32
    return %arg0, %arg1 : i32, i32
  }
}

module attributes {stable_mosaic.version = 11 : i64} {
  func.func @_in_stats_kernel(%arg0: i32, %arg1: i32, %arg2: memref<1x256x64xbf16, #tpu.memory_space<vmem>>, %arg3: memref<1x1x64xf32, #tpu.memory_space<vmem>>, %arg4: memref<1x1x64xf32, #tpu.memory_space<vmem>>) attributes {dimension_semantics = [#tpu.dimension_semantics<parallel>, #tpu.dimension_semantics<arbitrary>], iteration_bounds = array<i64: 2, 1>, scalar_prefetch = 0 : i64, scratch_operands = 0 : i64, tpu.core_type = #tpu.core_type<tc>, window_params = [{transform_indices = @transform_0, window_bounds = array<i64: 1, 256, 64>}, {transform_indices = @transform_1, window_bounds = array<i64: 1, 1, 64>}, {transform_indices = @transform_2, window_bounds = array<i64: 1, 1, 64>}]} {
    %c0_i32 = arith.constant 0 : i32
    %0 = arith.cmpi eq, %arg1, %c0_i32 : i32
    %1 = arith.extui %0 : i1 to i32
    %c0_i32_0 = arith.constant 0 : i32
    %2 = arith.cmpi ne, %1, %c0_i32_0 : i32
    scf.if %2 {
      %cst_16 = arith.constant 0.000000e+00 : f32
      %16 = vector.broadcast %cst_16 : f32 to vector<1x1x64xf32>
      %c0_17 = arith.constant 0 : index
      %c0_18 = arith.constant 0 : index
      %c0_19 = arith.constant 0 : index
      %17 = vector.load %arg3[%c0_17, %c0_18, %c0_19] : memref<1x1x64xf32, #tpu.memory_space<vmem>>, vector<1x1x64xf32>
      tpu.vector_store %arg3[%c0_17, %c0_18, %c0_19], %16 {strides = array<i32>} : memref<1x1x64xf32, #tpu.memory_space<vmem>>, vector<1x1x64xf32>,
      %cst_20 = arith.constant 0.000000e+00 : f32
      %18 = vector.broadcast %cst_20 : f32 to vector<1x1x64xf32>
      %c0_21 = arith.constant 0 : index
      %c0_22 = arith.constant 0 : index
      %c0_23 = arith.constant 0 : index
      %19 = vector.load %arg4[%c0_21, %c0_22, %c0_23] : memref<1x1x64xf32, #tpu.memory_space<vmem>>, vector<1x1x64xf32>
      tpu.vector_store %arg4[%c0_21, %c0_22, %c0_23], %18 {strides = array<i32>} : memref<1x1x64xf32, #tpu.memory_space<vmem>>, vector<1x1x64xf32>,
    } else {
    }
    %c0 = arith.constant 0 : index
    %c0_1 = arith.constant 0 : index
    %c0_2 = arith.constant 0 : index
    %3 = vector.load %arg2[%c0, %c0_1, %c0_2] : memref<1x256x64xbf16, #tpu.memory_space<vmem>>, vector<1x256x64xbf16>
    %4 = arith.extf %3 : vector<1x256x64xbf16> to vector<1x256x64xf32>
    %c0_3 = arith.constant 0 : index
    %c0_4 = arith.constant 0 : index
    %c0_5 = arith.constant 0 : index
    %5 = vector.load %arg3[%c0_3, %c0_4, %c0_5] : memref<1x1x64xf32, #tpu.memory_space<vmem>>, vector<1x1x64xf32>
    %cst = arith.constant dense<0.000000e+00> : vector<1x64xf32>
    %6 = vector.multi_reduction <add>, %4, %cst [1] : vector<1x256x64xf32> to vector<1x64xf32>
    %7 = vector.shape_cast %6 : vector<1x64xf32> to vector<1x1x64xf32>
    %8 = arith.addf %5, %7 : vector<1x1x64xf32>
    %c0_6 = arith.constant 0 : index
    %c0_7 = arith.constant 0 : index
    %c0_8 = arith.constant 0 : index
    %9 = vector.load %arg3[%c0_6, %c0_7, %c0_8] : memref<1x1x64xf32, #tpu.memory_space<vmem>>, vector<1x1x64xf32>
    tpu.vector_store %arg3[%c0_6, %c0_7, %c0_8], %8 {strides = array<i32>} : memref<1x1x64xf32, #tpu.memory_space<vmem>>, vector<1x1x64xf32>,
    %c0_9 = arith.constant 0 : index
    %c0_10 = arith.constant 0 : index
    %c0_11 = arith.constant 0 : index
    %10 = vector.load %arg4[%c0_9, %c0_10, %c0_11] : memref<1x1x64xf32, #tpu.memory_space<vmem>>, vector<1x1x64xf32>
    %11 = arith.mulf %4, %4 : vector<1x256x64xf32>
    %cst_12 = arith.constant dense<0.000000e+00> : vector<1x64xf32>
    %12 = vector.multi_reduction <add>, %11, %cst_12 [1] : vector<1x256x64xf32> to vector<1x64xf32>
    %13 = vector.shape_cast %12 : vector<1x64xf32> to vector<1x1x64xf32>
    %14 = arith.addf %10, %13 : vector<1x1x64xf32>
    %c0_13 = arith.constant 0 : index
    %c0_14 = arith.constant 0 : index
    %c0_15 = arith.constant 0 : index
    %15 = vector.load %arg4[%c0_13, %c0_14, %c0_15] : memref<1x1x64xf32, #tpu.memory_space<vmem>>, vector<1x1x64xf32>
    tpu.vector_store %arg4[%c0_13, %c0_14, %c0_15], %14 {strides = array<i32>} : memref<1x1x64xf32, #tpu.memory_space<vmem>>, vector<1x1x64xf32>,
    return
  }
  func.func @transform_0(%arg0: i32, %arg1: i32) -> (i32, i32, i32) {
    %c0_i32 = arith.constant 0 : i32
    %c0_i32_0 = arith.constant 0 : i32
    return %arg0, %arg1, %c0_i32 : i32, i32, i32
  }
  func.func @transform_1(%arg0: i32, %arg1: i32) -> (i32, i32, i32) {
    %c0_i32 = arith.constant 0 : i32
    %c0_i32_0 = arith.constant 0 : i32
    %c0_i32_1 = arith.constant 0 : i32
    return %arg0, %c0_i32, %c0_i32_0 : i32, i32, i32
  }
  func.func @transform_2(%arg0: i32, %arg1: i32) -> (i32, i32, i32) {
    %c0_i32 = arith.constant 0 : i32
    %c0_i32_0 = arith.constant 0 : i32
    %c0_i32_1 = arith.constant 0 : i32
    return %arg0, %c0_i32, %c0_i32_0 : i32, i32, i32
  }
}

module attributes {stable_mosaic.version = 11 : i64} {
  func.func @_in_apply_kernel(%arg0: i32, %arg1: i32, %arg2: memref<1x256x64xbf16, #tpu.memory_space<vmem>>, %arg3: memref<1x1x64xf32, #tpu.memory_space<vmem>>, %arg4: memref<1x1x64xf32, #tpu.memory_space<vmem>>, %arg5: memref<1x256x64xbf16, #tpu.memory_space<vmem>>) attributes {dimension_semantics = [#tpu.dimension_semantics<parallel>, #tpu.dimension_semantics<parallel>], iteration_bounds = array<i64: 2, 1>, scalar_prefetch = 0 : i64, scratch_operands = 0 : i64, tpu.core_type = #tpu.core_type<tc>, window_params = [{transform_indices = @transform_0, window_bounds = array<i64: 1, 256, 64>}, {transform_indices = @transform_1, window_bounds = array<i64: 1, 1, 64>}, {transform_indices = @transform_2, window_bounds = array<i64: 1, 1, 64>}, {transform_indices = @transform_3, window_bounds = array<i64: 1, 256, 64>}]} {
    %c0 = arith.constant 0 : index
    %c0_0 = arith.constant 0 : index
    %c0_1 = arith.constant 0 : index
    %0 = vector.load %arg2[%c0, %c0_0, %c0_1] : memref<1x256x64xbf16, #tpu.memory_space<vmem>>, vector<1x256x64xbf16>
    %1 = arith.extf %0 : vector<1x256x64xbf16> to vector<1x256x64xf32>
    %c0_2 = arith.constant 0 : index
    %c0_3 = arith.constant 0 : index
    %c0_4 = arith.constant 0 : index
    %2 = vector.load %arg3[%c0_2, %c0_3, %c0_4] : memref<1x1x64xf32, #tpu.memory_space<vmem>>, vector<1x1x64xf32>
    %cst = arith.constant 3.906250e-03 : f32
    %3 = vector.broadcast %cst : f32 to vector<1x1x64xf32>
    %4 = arith.mulf %2, %3 : vector<1x1x64xf32>
    %c0_5 = arith.constant 0 : index
    %c0_6 = arith.constant 0 : index
    %c0_7 = arith.constant 0 : index
    %5 = vector.load %arg4[%c0_5, %c0_6, %c0_7] : memref<1x1x64xf32, #tpu.memory_space<vmem>>, vector<1x1x64xf32>
    %cst_8 = arith.constant 3.906250e-03 : f32
    %6 = vector.broadcast %cst_8 : f32 to vector<1x1x64xf32>
    %7 = arith.mulf %5, %6 : vector<1x1x64xf32>
    %8 = arith.mulf %4, %4 : vector<1x1x64xf32>
    %9 = arith.subf %7, %8 : vector<1x1x64xf32>
    %cst_9 = arith.constant 0.000000e+00 : f32
    %10 = vector.broadcast %cst_9 : f32 to vector<1x1x64xf32>
    %11 = arith.maximumf %9, %10 : vector<1x1x64xf32>
    %12 = vector.broadcast %4 : vector<1x1x64xf32> to vector<1x256x64xf32>
    %13 = arith.subf %1, %12 : vector<1x256x64xf32>
    %cst_10 = arith.constant 9.99999974E-6 : f32
    %14 = vector.broadcast %cst_10 : f32 to vector<1x1x64xf32>
    %15 = arith.addf %11, %14 : vector<1x1x64xf32>
    %16 = math.rsqrt %15 : vector<1x1x64xf32>
    %17 = vector.broadcast %16 : vector<1x1x64xf32> to vector<1x256x64xf32>
    %18 = arith.mulf %13, %17 : vector<1x256x64xf32>
    %cst_11 = arith.constant 0.000000e+00 : f32
    %19 = vector.broadcast %cst_11 : f32 to vector<1x256x64xf32>
    %20 = arith.maximumf %18, %19 : vector<1x256x64xf32>
    %21 = arith.truncf %20 : vector<1x256x64xf32> to vector<1x256x64xbf16>
    %c0_12 = arith.constant 0 : index
    %c0_13 = arith.constant 0 : index
    %c0_14 = arith.constant 0 : index
    %22 = vector.load %arg5[%c0_12, %c0_13, %c0_14] : memref<1x256x64xbf16, #tpu.memory_space<vmem>>, vector<1x256x64xbf16>
    tpu.vector_store %arg5[%c0_12, %c0_13, %c0_14], %21 {strides = array<i32>} : memref<1x256x64xbf16, #tpu.memory_space<vmem>>, vector<1x256x64xbf16>,
    return
  }
  func.func @transform_0(%arg0: i32, %arg1: i32) -> (i32, i32, i32) {
    %c0_i32 = arith.constant 0 : i32
    %c0_i32_0 = arith.constant 0 : i32
    return %arg0, %arg1, %c0_i32 : i32, i32, i32
  }
  func.func @transform_1(%arg0: i32, %arg1: i32) -> (i32, i32, i32) {
    %c0_i32 = arith.constant 0 : i32
    %c0_i32_0 = arith.constant 0 : i32
    %c0_i32_1 = arith.constant 0 : i32
    return %arg0, %c0_i32, %c0_i32_0 : i32, i32, i32
  }
  func.func @transform_2(%arg0: i32, %arg1: i32) -> (i32, i32, i32) {
    %c0_i32 = arith.constant 0 : i32
    %c0_i32_0 = arith.constant 0 : i32
    %c0_i32_1 = arith.constant 0 : i32
    return %arg0, %c0_i32, %c0_i32_0 : i32, i32, i32
  }
  func.func @transform_3(%arg0: i32, %arg1: i32) -> (i32, i32, i32) {
    %c0_i32 = arith.constant 0 : i32
    %c0_i32_0 = arith.constant 0 : i32
    return %arg0, %arg1, %c0_i32 : i32, i32, i32
  }
}

module attributes {stable_mosaic.version = 11 : i64} {
  func.func @_matmul_bias_kernel(%arg0: i32, %arg1: i32, %arg2: i32, %arg3: memref<128x640xbf16, #tpu.memory_space<vmem>>, %arg4: memref<640x128xbf16, #tpu.memory_space<vmem>>, %arg5: memref<1x128xf32, #tpu.memory_space<vmem>>, %arg6: memref<128x128xbf16, #tpu.memory_space<vmem>>, %arg7: memref<128x128xf32, #tpu.memory_space<vmem>>) attributes {dimension_semantics = [#tpu.dimension_semantics<parallel>, #tpu.dimension_semantics<parallel>, #tpu.dimension_semantics<arbitrary>], iteration_bounds = array<i64: 1, 1, 1>, scalar_prefetch = 0 : i64, scratch_operands = 1 : i64, tpu.core_type = #tpu.core_type<tc>, window_params = [{transform_indices = @transform_0, window_bounds = array<i64: 128, 640>}, {transform_indices = @transform_1, window_bounds = array<i64: 640, 128>}, {transform_indices = @transform_2, window_bounds = array<i64: 1, 128>}, {transform_indices = @transform_3, window_bounds = array<i64: 128, 128>}]} {
    %c0_i32 = arith.constant 0 : i32
    %0 = arith.cmpi eq, %arg2, %c0_i32 : i32
    %1 = arith.extui %0 : i1 to i32
    %c0_i32_0 = arith.constant 0 : i32
    %2 = arith.cmpi ne, %1, %c0_i32_0 : i32
    scf.if %2 {
      %cst_10 = arith.constant 0.000000e+00 : f32
      %12 = vector.broadcast %cst_10 : f32 to vector<128x128xf32>
      %c0_11 = arith.constant 0 : index
      %c0_12 = arith.constant 0 : index
      %13 = vector.load %arg7[%c0_11, %c0_12] : memref<128x128xf32, #tpu.memory_space<vmem>>, vector<128x128xf32>
      tpu.vector_store %arg7[%c0_11, %c0_12], %12 {strides = array<i32>} : memref<128x128xf32, #tpu.memory_space<vmem>>, vector<128x128xf32>,
    } else {
    }
    %c0 = arith.constant 0 : index
    %c0_1 = arith.constant 0 : index
    %3 = vector.load %arg7[%c0, %c0_1] : memref<128x128xf32, #tpu.memory_space<vmem>>, vector<128x128xf32>
    %c0_2 = arith.constant 0 : index
    %c0_3 = arith.constant 0 : index
    %4 = vector.load %arg3[%c0_2, %c0_3] : memref<128x640xbf16, #tpu.memory_space<vmem>>, vector<128x640xbf16>
    %c0_4 = arith.constant 0 : index
    %c0_5 = arith.constant 0 : index
    %5 = vector.load %arg4[%c0_4, %c0_5] : memref<640x128xbf16, #tpu.memory_space<vmem>>, vector<640x128xbf16>
    %cst = arith.constant dense<0.000000e+00> : vector<128x128xf32>
    %6 = tpu.matmul %4, %5, %cst {dimension_numbers = #tpu.dot_dimension_numbers<[1], [0], [0], [1], [0, 0, 1, 1], [], []>} : vector<128x640xbf16>, vector<640x128xbf16>, vector<128x128xf32> -> vector<128x128xf32>
    %7 = arith.addf %3, %6 : vector<128x128xf32>
    %c0_6 = arith.constant 0 : index
    %c0_7 = arith.constant 0 : index
    %8 = vector.load %arg7[%c0_6, %c0_7] : memref<128x128xf32, #tpu.memory_space<vmem>>, vector<128x128xf32>
    tpu.vector_store %arg7[%c0_6, %c0_7], %7 {strides = array<i32>} : memref<128x128xf32, #tpu.memory_space<vmem>>, vector<128x128xf32>,
    %c0_i32_8 = arith.constant 0 : i32
    %9 = arith.cmpi eq, %arg2, %c0_i32_8 : i32
    %10 = arith.extui %9 : i1 to i32
    %c0_i32_9 = arith.constant 0 : i32
    %11 = arith.cmpi ne, %10, %c0_i32_9 : i32
    scf.if %11 {
      %c0_10 = arith.constant 0 : index
      %c0_11 = arith.constant 0 : index
      %12 = vector.load %arg7[%c0_10, %c0_11] : memref<128x128xf32, #tpu.memory_space<vmem>>, vector<128x128xf32>
      %c0_12 = arith.constant 0 : index
      %c0_13 = arith.constant 0 : index
      %13 = vector.load %arg5[%c0_12, %c0_13] : memref<1x128xf32, #tpu.memory_space<vmem>>, vector<1x128xf32>
      %14 = vector.broadcast %13 : vector<1x128xf32> to vector<128x128xf32>
      %15 = arith.addf %12, %14 : vector<128x128xf32>
      %16 = arith.truncf %15 : vector<128x128xf32> to vector<128x128xbf16>
      %c0_14 = arith.constant 0 : index
      %c0_15 = arith.constant 0 : index
      %17 = vector.load %arg6[%c0_14, %c0_15] : memref<128x128xbf16, #tpu.memory_space<vmem>>, vector<128x128xbf16>
      tpu.vector_store %arg6[%c0_14, %c0_15], %16 {strides = array<i32>} : memref<128x128xbf16, #tpu.memory_space<vmem>>, vector<128x128xbf16>,
    } else {
    }
    return
  }
  func.func @transform_0(%arg0: i32, %arg1: i32, %arg2: i32) -> (i32, i32) {
    %c0_i32 = arith.constant 0 : i32
    return %arg0, %arg2 : i32, i32
  }
  func.func @transform_1(%arg0: i32, %arg1: i32, %arg2: i32) -> (i32, i32) {
    %c0_i32 = arith.constant 0 : i32
    return %arg2, %arg1 : i32, i32
  }
  func.func @transform_2(%arg0: i32, %arg1: i32, %arg2: i32) -> (i32, i32) {
    %c0_i32 = arith.constant 0 : i32
    %c0_i32_0 = arith.constant 0 : i32
    return %c0_i32, %arg1 : i32, i32
  }
  func.func @transform_3(%arg0: i32, %arg1: i32, %arg2: i32) -> (i32, i32) {
    %c0_i32 = arith.constant 0 : i32
    return %arg0, %arg1 : i32, i32
  }
}

module attributes {stable_mosaic.version = 11 : i64} {
  func.func @_in_stats_kernel(%arg0: i32, %arg1: i32, %arg2: memref<1x64x128xbf16, #tpu.memory_space<vmem>>, %arg3: memref<1x1x128xf32, #tpu.memory_space<vmem>>, %arg4: memref<1x1x128xf32, #tpu.memory_space<vmem>>) attributes {dimension_semantics = [#tpu.dimension_semantics<parallel>, #tpu.dimension_semantics<arbitrary>], iteration_bounds = array<i64: 2, 1>, scalar_prefetch = 0 : i64, scratch_operands = 0 : i64, tpu.core_type = #tpu.core_type<tc>, window_params = [{transform_indices = @transform_0, window_bounds = array<i64: 1, 64, 128>}, {transform_indices = @transform_1, window_bounds = array<i64: 1, 1, 128>}, {transform_indices = @transform_2, window_bounds = array<i64: 1, 1, 128>}]} {
    %c0_i32 = arith.constant 0 : i32
    %0 = arith.cmpi eq, %arg1, %c0_i32 : i32
    %1 = arith.extui %0 : i1 to i32
    %c0_i32_0 = arith.constant 0 : i32
    %2 = arith.cmpi ne, %1, %c0_i32_0 : i32
    scf.if %2 {
      %cst_16 = arith.constant 0.000000e+00 : f32
      %16 = vector.broadcast %cst_16 : f32 to vector<1x1x128xf32>
      %c0_17 = arith.constant 0 : index
      %c0_18 = arith.constant 0 : index
      %c0_19 = arith.constant 0 : index
      %17 = vector.load %arg3[%c0_17, %c0_18, %c0_19] : memref<1x1x128xf32, #tpu.memory_space<vmem>>, vector<1x1x128xf32>
      tpu.vector_store %arg3[%c0_17, %c0_18, %c0_19], %16 {strides = array<i32>} : memref<1x1x128xf32, #tpu.memory_space<vmem>>, vector<1x1x128xf32>,
      %cst_20 = arith.constant 0.000000e+00 : f32
      %18 = vector.broadcast %cst_20 : f32 to vector<1x1x128xf32>
      %c0_21 = arith.constant 0 : index
      %c0_22 = arith.constant 0 : index
      %c0_23 = arith.constant 0 : index
      %19 = vector.load %arg4[%c0_21, %c0_22, %c0_23] : memref<1x1x128xf32, #tpu.memory_space<vmem>>, vector<1x1x128xf32>
      tpu.vector_store %arg4[%c0_21, %c0_22, %c0_23], %18 {strides = array<i32>} : memref<1x1x128xf32, #tpu.memory_space<vmem>>, vector<1x1x128xf32>,
    } else {
    }
    %c0 = arith.constant 0 : index
    %c0_1 = arith.constant 0 : index
    %c0_2 = arith.constant 0 : index
    %3 = vector.load %arg2[%c0, %c0_1, %c0_2] : memref<1x64x128xbf16, #tpu.memory_space<vmem>>, vector<1x64x128xbf16>
    %4 = arith.extf %3 : vector<1x64x128xbf16> to vector<1x64x128xf32>
    %c0_3 = arith.constant 0 : index
    %c0_4 = arith.constant 0 : index
    %c0_5 = arith.constant 0 : index
    %5 = vector.load %arg3[%c0_3, %c0_4, %c0_5] : memref<1x1x128xf32, #tpu.memory_space<vmem>>, vector<1x1x128xf32>
    %cst = arith.constant dense<0.000000e+00> : vector<1x128xf32>
    %6 = vector.multi_reduction <add>, %4, %cst [1] : vector<1x64x128xf32> to vector<1x128xf32>
    %7 = vector.shape_cast %6 : vector<1x128xf32> to vector<1x1x128xf32>
    %8 = arith.addf %5, %7 : vector<1x1x128xf32>
    %c0_6 = arith.constant 0 : index
    %c0_7 = arith.constant 0 : index
    %c0_8 = arith.constant 0 : index
    %9 = vector.load %arg3[%c0_6, %c0_7, %c0_8] : memref<1x1x128xf32, #tpu.memory_space<vmem>>, vector<1x1x128xf32>
    tpu.vector_store %arg3[%c0_6, %c0_7, %c0_8], %8 {strides = array<i32>} : memref<1x1x128xf32, #tpu.memory_space<vmem>>, vector<1x1x128xf32>,
    %c0_9 = arith.constant 0 : index
    %c0_10 = arith.constant 0 : index
    %c0_11 = arith.constant 0 : index
    %10 = vector.load %arg4[%c0_9, %c0_10, %c0_11] : memref<1x1x128xf32, #tpu.memory_space<vmem>>, vector<1x1x128xf32>
    %11 = arith.mulf %4, %4 : vector<1x64x128xf32>
    %cst_12 = arith.constant dense<0.000000e+00> : vector<1x128xf32>
    %12 = vector.multi_reduction <add>, %11, %cst_12 [1] : vector<1x64x128xf32> to vector<1x128xf32>
    %13 = vector.shape_cast %12 : vector<1x128xf32> to vector<1x1x128xf32>
    %14 = arith.addf %10, %13 : vector<1x1x128xf32>
    %c0_13 = arith.constant 0 : index
    %c0_14 = arith.constant 0 : index
    %c0_15 = arith.constant 0 : index
    %15 = vector.load %arg4[%c0_13, %c0_14, %c0_15] : memref<1x1x128xf32, #tpu.memory_space<vmem>>, vector<1x1x128xf32>
    tpu.vector_store %arg4[%c0_13, %c0_14, %c0_15], %14 {strides = array<i32>} : memref<1x1x128xf32, #tpu.memory_space<vmem>>, vector<1x1x128xf32>,
    return
  }
  func.func @transform_0(%arg0: i32, %arg1: i32) -> (i32, i32, i32) {
    %c0_i32 = arith.constant 0 : i32
    %c0_i32_0 = arith.constant 0 : i32
    return %arg0, %arg1, %c0_i32 : i32, i32, i32
  }
  func.func @transform_1(%arg0: i32, %arg1: i32) -> (i32, i32, i32) {
    %c0_i32 = arith.constant 0 : i32
    %c0_i32_0 = arith.constant 0 : i32
    %c0_i32_1 = arith.constant 0 : i32
    return %arg0, %c0_i32, %c0_i32_0 : i32, i32, i32
  }
  func.func @transform_2(%arg0: i32, %arg1: i32) -> (i32, i32, i32) {
    %c0_i32 = arith.constant 0 : i32
    %c0_i32_0 = arith.constant 0 : i32
    %c0_i32_1 = arith.constant 0 : i32
    return %arg0, %c0_i32, %c0_i32_0 : i32, i32, i32
  }
}

module attributes {stable_mosaic.version = 11 : i64} {
  func.func @_in_apply_kernel(%arg0: i32, %arg1: i32, %arg2: memref<1x64x128xbf16, #tpu.memory_space<vmem>>, %arg3: memref<1x1x128xf32, #tpu.memory_space<vmem>>, %arg4: memref<1x1x128xf32, #tpu.memory_space<vmem>>, %arg5: memref<1x64x128xbf16, #tpu.memory_space<vmem>>) attributes {dimension_semantics = [#tpu.dimension_semantics<parallel>, #tpu.dimension_semantics<parallel>], iteration_bounds = array<i64: 2, 1>, scalar_prefetch = 0 : i64, scratch_operands = 0 : i64, tpu.core_type = #tpu.core_type<tc>, window_params = [{transform_indices = @transform_0, window_bounds = array<i64: 1, 64, 128>}, {transform_indices = @transform_1, window_bounds = array<i64: 1, 1, 128>}, {transform_indices = @transform_2, window_bounds = array<i64: 1, 1, 128>}, {transform_indices = @transform_3, window_bounds = array<i64: 1, 64, 128>}]} {
    %c0 = arith.constant 0 : index
    %c0_0 = arith.constant 0 : index
    %c0_1 = arith.constant 0 : index
    %0 = vector.load %arg2[%c0, %c0_0, %c0_1] : memref<1x64x128xbf16, #tpu.memory_space<vmem>>, vector<1x64x128xbf16>
    %1 = arith.extf %0 : vector<1x64x128xbf16> to vector<1x64x128xf32>
    %c0_2 = arith.constant 0 : index
    %c0_3 = arith.constant 0 : index
    %c0_4 = arith.constant 0 : index
    %2 = vector.load %arg3[%c0_2, %c0_3, %c0_4] : memref<1x1x128xf32, #tpu.memory_space<vmem>>, vector<1x1x128xf32>
    %cst = arith.constant 1.562500e-02 : f32
    %3 = vector.broadcast %cst : f32 to vector<1x1x128xf32>
    %4 = arith.mulf %2, %3 : vector<1x1x128xf32>
    %c0_5 = arith.constant 0 : index
    %c0_6 = arith.constant 0 : index
    %c0_7 = arith.constant 0 : index
    %5 = vector.load %arg4[%c0_5, %c0_6, %c0_7] : memref<1x1x128xf32, #tpu.memory_space<vmem>>, vector<1x1x128xf32>
    %cst_8 = arith.constant 1.562500e-02 : f32
    %6 = vector.broadcast %cst_8 : f32 to vector<1x1x128xf32>
    %7 = arith.mulf %5, %6 : vector<1x1x128xf32>
    %8 = arith.mulf %4, %4 : vector<1x1x128xf32>
    %9 = arith.subf %7, %8 : vector<1x1x128xf32>
    %cst_9 = arith.constant 0.000000e+00 : f32
    %10 = vector.broadcast %cst_9 : f32 to vector<1x1x128xf32>
    %11 = arith.maximumf %9, %10 : vector<1x1x128xf32>
    %12 = vector.broadcast %4 : vector<1x1x128xf32> to vector<1x64x128xf32>
    %13 = arith.subf %1, %12 : vector<1x64x128xf32>
    %cst_10 = arith.constant 9.99999974E-6 : f32
    %14 = vector.broadcast %cst_10 : f32 to vector<1x1x128xf32>
    %15 = arith.addf %11, %14 : vector<1x1x128xf32>
    %16 = math.rsqrt %15 : vector<1x1x128xf32>
    %17 = vector.broadcast %16 : vector<1x1x128xf32> to vector<1x64x128xf32>
    %18 = arith.mulf %13, %17 : vector<1x64x128xf32>
    %cst_11 = arith.constant 0.000000e+00 : f32
    %19 = vector.broadcast %cst_11 : f32 to vector<1x64x128xf32>
    %20 = arith.maximumf %18, %19 : vector<1x64x128xf32>
    %21 = arith.truncf %20 : vector<1x64x128xf32> to vector<1x64x128xbf16>
    %c0_12 = arith.constant 0 : index
    %c0_13 = arith.constant 0 : index
    %c0_14 = arith.constant 0 : index
    %22 = vector.load %arg5[%c0_12, %c0_13, %c0_14] : memref<1x64x128xbf16, #tpu.memory_space<vmem>>, vector<1x64x128xbf16>
    tpu.vector_store %arg5[%c0_12, %c0_13, %c0_14], %21 {strides = array<i32>} : memref<1x64x128xbf16, #tpu.memory_space<vmem>>, vector<1x64x128xbf16>,
    return
  }
  func.func @transform_0(%arg0: i32, %arg1: i32) -> (i32, i32, i32) {
    %c0_i32 = arith.constant 0 : i32
    %c0_i32_0 = arith.constant 0 : i32
    return %arg0, %arg1, %c0_i32 : i32, i32, i32
  }
  func.func @transform_1(%arg0: i32, %arg1: i32) -> (i32, i32, i32) {
    %c0_i32 = arith.constant 0 : i32
    %c0_i32_0 = arith.constant 0 : i32
    %c0_i32_1 = arith.constant 0 : i32
    return %arg0, %c0_i32, %c0_i32_0 : i32, i32, i32
  }
  func.func @transform_2(%arg0: i32, %arg1: i32) -> (i32, i32, i32) {
    %c0_i32 = arith.constant 0 : i32
    %c0_i32_0 = arith.constant 0 : i32
    %c0_i32_1 = arith.constant 0 : i32
    return %arg0, %c0_i32, %c0_i32_0 : i32, i32, i32
  }
  func.func @transform_3(%arg0: i32, %arg1: i32) -> (i32, i32, i32) {
    %c0_i32 = arith.constant 0 : i32
    %c0_i32_0 = arith.constant 0 : i32
    return %arg0, %arg1, %c0_i32 : i32, i32, i32
  }
}

module attributes {stable_mosaic.version = 11 : i64} {
  func.func @_matmul_bias_kernel(%arg0: i32, %arg1: i32, %arg2: i32, %arg3: memref<32x384xbf16, #tpu.memory_space<vmem>>, %arg4: memref<384x256xbf16, #tpu.memory_space<vmem>>, %arg5: memref<1x256xf32, #tpu.memory_space<vmem>>, %arg6: memref<32x256xbf16, #tpu.memory_space<vmem>>, %arg7: memref<32x256xf32, #tpu.memory_space<vmem>>) attributes {dimension_semantics = [#tpu.dimension_semantics<parallel>, #tpu.dimension_semantics<parallel>, #tpu.dimension_semantics<arbitrary>], iteration_bounds = array<i64: 1, 1, 3>, scalar_prefetch = 0 : i64, scratch_operands = 1 : i64, tpu.core_type = #tpu.core_type<tc>, window_params = [{transform_indices = @transform_0, window_bounds = array<i64: 32, 384>}, {transform_indices = @transform_1, window_bounds = array<i64: 384, 256>}, {transform_indices = @transform_2, window_bounds = array<i64: 1, 256>}, {transform_indices = @transform_3, window_bounds = array<i64: 32, 256>}]} {
    %c0_i32 = arith.constant 0 : i32
    %0 = arith.cmpi eq, %arg2, %c0_i32 : i32
    %1 = arith.extui %0 : i1 to i32
    %c0_i32_0 = arith.constant 0 : i32
    %2 = arith.cmpi ne, %1, %c0_i32_0 : i32
    scf.if %2 {
      %cst_9 = arith.constant 0.000000e+00 : f32
      %12 = vector.broadcast %cst_9 : f32 to vector<32x256xf32>
      %c0_10 = arith.constant 0 : index
      %c0_11 = arith.constant 0 : index
      %13 = vector.load %arg7[%c0_10, %c0_11] : memref<32x256xf32, #tpu.memory_space<vmem>>, vector<32x256xf32>
      tpu.vector_store %arg7[%c0_10, %c0_11], %12 {strides = array<i32>} : memref<32x256xf32, #tpu.memory_space<vmem>>, vector<32x256xf32>,
    } else {
    }
    %c0 = arith.constant 0 : index
    %c0_1 = arith.constant 0 : index
    %3 = vector.load %arg7[%c0, %c0_1] : memref<32x256xf32, #tpu.memory_space<vmem>>, vector<32x256xf32>
    %c0_2 = arith.constant 0 : index
    %c0_3 = arith.constant 0 : index
    %4 = vector.load %arg3[%c0_2, %c0_3] : memref<32x384xbf16, #tpu.memory_space<vmem>>, vector<32x384xbf16>
    %c0_4 = arith.constant 0 : index
    %c0_5 = arith.constant 0 : index
    %5 = vector.load %arg4[%c0_4, %c0_5] : memref<384x256xbf16, #tpu.memory_space<vmem>>, vector<384x256xbf16>
    %cst = arith.constant dense<0.000000e+00> : vector<32x256xf32>
    %6 = tpu.matmul %4, %5, %cst {dimension_numbers = #tpu.dot_dimension_numbers<[1], [0], [0], [1], [0, 0, 1, 1], [], []>} : vector<32x384xbf16>, vector<384x256xbf16>, vector<32x256xf32> -> vector<32x256xf32>
    %7 = arith.addf %3, %6 : vector<32x256xf32>
    %c0_6 = arith.constant 0 : index
    %c0_7 = arith.constant 0 : index
    %8 = vector.load %arg7[%c0_6, %c0_7] : memref<32x256xf32, #tpu.memory_space<vmem>>, vector<32x256xf32>
    tpu.vector_store %arg7[%c0_6, %c0_7], %7 {strides = array<i32>} : memref<32x256xf32, #tpu.memory_space<vmem>>, vector<32x256xf32>,
    %c2_i32 = arith.constant 2 : i32
    %9 = arith.cmpi eq, %arg2, %c2_i32 : i32
    %10 = arith.extui %9 : i1 to i32
    %c0_i32_8 = arith.constant 0 : i32
    %11 = arith.cmpi ne, %10, %c0_i32_8 : i32
    scf.if %11 {
      %c0_9 = arith.constant 0 : index
      %c0_10 = arith.constant 0 : index
      %12 = vector.load %arg7[%c0_9, %c0_10] : memref<32x256xf32, #tpu.memory_space<vmem>>, vector<32x256xf32>
      %c0_11 = arith.constant 0 : index
      %c0_12 = arith.constant 0 : index
      %13 = vector.load %arg5[%c0_11, %c0_12] : memref<1x256xf32, #tpu.memory_space<vmem>>, vector<1x256xf32>
      %14 = vector.broadcast %13 : vector<1x256xf32> to vector<32x256xf32>
      %15 = arith.addf %12, %14 : vector<32x256xf32>
      %16 = arith.truncf %15 : vector<32x256xf32> to vector<32x256xbf16>
      %c0_13 = arith.constant 0 : index
      %c0_14 = arith.constant 0 : index
      %17 = vector.load %arg6[%c0_13, %c0_14] : memref<32x256xbf16, #tpu.memory_space<vmem>>, vector<32x256xbf16>
      tpu.vector_store %arg6[%c0_13, %c0_14], %16 {strides = array<i32>} : memref<32x256xbf16, #tpu.memory_space<vmem>>, vector<32x256xbf16>,
    } else {
    }
    return
  }
  func.func @transform_0(%arg0: i32, %arg1: i32, %arg2: i32) -> (i32, i32) {
    %c0_i32 = arith.constant 0 : i32
    return %arg0, %arg2 : i32, i32
  }
  func.func @transform_1(%arg0: i32, %arg1: i32, %arg2: i32) -> (i32, i32) {
    %c0_i32 = arith.constant 0 : i32
    return %arg2, %arg1 : i32, i32
  }
  func.func @transform_2(%arg0: i32, %arg1: i32, %arg2: i32) -> (i32, i32) {
    %c0_i32 = arith.constant 0 : i32
    %c0_i32_0 = arith.constant 0 : i32
    return %c0_i32, %arg1 : i32, i32
  }
  func.func @transform_3(%arg0: i32, %arg1: i32, %arg2: i32) -> (i32, i32) {
    %c0_i32 = arith.constant 0 : i32
    return %arg0, %arg1 : i32, i32
  }
}

module attributes {stable_mosaic.version = 11 : i64} {
  func.func @_in_stats_kernel(%arg0: i32, %arg1: i32, %arg2: memref<1x16x256xbf16, #tpu.memory_space<vmem>>, %arg3: memref<1x1x256xf32, #tpu.memory_space<vmem>>, %arg4: memref<1x1x256xf32, #tpu.memory_space<vmem>>) attributes {dimension_semantics = [#tpu.dimension_semantics<parallel>, #tpu.dimension_semantics<arbitrary>], iteration_bounds = array<i64: 2, 1>, scalar_prefetch = 0 : i64, scratch_operands = 0 : i64, tpu.core_type = #tpu.core_type<tc>, window_params = [{transform_indices = @transform_0, window_bounds = array<i64: 1, 16, 256>}, {transform_indices = @transform_1, window_bounds = array<i64: 1, 1, 256>}, {transform_indices = @transform_2, window_bounds = array<i64: 1, 1, 256>}]} {
    %c0_i32 = arith.constant 0 : i32
    %0 = arith.cmpi eq, %arg1, %c0_i32 : i32
    %1 = arith.extui %0 : i1 to i32
    %c0_i32_0 = arith.constant 0 : i32
    %2 = arith.cmpi ne, %1, %c0_i32_0 : i32
    scf.if %2 {
      %cst_16 = arith.constant 0.000000e+00 : f32
      %16 = vector.broadcast %cst_16 : f32 to vector<1x1x256xf32>
      %c0_17 = arith.constant 0 : index
      %c0_18 = arith.constant 0 : index
      %c0_19 = arith.constant 0 : index
      %17 = vector.load %arg3[%c0_17, %c0_18, %c0_19] : memref<1x1x256xf32, #tpu.memory_space<vmem>>, vector<1x1x256xf32>
      tpu.vector_store %arg3[%c0_17, %c0_18, %c0_19], %16 {strides = array<i32>} : memref<1x1x256xf32, #tpu.memory_space<vmem>>, vector<1x1x256xf32>,
      %cst_20 = arith.constant 0.000000e+00 : f32
      %18 = vector.broadcast %cst_20 : f32 to vector<1x1x256xf32>
      %c0_21 = arith.constant 0 : index
      %c0_22 = arith.constant 0 : index
      %c0_23 = arith.constant 0 : index
      %19 = vector.load %arg4[%c0_21, %c0_22, %c0_23] : memref<1x1x256xf32, #tpu.memory_space<vmem>>, vector<1x1x256xf32>
      tpu.vector_store %arg4[%c0_21, %c0_22, %c0_23], %18 {strides = array<i32>} : memref<1x1x256xf32, #tpu.memory_space<vmem>>, vector<1x1x256xf32>,
    } else {
    }
    %c0 = arith.constant 0 : index
    %c0_1 = arith.constant 0 : index
    %c0_2 = arith.constant 0 : index
    %3 = vector.load %arg2[%c0, %c0_1, %c0_2] : memref<1x16x256xbf16, #tpu.memory_space<vmem>>, vector<1x16x256xbf16>
    %4 = arith.extf %3 : vector<1x16x256xbf16> to vector<1x16x256xf32>
    %c0_3 = arith.constant 0 : index
    %c0_4 = arith.constant 0 : index
    %c0_5 = arith.constant 0 : index
    %5 = vector.load %arg3[%c0_3, %c0_4, %c0_5] : memref<1x1x256xf32, #tpu.memory_space<vmem>>, vector<1x1x256xf32>
    %cst = arith.constant dense<0.000000e+00> : vector<1x256xf32>
    %6 = vector.multi_reduction <add>, %4, %cst [1] : vector<1x16x256xf32> to vector<1x256xf32>
    %7 = vector.shape_cast %6 : vector<1x256xf32> to vector<1x1x256xf32>
    %8 = arith.addf %5, %7 : vector<1x1x256xf32>
    %c0_6 = arith.constant 0 : index
    %c0_7 = arith.constant 0 : index
    %c0_8 = arith.constant 0 : index
    %9 = vector.load %arg3[%c0_6, %c0_7, %c0_8] : memref<1x1x256xf32, #tpu.memory_space<vmem>>, vector<1x1x256xf32>
    tpu.vector_store %arg3[%c0_6, %c0_7, %c0_8], %8 {strides = array<i32>} : memref<1x1x256xf32, #tpu.memory_space<vmem>>, vector<1x1x256xf32>,
    %c0_9 = arith.constant 0 : index
    %c0_10 = arith.constant 0 : index
    %c0_11 = arith.constant 0 : index
    %10 = vector.load %arg4[%c0_9, %c0_10, %c0_11] : memref<1x1x256xf32, #tpu.memory_space<vmem>>, vector<1x1x256xf32>
    %11 = arith.mulf %4, %4 : vector<1x16x256xf32>
    %cst_12 = arith.constant dense<0.000000e+00> : vector<1x256xf32>
    %12 = vector.multi_reduction <add>, %11, %cst_12 [1] : vector<1x16x256xf32> to vector<1x256xf32>
    %13 = vector.shape_cast %12 : vector<1x256xf32> to vector<1x1x256xf32>
    %14 = arith.addf %10, %13 : vector<1x1x256xf32>
    %c0_13 = arith.constant 0 : index
    %c0_14 = arith.constant 0 : index
    %c0_15 = arith.constant 0 : index
    %15 = vector.load %arg4[%c0_13, %c0_14, %c0_15] : memref<1x1x256xf32, #tpu.memory_space<vmem>>, vector<1x1x256xf32>
    tpu.vector_store %arg4[%c0_13, %c0_14, %c0_15], %14 {strides = array<i32>} : memref<1x1x256xf32, #tpu.memory_space<vmem>>, vector<1x1x256xf32>,
    return
  }
  func.func @transform_0(%arg0: i32, %arg1: i32) -> (i32, i32, i32) {
    %c0_i32 = arith.constant 0 : i32
    %c0_i32_0 = arith.constant 0 : i32
    return %arg0, %arg1, %c0_i32 : i32, i32, i32
  }
  func.func @transform_1(%arg0: i32, %arg1: i32) -> (i32, i32, i32) {
    %c0_i32 = arith.constant 0 : i32
    %c0_i32_0 = arith.constant 0 : i32
    %c0_i32_1 = arith.constant 0 : i32
    return %arg0, %c0_i32, %c0_i32_0 : i32, i32, i32
  }
  func.func @transform_2(%arg0: i32, %arg1: i32) -> (i32, i32, i32) {
    %c0_i32 = arith.constant 0 : i32
    %c0_i32_0 = arith.constant 0 : i32
    %c0_i32_1 = arith.constant 0 : i32
    return %arg0, %c0_i32, %c0_i32_0 : i32, i32, i32
  }
}

module attributes {stable_mosaic.version = 11 : i64} {
  func.func @_in_apply_kernel(%arg0: i32, %arg1: i32, %arg2: memref<1x16x256xbf16, #tpu.memory_space<vmem>>, %arg3: memref<1x1x256xf32, #tpu.memory_space<vmem>>, %arg4: memref<1x1x256xf32, #tpu.memory_space<vmem>>, %arg5: memref<1x16x256xbf16, #tpu.memory_space<vmem>>) attributes {dimension_semantics = [#tpu.dimension_semantics<parallel>, #tpu.dimension_semantics<parallel>], iteration_bounds = array<i64: 2, 1>, scalar_prefetch = 0 : i64, scratch_operands = 0 : i64, tpu.core_type = #tpu.core_type<tc>, window_params = [{transform_indices = @transform_0, window_bounds = array<i64: 1, 16, 256>}, {transform_indices = @transform_1, window_bounds = array<i64: 1, 1, 256>}, {transform_indices = @transform_2, window_bounds = array<i64: 1, 1, 256>}, {transform_indices = @transform_3, window_bounds = array<i64: 1, 16, 256>}]} {
    %c0 = arith.constant 0 : index
    %c0_0 = arith.constant 0 : index
    %c0_1 = arith.constant 0 : index
    %0 = vector.load %arg2[%c0, %c0_0, %c0_1] : memref<1x16x256xbf16, #tpu.memory_space<vmem>>, vector<1x16x256xbf16>
    %1 = arith.extf %0 : vector<1x16x256xbf16> to vector<1x16x256xf32>
    %c0_2 = arith.constant 0 : index
    %c0_3 = arith.constant 0 : index
    %c0_4 = arith.constant 0 : index
    %2 = vector.load %arg3[%c0_2, %c0_3, %c0_4] : memref<1x1x256xf32, #tpu.memory_space<vmem>>, vector<1x1x256xf32>
    %cst = arith.constant 6.250000e-02 : f32
    %3 = vector.broadcast %cst : f32 to vector<1x1x256xf32>
    %4 = arith.mulf %2, %3 : vector<1x1x256xf32>
    %c0_5 = arith.constant 0 : index
    %c0_6 = arith.constant 0 : index
    %c0_7 = arith.constant 0 : index
    %5 = vector.load %arg4[%c0_5, %c0_6, %c0_7] : memref<1x1x256xf32, #tpu.memory_space<vmem>>, vector<1x1x256xf32>
    %cst_8 = arith.constant 6.250000e-02 : f32
    %6 = vector.broadcast %cst_8 : f32 to vector<1x1x256xf32>
    %7 = arith.mulf %5, %6 : vector<1x1x256xf32>
    %8 = arith.mulf %4, %4 : vector<1x1x256xf32>
    %9 = arith.subf %7, %8 : vector<1x1x256xf32>
    %cst_9 = arith.constant 0.000000e+00 : f32
    %10 = vector.broadcast %cst_9 : f32 to vector<1x1x256xf32>
    %11 = arith.maximumf %9, %10 : vector<1x1x256xf32>
    %12 = vector.broadcast %4 : vector<1x1x256xf32> to vector<1x16x256xf32>
    %13 = arith.subf %1, %12 : vector<1x16x256xf32>
    %cst_10 = arith.constant 9.99999974E-6 : f32
    %14 = vector.broadcast %cst_10 : f32 to vector<1x1x256xf32>
    %15 = arith.addf %11, %14 : vector<1x1x256xf32>
    %16 = math.rsqrt %15 : vector<1x1x256xf32>
    %17 = vector.broadcast %16 : vector<1x1x256xf32> to vector<1x16x256xf32>
    %18 = arith.mulf %13, %17 : vector<1x16x256xf32>
    %cst_11 = arith.constant 0.000000e+00 : f32
    %19 = vector.broadcast %cst_11 : f32 to vector<1x16x256xf32>
    %20 = arith.maximumf %18, %19 : vector<1x16x256xf32>
    %21 = arith.truncf %20 : vector<1x16x256xf32> to vector<1x16x256xbf16>
    %c0_12 = arith.constant 0 : index
    %c0_13 = arith.constant 0 : index
    %c0_14 = arith.constant 0 : index
    %22 = vector.load %arg5[%c0_12, %c0_13, %c0_14] : memref<1x16x256xbf16, #tpu.memory_space<vmem>>, vector<1x16x256xbf16>
    tpu.vector_store %arg5[%c0_12, %c0_13, %c0_14], %21 {strides = array<i32>} : memref<1x16x256xbf16, #tpu.memory_space<vmem>>, vector<1x16x256xbf16>,
    return
  }
  func.func @transform_0(%arg0: i32, %arg1: i32) -> (i32, i32, i32) {
    %c0_i32 = arith.constant 0 : i32
    %c0_i32_0 = arith.constant 0 : i32
    return %arg0, %arg1, %c0_i32 : i32, i32, i32
  }
  func.func @transform_1(%arg0: i32, %arg1: i32) -> (i32, i32, i32) {
    %c0_i32 = arith.constant 0 : i32
    %c0_i32_0 = arith.constant 0 : i32
    %c0_i32_1 = arith.constant 0 : i32
    return %arg0, %c0_i32, %c0_i32_0 : i32, i32, i32
  }
  func.func @transform_2(%arg0: i32, %arg1: i32) -> (i32, i32, i32) {
    %c0_i32 = arith.constant 0 : i32
    %c0_i32_0 = arith.constant 0 : i32
    %c0_i32_1 = arith.constant 0 : i32
    return %arg0, %c0_i32, %c0_i32_0 : i32, i32, i32
  }
  func.func @transform_3(%arg0: i32, %arg1: i32) -> (i32, i32, i32) {
    %c0_i32 = arith.constant 0 : i32
    %c0_i32_0 = arith.constant 0 : i32
    return %arg0, %arg1, %c0_i32 : i32, i32, i32
  }
}

module attributes {stable_mosaic.version = 11 : i64} {
  func.func @_matmul_bias_kernel(%arg0: i32, %arg1: i32, %arg2: i32, %arg3: memref<32x768xbf16, #tpu.memory_space<vmem>>, %arg4: memref<768x256xbf16, #tpu.memory_space<vmem>>, %arg5: memref<1x256xf32, #tpu.memory_space<vmem>>, %arg6: memref<32x256xbf16, #tpu.memory_space<vmem>>, %arg7: memref<32x256xf32, #tpu.memory_space<vmem>>) attributes {dimension_semantics = [#tpu.dimension_semantics<parallel>, #tpu.dimension_semantics<parallel>, #tpu.dimension_semantics<arbitrary>], iteration_bounds = array<i64: 1, 1, 3>, scalar_prefetch = 0 : i64, scratch_operands = 1 : i64, tpu.core_type = #tpu.core_type<tc>, window_params = [{transform_indices = @transform_0, window_bounds = array<i64: 32, 768>}, {transform_indices = @transform_1, window_bounds = array<i64: 768, 256>}, {transform_indices = @transform_2, window_bounds = array<i64: 1, 256>}, {transform_indices = @transform_3, window_bounds = array<i64: 32, 256>}]} {
    %c0_i32 = arith.constant 0 : i32
    %0 = arith.cmpi eq, %arg2, %c0_i32 : i32
    %1 = arith.extui %0 : i1 to i32
    %c0_i32_0 = arith.constant 0 : i32
    %2 = arith.cmpi ne, %1, %c0_i32_0 : i32
    scf.if %2 {
      %cst_9 = arith.constant 0.000000e+00 : f32
      %12 = vector.broadcast %cst_9 : f32 to vector<32x256xf32>
      %c0_10 = arith.constant 0 : index
      %c0_11 = arith.constant 0 : index
      %13 = vector.load %arg7[%c0_10, %c0_11] : memref<32x256xf32, #tpu.memory_space<vmem>>, vector<32x256xf32>
      tpu.vector_store %arg7[%c0_10, %c0_11], %12 {strides = array<i32>} : memref<32x256xf32, #tpu.memory_space<vmem>>, vector<32x256xf32>,
    } else {
    }
    %c0 = arith.constant 0 : index
    %c0_1 = arith.constant 0 : index
    %3 = vector.load %arg7[%c0, %c0_1] : memref<32x256xf32, #tpu.memory_space<vmem>>, vector<32x256xf32>
    %c0_2 = arith.constant 0 : index
    %c0_3 = arith.constant 0 : index
    %4 = vector.load %arg3[%c0_2, %c0_3] : memref<32x768xbf16, #tpu.memory_space<vmem>>, vector<32x768xbf16>
    %c0_4 = arith.constant 0 : index
    %c0_5 = arith.constant 0 : index
    %5 = vector.load %arg4[%c0_4, %c0_5] : memref<768x256xbf16, #tpu.memory_space<vmem>>, vector<768x256xbf16>
    %cst = arith.constant dense<0.000000e+00> : vector<32x256xf32>
    %6 = tpu.matmul %4, %5, %cst {dimension_numbers = #tpu.dot_dimension_numbers<[1], [0], [0], [1], [0, 0, 1, 1], [], []>} : vector<32x768xbf16>, vector<768x256xbf16>, vector<32x256xf32> -> vector<32x256xf32>
    %7 = arith.addf %3, %6 : vector<32x256xf32>
    %c0_6 = arith.constant 0 : index
    %c0_7 = arith.constant 0 : index
    %8 = vector.load %arg7[%c0_6, %c0_7] : memref<32x256xf32, #tpu.memory_space<vmem>>, vector<32x256xf32>
    tpu.vector_store %arg7[%c0_6, %c0_7], %7 {strides = array<i32>} : memref<32x256xf32, #tpu.memory_space<vmem>>, vector<32x256xf32>,
    %c2_i32 = arith.constant 2 : i32
    %9 = arith.cmpi eq, %arg2, %c2_i32 : i32
    %10 = arith.extui %9 : i1 to i32
    %c0_i32_8 = arith.constant 0 : i32
    %11 = arith.cmpi ne, %10, %c0_i32_8 : i32
    scf.if %11 {
      %c0_9 = arith.constant 0 : index
      %c0_10 = arith.constant 0 : index
      %12 = vector.load %arg7[%c0_9, %c0_10] : memref<32x256xf32, #tpu.memory_space<vmem>>, vector<32x256xf32>
      %c0_11 = arith.constant 0 : index
      %c0_12 = arith.constant 0 : index
      %13 = vector.load %arg5[%c0_11, %c0_12] : memref<1x256xf32, #tpu.memory_space<vmem>>, vector<1x256xf32>
      %14 = vector.broadcast %13 : vector<1x256xf32> to vector<32x256xf32>
      %15 = arith.addf %12, %14 : vector<32x256xf32>
      %16 = arith.truncf %15 : vector<32x256xf32> to vector<32x256xbf16>
      %c0_13 = arith.constant 0 : index
      %c0_14 = arith.constant 0 : index
      %17 = vector.load %arg6[%c0_13, %c0_14] : memref<32x256xbf16, #tpu.memory_space<vmem>>, vector<32x256xbf16>
      tpu.vector_store %arg6[%c0_13, %c0_14], %16 {strides = array<i32>} : memref<32x256xbf16, #tpu.memory_space<vmem>>, vector<32x256xbf16>,
    } else {
    }
    return
  }
  func.func @transform_0(%arg0: i32, %arg1: i32, %arg2: i32) -> (i32, i32) {
    %c0_i32 = arith.constant 0 : i32
    return %arg0, %arg2 : i32, i32
  }
  func.func @transform_1(%arg0: i32, %arg1: i32, %arg2: i32) -> (i32, i32) {
    %c0_i32 = arith.constant 0 : i32
    return %arg2, %arg1 : i32, i32
  }
  func.func @transform_2(%arg0: i32, %arg1: i32, %arg2: i32) -> (i32, i32) {
    %c0_i32 = arith.constant 0 : i32
    %c0_i32_0 = arith.constant 0 : i32
    return %c0_i32, %arg1 : i32, i32
  }
  func.func @transform_3(%arg0: i32, %arg1: i32, %arg2: i32) -> (i32, i32) {
    %c0_i32 = arith.constant 0 : i32
    return %arg0, %arg1 : i32, i32
  }
}

module attributes {stable_mosaic.version = 11 : i64} {
  func.func @_in_apply_res_kernel(%arg0: i32, %arg1: i32, %arg2: memref<1x16x256xbf16, #tpu.memory_space<vmem>>, %arg3: memref<1x16x256xbf16, #tpu.memory_space<vmem>>, %arg4: memref<1x1x256xf32, #tpu.memory_space<vmem>>, %arg5: memref<1x1x256xf32, #tpu.memory_space<vmem>>, %arg6: memref<1x16x256xbf16, #tpu.memory_space<vmem>>) attributes {dimension_semantics = [#tpu.dimension_semantics<parallel>, #tpu.dimension_semantics<parallel>], iteration_bounds = array<i64: 2, 1>, scalar_prefetch = 0 : i64, scratch_operands = 0 : i64, tpu.core_type = #tpu.core_type<tc>, window_params = [{transform_indices = @transform_0, window_bounds = array<i64: 1, 16, 256>}, {transform_indices = @transform_1, window_bounds = array<i64: 1, 16, 256>}, {transform_indices = @transform_2, window_bounds = array<i64: 1, 1, 256>}, {transform_indices = @transform_3, window_bounds = array<i64: 1, 1, 256>}, {transform_indices = @transform_4, window_bounds = array<i64: 1, 16, 256>}]} {
    %c0 = arith.constant 0 : index
    %c0_0 = arith.constant 0 : index
    %c0_1 = arith.constant 0 : index
    %0 = vector.load %arg2[%c0, %c0_0, %c0_1] : memref<1x16x256xbf16, #tpu.memory_space<vmem>>, vector<1x16x256xbf16>
    %1 = arith.extf %0 : vector<1x16x256xbf16> to vector<1x16x256xf32>
    %c0_2 = arith.constant 0 : index
    %c0_3 = arith.constant 0 : index
    %c0_4 = arith.constant 0 : index
    %2 = vector.load %arg4[%c0_2, %c0_3, %c0_4] : memref<1x1x256xf32, #tpu.memory_space<vmem>>, vector<1x1x256xf32>
    %cst = arith.constant 6.250000e-02 : f32
    %3 = vector.broadcast %cst : f32 to vector<1x1x256xf32>
    %4 = arith.mulf %2, %3 : vector<1x1x256xf32>
    %c0_5 = arith.constant 0 : index
    %c0_6 = arith.constant 0 : index
    %c0_7 = arith.constant 0 : index
    %5 = vector.load %arg5[%c0_5, %c0_6, %c0_7] : memref<1x1x256xf32, #tpu.memory_space<vmem>>, vector<1x1x256xf32>
    %cst_8 = arith.constant 6.250000e-02 : f32
    %6 = vector.broadcast %cst_8 : f32 to vector<1x1x256xf32>
    %7 = arith.mulf %5, %6 : vector<1x1x256xf32>
    %8 = arith.mulf %4, %4 : vector<1x1x256xf32>
    %9 = arith.subf %7, %8 : vector<1x1x256xf32>
    %cst_9 = arith.constant 0.000000e+00 : f32
    %10 = vector.broadcast %cst_9 : f32 to vector<1x1x256xf32>
    %11 = arith.maximumf %9, %10 : vector<1x1x256xf32>
    %12 = vector.broadcast %4 : vector<1x1x256xf32> to vector<1x16x256xf32>
    %13 = arith.subf %1, %12 : vector<1x16x256xf32>
    %cst_10 = arith.constant 9.99999974E-6 : f32
    %14 = vector.broadcast %cst_10 : f32 to vector<1x1x256xf32>
    %15 = arith.addf %11, %14 : vector<1x1x256xf32>
    %16 = math.rsqrt %15 : vector<1x1x256xf32>
    %17 = vector.broadcast %16 : vector<1x1x256xf32> to vector<1x16x256xf32>
    %18 = arith.mulf %13, %17 : vector<1x16x256xf32>
    %c0_11 = arith.constant 0 : index
    %c0_12 = arith.constant 0 : index
    %c0_13 = arith.constant 0 : index
    %19 = vector.load %arg3[%c0_11, %c0_12, %c0_13] : memref<1x16x256xbf16, #tpu.memory_space<vmem>>, vector<1x16x256xbf16>
    %20 = arith.extf %19 : vector<1x16x256xbf16> to vector<1x16x256xf32>
    %21 = arith.addf %20, %18 : vector<1x16x256xf32>
    %22 = arith.truncf %21 : vector<1x16x256xf32> to vector<1x16x256xbf16>
    %c0_14 = arith.constant 0 : index
    %c0_15 = arith.constant 0 : index
    %c0_16 = arith.constant 0 : index
    %23 = vector.load %arg6[%c0_14, %c0_15, %c0_16] : memref<1x16x256xbf16, #tpu.memory_space<vmem>>, vector<1x16x256xbf16>
    tpu.vector_store %arg6[%c0_14, %c0_15, %c0_16], %22 {strides = array<i32>} : memref<1x16x256xbf16, #tpu.memory_space<vmem>>, vector<1x16x256xbf16>,
    return
  }
  func.func @transform_0(%arg0: i32, %arg1: i32) -> (i32, i32, i32) {
    %c0_i32 = arith.constant 0 : i32
    %c0_i32_0 = arith.constant 0 : i32
    return %arg0, %arg1, %c0_i32 : i32, i32, i32
  }
  func.func @transform_1(%arg0: i32, %arg1: i32) -> (i32, i32, i32) {
    %c0_i32 = arith.constant 0 : i32
    %c0_i32_0 = arith.constant 0 : i32
    return %arg0, %arg1, %c0_i32 : i32, i32, i32
  }
  func.func @transform_2(%arg0: i32, %arg1: i32) -> (i32, i32, i32) {
    %c0_i32 = arith.constant 0 : i32
    %c0_i32_0 = arith.constant 0 : i32
    %c0_i32_1 = arith.constant 0 : i32
    return %arg0, %c0_i32, %c0_i32_0 : i32, i32, i32
  }
  func.func @transform_3(%arg0: i32, %arg1: i32) -> (i32, i32, i32) {
    %c0_i32 = arith.constant 0 : i32
    %c0_i32_0 = arith.constant 0 : i32
    %c0_i32_1 = arith.constant 0 : i32
    return %arg0, %c0_i32, %c0_i32_0 : i32, i32, i32
  }
  func.func @transform_4(%arg0: i32, %arg1: i32) -> (i32, i32, i32) {
    %c0_i32 = arith.constant 0 : i32
    %c0_i32_0 = arith.constant 0 : i32
    return %arg0, %arg1, %c0_i32 : i32, i32, i32
  }
}

module attributes {stable_mosaic.version = 11 : i64} {
  func.func @_matmul_bias_kernel(%arg0: i32, %arg1: i32, %arg2: i32, %arg3: memref<128x768xbf16, #tpu.memory_space<vmem>>, %arg4: memref<768x128xbf16, #tpu.memory_space<vmem>>, %arg5: memref<1x128xf32, #tpu.memory_space<vmem>>, %arg6: memref<128x128xbf16, #tpu.memory_space<vmem>>, %arg7: memref<128x128xf32, #tpu.memory_space<vmem>>) attributes {dimension_semantics = [#tpu.dimension_semantics<parallel>, #tpu.dimension_semantics<parallel>, #tpu.dimension_semantics<arbitrary>], iteration_bounds = array<i64: 1, 1, 3>, scalar_prefetch = 0 : i64, scratch_operands = 1 : i64, tpu.core_type = #tpu.core_type<tc>, window_params = [{transform_indices = @transform_0, window_bounds = array<i64: 128, 768>}, {transform_indices = @transform_1, window_bounds = array<i64: 768, 128>}, {transform_indices = @transform_2, window_bounds = array<i64: 1, 128>}, {transform_indices = @transform_3, window_bounds = array<i64: 128, 128>}]} {
    %c0_i32 = arith.constant 0 : i32
    %0 = arith.cmpi eq, %arg2, %c0_i32 : i32
    %1 = arith.extui %0 : i1 to i32
    %c0_i32_0 = arith.constant 0 : i32
    %2 = arith.cmpi ne, %1, %c0_i32_0 : i32
    scf.if %2 {
      %cst_9 = arith.constant 0.000000e+00 : f32
      %12 = vector.broadcast %cst_9 : f32 to vector<128x128xf32>
      %c0_10 = arith.constant 0 : index
      %c0_11 = arith.constant 0 : index
      %13 = vector.load %arg7[%c0_10, %c0_11] : memref<128x128xf32, #tpu.memory_space<vmem>>, vector<128x128xf32>
      tpu.vector_store %arg7[%c0_10, %c0_11], %12 {strides = array<i32>} : memref<128x128xf32, #tpu.memory_space<vmem>>, vector<128x128xf32>,
    } else {
    }
    %c0 = arith.constant 0 : index
    %c0_1 = arith.constant 0 : index
    %3 = vector.load %arg7[%c0, %c0_1] : memref<128x128xf32, #tpu.memory_space<vmem>>, vector<128x128xf32>
    %c0_2 = arith.constant 0 : index
    %c0_3 = arith.constant 0 : index
    %4 = vector.load %arg3[%c0_2, %c0_3] : memref<128x768xbf16, #tpu.memory_space<vmem>>, vector<128x768xbf16>
    %c0_4 = arith.constant 0 : index
    %c0_5 = arith.constant 0 : index
    %5 = vector.load %arg4[%c0_4, %c0_5] : memref<768x128xbf16, #tpu.memory_space<vmem>>, vector<768x128xbf16>
    %cst = arith.constant dense<0.000000e+00> : vector<128x128xf32>
    %6 = tpu.matmul %4, %5, %cst {dimension_numbers = #tpu.dot_dimension_numbers<[1], [0], [0], [1], [0, 0, 1, 1], [], []>} : vector<128x768xbf16>, vector<768x128xbf16>, vector<128x128xf32> -> vector<128x128xf32>
    %7 = arith.addf %3, %6 : vector<128x128xf32>
    %c0_6 = arith.constant 0 : index
    %c0_7 = arith.constant 0 : index
    %8 = vector.load %arg7[%c0_6, %c0_7] : memref<128x128xf32, #tpu.memory_space<vmem>>, vector<128x128xf32>
    tpu.vector_store %arg7[%c0_6, %c0_7], %7 {strides = array<i32>} : memref<128x128xf32, #tpu.memory_space<vmem>>, vector<128x128xf32>,
    %c2_i32 = arith.constant 2 : i32
    %9 = arith.cmpi eq, %arg2, %c2_i32 : i32
    %10 = arith.extui %9 : i1 to i32
    %c0_i32_8 = arith.constant 0 : i32
    %11 = arith.cmpi ne, %10, %c0_i32_8 : i32
    scf.if %11 {
      %c0_9 = arith.constant 0 : index
      %c0_10 = arith.constant 0 : index
      %12 = vector.load %arg7[%c0_9, %c0_10] : memref<128x128xf32, #tpu.memory_space<vmem>>, vector<128x128xf32>
      %c0_11 = arith.constant 0 : index
      %c0_12 = arith.constant 0 : index
      %13 = vector.load %arg5[%c0_11, %c0_12] : memref<1x128xf32, #tpu.memory_space<vmem>>, vector<1x128xf32>
      %14 = vector.broadcast %13 : vector<1x128xf32> to vector<128x128xf32>
      %15 = arith.addf %12, %14 : vector<128x128xf32>
      %16 = arith.truncf %15 : vector<128x128xf32> to vector<128x128xbf16>
      %c0_13 = arith.constant 0 : index
      %c0_14 = arith.constant 0 : index
      %17 = vector.load %arg6[%c0_13, %c0_14] : memref<128x128xbf16, #tpu.memory_space<vmem>>, vector<128x128xbf16>
      tpu.vector_store %arg6[%c0_13, %c0_14], %16 {strides = array<i32>} : memref<128x128xbf16, #tpu.memory_space<vmem>>, vector<128x128xbf16>,
    } else {
    }
    return
  }
  func.func @transform_0(%arg0: i32, %arg1: i32, %arg2: i32) -> (i32, i32) {
    %c0_i32 = arith.constant 0 : i32
    return %arg0, %arg2 : i32, i32
  }
  func.func @transform_1(%arg0: i32, %arg1: i32, %arg2: i32) -> (i32, i32) {
    %c0_i32 = arith.constant 0 : i32
    return %arg2, %arg1 : i32, i32
  }
  func.func @transform_2(%arg0: i32, %arg1: i32, %arg2: i32) -> (i32, i32) {
    %c0_i32 = arith.constant 0 : i32
    %c0_i32_0 = arith.constant 0 : i32
    return %c0_i32, %arg1 : i32, i32
  }
  func.func @transform_3(%arg0: i32, %arg1: i32, %arg2: i32) -> (i32, i32) {
    %c0_i32 = arith.constant 0 : i32
    return %arg0, %arg1 : i32, i32
  }
}

module attributes {stable_mosaic.version = 11 : i64} {
  func.func @_matmul_bias_kernel(%arg0: i32, %arg1: i32, %arg2: i32, %arg3: memref<256x384xbf16, #tpu.memory_space<vmem>>, %arg4: memref<384x128xbf16, #tpu.memory_space<vmem>>, %arg5: memref<1x128xf32, #tpu.memory_space<vmem>>, %arg6: memref<256x128xbf16, #tpu.memory_space<vmem>>, %arg7: memref<256x128xf32, #tpu.memory_space<vmem>>) attributes {dimension_semantics = [#tpu.dimension_semantics<parallel>, #tpu.dimension_semantics<parallel>, #tpu.dimension_semantics<arbitrary>], iteration_bounds = array<i64: 2, 1, 3>, scalar_prefetch = 0 : i64, scratch_operands = 1 : i64, tpu.core_type = #tpu.core_type<tc>, window_params = [{transform_indices = @transform_0, window_bounds = array<i64: 256, 384>}, {transform_indices = @transform_1, window_bounds = array<i64: 384, 128>}, {transform_indices = @transform_2, window_bounds = array<i64: 1, 128>}, {transform_indices = @transform_3, window_bounds = array<i64: 256, 128>}]} {
    %c0_i32 = arith.constant 0 : i32
    %0 = arith.cmpi eq, %arg2, %c0_i32 : i32
    %1 = arith.extui %0 : i1 to i32
    %c0_i32_0 = arith.constant 0 : i32
    %2 = arith.cmpi ne, %1, %c0_i32_0 : i32
    scf.if %2 {
      %cst_9 = arith.constant 0.000000e+00 : f32
      %12 = vector.broadcast %cst_9 : f32 to vector<256x128xf32>
      %c0_10 = arith.constant 0 : index
      %c0_11 = arith.constant 0 : index
      %13 = vector.load %arg7[%c0_10, %c0_11] : memref<256x128xf32, #tpu.memory_space<vmem>>, vector<256x128xf32>
      tpu.vector_store %arg7[%c0_10, %c0_11], %12 {strides = array<i32>} : memref<256x128xf32, #tpu.memory_space<vmem>>, vector<256x128xf32>,
    } else {
    }
    %c0 = arith.constant 0 : index
    %c0_1 = arith.constant 0 : index
    %3 = vector.load %arg7[%c0, %c0_1] : memref<256x128xf32, #tpu.memory_space<vmem>>, vector<256x128xf32>
    %c0_2 = arith.constant 0 : index
    %c0_3 = arith.constant 0 : index
    %4 = vector.load %arg3[%c0_2, %c0_3] : memref<256x384xbf16, #tpu.memory_space<vmem>>, vector<256x384xbf16>
    %c0_4 = arith.constant 0 : index
    %c0_5 = arith.constant 0 : index
    %5 = vector.load %arg4[%c0_4, %c0_5] : memref<384x128xbf16, #tpu.memory_space<vmem>>, vector<384x128xbf16>
    %cst = arith.constant dense<0.000000e+00> : vector<256x128xf32>
    %6 = tpu.matmul %4, %5, %cst {dimension_numbers = #tpu.dot_dimension_numbers<[1], [0], [0], [1], [0, 0, 1, 1], [], []>} : vector<256x384xbf16>, vector<384x128xbf16>, vector<256x128xf32> -> vector<256x128xf32>
    %7 = arith.addf %3, %6 : vector<256x128xf32>
    %c0_6 = arith.constant 0 : index
    %c0_7 = arith.constant 0 : index
    %8 = vector.load %arg7[%c0_6, %c0_7] : memref<256x128xf32, #tpu.memory_space<vmem>>, vector<256x128xf32>
    tpu.vector_store %arg7[%c0_6, %c0_7], %7 {strides = array<i32>} : memref<256x128xf32, #tpu.memory_space<vmem>>, vector<256x128xf32>,
    %c2_i32 = arith.constant 2 : i32
    %9 = arith.cmpi eq, %arg2, %c2_i32 : i32
    %10 = arith.extui %9 : i1 to i32
    %c0_i32_8 = arith.constant 0 : i32
    %11 = arith.cmpi ne, %10, %c0_i32_8 : i32
    scf.if %11 {
      %c0_9 = arith.constant 0 : index
      %c0_10 = arith.constant 0 : index
      %12 = vector.load %arg7[%c0_9, %c0_10] : memref<256x128xf32, #tpu.memory_space<vmem>>, vector<256x128xf32>
      %c0_11 = arith.constant 0 : index
      %c0_12 = arith.constant 0 : index
      %13 = vector.load %arg5[%c0_11, %c0_12] : memref<1x128xf32, #tpu.memory_space<vmem>>, vector<1x128xf32>
      %14 = vector.broadcast %13 : vector<1x128xf32> to vector<256x128xf32>
      %15 = arith.addf %12, %14 : vector<256x128xf32>
      %16 = arith.truncf %15 : vector<256x128xf32> to vector<256x128xbf16>
      %c0_13 = arith.constant 0 : index
      %c0_14 = arith.constant 0 : index
      %17 = vector.load %arg6[%c0_13, %c0_14] : memref<256x128xbf16, #tpu.memory_space<vmem>>, vector<256x128xbf16>
      tpu.vector_store %arg6[%c0_13, %c0_14], %16 {strides = array<i32>} : memref<256x128xbf16, #tpu.memory_space<vmem>>, vector<256x128xbf16>,
    } else {
    }
    return
  }
  func.func @transform_0(%arg0: i32, %arg1: i32, %arg2: i32) -> (i32, i32) {
    %c0_i32 = arith.constant 0 : i32
    return %arg0, %arg2 : i32, i32
  }
  func.func @transform_1(%arg0: i32, %arg1: i32, %arg2: i32) -> (i32, i32) {
    %c0_i32 = arith.constant 0 : i32
    return %arg2, %arg1 : i32, i32
  }
  func.func @transform_2(%arg0: i32, %arg1: i32, %arg2: i32) -> (i32, i32) {
    %c0_i32 = arith.constant 0 : i32
    %c0_i32_0 = arith.constant 0 : i32
    return %c0_i32, %arg1 : i32, i32
  }
  func.func @transform_3(%arg0: i32, %arg1: i32, %arg2: i32) -> (i32, i32) {
    %c0_i32 = arith.constant 0 : i32
    return %arg0, %arg1 : i32, i32
  }
}

module attributes {stable_mosaic.version = 11 : i64} {
  func.func @_matmul_bias_kernel(%arg0: i32, %arg1: i32, %arg2: i32, %arg3: memref<256x640xbf16, #tpu.memory_space<vmem>>, %arg4: memref<640x128xbf16, #tpu.memory_space<vmem>>, %arg5: memref<1x128xf32, #tpu.memory_space<vmem>>, %arg6: memref<256x128xf32, #tpu.memory_space<vmem>>, %arg7: memref<256x128xf32, #tpu.memory_space<vmem>>) attributes {dimension_semantics = [#tpu.dimension_semantics<parallel>, #tpu.dimension_semantics<parallel>, #tpu.dimension_semantics<arbitrary>], iteration_bounds = array<i64: 2, 1, 5>, scalar_prefetch = 0 : i64, scratch_operands = 1 : i64, tpu.core_type = #tpu.core_type<tc>, window_params = [{transform_indices = @transform_0, window_bounds = array<i64: 256, 640>}, {transform_indices = @transform_1, window_bounds = array<i64: 640, 128>}, {transform_indices = @transform_2, window_bounds = array<i64: 1, 128>}, {transform_indices = @transform_3, window_bounds = array<i64: 256, 128>}]} {
    %c0_i32 = arith.constant 0 : i32
    %0 = arith.cmpi eq, %arg2, %c0_i32 : i32
    %1 = arith.extui %0 : i1 to i32
    %c0_i32_0 = arith.constant 0 : i32
    %2 = arith.cmpi ne, %1, %c0_i32_0 : i32
    scf.if %2 {
      %cst_9 = arith.constant 0.000000e+00 : f32
      %12 = vector.broadcast %cst_9 : f32 to vector<256x128xf32>
      %c0_10 = arith.constant 0 : index
      %c0_11 = arith.constant 0 : index
      %13 = vector.load %arg7[%c0_10, %c0_11] : memref<256x128xf32, #tpu.memory_space<vmem>>, vector<256x128xf32>
      tpu.vector_store %arg7[%c0_10, %c0_11], %12 {strides = array<i32>} : memref<256x128xf32, #tpu.memory_space<vmem>>, vector<256x128xf32>,
    } else {
    }
    %c0 = arith.constant 0 : index
    %c0_1 = arith.constant 0 : index
    %3 = vector.load %arg7[%c0, %c0_1] : memref<256x128xf32, #tpu.memory_space<vmem>>, vector<256x128xf32>
    %c0_2 = arith.constant 0 : index
    %c0_3 = arith.constant 0 : index
    %4 = vector.load %arg3[%c0_2, %c0_3] : memref<256x640xbf16, #tpu.memory_space<vmem>>, vector<256x640xbf16>
    %c0_4 = arith.constant 0 : index
    %c0_5 = arith.constant 0 : index
    %5 = vector.load %arg4[%c0_4, %c0_5] : memref<640x128xbf16, #tpu.memory_space<vmem>>, vector<640x128xbf16>
    %cst = arith.constant dense<0.000000e+00> : vector<256x128xf32>
    %6 = tpu.matmul %4, %5, %cst {dimension_numbers = #tpu.dot_dimension_numbers<[1], [0], [0], [1], [0, 0, 1, 1], [], []>} : vector<256x640xbf16>, vector<640x128xbf16>, vector<256x128xf32> -> vector<256x128xf32>
    %7 = arith.addf %3, %6 : vector<256x128xf32>
    %c0_6 = arith.constant 0 : index
    %c0_7 = arith.constant 0 : index
    %8 = vector.load %arg7[%c0_6, %c0_7] : memref<256x128xf32, #tpu.memory_space<vmem>>, vector<256x128xf32>
    tpu.vector_store %arg7[%c0_6, %c0_7], %7 {strides = array<i32>} : memref<256x128xf32, #tpu.memory_space<vmem>>, vector<256x128xf32>,
    %c4_i32 = arith.constant 4 : i32
    %9 = arith.cmpi eq, %arg2, %c4_i32 : i32
    %10 = arith.extui %9 : i1 to i32
    %c0_i32_8 = arith.constant 0 : i32
    %11 = arith.cmpi ne, %10, %c0_i32_8 : i32
    scf.if %11 {
      %c0_9 = arith.constant 0 : index
      %c0_10 = arith.constant 0 : index
      %12 = vector.load %arg7[%c0_9, %c0_10] : memref<256x128xf32, #tpu.memory_space<vmem>>, vector<256x128xf32>
      %c0_11 = arith.constant 0 : index
      %c0_12 = arith.constant 0 : index
      %13 = vector.load %arg5[%c0_11, %c0_12] : memref<1x128xf32, #tpu.memory_space<vmem>>, vector<1x128xf32>
      %14 = vector.broadcast %13 : vector<1x128xf32> to vector<256x128xf32>
      %15 = arith.addf %12, %14 : vector<256x128xf32>
      %16 = math.tanh %15 : vector<256x128xf32>
      %c0_13 = arith.constant 0 : index
      %c0_14 = arith.constant 0 : index
      %17 = vector.load %arg6[%c0_13, %c0_14] : memref<256x128xf32, #tpu.memory_space<vmem>>, vector<256x128xf32>
      tpu.vector_store %arg6[%c0_13, %c0_14], %16 {strides = array<i32>} : memref<256x128xf32, #tpu.memory_space<vmem>>, vector<256x128xf32>,
    } else {
    }
    return
  }
  func.func @transform_0(%arg0: i32, %arg1: i32, %arg2: i32) -> (i32, i32) {
    %c0_i32 = arith.constant 0 : i32
    return %arg0, %arg2 : i32, i32
  }
  func.func @transform_1(%arg0: i32, %arg1: i32, %arg2: i32) -> (i32, i32) {
    %c0_i32 = arith.constant 0 : i32
    return %arg2, %arg1 : i32, i32
  }
  func.func @transform_2(%arg0: i32, %arg1: i32, %arg2: i32) -> (i32, i32) {
    %c0_i32 = arith.constant 0 : i32
    %c0_i32_0 = arith.constant 0 : i32
    return %c0_i32, %arg1 : i32, i32
  }
  func.func @transform_3(%arg0: i32, %arg1: i32, %arg2: i32) -> (i32, i32) {
    %c0_i32 = arith.constant 0 : i32
    return %arg0, %arg1 : i32, i32
  }
}

</mosaic_0001>

<bundles_post_ra>
// kernel: generator_forward.29
= control target key start
LH: loop header
LB: loop body
LE: loop exit
PB: predicated region body
PF: predicated region fallthrough
CT: control target
= control target key end

     0   :  { %s666_s9 = smov 0   ;;  %s668_s10 = smov 0   ;;  %s798_s0 = inlined_call_operand.vmem [shape: bf16[2,256,64], index: 0, kind: input, shape index: {}]   ;;  %s799_s1 = inlined_call_operand.vmem [shape: f32[2,1,64], index: 1, kind: output, shape index: {0}]   ;;  %s800_s2 = inlined_call_operand.vmem [shape: f32[2,1,64], index: 2, kind: output, shape index: {1}]  }
   0x1   :  { %s670_s11 = smov 0  }
   0x2 LB: > { %s25_s12 = sadd.s32 1, %s644_s10  ;;  %p516_p0 = scmp.ge.s32.totalorder %s648_s11, 1  ;;  %s648_s11 = sphi %s670_s11, %s13_s11   ;;  %s644_s10 = sphi %s668_s10, %s802_s10   ;;  %s640_s9 = sphi %s666_s9, %s801_s9  }
   0x3   : > { %p27_p1 = scmp.ge.s32.totalorder %s25_s12, 2  ;;  %p134_p2 = scmp.lt.s32.totalorder %s648_s11, 3 }
   0x5   : > { %s804_s12 = smov (%p27_p1, %s25_s12), 0  ;;  %p135_p3 = pnand %p516_p0, %p134_p2 }
   0x6   : > { %p162_p4 = scmp.lt.s32.totalorder (!%p135_p3), %s640_s9, 1  ;;  %vm181_vm0 = vcmask (!%p135_p3), 516096   ;;  %v650_v0 = vmov (!%p135_p3), 0.0   ;;  %vm249_vm1 = vcmask (!%p135_p3), 523264  }
   0x7   : > { %138 = sbr.rel (%p135_p3) target bundleno = 104 (0x68), region = 24 }
   0xe   : > { %s806_s9 = smov (!%p162_p4, %s640_s9), 1 }
   0xf   : > { %s521_s13 = sshll.u32 %s806_s9, 7  ;;  %s687_s16 = scalar_lea.vmem %s799_s1, %s806_s9 }
  0x10   : > { %182 = vst.msk [vmem:[%s687_s16] sm:$0x1] %vm181_vm0, %v650_v0  ;;  %s694_s19 = scalar_lea.vmem %s800_s2, %s806_s9  ;;  %s701_s22 = scalar_lea.vmem %s798_s0, %s521_s13 }
  0x11   : > { %183 = vst.msk [vmem:[%s694_s19] sm:$0x1] %vm181_vm0, %v650_v0  ;;  %v523_v1 = vld [vmem:[%s701_s22] sm:$0xff]   ;;  %v586_v2 = vld [vmem:[%s701_s22 + $0x8] sm:$0xff]   ;;  %v587_v6 = vld [vmem:[%s701_s22 + $0x10] sm:$0xff]  }
  0x12   : > { %v524_v3 = vunpack.c.l.bf16 %v523_v1  ;;  %v525_v4 = vunpack.c.h.bf16 %v523_v1  ;;  %v528_v5 = vunpack.c.l.bf16 %v586_v2  ;;  %v529_v7 = vunpack.c.h.bf16 %v586_v2  ;;  %v588_v14 = vld [vmem:[%s701_s22 + $0x18] sm:$0xff]   ;;  %v589_v21 = vld [vmem:[%s701_s22 + $0x20] sm:$0xff]   ;;  %v590_v27 = vld [vmem:[%s701_s22 + $0x28] sm:$0xff]  }
  0x13   : > { %v532_v12 = vunpack.c.l.bf16 %v587_v6  ;;  %v533_v16 = vunpack.c.h.bf16 %v587_v6  ;;  %v536_v19 = vunpack.c.l.bf16 %v588_v14  ;;  %v537_v23 = vunpack.c.h.bf16 %v588_v14  ;;  %v591_v34 = vld [vmem:[%s701_s22 + $0x30] sm:$0xff]   ;;  %v592_v50 = vld [vmem:[%s701_s22 + $0x38] sm:$0xff]   ;;  %v593_v63 = vld [vmem:[%s701_s22 + $0x40] sm:$0xff]  }
  0x14   : > { %v250_v8 = vsel %vm249_vm1, %v524_v3, 0.0  ;;  %v251_v9 = vsel %vm249_vm1, %v525_v4, 0.0  ;;  %v253_v10 = vsel %vm249_vm1, %v528_v5, 0.0  ;;  %v255_v13 = vsel %vm249_vm1, %v529_v7, 0.0 }
  0x15   : > { %v252_v11 = vadd.f32 %v251_v9, %v250_v8  ;;  %v257_v17 = vsel %vm249_vm1, %v532_v12, 0.0  ;;  %v259_v20 = vsel %vm249_vm1, %v533_v16, 0.0  ;;  %v261_v24 = vsel %vm249_vm1, %v536_v19, 0.0 }
  0x16   : > { %v540_v26 = vunpack.c.l.bf16 %v589_v21  ;;  %v263_v28 = vsel %vm249_vm1, %v537_v23, 0.0  ;;  %v541_v30 = vunpack.c.h.bf16 %v589_v21  ;;  %v544_v32 = vunpack.c.l.bf16 %v590_v27 }
  0x17   : > { %v254_v15 = vadd.f32 %v253_v10, %v252_v11  ;;  %v323_v36 = vmul.f32 %v524_v3, %v524_v3  ;;  %v324_v37 = vmul.f32 %v525_v4, %v525_v4  ;;  %v325_v38 = vmul.f32 %v528_v5, %v528_v5 }
  0x18   : > { %v265_v31 = vsel %vm249_vm1, %v540_v26, 0.0  ;;  %v267_v35 = vsel %vm249_vm1, %v541_v30, 0.0  ;;  %v545_v39 = vunpack.c.h.bf16 %v590_v27  ;;  %v269_v41 = vsel %vm249_vm1, %v544_v32, 0.0 }
  0x19   : > { %v256_v18 = vadd.f32 %v255_v13, %v254_v15  ;;  %v326_v42 = vmul.f32 %v529_v7, %v529_v7  ;;  %v548_v43 = vunpack.c.l.bf16 %v591_v34  ;;  %v327_v46 = vmul.f32 %v532_v12, %v532_v12  ;;  %v594_v12 = vld [vmem:[%s701_s22 + $0x48] sm:$0xff]  }
  0x1a   : > { %v271_v45 = vsel %vm249_vm1, %v545_v39, 0.0  ;;  %v355_v47 = vsel %vm249_vm1, %v323_v36, 0.0  ;;  %v356_v48 = vsel %vm249_vm1, %v324_v37, 0.0  ;;  %v358_v49 = vsel %vm249_vm1, %v325_v38, 0.0  ;;  %v596_v38 = vld [vmem:[%s701_s22 + $0x58] sm:$0xff]  }
  0x1b   : > { %v258_v22 = vadd.f32 %v257_v17, %v256_v18  ;;  %v357_v52 = vadd.f32 %v356_v48, %v355_v47  ;;  %v549_v53 = vunpack.c.h.bf16 %v591_v34  ;;  %v273_v54 = vsel %vm249_vm1, %v548_v43, 0.0 }
  0x1c   : > { %v328_v55 = vmul.f32 %v533_v16, %v533_v16  ;;  %v360_v56 = vsel %vm249_vm1, %v326_v42, 0.0  ;;  %v552_v59 = vunpack.c.l.bf16 %v592_v50  ;;  %v329_v61 = vmul.f32 %v536_v19, %v536_v19 }
  0x1d   : > { %v260_v25 = vadd.f32 %v259_v20, %v258_v22  ;;  %v359_v58 = vadd.f32 %v358_v49, %v357_v52  ;;  %v275_v60 = vsel %vm249_vm1, %v549_v53, 0.0  ;;  %v362_v62 = vsel %vm249_vm1, %v327_v46, 0.0 }
  0x1e   : > { %v553_v2 = vunpack.c.h.bf16 %v592_v50  ;;  %v277_v3 = vsel %vm249_vm1, %v552_v59, 0.0  ;;  %v330_v4 = vmul.f32 %v537_v23, %v537_v23  ;;  %v364_v5 = vsel %vm249_vm1, %v328_v55, 0.0 }
  0x1f   : > { %v262_v29 = vadd.f32 %v261_v24, %v260_v25  ;;  %v361_v1 = vadd.f32 %v360_v56, %v359_v58  ;;  %v556_v8 = vunpack.c.l.bf16 %v593_v63  ;;  %v331_v10 = vmul.f32 %v540_v26, %v540_v26  ;;  %v595_v25 = vld [vmem:[%s701_s22 + $0x50] sm:$0xff]  }
  0x20   : > { %v279_v9 = vsel %vm249_vm1, %v553_v2, 0.0  ;;  %v366_v11 = vsel %vm249_vm1, %v329_v61, 0.0  ;;  %v557_v15 = vunpack.c.h.bf16 %v593_v63  ;;  %v332_v17 = vmul.f32 %v541_v30, %v541_v30 }
  0x21   : > { %v264_v33 = vadd.f32 %v263_v28, %v262_v29  ;;  %v363_v7 = vadd.f32 %v362_v62, %v361_v1  ;;  %v281_v16 = vsel %vm249_vm1, %v556_v8, 0.0  ;;  %v368_v18 = vsel %vm249_vm1, %v330_v4, 0.0 }
  0x22   : > { %v560_v21 = vunpack.c.l.bf16 %v594_v12  ;;  %v283_v22 = vsel %vm249_vm1, %v557_v15, 0.0  ;;  %v333_v23 = vmul.f32 %v544_v32, %v544_v32  ;;  %v370_v24 = vsel %vm249_vm1, %v331_v10, 0.0 }
  0x23   : > { %v266_v40 = vadd.f32 %v265_v31, %v264_v33  ;;  %v365_v14 = vadd.f32 %v364_v5, %v363_v7  ;;  %v561_v28 = vunpack.c.h.bf16 %v594_v12  ;;  %v334_v31 = vmul.f32 %v545_v39, %v545_v39 }
  0x24   : > { %v285_v29 = vsel %vm249_vm1, %v560_v21, 0.0  ;;  %v372_v30 = vsel %vm249_vm1, %v332_v17, 0.0  ;;  %v335_v37 = vmul.f32 %v548_v43, %v548_v43  ;;  %v374_v32 = vsel %vm249_vm1, %v333_v23, 0.0 }
  0x25   : > { %v268_v44 = vadd.f32 %v267_v35, %v266_v40  ;;  %v367_v20 = vadd.f32 %v366_v11, %v365_v14  ;;  %v564_v35 = vunpack.c.l.bf16 %v595_v25  ;;  %v287_v36 = vsel %vm249_vm1, %v561_v28, 0.0 }
  0x26   : > { %v565_v42 = vunpack.c.h.bf16 %v595_v25  ;;  %v376_v39 = vsel %vm249_vm1, %v334_v31, 0.0  ;;  %v568_v48 = vunpack.c.l.bf16 %v596_v38  ;;  %v337_v50 = vmul.f32 %v552_v59, %v552_v59 }
  0x27   : > { %v270_v51 = vadd.f32 %v269_v41, %v268_v44  ;;  %v369_v27 = vadd.f32 %v368_v18, %v367_v20  ;;  %v289_v44 = vsel %vm249_vm1, %v564_v35, 0.0  ;;  %v378_v43 = vsel %vm249_vm1, %v335_v37, 0.0 }
  0x28   : > { %v291_v49 = vsel %vm249_vm1, %v565_v42, 0.0  ;;  %v569_v55 = vunpack.c.h.bf16 %v596_v38  ;;  %v293_v56 = vsel %vm249_vm1, %v568_v48, 0.0  ;;  %v339_v63 = vmul.f32 %v556_v8, %v556_v8 }
  0x29   : > { %v272_v57 = vadd.f32 %v271_v45, %v270_v51  ;;  %v371_v34 = vadd.f32 %v370_v24, %v369_v27  ;;  %v336_v45 = vmul.f32 %v549_v53, %v549_v53  ;;  %v597_v51 = vld [vmem:[%s701_s22 + $0x60] sm:$0xff]   ;;  %v382_v59 = vsel %vm249_vm1, %v337_v50, 0.0 }
  0x2a   : > { %v572_v61 = vunpack.c.l.bf16 %v597_v51  ;;  %v295_v62 = vsel %vm249_vm1, %v569_v55, 0.0  ;;  %v573_v4 = vunpack.c.h.bf16 %v597_v51  ;;  %v341_v12 = vmul.f32 %v560_v21, %v560_v21  ;;  %v600_v21 = vld [vmem:[%s701_s22 + $0x78] sm:$0xff]  }
  0x2b   : > { %v274_v0 = vadd.f32 %v273_v54, %v272_v57  ;;  %v373_v41 = vadd.f32 %v372_v30, %v371_v34  ;;  %v338_v57 = vmul.f32 %v553_v2, %v553_v2  ;;  %v380_v53 = vsel %vm249_vm1, %v336_v45, 0.0 }
  0x2c   : > { %v297_v5 = vsel %vm249_vm1, %v572_v61, 0.0  ;;  %v299_v11 = vsel %vm249_vm1, %v573_v4, 0.0  ;;  %v386_v8 = vsel %vm249_vm1, %v339_v63, 0.0  ;;  %v343_v25 = vmul.f32 %v564_v35, %v564_v35 }
  0x2d   : > { %v276_v6 = vadd.f32 %v275_v60, %v274_v0  ;;  %v375_v47 = vadd.f32 %v374_v32, %v373_v41  ;;  %v598_v0 = vld [vmem:[%s701_s22 + $0x68] sm:$0xff]   ;;  %v384_v2 = vsel %vm249_vm1, %v338_v57, 0.0  ;;  %v584_v37 = vunpack.c.l.bf16 %v600_v21 }
  0x2e   : > { %v576_v10 = vunpack.c.l.bf16 %v598_v0  ;;  %v577_v17 = vunpack.c.h.bf16 %v598_v0  ;;  %v345_v38 = vmul.f32 %v568_v48, %v568_v48  ;;  %v347_v50 = vmul.f32 %v572_v61, %v572_v61 }
  0x2f   : > { %v278_v13 = vadd.f32 %v277_v3, %v276_v6  ;;  %v377_v54 = vadd.f32 %v376_v39, %v375_v47  ;;  %v340_v6 = vmul.f32 %v557_v15, %v557_v15  ;;  %v309_v45 = vsel %vm249_vm1, %v584_v37, 0.0 }
  0x30   : > { %v301_v18 = vsel %vm249_vm1, %v576_v10, 0.0  ;;  %v303_v24 = vsel %vm249_vm1, %v577_v17, 0.0  ;;  %v346_v39 = vmul.f32 %v569_v55, %v569_v55  ;;  %v348_v48 = vmul.f32 %v573_v4, %v573_v4 }
  0x31   : > { %v280_v19 = vadd.f32 %v279_v9, %v278_v13  ;;  %v379_v60 = vadd.f32 %v378_v43, %v377_v54  ;;  %v599_v13 = vld [vmem:[%s701_s22 + $0x70] sm:$0xff]   ;;  %v388_v15 = vsel %vm249_vm1, %v340_v6, 0.0  ;;  %v398_v43 = vsel %vm249_vm1, %v345_v38, 0.0 }
  0x32   : > { %v580_v23 = vunpack.c.l.bf16 %v599_v13  ;;  %v581_v31 = vunpack.c.h.bf16 %v599_v13  ;;  %v400_v54 = vsel %vm249_vm1, %v346_v39, 0.0  ;;  %v404_v63 = vsel %vm249_vm1, %v348_v48, 0.0 }
  0x33   : > { %v282_v26 = vadd.f32 %v281_v16, %v280_v19  ;;  %v381_v3 = vadd.f32 %v380_v53, %v379_v60  ;;  %v342_v19 = vmul.f32 %v561_v28, %v561_v28  ;;  %v349_v53 = vmul.f32 %v576_v10, %v576_v10 }
  0x34   : > { %v305_v30 = vsel %vm249_vm1, %v580_v23, 0.0  ;;  %v307_v32 = vsel %vm249_vm1, %v581_v31, 0.0  ;;  %v351_v0 = vmul.f32 %v580_v23, %v580_v23 }
  0x35   : > { %v284_v33 = vadd.f32 %v283_v22, %v282_v26  ;;  %v383_v9 = vadd.f32 %v382_v59, %v381_v3  ;;  %v390_v26 = vsel %vm249_vm1, %v341_v12, 0.0  ;;  %v392_v34 = vsel %vm249_vm1, %v342_v19, 0.0 }
  0x36   : > { %v410_v10 = vsel %vm249_vm1, %v351_v0, 0.0 }
  0x37   : > { %v286_v40 = vadd.f32 %v285_v29, %v284_v33  ;;  %v385_v16 = vadd.f32 %v384_v2, %v383_v9  ;;  %v344_v33 = vmul.f32 %v565_v42, %v565_v42  ;;  %v353_v9 = vmul.f32 %v584_v37, %v584_v37 }
  0x39   : > { %v288_v46 = vadd.f32 %v287_v36, %v286_v40  ;;  %v387_v22 = vadd.f32 %v386_v8, %v385_v16  ;;  %v394_v40 = vsel %vm249_vm1, %v343_v25, 0.0  ;;  %v248_v8 = vld [vmem:[%s687_s16] sm:$0x1] }
  0x3b   : > { %v290_v52 = vadd.f32 %v289_v44, %v288_v46  ;;  %v389_v29 = vadd.f32 %v388_v15, %v387_v22  ;;  %v585_v44 = vunpack.c.h.bf16 %v600_v21  ;;  %v396_v46 = vsel %vm249_vm1, %v344_v33, 0.0 }
  0x3d   : > { %v292_v58 = vadd.f32 %v291_v49, %v290_v52  ;;  %v391_v36 = vadd.f32 %v390_v26, %v389_v29  ;;  %v311_v49 = vsel %vm249_vm1, %v585_v44, 0.0  ;;  %v354_v13 = vmul.f32 %v585_v44, %v585_v44  ;;  %v322_v29 = vld [vmem:[%s694_s19] sm:$0x1] }
  0x3f   : > { %v294_v1 = vadd.f32 %v293_v56, %v292_v58  ;;  %v393_v41 = vadd.f32 %v392_v34, %v391_v36  ;;  %v402_v58 = vsel %vm249_vm1, %v347_v50, 0.0 }
  0x41   : > { %v296_v7 = vadd.f32 %v295_v62, %v294_v1  ;;  %v395_v42 = vadd.f32 %v394_v40, %v393_v41  ;;  %v350_v62 = vmul.f32 %v577_v17, %v577_v17  ;;  %v406_v1 = vsel %vm249_vm1, %v349_v53, 0.0 }
  0x43   : > { %v298_v14 = vadd.f32 %v297_v5, %v296_v7  ;;  %v397_v52 = vadd.f32 %v396_v46, %v395_v42  ;;  %v352_v5 = vmul.f32 %v581_v31, %v581_v31  ;;  %v408_v6 = vsel %vm249_vm1, %v350_v62, 0.0 }
  0x45   : > { %v300_v20 = vadd.f32 %v299_v11, %v298_v14  ;;  %v399_v57 = vadd.f32 %v398_v43, %v397_v52  ;;  %v412_v14 = vsel %vm249_vm1, %v352_v5, 0.0 }
  0x47   : > { %v302_v27 = vadd.f32 %v301_v18, %v300_v20  ;;  %v401_v60 = vadd.f32 %v400_v54, %v399_v57  ;;  %v414_v18 = vsel %vm249_vm1, %v353_v9, 0.0  ;;  %v416_v20 = vsel %vm249_vm1, %v354_v13, 0.0 }
  0x49   : > { %v304_v28 = vadd.f32 %v303_v24, %v302_v27  ;;  %v403_v61 = vadd.f32 %v402_v58, %v401_v60 }
  0x4b   : > { %v306_v35 = vadd.f32 %v305_v30, %v304_v28  ;;  %v405_v4 = vadd.f32 %v404_v63, %v403_v61 }
  0x4d   : > { %v308_v47 = vadd.f32 %v307_v32, %v306_v35  ;;  %v407_v7 = vadd.f32 %v406_v1, %v405_v4 }
  0x4f   : > { %v310_v51 = vadd.f32 %v309_v45, %v308_v47  ;;  %v409_v12 = vadd.f32 %v408_v6, %v407_v7 }
  0x51   : > { %v312_v56 = vadd.f32 %v311_v49, %v310_v51  ;;  %v411_v17 = vadd.f32 %v410_v10, %v409_v12 }
  0x53   : > { %v313_v55 = vrot.slane %v312_v56, 4  ;;  %v413_v15 = vadd.f32 %v412_v14, %v411_v17 }
  0x55   : > { %v314_v59 = vadd.f32 %v313_v55, %v312_v56  ;;  %v415_v22 = vadd.f32 %v414_v18, %v413_v15 }
  0x57   : > { %v315_v3 = vrot.slane %v314_v59, 2  ;;  %v417_v23 = vadd.f32 %v416_v20, %v415_v22 }
  0x59   : > { %v316_v2 = vadd.f32 %v315_v3, %v314_v59  ;;  %v418_v24 = vrot.slane %v417_v23, 4 }
  0x5b   : > { %v317_v11 = vrot.slane %v316_v2, 1  ;;  %v419_v25 = vadd.f32 %v418_v24, %v417_v23 }
  0x5d   : > { %v318_v16 = vadd.f32 %v317_v11, %v316_v2  ;;  %v420_v26 = vrot.slane %v419_v25, 2 }
  0x5f   : > { %v319_v19 = vadd.f32 %v318_v16, %v248_v8  ;;  %v421_v21 = vadd.f32 %v420_v26, %v419_v25 }
  0x61   : > { %321 = vst.msk [vmem:[%s687_s16] sm:$0x1] %vm181_vm0, %v319_v19  ;;  %v422_v27 = vrot.slane %v421_v21, 1 }
  0x63   : > { %v423_v31 = vadd.f32 %v422_v27, %v421_v21 }
  0x65   : > { %v424_v30 = vadd.f32 %v423_v31, %v322_v29 }
  0x67   : > { %425 = vst.msk [vmem:[%s694_s19] sm:$0x1] %vm181_vm0, %v424_v30 }
  0x68 PF: > { %s13_s11 = sadd.s32 1, %s648_s11   ;;  %s801_s9 = smov %s644_s10 }
  0x69   : > { %p10_p5 = scmp.ge.s32.totalorder %s13_s11, 4   ;;  %s802_s10 = smov %s804_s12 }
  0x6b   :  { %12 = sbr.rel (!%p10_p5) target bundleno = 2 (0x2), region = 70 }

// kernel: generator_forward.28
= control target key start
LH: loop header
LB: loop body
LE: loop exit
PB: predicated region body
PF: predicated region fallthrough
CT: control target
= control target key end

     0   :  { %s1712_s12 = smov 0   ;;  %s1714_s13 = smov 0   ;;  %s1886_s0 = inlined_call_operand.vmem [shape: bf16[512,256], index: 0, kind: input, shape index: {}]   ;;  %s1887_s1 = inlined_call_operand.vmem [shape: bf16[256,128], index: 1, kind: input, shape index: {}]   ;;  %s1888_s2 = inlined_call_operand.vmem [shape: f32[1,128], index: 2, kind: input, shape index: {}]   ;;  %s1889_s3 = inlined_call_operand.vmem [shape: bf16[512,128], index: 3, kind: output, shape index: {}]  }
   0x1   :  { %s1716_s14 = smov 0  }
   0x2 LB: > { %s32_s15 = sadd.s32 1, %s1686_s13  ;;  %p1235_p0 = scmp.ge.s32.totalorder %s1690_s14, 1  ;;  %s1690_s14 = sphi %s1716_s14, %s13_s14   ;;  %s1686_s13 = sphi %s1714_s13, %s1891_s13   ;;  %s1682_s12 = sphi %s1712_s12, %s1890_s12  }
   0x3   : > { %p34_p1 = scmp.ge.s32.totalorder %s32_s15, 2  ;;  %p191_p2 = scmp.lt.s32.totalorder %s1690_s14, 3 }
   0x5   : > { %s1893_s15 = smov (%p34_p1, %s32_s15), 0  ;;  %p192_p3 = pnand %p1235_p0, %p191_p2 }
   0x6   : > { %v1604_v0 = vld [vmem:[%s1887_s1 + $0x40] sm:$0xff] (!%p192_p3)   ;;  %s1236_s18 = sshll.u32 (!%p192_p3), %s1682_s12, 5  ;;  %v1606_v2 = vld [vmem:[%s1887_s1 + $0x48] sm:$0xff] (!%p192_p3)   ;;  %v1608_v4 = vld [vmem:[%s1887_s1 + $0x50] sm:$0xff] (!%p192_p3)  }
   0x7   : > { %195 = sbr.rel (%p192_p3) target bundleno = 317 (0x13d), region = 32  ;;  %v1605_v1 = vld [vmem:[%s1887_s1] sm:$0xff] (!%p192_p3)   ;;  %1452 = vmatprep.subr.bf16.mxu0 (!%p192_p3), %v1604_v0  ;;  %1564 = vmatprep.subr.bf16.mxu1 (!%p192_p3), %v1604_v0  ;;  %v1607_v3 = vld [vmem:[%s1887_s1 + $0x8] sm:$0xff] (!%p192_p3)   ;;  %p236_p4 = scmp.lt.s32.totalorder (!%p192_p3), %s1236_s18, 63  ;;  %v1609_v5 = vld [vmem:[%s1887_s1 + $0x10] sm:$0xff] (!%p192_p3)  }
   0x8   : > { %1453 = vmatpush3.bf16.msra.mxu0 (!%p192_p3), %v1605_v1  ;;  %1572 = vmatpush3.bf16.msra.mxu1 (!%p192_p3), %v1605_v1  ;;  %v1610_v6 = vld [vmem:[%s1887_s1 + $0x58] sm:$0xff] (!%p192_p3)   ;;  %v1612_v8 = vld [vmem:[%s1887_s1 + $0x60] sm:$0xff] (!%p192_p3)   ;;  %v1614_v10 = vld [vmem:[%s1887_s1 + $0x68] sm:$0xff] (!%p192_p3)  }
   0x9   : > { %1454 = vmatprep.subr.bf16.mxu0 (!%p192_p3), %v1606_v2  ;;  %1565 = vmatprep.subr.bf16.mxu1 (!%p192_p3), %v1606_v2  ;;  %v1611_v7 = vld [vmem:[%s1887_s1 + $0x18] sm:$0xff] (!%p192_p3)   ;;  %v1613_v9 = vld [vmem:[%s1887_s1 + $0x20] sm:$0xff] (!%p192_p3)   ;;  %v1615_v13 = vld [vmem:[%s1887_s1 + $0x28] sm:$0xff] (!%p192_p3)  }
   0xa   : > { %v1616_v14 = vld [vmem:[%s1887_s1 + $0x70] sm:$0xff] (!%p192_p3)   ;;  %v1618_v16 = vld [vmem:[%s1887_s1 + $0x78] sm:$0xff] (!%p192_p3)   ;;  %v1821_v56 = vld [vmem:[%s1888_s2] ss:$0 sm:$0xff] (!%p192_p3) }
   0xb   : > { %v1617_v15 = vld [vmem:[%s1887_s1 + $0x30] sm:$0xff] (!%p192_p3)   ;;  %v1619_v17 = vld [vmem:[%s1887_s1 + $0x38] sm:$0xff] (!%p192_p3)  }
   0xc   : > { %1455 = vmatpush3.bf16.msra.mxu0 (!%p192_p3), %v1607_v3  ;;  %1573 = vmatpush3.bf16.msra.mxu1 (!%p192_p3), %v1607_v3 }
   0xd   : > { %1456 = vmatprep.subr.bf16.mxu0 (!%p192_p3), %v1608_v4  ;;  %1566 = vmatprep.subr.bf16.mxu1 (!%p192_p3), %v1608_v4 }
   0xe   : > { %s1895_s18 = smov (!%p236_p4, %s1236_s18), 63 }
   0xf   : > { %s1324_s6 = sshll.u32 %s1895_s18, 3  ;;  %s1240_s5 = sshll.u32 %s1895_s18, 2 }
  0x10   : > { %1457 = vmatpush3.bf16.msra.mxu0 %v1609_v5  ;;  %1574 = vmatpush3.bf16.msra.mxu1 %v1609_v5  ;;  %s1763_s11 = scalar_lea.vmem %s1886_s0, %s1324_s6  ;;  %s1831_s8 = scalar_lea.vmem %s1889_s3, %s1240_s5 }
  0x11   : > { %1458 = vmatprep.subr.bf16.mxu0 %v1610_v6  ;;  %1567 = vmatprep.subr.bf16.mxu1 %v1610_v6  ;;  %v1622_v11 = vld [vmem:[%s1763_s11 + $0x4] ss:$8 sps:$4 sm:$0xff]   ;;  %v1620_v18 = vld [vmem:[%s1763_s11] ss:$8 sps:$4 sm:$0xff]   ;;  %v1626_v20 = vld [vmem:[%s1763_s11 + $0x14] ss:$8 sps:$4 sm:$0xff]  }
  0x12   : > { %v1625_v12 = vld [vmem:[%s1763_s11 + $0x84] ss:$8 sps:$4 sm:$0xff]   ;;  %688 = vmatprep.mubr.bf16.mxu0 %v1622_v11  ;;  %v1623_v19 = vld [vmem:[%s1763_s11 + $0x80] ss:$8 sps:$4 sm:$0xff]   ;;  %v1628_v21 = vld [vmem:[%s1763_s11 + $0x94] ss:$8 sps:$4 sm:$0xff]  }
  0x13   : > { %752 = vmatprep.mubr.bf16.mxu1 %v1625_v12  ;;  %v1630_v22 = vld [vmem:[%s1763_s11 + $0x10] ss:$8 sps:$4 sm:$0xff]   ;;  %v1632_v24 = vld [vmem:[%s1763_s11 + $0x24] ss:$8 sps:$4 sm:$0xff]   ;;  %v1636_v26 = vld [vmem:[%s1763_s11 + $0x20] ss:$8 sps:$4 sm:$0xff]  }
  0x14   : > { %1459 = vmatpush3.bf16.msra.mxu0 %v1611_v7  ;;  %1575 = vmatpush3.bf16.msra.mxu1 %v1611_v7  ;;  %v1631_v23 = vld [vmem:[%s1763_s11 + $0x90] ss:$8 sps:$4 sm:$0xff]   ;;  %v1634_v25 = vld [vmem:[%s1763_s11 + $0xa4] ss:$8 sps:$4 sm:$0xff]   ;;  %v1637_v27 = vld [vmem:[%s1763_s11 + $0xa0] ss:$8 sps:$4 sm:$0xff]  }
  0x15   : > { %1460 = vmatprep.subr.bf16.mxu0 %v1612_v8  ;;  %1568 = vmatprep.subr.bf16.mxu1 %v1612_v8  ;;  %v1638_v28 = vld [vmem:[%s1763_s11 + $0x34] ss:$8 sps:$4 sm:$0xff]   ;;  %v1642_v30 = vld [vmem:[%s1763_s11 + $0x30] ss:$8 sps:$4 sm:$0xff]   ;;  %v1644_v32 = vld [vmem:[%s1763_s11 + $0x44] ss:$8 sps:$4 sm:$0xff]  }
  0x16   : > { %v1640_v29 = vld [vmem:[%s1763_s11 + $0xb4] ss:$8 sps:$4 sm:$0xff]   ;;  %v1643_v31 = vld [vmem:[%s1763_s11 + $0xb0] ss:$8 sps:$4 sm:$0xff]   ;;  %v1646_v33 = vld [vmem:[%s1763_s11 + $0xc4] ss:$8 sps:$4 sm:$0xff]  }
  0x17   : > { %v1648_v34 = vld [vmem:[%s1763_s11 + $0x40] ss:$8 sps:$4 sm:$0xff]   ;;  %v1650_v36 = vld [vmem:[%s1763_s11 + $0x54] ss:$8 sps:$4 sm:$0xff]   ;;  %v1654_v38 = vld [vmem:[%s1763_s11 + $0x50] ss:$8 sps:$4 sm:$0xff]  }
  0x18   : > { %1461 = vmatpush3.bf16.msra.mxu0 %v1613_v9  ;;  %1576 = vmatpush3.bf16.msra.mxu1 %v1613_v9  ;;  %v1649_v35 = vld [vmem:[%s1763_s11 + $0xc0] ss:$8 sps:$4 sm:$0xff]   ;;  %v1652_v37 = vld [vmem:[%s1763_s11 + $0xd4] ss:$8 sps:$4 sm:$0xff]   ;;  %v1655_v39 = vld [vmem:[%s1763_s11 + $0xd0] ss:$8 sps:$4 sm:$0xff]  }
  0x19   : > { %1462 = vmatprep.subr.bf16.mxu0 %v1614_v10  ;;  %1569 = vmatprep.subr.bf16.mxu1 %v1614_v10  ;;  %v1656_v40 = vld [vmem:[%s1763_s11 + $0x64] ss:$8 sps:$4 sm:$0xff]   ;;  %v1660_v42 = vld [vmem:[%s1763_s11 + $0x60] ss:$8 sps:$4 sm:$0xff]   ;;  %v1662_v44 = vld [vmem:[%s1763_s11 + $0x74] ss:$8 sps:$4 sm:$0xff]  }
  0x1a   : > { %v1658_v41 = vld [vmem:[%s1763_s11 + $0xe4] ss:$8 sps:$4 sm:$0xff]   ;;  %v1661_v43 = vld [vmem:[%s1763_s11 + $0xe0] ss:$8 sps:$4 sm:$0xff]   ;;  %v1664_v45 = vld [vmem:[%s1763_s11 + $0xf4] ss:$8 sps:$4 sm:$0xff]  }
  0x1b   : > { %v1666_v46 = vld [vmem:[%s1763_s11 + $0x70] ss:$8 sps:$4 sm:$0xff]  }
  0x1c   : > { %1463 = vmatpush3.bf16.msra.mxu0 %v1615_v13  ;;  %1577 = vmatpush3.bf16.msra.mxu1 %v1615_v13  ;;  %v1667_v47 = vld [vmem:[%s1763_s11 + $0xf0] ss:$8 sps:$4 sm:$0xff]  }
  0x1d   : > { %1464 = vmatprep.subr.bf16.mxu0 %v1616_v14  ;;  %1570 = vmatprep.subr.bf16.mxu1 %v1616_v14 }
  0x20   : > { %1465 = vmatpush3.bf16.msra.mxu0 %v1617_v15  ;;  %1578 = vmatpush3.bf16.msra.mxu1 %v1617_v15 }
  0x21   : > { %1466 = vmatprep.subr.bf16.mxu0 %v1618_v16  ;;  %1571 = vmatprep.subr.bf16.mxu1 %v1618_v16 }
  0x24   : > { %1467 = vmatpush3.bf16.msra.mxu0 %v1619_v17  ;;  %1579 = vmatpush3.bf16.msra.mxu1 %v1619_v17 }
  0x27   : > { %689 = vmatmul.mubr.bf16.vlgmr.msra.gmra.mrb[0].mxu0 %v1620_v18  ;;  %753 = vmatmul.mubr.bf16.vlgmr.msra.gmra.mrb[0].mxu1 %v1623_v19 }
  0x28   : > { %696 = vmatprep.mubr.bf16.mxu0 %v1626_v20  ;;  %760 = vmatprep.mubr.bf16.mxu1 %v1628_v21 }
  0x2f   : > { %697 = vmatmul.mubr.bf16.gmra.mrb[4].mxu0 %v1630_v22  ;;  %761 = vmatmul.mubr.bf16.gmra.mrb[4].mxu1 %v1631_v23 }
  0x30   : > { %704 = vmatprep.mubr.bf16.mxu0 %v1632_v24  ;;  %768 = vmatprep.mubr.bf16.mxu1 %v1634_v25 }
  0x37   : > { %705 = vmatmul.mubr.bf16.gmra.mrb[8].mxu0 %v1636_v26  ;;  %769 = vmatmul.mubr.bf16.gmra.mrb[8].mxu1 %v1637_v27 }
  0x38   : > { %712 = vmatprep.mubr.bf16.mxu0 %v1638_v28  ;;  %776 = vmatprep.mubr.bf16.mxu1 %v1640_v29 }
  0x3f   : > { %713 = vmatmul.mubr.bf16.gmra.mrb[12].mxu0 %v1642_v30  ;;  %777 = vmatmul.mubr.bf16.gmra.mrb[12].mxu1 %v1643_v31 }
  0x40   : > { %720 = vmatprep.mubr.bf16.mxu0 %v1644_v32  ;;  %784 = vmatprep.mubr.bf16.mxu1 %v1646_v33 }
  0x47   : > { %721 = vmatmul.mubr.bf16.gmra.mrb[16].mxu0 %v1648_v34  ;;  %785 = vmatmul.mubr.bf16.gmra.mrb[16].mxu1 %v1649_v35 }
  0x48   : > { %728 = vmatprep.mubr.bf16.mxu0 %v1650_v36  ;;  %792 = vmatprep.mubr.bf16.mxu1 %v1652_v37 }
  0x4f   : > { %729 = vmatmul.mubr.bf16.gmra.mrb[20].mxu0 %v1654_v38  ;;  %793 = vmatmul.mubr.bf16.gmra.mrb[20].mxu1 %v1655_v39 }
  0x50   : > { %736 = vmatprep.mubr.bf16.mxu0 %v1656_v40  ;;  %800 = vmatprep.mubr.bf16.mxu1 %v1658_v41 }
  0x57   : > { %737 = vmatmul.mubr.bf16.gmra.mrb[24].mxu0 %v1660_v42  ;;  %801 = vmatmul.mubr.bf16.gmra.mrb[24].mxu1 %v1661_v43 }
  0x58   : > { %744 = vmatprep.mubr.bf16.mxu0 %v1662_v44  ;;  %808 = vmatprep.mubr.bf16.mxu1 %v1664_v45 }
  0x5f   : > { %745 = vmatmul.mubr.bf16.gmra.mrb[28].mxu0 %v1666_v46  ;;  %809 = vmatmul.mubr.bf16.gmra.mrb[28].mxu1 %v1667_v47 }
  0xfa   : > { %v1468_v48 = vpop.f32.mrb[0].mxu0  ;;  %v1516_v49 = vpop.f32.mrb[0].mxu1 }
  0xfb   : > { %v1469_v50 = vpop.f32.mrb[1].mxu0  ;;  %v1517_v51 = vpop.f32.mrb[1].mxu1 }
  0xfc   : > { %v1470_v52 = vadd.f32 %v1469_v50, %v1468_v48  ;;  %v1518_v53 = vadd.f32 %v1517_v51, %v1516_v49  ;;  %v1471_v54 = vpop.f32.mrb[2].mxu0  ;;  %v1519_v55 = vpop.f32.mrb[2].mxu1 }
  0xfd   : > { %v1472_v57 = vpop.f32.mrb[3].mxu0  ;;  %v1520_v58 = vpop.f32.mrb[3].mxu1 }
  0xfe   : > { %v1473_v59 = vadd.f32 %v1472_v57, %v1471_v54  ;;  %v1521_v60 = vadd.f32 %v1520_v58, %v1519_v55  ;;  %v923_v61 = vadd.f32 %v1470_v52, %v1821_v56  ;;  %v939_v62 = vadd.f32 %v1518_v53, %v1821_v56 }
 0x100   : > { %v924_v63 = vadd.f32 %v1473_v59, %v1821_v56  ;;  %v940_v0 = vadd.f32 %v1521_v60, %v1821_v56 }
 0x102   : > { %v1360_v1 = vpack.c.bf16 %v924_v63, %v923_v61  ;;  %v1400_v2 = vpack.c.bf16 %v940_v0, %v939_v62  ;;  %v1474_v3 = vpop.f32.mrb[4].mxu0  ;;  %v1522_v4 = vpop.f32.mrb[4].mxu1 }
 0x103   : > { %v1475_v5 = vpop.f32.mrb[5].mxu0  ;;  %v1523_v6 = vpop.f32.mrb[5].mxu1 }
 0x104   : > { %1361 = vst [vmem:[%s1831_s8] sm:$0xff] %v1360_v1   ;;  %1444 = vst [vmem:[%s1831_s8 + $0x40] sm:$0xff] %v1400_v2   ;;  %v1476_v7 = vadd.f32 %v1475_v5, %v1474_v3  ;;  %v1524_v8 = vadd.f32 %v1523_v6, %v1522_v4  ;;  %v1477_v9 = vpop.f32.mrb[6].mxu0  ;;  %v1525_v10 = vpop.f32.mrb[6].mxu1 }
 0x105   : > { %v1478_v11 = vpop.f32.mrb[7].mxu0  ;;  %v1526_v12 = vpop.f32.mrb[7].mxu1 }
 0x106   : > { %v1479_v13 = vadd.f32 %v1478_v11, %v1477_v9  ;;  %v1527_v14 = vadd.f32 %v1526_v12, %v1525_v10  ;;  %v925_v15 = vadd.f32 %v1476_v7, %v1821_v56  ;;  %v941_v16 = vadd.f32 %v1524_v8, %v1821_v56 }
 0x108   : > { %v926_v17 = vadd.f32 %v1479_v13, %v1821_v56  ;;  %v942_v18 = vadd.f32 %v1527_v14, %v1821_v56 }
 0x10a   : > { %v1365_v19 = vpack.c.bf16 %v926_v17, %v925_v15  ;;  %v1405_v20 = vpack.c.bf16 %v942_v18, %v941_v16  ;;  %v1480_v21 = vpop.f32.mrb[8].mxu0  ;;  %v1528_v22 = vpop.f32.mrb[8].mxu1 }
 0x10b   : > { %v1481_v23 = vpop.f32.mrb[9].mxu0  ;;  %v1529_v24 = vpop.f32.mrb[9].mxu1 }
 0x10c   : > { %1437 = vst [vmem:[%s1831_s8 + $0x8] sm:$0xff] %v1365_v19   ;;  %1445 = vst [vmem:[%s1831_s8 + $0x48] sm:$0xff] %v1405_v20   ;;  %v1482_v25 = vadd.f32 %v1481_v23, %v1480_v21  ;;  %v1530_v26 = vadd.f32 %v1529_v24, %v1528_v22  ;;  %v1483_v27 = vpop.f32.mrb[10].mxu0  ;;  %v1531_v28 = vpop.f32.mrb[10].mxu1 }
 0x10d   : > { %v1484_v29 = vpop.f32.mrb[11].mxu0  ;;  %v1532_v30 = vpop.f32.mrb[11].mxu1 }
 0x10e   : > { %v1485_v31 = vadd.f32 %v1484_v29, %v1483_v27  ;;  %v1533_v32 = vadd.f32 %v1532_v30, %v1531_v28  ;;  %v927_v33 = vadd.f32 %v1482_v25, %v1821_v56  ;;  %v943_v34 = vadd.f32 %v1530_v26, %v1821_v56 }
 0x110   : > { %v928_v35 = vadd.f32 %v1485_v31, %v1821_v56  ;;  %v944_v36 = vadd.f32 %v1533_v32, %v1821_v56 }
 0x112   : > { %v1370_v37 = vpack.c.bf16 %v928_v35, %v927_v33  ;;  %v1410_v38 = vpack.c.bf16 %v944_v36, %v943_v34  ;;  %v1486_v39 = vpop.f32.mrb[12].mxu0  ;;  %v1534_v40 = vpop.f32.mrb[12].mxu1 }
 0x113   : > { %v1487_v41 = vpop.f32.mrb[13].mxu0  ;;  %v1535_v42 = vpop.f32.mrb[13].mxu1 }
 0x114   : > { %1438 = vst [vmem:[%s1831_s8 + $0x10] sm:$0xff] %v1370_v37   ;;  %1446 = vst [vmem:[%s1831_s8 + $0x50] sm:$0xff] %v1410_v38   ;;  %v1488_v43 = vadd.f32 %v1487_v41, %v1486_v39  ;;  %v1536_v44 = vadd.f32 %v1535_v42, %v1534_v40  ;;  %v1489_v45 = vpop.f32.mrb[14].mxu0  ;;  %v1537_v46 = vpop.f32.mrb[14].mxu1 }
 0x115   : > { %v1490_v47 = vpop.f32.mrb[15].mxu0  ;;  %v1538_v48 = vpop.f32.mrb[15].mxu1 }
 0x116   : > { %v1491_v49 = vadd.f32 %v1490_v47, %v1489_v45  ;;  %v1539_v50 = vadd.f32 %v1538_v48, %v1537_v46  ;;  %v929_v51 = vadd.f32 %v1488_v43, %v1821_v56  ;;  %v945_v52 = vadd.f32 %v1536_v44, %v1821_v56 }
 0x118   : > { %v930_v53 = vadd.f32 %v1491_v49, %v1821_v56  ;;  %v946_v54 = vadd.f32 %v1539_v50, %v1821_v56 }
 0x11a   : > { %v1375_v55 = vpack.c.bf16 %v930_v53, %v929_v51  ;;  %v1415_v57 = vpack.c.bf16 %v946_v54, %v945_v52  ;;  %v1492_v58 = vpop.f32.mrb[16].mxu0  ;;  %v1540_v59 = vpop.f32.mrb[16].mxu1 }
 0x11b   : > { %v1493_v60 = vpop.f32.mrb[17].mxu0  ;;  %v1541_v61 = vpop.f32.mrb[17].mxu1 }
 0x11c   : > { %1439 = vst [vmem:[%s1831_s8 + $0x18] sm:$0xff] %v1375_v55   ;;  %1447 = vst [vmem:[%s1831_s8 + $0x58] sm:$0xff] %v1415_v57   ;;  %v1494_v62 = vadd.f32 %v1493_v60, %v1492_v58  ;;  %v1542_v63 = vadd.f32 %v1541_v61, %v1540_v59  ;;  %v1495_v0 = vpop.f32.mrb[18].mxu0  ;;  %v1543_v1 = vpop.f32.mrb[18].mxu1 }
 0x11d   : > { %v1496_v2 = vpop.f32.mrb[19].mxu0  ;;  %v1544_v3 = vpop.f32.mrb[19].mxu1 }
 0x11e   : > { %v1497_v4 = vadd.f32 %v1496_v2, %v1495_v0  ;;  %v1545_v5 = vadd.f32 %v1544_v3, %v1543_v1  ;;  %v931_v6 = vadd.f32 %v1494_v62, %v1821_v56  ;;  %v947_v7 = vadd.f32 %v1542_v63, %v1821_v56 }
 0x120   : > { %v932_v8 = vadd.f32 %v1497_v4, %v1821_v56  ;;  %v948_v9 = vadd.f32 %v1545_v5, %v1821_v56 }
 0x122   : > { %v1380_v10 = vpack.c.bf16 %v932_v8, %v931_v6  ;;  %v1420_v11 = vpack.c.bf16 %v948_v9, %v947_v7  ;;  %v1498_v12 = vpop.f32.mrb[20].mxu0  ;;  %v1546_v13 = vpop.f32.mrb[20].mxu1 }
 0x123   : > { %v1499_v14 = vpop.f32.mrb[21].mxu0  ;;  %v1547_v15 = vpop.f32.mrb[21].mxu1 }
 0x124   : > { %1440 = vst [vmem:[%s1831_s8 + $0x20] sm:$0xff] %v1380_v10   ;;  %1448 = vst [vmem:[%s1831_s8 + $0x60] sm:$0xff] %v1420_v11   ;;  %v1500_v16 = vadd.f32 %v1499_v14, %v1498_v12  ;;  %v1548_v17 = vadd.f32 %v1547_v15, %v1546_v13  ;;  %v1501_v18 = vpop.f32.mrb[22].mxu0  ;;  %v1549_v19 = vpop.f32.mrb[22].mxu1 }
 0x125   : > { %v1502_v20 = vpop.f32.mrb[23].mxu0  ;;  %v1550_v21 = vpop.f32.mrb[23].mxu1 }
 0x126   : > { %v1503_v22 = vadd.f32 %v1502_v20, %v1501_v18  ;;  %v1551_v23 = vadd.f32 %v1550_v21, %v1549_v19  ;;  %v933_v24 = vadd.f32 %v1500_v16, %v1821_v56  ;;  %v949_v25 = vadd.f32 %v1548_v17, %v1821_v56 }
 0x128   : > { %v934_v26 = vadd.f32 %v1503_v22, %v1821_v56  ;;  %v950_v27 = vadd.f32 %v1551_v23, %v1821_v56 }
 0x12a   : > { %v1385_v28 = vpack.c.bf16 %v934_v26, %v933_v24  ;;  %v1425_v29 = vpack.c.bf16 %v950_v27, %v949_v25  ;;  %v1504_v30 = vpop.f32.mrb[24].mxu0  ;;  %v1552_v31 = vpop.f32.mrb[24].mxu1 }
 0x12b   : > { %v1505_v32 = vpop.f32.mrb[25].mxu0  ;;  %v1553_v33 = vpop.f32.mrb[25].mxu1 }
 0x12c   : > { %1441 = vst [vmem:[%s1831_s8 + $0x28] sm:$0xff] %v1385_v28   ;;  %1449 = vst [vmem:[%s1831_s8 + $0x68] sm:$0xff] %v1425_v29   ;;  %v1506_v34 = vadd.f32 %v1505_v32, %v1504_v30  ;;  %v1554_v35 = vadd.f32 %v1553_v33, %v1552_v31  ;;  %v1507_v36 = vpop.f32.mrb[26].mxu0  ;;  %v1555_v37 = vpop.f32.mrb[26].mxu1 }
 0x12d   : > { %v1508_v38 = vpop.f32.mrb[27].mxu0  ;;  %v1556_v39 = vpop.f32.mrb[27].mxu1 }
 0x12e   : > { %v1509_v40 = vadd.f32 %v1508_v38, %v1507_v36  ;;  %v1557_v41 = vadd.f32 %v1556_v39, %v1555_v37  ;;  %v935_v42 = vadd.f32 %v1506_v34, %v1821_v56  ;;  %v951_v43 = vadd.f32 %v1554_v35, %v1821_v56 }
 0x130   : > { %v936_v44 = vadd.f32 %v1509_v40, %v1821_v56  ;;  %v952_v45 = vadd.f32 %v1557_v41, %v1821_v56 }
 0x132   : > { %v1390_v46 = vpack.c.bf16 %v936_v44, %v935_v42  ;;  %v1430_v47 = vpack.c.bf16 %v952_v45, %v951_v43  ;;  %v1510_v48 = vpop.f32.mrb[28].mxu0  ;;  %v1558_v49 = vpop.f32.mrb[28].mxu1 }
 0x133   : > { %v1511_v50 = vpop.f32.mrb[29].mxu0  ;;  %v1559_v51 = vpop.f32.mrb[29].mxu1 }
 0x134   : > { %1442 = vst [vmem:[%s1831_s8 + $0x30] sm:$0xff] %v1390_v46   ;;  %1450 = vst [vmem:[%s1831_s8 + $0x70] sm:$0xff] %v1430_v47   ;;  %v1512_v52 = vadd.f32 %v1511_v50, %v1510_v48  ;;  %v1560_v53 = vadd.f32 %v1559_v51, %v1558_v49  ;;  %v1513_v54 = vpop.f32.mrb[30].mxu0  ;;  %v1561_v55 = vpop.f32.mrb[30].mxu1 }
 0x135   : > { %v1514_v57 = vpop.f32.mrb[31].mxu0  ;;  %v1562_v58 = vpop.f32.mrb[31].mxu1 }
 0x136   : > { %v1515_v59 = vadd.f32 %v1514_v57, %v1513_v54  ;;  %v1563_v60 = vadd.f32 %v1562_v58, %v1561_v55  ;;  %v937_v61 = vadd.f32 %v1512_v52, %v1821_v56  ;;  %v953_v62 = vadd.f32 %v1560_v53, %v1821_v56 }
 0x138   : > { %v938_v63 = vadd.f32 %v1515_v59, %v1821_v56  ;;  %v954_v0 = vadd.f32 %v1563_v60, %v1821_v56 }
 0x13a   : > { %v1395_v1 = vpack.c.bf16 %v938_v63, %v937_v61  ;;  %v1435_v2 = vpack.c.bf16 %v954_v0, %v953_v62 }
 0x13c   : > { %1443 = vst [vmem:[%s1831_s8 + $0x38] sm:$0xff] %v1395_v1   ;;  %1451 = vst [vmem:[%s1831_s8 + $0x78] sm:$0xff] %v1435_v2  }
 0x13d PF: > { %s13_s14 = sadd.s32 1, %s1690_s14   ;;  %s1890_s12 = smov %s1686_s13 }
 0x13e   : > { %p10_p5 = scmp.ge.s32.totalorder %s13_s14, 4   ;;  %s1891_s13 = smov %s1893_s15 }
 0x140   :  { %12 = sbr.rel (!%p10_p5) target bundleno = 2 (0x2), region = 76 }

// kernel: generator_forward.30
= control target key start
LH: loop header
LB: loop body
LE: loop exit
PB: predicated region body
PF: predicated region fallthrough
CT: control target
= control target key end

     0   :  { %s911_s12 = smov 0   ;;  %s913_s13 = smov 0   ;;  %s1193_s0 = inlined_call_operand.vmem [shape: bf16[2,256,64], index: 0, kind: input, shape index: {}]   ;;  %s1194_s1 = inlined_call_operand.vmem [shape: f32[2,1,64], index: 1, kind: input, shape index: {}]   ;;  %s1195_s2 = inlined_call_operand.vmem [shape: f32[2,1,64], index: 2, kind: input, shape index: {}]   ;;  %s1196_s3 = inlined_call_operand.vmem [shape: bf16[2,256,64], index: 3, kind: output, shape index: {}]  }
   0x1   :  { %s915_s14 = smov 0  }
   0x2 LB: > { %s25_s15 = sadd.s32 1, %s885_s13  ;;  %p689_p0 = scmp.ge.s32.totalorder %s889_s14, 1  ;;  %s889_s14 = sphi %s915_s14, %s13_s14   ;;  %s885_s13 = sphi %s913_s13, %s1198_s13   ;;  %s881_s12 = sphi %s911_s12, %s1197_s12  }
   0x3   : > { %p27_p1 = scmp.ge.s32.totalorder %s25_s15, 2  ;;  %p174_p2 = scmp.lt.s32.totalorder %s889_s14, 3 }
   0x5   : > { %s1200_s15 = smov (%p27_p1, %s25_s15), 0  ;;  %p175_p3 = pnand %p689_p0, %p174_p2 }
   0x6   : > { %p213_p4 = scmp.lt.s32.totalorder (!%p175_p3), %s881_s12, 1  ;;  %v310_v0 = vlaneseq (!%p175_p3)  ;;  %vm547_vm0 = vcmask (!%p175_p3), 519168  }
   0x7   : > { %178 = sbr.rel (%p175_p3) target bundleno = 69 (0x45), region = 32 }
   0x8   : > { %v931_v1 = vshrl.u32 (!%p175_p3), %v310_v0, 7 }
   0xa   : > { %v312_v5 = vsub.s32 (!%p175_p3), 0, %v931_v1 }
   0xe   : > { %s1202_s12 = smov (!%p213_p4, %s881_s12), 1 }
   0xf   : > { %s728_s16 = sshll.u32 %s1202_s12, 7  ;;  %s224_s19 = scalar_lea.vmem %s1194_s1, %s1202_s12 }
  0x10   : > { %s943_s22 = scalar_lea.vmem %s1193_s0, %s728_s16  ;;  %s227_s25 = scalar_lea.vmem %s1195_s2, %s1202_s12  ;;  %v302_v2 = vld [vmem:[%s224_s19] sm:$0x1] }
  0x11   : > { %v303_v3 = vmul.f32 0.00390625, %v302_v2  ;;  %v304_v4 = vld [vmem:[%s227_s25] sm:$0x1]  ;;  %v826_v9 = vld [vmem:[%s943_s22 + $0x8] sm:$0xff]   ;;  %v827_v13 = vld [vmem:[%s943_s22 + $0x10] sm:$0xff]   ;;  %s1070_s28 = scalar_lea.vmem %s1196_s3, %s728_s16 }
  0x12   : > { %v763_v6 = vld [vmem:[%s943_s22] sm:$0xff]   ;;  %v305_v7 = vmul.f32 0.00390625, %v304_v4  ;;  %v828_v14 = vld [vmem:[%s943_s22 + $0x18] sm:$0xff]   ;;  %v768_v18 = vunpack.c.l.bf16 %v826_v9  ;;  %v830_v19 = vld [vmem:[%s943_s22 + $0x28] sm:$0xff]   ;;  %v769_v21 = vunpack.c.h.bf16 %v826_v9  ;;  %v772_v22 = vunpack.c.l.bf16 %v827_v13 }
  0x13   : > { %v306_v8 = vmul.f32 %v303_v3, %v303_v3  ;;  %v764_v10 = vunpack.c.l.bf16 %v763_v6  ;;  %v954_v12 = vrot.slane %v303_v3, %v312_v5  ;;  %v829_v15 = vld [vmem:[%s943_s22 + $0x20] sm:$0xff]   ;;  %v765_v17 = vunpack.c.h.bf16 %v763_v6  ;;  %v831_v20 = vld [vmem:[%s943_s22 + $0x30] sm:$0xff]   ;;  %v832_v25 = vld [vmem:[%s943_s22 + $0x38] sm:$0xff]  }
  0x14   : > { %v773_v23 = vunpack.c.h.bf16 %v827_v13  ;;  %v776_v24 = vunpack.c.l.bf16 %v828_v14  ;;  %v777_v28 = vunpack.c.h.bf16 %v828_v14  ;;  %v780_v29 = vunpack.c.l.bf16 %v829_v15  ;;  %v833_v37 = vld [vmem:[%s943_s22 + $0x40] sm:$0xff]   ;;  %v834_v46 = vld [vmem:[%s943_s22 + $0x48] sm:$0xff]   ;;  %v835_v47 = vld [vmem:[%s943_s22 + $0x50] sm:$0xff]  }
  0x15   : > { %v307_v11 = vsub.f32 %v305_v7, %v306_v8  ;;  %v963_v26 = vsub.f32 %v764_v10, %v954_v12  ;;  %v781_v30 = vunpack.c.h.bf16 %v829_v15  ;;  %v784_v31 = vunpack.c.l.bf16 %v830_v19  ;;  %v836_v52 = vld [vmem:[%s943_s22 + $0x58] sm:$0xff]   ;;  %v837_v53 = vld [vmem:[%s943_s22 + $0x60] sm:$0xff]   ;;  %v838_v58 = vld [vmem:[%s943_s22 + $0x68] sm:$0xff]  }
  0x16   : > { %v785_v32 = vunpack.c.h.bf16 %v830_v19  ;;  %v788_v33 = vunpack.c.l.bf16 %v831_v20  ;;  %v789_v34 = vunpack.c.h.bf16 %v831_v20  ;;  %v792_v35 = vunpack.c.l.bf16 %v832_v25  ;;  %v839_v63 = vld [vmem:[%s943_s22 + $0x70] sm:$0xff]   ;;  %v840_v0 = vld [vmem:[%s943_s22 + $0x78] sm:$0xff]  }
  0x17   : > { %v308_v16 = vmax.f32 %v307_v11, 0.0  ;;  %v793_v36 = vunpack.c.h.bf16 %v832_v25  ;;  %v316_v38 = vsub.f32 %v765_v17, %v954_v12  ;;  %v317_v39 = vsub.f32 %v768_v18, %v954_v12 }
  0x18   : > { %v318_v40 = vsub.f32 %v769_v21, %v954_v12  ;;  %v319_v41 = vsub.f32 %v772_v22, %v954_v12  ;;  %v320_v42 = vsub.f32 %v773_v23, %v954_v12  ;;  %v321_v43 = vsub.f32 %v776_v24, %v954_v12 }
  0x19   : > { %v347_v27 = vadd.f32 1e-05, %v308_v16  ;;  %v322_v44 = vsub.f32 %v777_v28, %v954_v12  ;;  %v974_v45 = vsub.f32 %v780_v29, %v954_v12  ;;  %v979_v48 = vsub.f32 %v781_v30, %v954_v12 }
  0x1a   : > { %v982_v49 = vsub.f32 %v784_v31, %v954_v12  ;;  %v985_v50 = vsub.f32 %v785_v32, %v954_v12  ;;  %v796_v51 = vunpack.c.l.bf16 %v833_v37  ;;  %v990_v54 = vsub.f32 %v788_v33, %v954_v12 }
  0x1b   : > { %865 = vrsqrt.f32 %v347_v27  ;;  %v993_v55 = vsub.f32 %v789_v34, %v954_v12  ;;  %v996_v56 = vsub.f32 %v792_v35, %v954_v12  ;;  %v999_v57 = vsub.f32 %v793_v36, %v954_v12 }
  0x1c   : > { %v797_v59 = vunpack.c.h.bf16 %v833_v37  ;;  %v800_v60 = vunpack.c.l.bf16 %v834_v46  ;;  %v801_v61 = vunpack.c.h.bf16 %v834_v46  ;;  %v804_v62 = vunpack.c.l.bf16 %v835_v47 }
  0x1d   : > { %v805_v2 = vunpack.c.h.bf16 %v835_v47  ;;  %v808_v3 = vunpack.c.l.bf16 %v836_v52  ;;  %v809_v4 = vunpack.c.h.bf16 %v836_v52  ;;  %v812_v6 = vunpack.c.l.bf16 %v837_v53 }
  0x1e   : > { %v1005_v7 = vsub.f32 %v796_v51, %v954_v12  ;;  %v813_v8 = vunpack.c.h.bf16 %v837_v53  ;;  %v816_v9 = vunpack.c.l.bf16 %v838_v58  ;;  %v817_v10 = vunpack.c.h.bf16 %v838_v58 }
  0x1f   : > { %v820_v11 = vunpack.c.l.bf16 %v839_v63  ;;  %v821_v13 = vunpack.c.h.bf16 %v839_v63  ;;  %v824_v14 = vunpack.c.l.bf16 %v840_v0  ;;  %v825_v15 = vunpack.c.h.bf16 %v840_v0 }
  0x20   : > { %v1008_v16 = vsub.f32 %v797_v59, %v954_v12  ;;  %v1011_v17 = vsub.f32 %v800_v60, %v954_v12  ;;  %v1014_v18 = vsub.f32 %v801_v61, %v954_v12  ;;  %v1017_v19 = vsub.f32 %v804_v62, %v954_v12 }
  0x21   : > { %v1020_v21 = vsub.f32 %v805_v2, %v954_v12  ;;  %v1023_v22 = vsub.f32 %v808_v3, %v954_v12  ;;  %v1026_v23 = vsub.f32 %v809_v4, %v954_v12  ;;  %v1029_v24 = vsub.f32 %v812_v6, %v954_v12 }
  0x22   : > { %v1036_v27 = vsub.f32 %v813_v8, %v954_v12  ;;  %v1039_v28 = vsub.f32 %v816_v9, %v954_v12  ;;  %v1042_v29 = vsub.f32 %v817_v10, %v954_v12  ;;  %v1045_v30 = vsub.f32 %v820_v11, %v954_v12 }
  0x23   : > { %v1048_v31 = vsub.f32 %v821_v13, %v954_v12  ;;  %v1051_v1 = vsub.f32 %v824_v14, %v954_v12 }
  0x25   : > { %v866_v20 = vpop.eup %865 }
  0x26   : > { %v1033_v25 = vrot.slane %v866_v20, %v312_v5  ;;  %v1054_v5 = vsub.f32 %v825_v15, %v954_v12 }
  0x28   : > { %v355_v32 = vmul.f32 %v1033_v25, %v963_v26  ;;  %v356_v33 = vmul.f32 %v1033_v25, %v316_v38  ;;  %v357_v34 = vmul.f32 %v1033_v25, %v317_v39  ;;  %v358_v35 = vmul.f32 %v1033_v25, %v318_v40 }
  0x29   : > { %v359_v36 = vmul.f32 %v1033_v25, %v319_v41  ;;  %v360_v37 = vmul.f32 %v1033_v25, %v320_v42  ;;  %v361_v46 = vmul.f32 %v1033_v25, %v321_v43  ;;  %v362_v47 = vmul.f32 %v1033_v25, %v322_v44 }
  0x2a   : > { %v387_v51 = vmax.f32 %v355_v32, 0.0  ;;  %v388_v12 = vmax.f32 %v356_v33, 0.0  ;;  %v389_v52 = vmax.f32 %v357_v34, 0.0  ;;  %v390_v53 = vmax.f32 %v358_v35, 0.0 }
  0x2b   : > { %v391_v26 = vmax.f32 %v359_v36, 0.0  ;;  %v392_v38 = vmax.f32 %v360_v37, 0.0  ;;  %v393_v39 = vmax.f32 %v361_v46, 0.0  ;;  %v394_v40 = vmax.f32 %v362_v47, 0.0 }
  0x2c   : > { %v730_v41 = vpack.c.bf16 %v387_v51, %v387_v51  ;;  %v731_v42 = vpack.c.bf16 %v388_v12, %v388_v12  ;;  %v732_v43 = vpack.c.bf16 %v389_v52, %v389_v52  ;;  %v733_v44 = vpack.c.bf16 %v390_v53, %v390_v53 }
  0x2d   : > { %v734_v58 = vpack.c.bf16 %v391_v26, %v391_v26  ;;  %v735_v59 = vpack.c.bf16 %v392_v38, %v392_v38  ;;  %v736_v60 = vpack.c.bf16 %v393_v39, %v393_v39  ;;  %v737_v61 = vpack.c.bf16 %v394_v40, %v394_v40 }
  0x2e   : > { %548 = vst.msk [vmem:[%s1070_s28] sm:$0xf] %vm547_vm0, %v730_v41  ;;  %549 = vst.msk [vmem:[%s1070_s28 + $0x4] sm:$0xf] %vm547_vm0, %v731_v42  ;;  %v363_v62 = vmul.f32 %v1033_v25, %v974_v45  ;;  %v364_v63 = vmul.f32 %v1033_v25, %v979_v48  ;;  %v365_v0 = vmul.f32 %v1033_v25, %v982_v49 }
  0x2f   : > { %550 = vst.msk [vmem:[%s1070_s28 + $0x8] sm:$0xf] %vm547_vm0, %v732_v43  ;;  %551 = vst.msk [vmem:[%s1070_s28 + $0xc] sm:$0xf] %vm547_vm0, %v733_v44  ;;  %v366_v2 = vmul.f32 %v1033_v25, %v985_v50  ;;  %v367_v45 = vmul.f32 %v1033_v25, %v990_v54  ;;  %v368_v48 = vmul.f32 %v1033_v25, %v993_v55 }
  0x30   : > { %552 = vst.msk [vmem:[%s1070_s28 + $0x10] sm:$0xf] %vm547_vm0, %v734_v58  ;;  %553 = vst.msk [vmem:[%s1070_s28 + $0x14] sm:$0xf] %vm547_vm0, %v735_v59  ;;  %v369_v49 = vmul.f32 %v1033_v25, %v996_v56  ;;  %v370_v50 = vmul.f32 %v1033_v25, %v999_v57  ;;  %v395_v3 = vmax.f32 %v363_v62, 0.0  ;;  %v396_v4 = vmax.f32 %v364_v63, 0.0 }
  0x31   : > { %554 = vst.msk [vmem:[%s1070_s28 + $0x18] sm:$0xf] %vm547_vm0, %v736_v60  ;;  %555 = vst.msk [vmem:[%s1070_s28 + $0x1c] sm:$0xf] %vm547_vm0, %v737_v61  ;;  %v397_v6 = vmax.f32 %v365_v0, 0.0  ;;  %v398_v8 = vmax.f32 %v366_v2, 0.0  ;;  %v371_v33 = vmul.f32 %v1033_v25, %v1005_v7  ;;  %v372_v34 = vmul.f32 %v1033_v25, %v1008_v16 }
  0x32   : > { %v399_v9 = vmax.f32 %v367_v45, 0.0  ;;  %v400_v10 = vmax.f32 %v368_v48, 0.0  ;;  %v401_v54 = vmax.f32 %v369_v49, 0.0  ;;  %v402_v11 = vmax.f32 %v370_v50, 0.0 }
  0x33   : > { %v738_v13 = vpack.c.bf16 %v395_v3, %v395_v3  ;;  %v739_v55 = vpack.c.bf16 %v396_v4, %v396_v4  ;;  %v740_v56 = vpack.c.bf16 %v397_v6, %v397_v6  ;;  %v741_v14 = vpack.c.bf16 %v398_v8, %v398_v8 }
  0x34   : > { %v742_v57 = vpack.c.bf16 %v399_v9, %v399_v9  ;;  %v743_v15 = vpack.c.bf16 %v400_v10, %v400_v10  ;;  %v744_v20 = vpack.c.bf16 %v401_v54, %v401_v54  ;;  %v745_v32 = vpack.c.bf16 %v402_v11, %v402_v11 }
  0x35   : > { %556 = vst.msk [vmem:[%s1070_s28 + $0x20] sm:$0xf] %vm547_vm0, %v738_v13  ;;  %557 = vst.msk [vmem:[%s1070_s28 + $0x24] sm:$0xf] %vm547_vm0, %v739_v55  ;;  %v373_v35 = vmul.f32 %v1033_v25, %v1011_v17  ;;  %v374_v36 = vmul.f32 %v1033_v25, %v1014_v18  ;;  %v375_v7 = vmul.f32 %v1033_v25, %v1017_v19  ;;  %v403_v37 = vmax.f32 %v371_v33, 0.0 }
  0x36   : > { %558 = vst.msk [vmem:[%s1070_s28 + $0x28] sm:$0xf] %vm547_vm0, %v740_v56  ;;  %559 = vst.msk [vmem:[%s1070_s28 + $0x2c] sm:$0xf] %vm547_vm0, %v741_v14  ;;  %v376_v16 = vmul.f32 %v1033_v25, %v1020_v21  ;;  %v377_v17 = vmul.f32 %v1033_v25, %v1023_v22  ;;  %v378_v18 = vmul.f32 %v1033_v25, %v1026_v23  ;;  %v404_v46 = vmax.f32 %v372_v34, 0.0 }
  0x37   : > { %560 = vst.msk [vmem:[%s1070_s28 + $0x30] sm:$0xf] %vm547_vm0, %v742_v57  ;;  %561 = vst.msk [vmem:[%s1070_s28 + $0x34] sm:$0xf] %vm547_vm0, %v743_v15  ;;  %v405_v47 = vmax.f32 %v373_v35, 0.0  ;;  %v406_v51 = vmax.f32 %v374_v36, 0.0  ;;  %v746_v26 = vpack.c.bf16 %v403_v37, %v403_v37  ;;  %v379_v42 = vmul.f32 %v1033_v25, %v1029_v24 }
  0x38   : > { %562 = vst.msk [vmem:[%s1070_s28 + $0x38] sm:$0xf] %vm547_vm0, %v744_v20  ;;  %563 = vst.msk [vmem:[%s1070_s28 + $0x3c] sm:$0xf] %vm547_vm0, %v745_v32  ;;  %v407_v12 = vmax.f32 %v375_v7, 0.0  ;;  %v408_v52 = vmax.f32 %v376_v16, 0.0  ;;  %v747_v21 = vpack.c.bf16 %v404_v46, %v404_v46  ;;  %v380_v43 = vmul.f32 %v1033_v25, %v1036_v27 }
  0x39   : > { %v409_v19 = vmax.f32 %v377_v17, 0.0  ;;  %v410_v53 = vmax.f32 %v378_v18, 0.0  ;;  %v748_v22 = vpack.c.bf16 %v405_v47, %v405_v47  ;;  %v749_v38 = vpack.c.bf16 %v406_v51, %v406_v51  ;;  %564 = vst.msk [vmem:[%s1070_s28 + $0x40] sm:$0xf] %vm547_vm0, %v746_v26 }
  0x3a   : > { %v750_v23 = vpack.c.bf16 %v407_v12, %v407_v12  ;;  %v751_v39 = vpack.c.bf16 %v408_v52, %v408_v52  ;;  %565 = vst.msk [vmem:[%s1070_s28 + $0x44] sm:$0xf] %vm547_vm0, %v747_v21  ;;  %v381_v44 = vmul.f32 %v1033_v25, %v1039_v28  ;;  %v382_v58 = vmul.f32 %v1033_v25, %v1042_v29 }
  0x3b   : > { %v752_v40 = vpack.c.bf16 %v409_v19, %v409_v19  ;;  %v753_v41 = vpack.c.bf16 %v410_v53, %v410_v53  ;;  %566 = vst.msk [vmem:[%s1070_s28 + $0x48] sm:$0xf] %vm547_vm0, %v748_v22  ;;  %567 = vst.msk [vmem:[%s1070_s28 + $0x4c] sm:$0xf] %vm547_vm0, %v749_v38  ;;  %v383_v24 = vmul.f32 %v1033_v25, %v1045_v30  ;;  %v411_v59 = vmax.f32 %v379_v42, 0.0 }
  0x3c   : > { %568 = vst.msk [vmem:[%s1070_s28 + $0x50] sm:$0xf] %vm547_vm0, %v750_v23  ;;  %569 = vst.msk [vmem:[%s1070_s28 + $0x54] sm:$0xf] %vm547_vm0, %v751_v39  ;;  %v384_v27 = vmul.f32 %v1033_v25, %v1048_v31  ;;  %v385_v28 = vmul.f32 %v1033_v25, %v1051_v1  ;;  %v386_v29 = vmul.f32 %v1033_v25, %v1054_v5  ;;  %v412_v60 = vmax.f32 %v380_v43, 0.0 }
  0x3d   : > { %570 = vst.msk [vmem:[%s1070_s28 + $0x58] sm:$0xf] %vm547_vm0, %v752_v40  ;;  %571 = vst.msk [vmem:[%s1070_s28 + $0x5c] sm:$0xf] %vm547_vm0, %v753_v41  ;;  %v413_v61 = vmax.f32 %v381_v44, 0.0  ;;  %v414_v62 = vmax.f32 %v382_v58, 0.0  ;;  %v754_v1 = vpack.c.bf16 %v411_v59, %v411_v59 }
  0x3e   : > { %v415_v63 = vmax.f32 %v383_v24, 0.0  ;;  %v416_v30 = vmax.f32 %v384_v27, 0.0  ;;  %v417_v0 = vmax.f32 %v385_v28, 0.0  ;;  %v418_v31 = vmax.f32 %v386_v29, 0.0 }
  0x3f   : > { %v755_v2 = vpack.c.bf16 %v412_v60, %v412_v60  ;;  %v756_v45 = vpack.c.bf16 %v413_v61, %v413_v61  ;;  %v757_v25 = vpack.c.bf16 %v414_v62, %v414_v62  ;;  %572 = vst.msk [vmem:[%s1070_s28 + $0x60] sm:$0xf] %vm547_vm0, %v754_v1 }
  0x40   : > { %v758_v5 = vpack.c.bf16 %v415_v63, %v415_v63  ;;  %v759_v48 = vpack.c.bf16 %v416_v30, %v416_v30  ;;  %v760_v49 = vpack.c.bf16 %v417_v0, %v417_v0  ;;  %v761_v50 = vpack.c.bf16 %v418_v31, %v418_v31 }
  0x41   : > { %573 = vst.msk [vmem:[%s1070_s28 + $0x64] sm:$0xf] %vm547_vm0, %v755_v2  ;;  %574 = vst.msk [vmem:[%s1070_s28 + $0x68] sm:$0xf] %vm547_vm0, %v756_v45 }
  0x42   : > { %575 = vst.msk [vmem:[%s1070_s28 + $0x6c] sm:$0xf] %vm547_vm0, %v757_v25  ;;  %576 = vst.msk [vmem:[%s1070_s28 + $0x70] sm:$0xf] %vm547_vm0, %v758_v5 }
  0x43   : > { %577 = vst.msk [vmem:[%s1070_s28 + $0x74] sm:$0xf] %vm547_vm0, %v759_v48  ;;  %578 = vst.msk [vmem:[%s1070_s28 + $0x78] sm:$0xf] %vm547_vm0, %v760_v49 }
  0x44   : > { %579 = vst.msk [vmem:[%s1070_s28 + $0x7c] sm:$0xf] %vm547_vm0, %v761_v50 }
  0x45 PF: > { %s13_s14 = sadd.s32 1, %s889_s14   ;;  %s1197_s12 = smov %s885_s13 }
  0x46   : > { %p10_p5 = scmp.ge.s32.totalorder %s13_s14, 4   ;;  %s1198_s13 = smov %s1200_s15 }
  0x48   :  { %12 = sbr.rel (!%p10_p5) target bundleno = 2 (0x2), region = 68 }

// kernel: generator_forward.31
= control target key start
LH: loop header
LB: loop body
LE: loop exit
PB: predicated region body
PF: predicated region fallthrough
CT: control target
= control target key end

     0   :  { %s1838_s1 = inlined_call_operand.vmem [shape: bf16[640,128], index: 1, kind: input, shape index: {}]   ;;  %s1839_s0 = inlined_call_operand.vmem [shape: bf16[128,640], index: 0, kind: input, shape index: {}]   ;;  %s1840_s2 = inlined_call_operand.vmem [shape: f32[1,128], index: 2, kind: input, shape index: {}]   ;;  %s1841_s3 = inlined_call_operand.vmem [shape: bf16[128,128], index: 3, kind: output, shape index: {}]  }
   0x1   :  { %v1428_v0 = vld [vmem:[%s1838_s1 + $0x40] sm:$0xff]   ;;  %v1432_v4 = vld [vmem:[%s1838_s1 + $0x48] sm:$0xff]   ;;  %v1436_v8 = vld [vmem:[%s1838_s1 + $0x50] sm:$0xff]  }
   0x2   :  { %v1429_v1 = vld [vmem:[%s1838_s1 + $0xc0] sm:$0xff]   ;;  %1236 = vmatprep.subr.bf16.mxu0 %v1428_v0  ;;  %v1433_v5 = vld [vmem:[%s1838_s1 + $0xc8] sm:$0xff]   ;;  %v1437_v9 = vld [vmem:[%s1838_s1 + $0xd0] sm:$0xff]  }
   0x3   :  { %v1430_v2 = vld [vmem:[%s1838_s1] sm:$0xff]   ;;  %1300 = vmatprep.subr.bf16.mxu1 %v1429_v1  ;;  %v1434_v6 = vld [vmem:[%s1838_s1 + $0x8] sm:$0xff]   ;;  %v1438_v10 = vld [vmem:[%s1838_s1 + $0x10] sm:$0xff]  }
   0x4   :  { %v1431_v3 = vld [vmem:[%s1838_s1 + $0x80] sm:$0xff]   ;;  %1237 = vmatpush3.bf16.msra.mxu0 %v1430_v2  ;;  %v1435_v7 = vld [vmem:[%s1838_s1 + $0x88] sm:$0xff]   ;;  %v1439_v11 = vld [vmem:[%s1838_s1 + $0x90] sm:$0xff]  }
   0x5   :  { %1301 = vmatpush3.bf16.msra.mxu1 %v1431_v3  ;;  %1238 = vmatprep.subr.bf16.mxu0 %v1432_v4  ;;  %v1440_v12 = vld [vmem:[%s1838_s1 + $0x58] sm:$0xff]   ;;  %v1444_v16 = vld [vmem:[%s1838_s1 + $0x60] sm:$0xff]   ;;  %v1448_v20 = vld [vmem:[%s1838_s1 + $0x68] sm:$0xff]  }
   0x6   :  { %1302 = vmatprep.subr.bf16.mxu1 %v1433_v5  ;;  %v1441_v13 = vld [vmem:[%s1838_s1 + $0xd8] sm:$0xff]   ;;  %v1445_v17 = vld [vmem:[%s1838_s1 + $0xe0] sm:$0xff]   ;;  %v1449_v21 = vld [vmem:[%s1838_s1 + $0xe8] sm:$0xff]  }
   0x7   :  { %v1442_v14 = vld [vmem:[%s1838_s1 + $0x18] sm:$0xff]   ;;  %v1446_v18 = vld [vmem:[%s1838_s1 + $0x20] sm:$0xff]   ;;  %v1450_v22 = vld [vmem:[%s1838_s1 + $0x28] sm:$0xff]  }
   0x8   :  { %1239 = vmatpush3.bf16.msra.mxu0 %v1434_v6  ;;  %v1443_v15 = vld [vmem:[%s1838_s1 + $0x98] sm:$0xff]   ;;  %v1447_v19 = vld [vmem:[%s1838_s1 + $0xa0] sm:$0xff]   ;;  %v1451_v23 = vld [vmem:[%s1838_s1 + $0xa8] sm:$0xff]  }
   0x9   :  { %1303 = vmatpush3.bf16.msra.mxu1 %v1435_v7  ;;  %1240 = vmatprep.subr.bf16.mxu0 %v1436_v8  ;;  %v1452_v24 = vld [vmem:[%s1838_s1 + $0x70] sm:$0xff]   ;;  %v1456_v28 = vld [vmem:[%s1838_s1 + $0x78] sm:$0xff]   ;;  %v1465_v35 = vld [vmem:[%s1839_s0 + $0xc] ss:$20 sps:$4 sm:$0xff]  }
   0xa   :  { %1304 = vmatprep.subr.bf16.mxu1 %v1437_v9  ;;  %v1453_v25 = vld [vmem:[%s1838_s1 + $0xf0] sm:$0xff]   ;;  %v1457_v29 = vld [vmem:[%s1838_s1 + $0xf8] sm:$0xff]   ;;  %v1466_v36 = vld [vmem:[%s1838_s1 + $0x100] sm:$0xff]   ;;  %756 = vmatprep.mubr.bf16.mxu1 %v1465_v35 }
   0xb   :  { %v1454_v26 = vld [vmem:[%s1838_s1 + $0x30] sm:$0xff]   ;;  %v1458_v30 = vld [vmem:[%s1838_s1 + $0x38] sm:$0xff]   ;;  %v1467_v37 = vld [vmem:[%s1839_s0 + $0x2c] ss:$20 sps:$4 sm:$0xff]  }
   0xc   :  { %1241 = vmatpush3.bf16.msra.mxu0 %v1438_v10  ;;  %v1455_v27 = vld [vmem:[%s1838_s1 + $0xb0] sm:$0xff]   ;;  %v1459_v31 = vld [vmem:[%s1838_s1 + $0xb8] sm:$0xff]   ;;  %v1473_v39 = vld [vmem:[%s1838_s1 + $0x108] sm:$0xff]  }
   0xd   :  { %1305 = vmatpush3.bf16.msra.mxu1 %v1439_v11  ;;  %1242 = vmatprep.subr.bf16.mxu0 %v1440_v12  ;;  %v1460_v32 = vld [vmem:[%s1839_s0] ss:$20 sps:$4 sm:$0xff]   ;;  %v1462_v33 = vld [vmem:[%s1839_s0 + $0x4] ss:$20 sps:$4 sm:$0xff]   ;;  %v1463_v34 = vld [vmem:[%s1839_s0 + $0x8] ss:$20 sps:$4 sm:$0xff]  }
   0xe   :  { %1306 = vmatprep.subr.bf16.mxu1 %v1441_v13  ;;  %659 = vmatprep.mubr.bf16.mxu0 %v1462_v33  ;;  %v1469_v38 = vld [vmem:[%s1839_s0 + $0x34] ss:$20 sps:$4 sm:$0xff]   ;;  %v1472_v41 = vld [vmem:[%s1839_s0 + $0x30] ss:$20 sps:$4 sm:$0xff]   ;;  %v1487_v45 = vld [vmem:[%s1838_s1 + $0x118] sm:$0xff]  }
   0xf   :  { %v1471_v40 = vld [vmem:[%s1839_s0 + $0x28] ss:$20 sps:$4 sm:$0xff]   ;;  %v1480_v44 = vld [vmem:[%s1838_s1 + $0x110] sm:$0xff]   ;;  %v1479_v47 = vld [vmem:[%s1839_s0 + $0x58] ss:$20 sps:$4 sm:$0xff]  }
  0x10   :  { %1243 = vmatpush3.bf16.msra.mxu0 %v1442_v14  ;;  %v1474_v42 = vld [vmem:[%s1839_s0 + $0x54] ss:$20 sps:$4 sm:$0xff]   ;;  %v1476_v43 = vld [vmem:[%s1839_s0 + $0x5c] ss:$20 sps:$4 sm:$0xff]   ;;  %v1483_v49 = vld [vmem:[%s1839_s0 + $0x84] ss:$20 sps:$4 sm:$0xff]  }
  0x11   :  { %1307 = vmatpush3.bf16.msra.mxu1 %v1443_v15  ;;  %1244 = vmatprep.subr.bf16.mxu0 %v1444_v16  ;;  %v1478_v46 = vld [vmem:[%s1839_s0 + $0x50] ss:$20 sps:$4 sm:$0xff]   ;;  %v1501_v51 = vld [vmem:[%s1838_s1 + $0x128] sm:$0xff]   ;;  %v1486_v53 = vld [vmem:[%s1839_s0 + $0x80] ss:$20 sps:$4 sm:$0xff]  }
  0x12   :  { %1308 = vmatprep.subr.bf16.mxu1 %v1445_v17  ;;  %v1481_v48 = vld [vmem:[%s1839_s0 + $0x7c] ss:$20 sps:$4 sm:$0xff]   ;;  %v1494_v50 = vld [vmem:[%s1838_s1 + $0x120] sm:$0xff]   ;;  %v1485_v52 = vld [vmem:[%s1839_s0 + $0x78] ss:$20 sps:$4 sm:$0xff]  }
  0x13   :  { %v1488_v54 = vld [vmem:[%s1839_s0 + $0xa4] ss:$20 sps:$4 sm:$0xff]   ;;  %v1508_v55 = vld [vmem:[%s1838_s1 + $0x130] sm:$0xff]   ;;  %v1490_v56 = vld [vmem:[%s1839_s0 + $0xac] ss:$20 sps:$4 sm:$0xff]  }
  0x14   :  { %1245 = vmatpush3.bf16.msra.mxu0 %v1446_v18  ;;  %v1515_v57 = vld [vmem:[%s1838_s1 + $0x138] sm:$0xff]   ;;  %v1492_v58 = vld [vmem:[%s1839_s0 + $0xa0] ss:$20 sps:$4 sm:$0xff]   ;;  %v1500_v63 = vld [vmem:[%s1839_s0 + $0xd0] ss:$20 sps:$4 sm:$0xff]  }
  0x15   :  { %1309 = vmatpush3.bf16.msra.mxu1 %v1447_v19  ;;  %1246 = vmatprep.subr.bf16.mxu0 %v1448_v20  ;;  %v1493_v59 = vld [vmem:[%s1839_s0 + $0xa8] ss:$20 sps:$4 sm:$0xff]   ;;  %v1495_v60 = vld [vmem:[%s1839_s0 + $0xcc] ss:$20 sps:$4 sm:$0xff]   ;;  %v1506_v2 = vld [vmem:[%s1839_s0 + $0xf0] ss:$20 sps:$4 sm:$0xff]  }
  0x16   :  { %1310 = vmatprep.subr.bf16.mxu1 %v1449_v21  ;;  %v1497_v61 = vld [vmem:[%s1839_s0 + $0xd4] ss:$20 sps:$4 sm:$0xff]   ;;  %v1504_v1 = vld [vmem:[%s1839_s0 + $0xfc] ss:$20 sps:$4 sm:$0xff]   ;;  %v1507_v3 = vld [vmem:[%s1839_s0 + $0xf8] ss:$20 sps:$4 sm:$0xff]  }
  0x17   :  { %v1499_v62 = vld [vmem:[%s1839_s0 + $0xc8] ss:$20 sps:$4 sm:$0xff]   ;;  %v1511_v5 = vld [vmem:[%s1839_s0 + $0x124] ss:$20 sps:$4 sm:$0xff]   ;;  %v1514_v7 = vld [vmem:[%s1839_s0 + $0x120] ss:$20 sps:$4 sm:$0xff]  }
  0x18   :  { %1247 = vmatpush3.bf16.msra.mxu0 %v1450_v22  ;;  %v1502_v0 = vld [vmem:[%s1839_s0 + $0xf4] ss:$20 sps:$4 sm:$0xff]   ;;  %v1509_v4 = vld [vmem:[%s1839_s0 + $0x11c] ss:$20 sps:$4 sm:$0xff]   ;;  %v1513_v6 = vld [vmem:[%s1839_s0 + $0x118] ss:$20 sps:$4 sm:$0xff]  }
  0x19   :  { %1311 = vmatpush3.bf16.msra.mxu1 %v1451_v23  ;;  %1248 = vmatprep.subr.bf16.mxu0 %v1452_v24  ;;  %v1516_v8 = vld [vmem:[%s1839_s0 + $0x10] ss:$20 sps:$4 sm:$0xff]   ;;  %v1518_v10 = vld [vmem:[%s1839_s0 + $0x38] ss:$20 sps:$4 sm:$0xff]   ;;  %v1520_v12 = vld [vmem:[%s1839_s0 + $0x60] ss:$20 sps:$4 sm:$0xff]  }
  0x1a   :  { %1312 = vmatprep.subr.bf16.mxu1 %v1453_v25  ;;  %v1517_v9 = vld [vmem:[%s1839_s0 + $0xb0] ss:$20 sps:$4 sm:$0xff]   ;;  %v1519_v11 = vld [vmem:[%s1839_s0 + $0xd8] ss:$20 sps:$4 sm:$0xff]   ;;  %v1521_v13 = vld [vmem:[%s1839_s0 + $0x100] ss:$20 sps:$4 sm:$0xff]  }
  0x1b   :  { %v1522_v14 = vld [vmem:[%s1839_s0 + $0x88] ss:$20 sps:$4 sm:$0xff]  }
  0x1c   :  { %1249 = vmatpush3.bf16.msra.mxu0 %v1454_v26  ;;  %v1523_v15 = vld [vmem:[%s1839_s0 + $0x128] ss:$20 sps:$4 sm:$0xff]  }
  0x1d   :  { %1313 = vmatpush3.bf16.msra.mxu1 %v1455_v27  ;;  %1250 = vmatprep.subr.bf16.mxu0 %v1456_v28 }
  0x1e   :  { %1314 = vmatprep.subr.bf16.mxu1 %v1457_v29 }
  0x20   :  { %1251 = vmatpush3.bf16.msra.mxu0 %v1458_v30 }
  0x21   :  { %1315 = vmatpush3.bf16.msra.mxu1 %v1459_v31  ;;  %1380 = vmatprep.subr.bf16.mxu0 %v1466_v36 }
  0x22   :  { %1412 = vmatprep.subr.bf16.mxu1 %v1466_v36 }
  0x23   :  { %660 = vmatmul.mubr.bf16.vlgmr.msra.gmra.mrb[0].mxu0 %v1460_v32 }
  0x24   :  { %757 = vmatmul.mubr.bf16.vlgmr.msra.gmra.mrb[0].mxu1 %v1463_v34  ;;  %1381 = vmatpush3.bf16.msra.mxu0 %v1466_v36 }
  0x25   :  { %1420 = vmatpush3.bf16.msra.mxu1 %v1466_v36  ;;  %667 = vmatprep.mubr.bf16.mxu0 %v1467_v37 }
  0x26   :  { %764 = vmatprep.mubr.bf16.mxu1 %v1469_v38  ;;  %1382 = vmatprep.subr.bf16.mxu0 %v1473_v39 }
  0x27   :  { %1413 = vmatprep.subr.bf16.mxu1 %v1473_v39 }
  0x28   :  { %1383 = vmatpush3.bf16.msra.mxu0 %v1473_v39 }
  0x29   :  { %1421 = vmatpush3.bf16.msra.mxu1 %v1473_v39  ;;  %1384 = vmatprep.subr.bf16.mxu0 %v1480_v44 }
  0x2a   :  { %1414 = vmatprep.subr.bf16.mxu1 %v1480_v44 }
  0x2b   :  { %668 = vmatmul.mubr.bf16.gmra.mrb[4].mxu0 %v1471_v40 }
  0x2c   :  { %765 = vmatmul.mubr.bf16.gmra.mrb[4].mxu1 %v1472_v41  ;;  %675 = vmatprep.mubr.bf16.mxu0 %v1474_v42 }
  0x2d   :  { %772 = vmatprep.mubr.bf16.mxu1 %v1476_v43  ;;  %1385 = vmatpush3.bf16.msra.mxu0 %v1480_v44 }
  0x2e   :  { %1422 = vmatpush3.bf16.msra.mxu1 %v1480_v44  ;;  %1386 = vmatprep.subr.bf16.mxu0 %v1487_v45 }
  0x2f   :  { %1415 = vmatprep.subr.bf16.mxu1 %v1487_v45 }
  0x31   :  { %1387 = vmatpush3.bf16.msra.mxu0 %v1487_v45 }
  0x32   :  { %1423 = vmatpush3.bf16.msra.mxu1 %v1487_v45  ;;  %1388 = vmatprep.subr.bf16.mxu0 %v1494_v50 }
  0x33   :  { %676 = vmatmul.mubr.bf16.gmra.mrb[8].mxu0 %v1478_v46  ;;  %1416 = vmatprep.subr.bf16.mxu1 %v1494_v50 }
  0x34   :  { %773 = vmatmul.mubr.bf16.gmra.mrb[8].mxu1 %v1479_v47  ;;  %683 = vmatprep.mubr.bf16.mxu0 %v1481_v48 }
  0x35   :  { %780 = vmatprep.mubr.bf16.mxu1 %v1483_v49  ;;  %1389 = vmatpush3.bf16.msra.mxu0 %v1494_v50 }
  0x36   :  { %1424 = vmatpush3.bf16.msra.mxu1 %v1494_v50  ;;  %1390 = vmatprep.subr.bf16.mxu0 %v1501_v51 }
  0x37   :  { %1417 = vmatprep.subr.bf16.mxu1 %v1501_v51 }
  0x39   :  { %1391 = vmatpush3.bf16.msra.mxu0 %v1501_v51 }
  0x3a   :  { %1425 = vmatpush3.bf16.msra.mxu1 %v1501_v51  ;;  %1392 = vmatprep.subr.bf16.mxu0 %v1508_v55 }
  0x3b   :  { %684 = vmatmul.mubr.bf16.gmra.mrb[12].mxu0 %v1485_v52  ;;  %1418 = vmatprep.subr.bf16.mxu1 %v1508_v55 }
  0x3c   :  { %781 = vmatmul.mubr.bf16.gmra.mrb[12].mxu1 %v1486_v53  ;;  %691 = vmatprep.mubr.bf16.mxu0 %v1488_v54 }
  0x3d   :  { %788 = vmatprep.mubr.bf16.mxu1 %v1490_v56  ;;  %1393 = vmatpush3.bf16.msra.mxu0 %v1508_v55 }
  0x3e   :  { %1426 = vmatpush3.bf16.msra.mxu1 %v1508_v55  ;;  %1394 = vmatprep.subr.bf16.mxu0 %v1515_v57 }
  0x3f   :  { %1419 = vmatprep.subr.bf16.mxu1 %v1515_v57 }
  0x41   :  { %1395 = vmatpush3.bf16.msra.mxu0 %v1515_v57 }
  0x42   :  { %1427 = vmatpush3.bf16.msra.mxu1 %v1515_v57 }
  0x43   :  { %692 = vmatmul.mubr.bf16.gmra.mrb[16].mxu0 %v1492_v58 }
  0x44   :  { %789 = vmatmul.mubr.bf16.gmra.mrb[16].mxu1 %v1493_v59  ;;  %699 = vmatprep.mubr.bf16.mxu0 %v1495_v60 }
  0x45   :  { %796 = vmatprep.mubr.bf16.mxu1 %v1497_v61 }
  0x4b   :  { %700 = vmatmul.mubr.bf16.gmra.mrb[20].mxu0 %v1499_v62 }
  0x4c   :  { %797 = vmatmul.mubr.bf16.gmra.mrb[20].mxu1 %v1500_v63  ;;  %707 = vmatprep.mubr.bf16.mxu0 %v1502_v0 }
  0x4d   :  { %804 = vmatprep.mubr.bf16.mxu1 %v1504_v1 }
  0x53   :  { %708 = vmatmul.mubr.bf16.gmra.mrb[24].mxu0 %v1506_v2 }
  0x54   :  { %805 = vmatmul.mubr.bf16.gmra.mrb[24].mxu1 %v1507_v3  ;;  %715 = vmatprep.mubr.bf16.mxu0 %v1509_v4 }
  0x55   :  { %812 = vmatprep.mubr.bf16.mxu1 %v1511_v5 }
  0x5b   :  { %716 = vmatmul.mubr.bf16.gmra.mrb[28].mxu0 %v1513_v6 }
  0x5c   :  { %813 = vmatmul.mubr.bf16.gmra.mrb[28].mxu1 %v1514_v7  ;;  %1396 = vmatprep.mubr.bf16.mxu0 %v1516_v8 }
  0x5d   :  { %1404 = vmatprep.mubr.bf16.mxu1 %v1517_v9 }
  0x63   :  { %1397 = vmatmul.mubr.bf16.vlgmr.msra.gmra.mrb[32].mxu0 %v1518_v10 }
  0x64   :  { %1405 = vmatmul.mubr.bf16.vlgmr.msra.gmra.mrb[32].mxu1 %v1519_v11  ;;  %1400 = vmatprep.mubr.bf16.mxu0 %v1520_v12 }
  0x65   :  { %1408 = vmatprep.mubr.bf16.mxu1 %v1521_v13 }
  0x6b   :  { %1401 = vmatmul.mubr.bf16.gmra.mrb[36].mxu0 %v1522_v14 }
  0x6c   :  { %1409 = vmatmul.mubr.bf16.gmra.mrb[36].mxu1 %v1523_v15 }
  0xf6   :  { %v1252_v16 = vpop.f32.mrb[0].mxu0 }
  0xf7   :  { %v1316_v17 = vpop.f32.mrb[0].mxu1  ;;  %v1253_v18 = vpop.f32.mrb[1].mxu0 }
  0xf8   :  { %v1254_v19 = vadd.f32 %v1253_v18, %v1252_v16  ;;  %v1317_v20 = vpop.f32.mrb[1].mxu1  ;;  %v1255_v21 = vpop.f32.mrb[2].mxu0 }
  0xf9   :  { %v1318_v22 = vadd.f32 %v1317_v20, %v1316_v17  ;;  %v1319_v23 = vpop.f32.mrb[2].mxu1  ;;  %v1256_v24 = vpop.f32.mrb[3].mxu0 }
  0xfa   :  { %v1257_v25 = vadd.f32 %v1256_v24, %v1255_v21  ;;  %v1320_v26 = vpop.f32.mrb[3].mxu1 }
  0xfb   :  { %v1321_v27 = vadd.f32 %v1320_v26, %v1319_v23  ;;  %v1784_v28 = vadd.f32 %v1318_v22, %v1254_v19 }
  0xfd   :  { %v1786_v29 = vadd.f32 %v1321_v27, %v1257_v25 }
  0xfe   :  { %v1258_v30 = vpop.f32.mrb[4].mxu0 }
  0xff   :  { %v1322_v31 = vpop.f32.mrb[4].mxu1  ;;  %v1259_v32 = vpop.f32.mrb[5].mxu0 }
 0x100   :  { %v1260_v33 = vadd.f32 %v1259_v32, %v1258_v30  ;;  %v1323_v34 = vpop.f32.mrb[5].mxu1  ;;  %v1261_v35 = vpop.f32.mrb[6].mxu0 }
 0x101   :  { %v1324_v36 = vadd.f32 %v1323_v34, %v1322_v31  ;;  %v1325_v37 = vpop.f32.mrb[6].mxu1  ;;  %v1262_v38 = vpop.f32.mrb[7].mxu0 }
 0x102   :  { %v1263_v39 = vadd.f32 %v1262_v38, %v1261_v35  ;;  %v1326_v40 = vpop.f32.mrb[7].mxu1 }
 0x103   :  { %v1327_v41 = vadd.f32 %v1326_v40, %v1325_v37  ;;  %v1788_v42 = vadd.f32 %v1324_v36, %v1260_v33 }
 0x105   :  { %v1790_v43 = vadd.f32 %v1327_v41, %v1263_v39 }
 0x106   :  { %v1264_v44 = vpop.f32.mrb[8].mxu0 }
 0x107   :  { %v1328_v45 = vpop.f32.mrb[8].mxu1  ;;  %v1265_v46 = vpop.f32.mrb[9].mxu0 }
 0x108   :  { %v1266_v47 = vadd.f32 %v1265_v46, %v1264_v44  ;;  %v1329_v48 = vpop.f32.mrb[9].mxu1  ;;  %v1267_v49 = vpop.f32.mrb[10].mxu0 }
 0x109   :  { %v1330_v50 = vadd.f32 %v1329_v48, %v1328_v45  ;;  %v1331_v51 = vpop.f32.mrb[10].mxu1  ;;  %v1268_v52 = vpop.f32.mrb[11].mxu0 }
 0x10a   :  { %v1269_v53 = vadd.f32 %v1268_v52, %v1267_v49  ;;  %v1332_v54 = vpop.f32.mrb[11].mxu1 }
 0x10b   :  { %v1333_v55 = vadd.f32 %v1332_v54, %v1331_v51  ;;  %v1792_v56 = vadd.f32 %v1330_v50, %v1266_v47 }
 0x10d   :  { %v1794_v57 = vadd.f32 %v1333_v55, %v1269_v53 }
 0x10e   :  { %v1270_v58 = vpop.f32.mrb[12].mxu0 }
 0x10f   :  { %v1334_v59 = vpop.f32.mrb[12].mxu1  ;;  %v1271_v60 = vpop.f32.mrb[13].mxu0 }
 0x110   :  { %v1272_v61 = vadd.f32 %v1271_v60, %v1270_v58  ;;  %v1335_v62 = vpop.f32.mrb[13].mxu1  ;;  %v1273_v63 = vpop.f32.mrb[14].mxu0 }
 0x111   :  { %v1336_v0 = vadd.f32 %v1335_v62, %v1334_v59  ;;  %v1337_v1 = vpop.f32.mrb[14].mxu1  ;;  %v1274_v2 = vpop.f32.mrb[15].mxu0 }
 0x112   :  { %v1275_v3 = vadd.f32 %v1274_v2, %v1273_v63  ;;  %v1338_v4 = vpop.f32.mrb[15].mxu1 }
 0x113   :  { %v1339_v5 = vadd.f32 %v1338_v4, %v1337_v1  ;;  %v1796_v6 = vadd.f32 %v1336_v0, %v1272_v61 }
 0x115   :  { %v1798_v7 = vadd.f32 %v1339_v5, %v1275_v3 }
 0x116   :  { %v1276_v8 = vpop.f32.mrb[16].mxu0 }
 0x117   :  { %v1340_v9 = vpop.f32.mrb[16].mxu1  ;;  %v1277_v10 = vpop.f32.mrb[17].mxu0 }
 0x118   :  { %v1278_v11 = vadd.f32 %v1277_v10, %v1276_v8  ;;  %v1341_v12 = vpop.f32.mrb[17].mxu1  ;;  %v1279_v13 = vpop.f32.mrb[18].mxu0 }
 0x119   :  { %v1342_v14 = vadd.f32 %v1341_v12, %v1340_v9  ;;  %v1343_v15 = vpop.f32.mrb[18].mxu1  ;;  %v1280_v16 = vpop.f32.mrb[19].mxu0  ;;  %v1156_v12 = vld [vmem:[%s1840_s2] ss:$0 sm:$0xff] }
 0x11a   :  { %v1281_v17 = vadd.f32 %v1280_v16, %v1279_v13  ;;  %v1344_v18 = vpop.f32.mrb[19].mxu1 }
 0x11b   :  { %v1345_v19 = vadd.f32 %v1344_v18, %v1343_v15  ;;  %v791_v20 = vadd.f32 %v1342_v14, %v1278_v11 }
 0x11d   :  { %v794_v21 = vadd.f32 %v1345_v19, %v1281_v17 }
 0x11e   :  { %v1282_v22 = vpop.f32.mrb[20].mxu0 }
 0x11f   :  { %v1346_v23 = vpop.f32.mrb[20].mxu1  ;;  %v1283_v24 = vpop.f32.mrb[21].mxu0 }
 0x120   :  { %v1284_v25 = vadd.f32 %v1283_v24, %v1282_v22  ;;  %v1347_v26 = vpop.f32.mrb[21].mxu1  ;;  %v1285_v27 = vpop.f32.mrb[22].mxu0 }
 0x121   :  { %v1348_v30 = vadd.f32 %v1347_v26, %v1346_v23  ;;  %v1349_v31 = vpop.f32.mrb[22].mxu1  ;;  %v1286_v32 = vpop.f32.mrb[23].mxu0 }
 0x122   :  { %v1287_v33 = vadd.f32 %v1286_v32, %v1285_v27  ;;  %v1350_v34 = vpop.f32.mrb[23].mxu1 }
 0x123   :  { %v1351_v35 = vadd.f32 %v1350_v34, %v1349_v31  ;;  %v799_v36 = vadd.f32 %v1348_v30, %v1284_v25 }
 0x125   :  { %v802_v37 = vadd.f32 %v1351_v35, %v1287_v33 }
 0x126   :  { %v1288_v38 = vpop.f32.mrb[24].mxu0 }
 0x127   :  { %v1352_v39 = vpop.f32.mrb[24].mxu1  ;;  %v1289_v40 = vpop.f32.mrb[25].mxu0 }
 0x128   :  { %v1290_v41 = vadd.f32 %v1289_v40, %v1288_v38  ;;  %v1353_v44 = vpop.f32.mrb[25].mxu1  ;;  %v1291_v45 = vpop.f32.mrb[26].mxu0 }
 0x129   :  { %v1354_v46 = vadd.f32 %v1353_v44, %v1352_v39  ;;  %v1355_v47 = vpop.f32.mrb[26].mxu1  ;;  %v1292_v48 = vpop.f32.mrb[27].mxu0 }
 0x12a   :  { %v1293_v49 = vadd.f32 %v1292_v48, %v1291_v45  ;;  %v1356_v50 = vpop.f32.mrb[27].mxu1 }
 0x12b   :  { %v1357_v51 = vadd.f32 %v1356_v50, %v1355_v47  ;;  %v807_v52 = vadd.f32 %v1354_v46, %v1290_v41 }
 0x12d   :  { %v1800_v53 = vadd.f32 %v1357_v51, %v1293_v49 }
 0x12e   :  { %v1294_v54 = vpop.f32.mrb[28].mxu0 }
 0x12f   :  { %v1358_v55 = vpop.f32.mrb[28].mxu1  ;;  %v1295_v58 = vpop.f32.mrb[29].mxu0 }
 0x130   :  { %v1296_v59 = vadd.f32 %v1295_v58, %v1294_v54  ;;  %v1359_v60 = vpop.f32.mrb[29].mxu1  ;;  %v1297_v61 = vpop.f32.mrb[30].mxu0 }
 0x131   :  { %v1360_v62 = vadd.f32 %v1359_v60, %v1358_v55  ;;  %v1361_v63 = vpop.f32.mrb[30].mxu1  ;;  %v1298_v0 = vpop.f32.mrb[31].mxu0 }
 0x132   :  { %v1299_v1 = vadd.f32 %v1298_v0, %v1297_v61  ;;  %v1362_v2 = vpop.f32.mrb[31].mxu1 }
 0x133   :  { %v1363_v3 = vadd.f32 %v1362_v2, %v1361_v63  ;;  %v815_v4 = vadd.f32 %v1360_v62, %v1296_v59 }
 0x135   :  { %v818_v5 = vadd.f32 %v1363_v3, %v1299_v1 }
 0x136   :  { %v1398_v8 = vpop.f32.mrb[32].mxu0 }
 0x137   :  { %v864_v9 = vadd.f32 %v1398_v8, %v1788_v42  ;;  %v1406_v10 = vpop.f32.mrb[32].mxu1  ;;  %v855_v11 = vpop.f32.mrb[33].mxu0 }
 0x138   :  { %v896_v13 = vadd.f32 %v1406_v10, %v799_v36  ;;  %v856_v14 = vadd.f32 %v855_v11, %v1784_v28  ;;  %v887_v15 = vpop.f32.mrb[33].mxu1  ;;  %v1399_v16 = vpop.f32.mrb[34].mxu0 }
 0x139   :  { %v888_v17 = vadd.f32 %v887_v15, %v791_v20  ;;  %v867_v18 = vadd.f32 %v1399_v16, %v1790_v43  ;;  %v1407_v19 = vpop.f32.mrb[34].mxu1  ;;  %v858_v22 = vpop.f32.mrb[35].mxu0  ;;  %v978_v25 = vadd.f32 %v1156_v12, %v864_v9 }
 0x13a   :  { %v899_v23 = vadd.f32 %v1407_v19, %v802_v37  ;;  %v859_v24 = vadd.f32 %v858_v22, %v1786_v29  ;;  %v890_v42 = vpop.f32.mrb[35].mxu1  ;;  %v986_v30 = vadd.f32 %v1156_v12, %v896_v13  ;;  %v976_v31 = vadd.f32 %v1156_v12, %v856_v14 }
 0x13b   :  { %v979_v26 = vadd.f32 %v1156_v12, %v867_v18  ;;  %v891_v27 = vadd.f32 %v890_v42, %v794_v21  ;;  %v984_v34 = vadd.f32 %v1156_v12, %v888_v17 }
 0x13c   :  { %v987_v32 = vadd.f32 %v1156_v12, %v899_v23  ;;  %v977_v33 = vadd.f32 %v1156_v12, %v859_v24 }
 0x13d   :  { %v1197_v28 = vpack.c.bf16 %v979_v26, %v978_v25  ;;  %v985_v35 = vadd.f32 %v1156_v12, %v891_v27 }
 0x13e   :  { %v1217_v36 = vpack.c.bf16 %v987_v32, %v986_v30  ;;  %v1192_v20 = vpack.c.bf16 %v977_v33, %v976_v31  ;;  %v1402_v38 = vpop.f32.mrb[36].mxu0 }
 0x13f   :  { %1229 = vst [vmem:[%s1841_s3 + $0x8] sm:$0xff] %v1197_v28   ;;  %v1212_v43 = vpack.c.bf16 %v985_v35, %v984_v34  ;;  %v880_v29 = vadd.f32 %v1402_v38, %v1796_v6  ;;  %v1410_v37 = vpop.f32.mrb[36].mxu1  ;;  %v871_v39 = vpop.f32.mrb[37].mxu0 }
 0x140   :  { %1233 = vst [vmem:[%s1841_s3 + $0x28] sm:$0xff] %v1217_v36   ;;  %1193 = vst [vmem:[%s1841_s3] sm:$0xff] %v1192_v20   ;;  %v912_v21 = vadd.f32 %v1410_v37, %v815_v4  ;;  %v872_v40 = vadd.f32 %v871_v39, %v1792_v56  ;;  %v903_v41 = vpop.f32.mrb[37].mxu1  ;;  %v1403_v44 = vpop.f32.mrb[38].mxu0 }
 0x141   :  { %1232 = vst [vmem:[%s1841_s3 + $0x20] sm:$0xff] %v1212_v43   ;;  %v904_v6 = vadd.f32 %v903_v41, %v807_v52  ;;  %v883_v45 = vadd.f32 %v1403_v44, %v1798_v7  ;;  %v1411_v46 = vpop.f32.mrb[38].mxu1  ;;  %v874_v47 = vpop.f32.mrb[39].mxu0  ;;  %v982_v51 = vadd.f32 %v1156_v12, %v880_v29 }
 0x142   :  { %v915_v48 = vadd.f32 %v1411_v46, %v818_v5  ;;  %v875_v49 = vadd.f32 %v874_v47, %v1794_v57  ;;  %v906_v50 = vpop.f32.mrb[39].mxu1  ;;  %v990_v56 = vadd.f32 %v1156_v12, %v912_v21  ;;  %v980_v58 = vadd.f32 %v1156_v12, %v872_v40 }
 0x143   :  { %v983_v54 = vadd.f32 %v1156_v12, %v883_v45  ;;  %v907_v55 = vadd.f32 %v906_v50, %v1800_v53  ;;  %v988_v61 = vadd.f32 %v1156_v12, %v904_v6 }
 0x144   :  { %v991_v59 = vadd.f32 %v1156_v12, %v915_v48  ;;  %v981_v60 = vadd.f32 %v1156_v12, %v875_v49 }
 0x145   :  { %v1207_v62 = vpack.c.bf16 %v983_v54, %v982_v51  ;;  %v989_v63 = vadd.f32 %v1156_v12, %v907_v55 }
 0x146   :  { %v1227_v52 = vpack.c.bf16 %v991_v59, %v990_v56  ;;  %v1202_v0 = vpack.c.bf16 %v981_v60, %v980_v58 }
 0x147   :  { %1231 = vst [vmem:[%s1841_s3 + $0x18] sm:$0xff] %v1207_v62   ;;  %v1222_v7 = vpack.c.bf16 %v989_v63, %v988_v61 }
 0x148   :  { %1235 = vst [vmem:[%s1841_s3 + $0x38] sm:$0xff] %v1227_v52   ;;  %1230 = vst [vmem:[%s1841_s3 + $0x10] sm:$0xff] %v1202_v0  }
 0x149   :  { %1234 = vst [vmem:[%s1841_s3 + $0x30] sm:$0xff] %v1222_v7  }

// kernel: generator_forward.32
= control target key start
LH: loop header
LB: loop body
LE: loop exit
PB: predicated region body
PF: predicated region fallthrough
CT: control target
= control target key end

     0   :  { %s419_s9 = smov 0   ;;  %s421_s10 = smov 0   ;;  %s465_s0 = inlined_call_operand.vmem [shape: bf16[2,64,128], index: 0, kind: input, shape index: {}]   ;;  %s466_s1 = inlined_call_operand.vmem [shape: f32[2,1,128], index: 1, kind: output, shape index: {0}]   ;;  %s467_s2 = inlined_call_operand.vmem [shape: f32[2,1,128], index: 2, kind: output, shape index: {1}]  }
   0x1   :  { %s423_s11 = smov 0  }
   0x2 LB: > { %s25_s12 = sadd.s32 1, %s397_s10  ;;  %p329_p0 = scmp.ge.s32.totalorder %s401_s11, 1  ;;  %s401_s11 = sphi %s423_s11, %s13_s11   ;;  %s397_s10 = sphi %s421_s10, %s469_s10   ;;  %s393_s9 = sphi %s419_s9, %s468_s9  }
   0x3   : > { %p27_p1 = scmp.ge.s32.totalorder %s25_s12, 2  ;;  %p134_p2 = scmp.lt.s32.totalorder %s401_s11, 3 }
   0x5   : > { %s471_s12 = smov (%p27_p1, %s25_s12), 0  ;;  %p135_p3 = pnand %p329_p0, %p134_p2 }
   0x6   : > { %p162_p4 = scmp.lt.s32.totalorder (!%p135_p3), %s393_s9, 1  ;;  %v403_v0 = vmov (!%p135_p3), 0.0  }
   0x7   : > { %138 = sbr.rel (%p135_p3) target bundleno = 51 (0x33), region = 24 }
   0xe   : > { %s473_s9 = smov (!%p162_p4, %s393_s9), 1 }
   0xf   : > { %s334_s13 = sshll.u32 %s473_s9, 5  ;;  %s440_s16 = scalar_lea.vmem %s466_s1, %s473_s9 }
  0x10   : > { %s169_s19 = scalar_lea.vmem %s465_s0, %s334_s13  ;;  %181 = vst [vmem:[%s440_s16] sm:$0x1] %v403_v0  ;;  %s449_s22 = scalar_lea.vmem %s467_s2, %s473_s9 }
  0x11   : > { %v336_v1 = vld [vmem:[%s169_s19] sm:$0xff]   ;;  %v351_v2 = vld [vmem:[%s169_s19 + $0x8] sm:$0xff]   ;;  %v352_v3 = vld [vmem:[%s169_s19 + $0x10] sm:$0xff]   ;;  %182 = vst [vmem:[%s449_s22] sm:$0x1] %v403_v0 }
  0x12   : > { %v337_v4 = vunpack.c.l.bf16 %v336_v1  ;;  %v338_v5 = vunpack.c.h.bf16 %v336_v1  ;;  %v341_v6 = vunpack.c.l.bf16 %v351_v2  ;;  %v342_v7 = vunpack.c.h.bf16 %v351_v2  ;;  %v353_v13 = vld [vmem:[%s169_s19 + $0x18] sm:$0xff]  }
  0x13   : > { %v345_v8 = vunpack.c.l.bf16 %v352_v3  ;;  %v346_v14 = vunpack.c.h.bf16 %v352_v3  ;;  %v349_v18 = vunpack.c.l.bf16 %v353_v13  ;;  %v350_v25 = vunpack.c.h.bf16 %v353_v13 }
  0x14   : > { %v200_v9 = vadd.f32 %v338_v5, %v337_v4  ;;  %v216_v10 = vmul.f32 %v337_v4, %v337_v4  ;;  %v217_v11 = vmul.f32 %v338_v5, %v338_v5  ;;  %v218_v12 = vmul.f32 %v341_v6, %v341_v6 }
  0x15   : > { %v219_v16 = vmul.f32 %v342_v7, %v342_v7  ;;  %v220_v20 = vmul.f32 %v345_v8, %v345_v8  ;;  %v221_v23 = vmul.f32 %v346_v14, %v346_v14  ;;  %v222_v27 = vmul.f32 %v349_v18, %v349_v18 }
  0x16   : > { %v201_v15 = vadd.f32 %v341_v6, %v200_v9  ;;  %v224_v17 = vadd.f32 %v217_v11, %v216_v10  ;;  %v223_v30 = vmul.f32 %v350_v25, %v350_v25 }
  0x17   : > { %v199_v44 = vld [vmem:[%s440_s16] sm:$0x1] }
  0x18   : > { %v202_v19 = vadd.f32 %v342_v7, %v201_v15  ;;  %v225_v21 = vadd.f32 %v224_v17, %v218_v12  ;;  %v215_v47 = vld [vmem:[%s449_s22] sm:$0x1] }
  0x1a   : > { %v203_v22 = vadd.f32 %v345_v8, %v202_v19  ;;  %v226_v24 = vadd.f32 %v225_v21, %v219_v16 }
  0x1c   : > { %v204_v26 = vadd.f32 %v346_v14, %v203_v22  ;;  %v227_v28 = vadd.f32 %v226_v24, %v220_v20 }
  0x1e   : > { %v205_v29 = vadd.f32 %v349_v18, %v204_v26  ;;  %v228_v31 = vadd.f32 %v227_v28, %v221_v23 }
  0x20   : > { %v206_v32 = vadd.f32 %v350_v25, %v205_v29  ;;  %v229_v33 = vadd.f32 %v228_v31, %v222_v27 }
  0x22   : > { %v207_v34 = vrot.slane %v206_v32, 4  ;;  %v230_v35 = vadd.f32 %v229_v33, %v223_v30 }
  0x24   : > { %v208_v36 = vadd.f32 %v207_v34, %v206_v32  ;;  %v231_v37 = vrot.slane %v230_v35, 4 }
  0x26   : > { %v209_v38 = vrot.slane %v208_v36, 2  ;;  %v232_v39 = vadd.f32 %v231_v37, %v230_v35 }
  0x28   : > { %v210_v40 = vadd.f32 %v209_v38, %v208_v36  ;;  %v233_v41 = vrot.slane %v232_v39, 2 }
  0x2a   : > { %v211_v42 = vrot.slane %v210_v40, 1  ;;  %v234_v43 = vadd.f32 %v233_v41, %v232_v39 }
  0x2c   : > { %v212_v45 = vadd.f32 %v211_v42, %v210_v40  ;;  %v235_v46 = vrot.slane %v234_v43, 1 }
  0x2e   : > { %v213_v48 = vadd.f32 %v212_v45, %v199_v44  ;;  %v236_v49 = vadd.f32 %v235_v46, %v234_v43 }
  0x30   : > { %214 = vst [vmem:[%s440_s16] sm:$0x1] %v213_v48  ;;  %v237_v50 = vadd.f32 %v236_v49, %v215_v47 }
  0x32   : > { %238 = vst [vmem:[%s449_s22] sm:$0x1] %v237_v50 }
  0x33 PF: > { %s13_s11 = sadd.s32 1, %s401_s11   ;;  %s468_s9 = smov %s397_s10 }
  0x34   : > { %p10_p5 = scmp.ge.s32.totalorder %s13_s11, 4   ;;  %s469_s10 = smov %s471_s12 }
  0x36   :  { %12 = sbr.rel (!%p10_p5) target bundleno = 2 (0x2), region = 70 }

// kernel: generator_forward.33
= control target key start
LH: loop header
LB: loop body
LE: loop exit
PB: predicated region body
PF: predicated region fallthrough
CT: control target
= control target key end

     0   :  { %s585_s12 = smov 0   ;;  %s587_s13 = smov 0   ;;  %s633_s0 = inlined_call_operand.vmem [shape: bf16[2,64,128], index: 0, kind: input, shape index: {}]   ;;  %s634_s1 = inlined_call_operand.vmem [shape: f32[2,1,128], index: 1, kind: input, shape index: {}]   ;;  %s635_s2 = inlined_call_operand.vmem [shape: f32[2,1,128], index: 2, kind: input, shape index: {}]   ;;  %s636_s3 = inlined_call_operand.vmem [shape: bf16[2,64,128], index: 3, kind: output, shape index: {}]  }
   0x1   :  { %s589_s14 = smov 0  }
   0x2 LB: > { %s25_s15 = sadd.s32 1, %s559_s13  ;;  %p448_p0 = scmp.ge.s32.totalorder %s563_s14, 1  ;;  %s563_s14 = sphi %s589_s14, %s13_s14   ;;  %s559_s13 = sphi %s587_s13, %s638_s13   ;;  %s555_s12 = sphi %s585_s12, %s637_s12  }
   0x3   : > { %p27_p1 = scmp.ge.s32.totalorder %s25_s15, 2  ;;  %p174_p2 = scmp.lt.s32.totalorder %s563_s14, 3 }
   0x5   : > { %s640_s15 = smov (%p27_p1, %s25_s15), 0  ;;  %p175_p3 = pnand %p448_p0, %p174_p2 }
   0x6   : > { %p213_p4 = scmp.lt.s32.totalorder (!%p175_p3), %s555_s12, 1  ;;  %v262_v5 = vlaneseq (!%p175_p3) }
   0x7   : > { %178 = sbr.rel (%p175_p3) target bundleno = 48 (0x30), region = 32 }
   0x8   : > { %v263_v8 = vshrl.u32 (!%p175_p3), %v262_v5, 7 }
   0xa   : > { %v264_v11 = vsub.s32 (!%p175_p3), 0, %v263_v8 }
   0xe   : > { %s642_s12 = smov (!%p213_p4, %s555_s12), 1 }
   0xf   : > { %s224_s18 = scalar_lea.vmem %s634_s1, %s642_s12  ;;  %s227_s21 = scalar_lea.vmem %s635_s2, %s642_s12 }
  0x10   : > { %v254_v0 = vld [vmem:[%s224_s18] sm:$0x1]  ;;  %s463_s22 = sshll.u32 %s642_s12, 5 }
  0x11   : > { %v255_v1 = vmul.f32 0.015625, %v254_v0  ;;  %v256_v2 = vld [vmem:[%s227_s21] sm:$0x1]  ;;  %s220_s25 = scalar_lea.vmem %s633_s0, %s463_s22  ;;  %s236_s28 = scalar_lea.vmem %s636_s3, %s463_s22 }
  0x12   : > { %v257_v3 = vmul.f32 0.015625, %v256_v2  ;;  %v474_v10 = vld [vmem:[%s220_s25] sm:$0xff]   ;;  %v509_v12 = vld [vmem:[%s220_s25 + $0x8] sm:$0xff]   ;;  %v510_v13 = vld [vmem:[%s220_s25 + $0x10] sm:$0xff]  }
  0x13   : > { %v258_v4 = vmul.f32 %v255_v1, %v255_v1  ;;  %v511_v14 = vld [vmem:[%s220_s25 + $0x18] sm:$0xff]   ;;  %v475_v15 = vunpack.c.l.bf16 %v474_v10  ;;  %v476_v16 = vunpack.c.h.bf16 %v474_v10  ;;  %v265_v17 = vrot.slane %v255_v1, %v264_v11 }
  0x14   : > { %v479_v18 = vunpack.c.l.bf16 %v509_v12  ;;  %v480_v19 = vunpack.c.h.bf16 %v509_v12  ;;  %v483_v20 = vunpack.c.l.bf16 %v510_v13  ;;  %v484_v21 = vunpack.c.h.bf16 %v510_v13 }
  0x15   : > { %v259_v6 = vsub.f32 %v257_v3, %v258_v4  ;;  %v487_v22 = vunpack.c.l.bf16 %v511_v14  ;;  %v488_v23 = vunpack.c.h.bf16 %v511_v14  ;;  %v267_v24 = vsub.f32 %v475_v15, %v265_v17 }
  0x16   : > { %v268_v25 = vsub.f32 %v476_v16, %v265_v17  ;;  %v269_v26 = vsub.f32 %v479_v18, %v265_v17  ;;  %v270_v27 = vsub.f32 %v480_v19, %v265_v17  ;;  %v271_v29 = vsub.f32 %v483_v20, %v265_v17 }
  0x17   : > { %v260_v7 = vmax.f32 %v259_v6, 0.0  ;;  %v272_v30 = vsub.f32 %v484_v21, %v265_v17  ;;  %v273_v31 = vsub.f32 %v487_v22, %v265_v17  ;;  %v274_v32 = vsub.f32 %v488_v23, %v265_v17 }
  0x19   : > { %v275_v9 = vadd.f32 1e-05, %v260_v7 }
  0x1b   : > { %539 = vrsqrt.f32 %v275_v9 }
  0x25   : > { %v540_v28 = vpop.eup %539 }
  0x26   : > { %v281_v33 = vrot.slane %v540_v28, %v264_v11 }
  0x28   : > { %v283_v34 = vmul.f32 %v281_v33, %v267_v24  ;;  %v284_v35 = vmul.f32 %v281_v33, %v268_v25  ;;  %v285_v36 = vmul.f32 %v281_v33, %v269_v26  ;;  %v286_v37 = vmul.f32 %v281_v33, %v270_v27 }
  0x29   : > { %v287_v38 = vmul.f32 %v281_v33, %v271_v29  ;;  %v288_v39 = vmul.f32 %v281_v33, %v272_v30  ;;  %v289_v40 = vmul.f32 %v281_v33, %v273_v31  ;;  %v290_v41 = vmul.f32 %v281_v33, %v274_v32 }
  0x2a   : > { %v291_v42 = vmax.f32 %v283_v34, 0.0  ;;  %v292_v43 = vmax.f32 %v284_v35, 0.0  ;;  %v293_v44 = vmax.f32 %v285_v36, 0.0  ;;  %v294_v45 = vmax.f32 %v286_v37, 0.0 }
  0x2b   : > { %v295_v46 = vmax.f32 %v287_v38, 0.0  ;;  %v296_v47 = vmax.f32 %v288_v39, 0.0  ;;  %v297_v48 = vmax.f32 %v289_v40, 0.0  ;;  %v298_v49 = vmax.f32 %v290_v41, 0.0 }
  0x2c   : > { %v492_v50 = vpack.c.bf16 %v292_v43, %v291_v42  ;;  %v497_v51 = vpack.c.bf16 %v294_v45, %v293_v44 }
  0x2d   : > { %v502_v52 = vpack.c.bf16 %v296_v47, %v295_v46  ;;  %v507_v53 = vpack.c.bf16 %v298_v49, %v297_v48 }
  0x2e   : > { %493 = vst [vmem:[%s236_s28] sm:$0xff] %v492_v50   ;;  %512 = vst [vmem:[%s236_s28 + $0x8] sm:$0xff] %v497_v51  }
  0x2f   : > { %513 = vst [vmem:[%s236_s28 + $0x10] sm:$0xff] %v502_v52   ;;  %514 = vst [vmem:[%s236_s28 + $0x18] sm:$0xff] %v507_v53  }
  0x30 PF: > { %s13_s14 = sadd.s32 1, %s563_s14   ;;  %s637_s12 = smov %s559_s13 }
  0x31   : > { %p10_p5 = scmp.ge.s32.totalorder %s13_s14, 4   ;;  %s638_s13 = smov %s640_s15 }
  0x33   :  { %12 = sbr.rel (!%p10_p5) target bundleno = 2 (0x2), region = 68 }

// kernel: generator_forward.34
= control target key start
LH: loop header
LB: loop body
LE: loop exit
PB: predicated region body
PF: predicated region fallthrough
CT: control target
= control target key end

     0   :  { %s1252_s12 = smov 0   ;;  %s1254_s13 = smov 0   ;;  %s1394_s0 = inlined_call_operand.vmem [shape: bf16[32,1152], index: 0, kind: input, shape index: {}]   ;;  %s1395_s1 = inlined_call_operand.vmem [shape: bf16[1152,256], index: 1, kind: input, shape index: {}]   ;;  %s1396_s2 = inlined_call_operand.vmem [shape: f32[1,256], index: 2, kind: input, shape index: {}]   ;;  %s1397_s3 = inlined_call_operand.vmem [shape: bf16[32,256], index: 3, kind: output, shape index: {}]  }
   0x1   :  { %s1256_s14 = smov 0   ;;  %s1258_s15 = smov 0  }
   0x2   :  { %s1260_s16 = smov 0  }
   0x3 LB: > { %s25_s17 = sadd.s32 1, %s1224_s15  ;;  %p48_p1 = scmp.ne.s32.totalorder %s1216_s13, %s1212_s12  ;;  %s1228_s16 = sphi %s1260_s16, %s13_s16   ;;  %s1224_s15 = sphi %s1258_s15, %s1401_s15   ;;  %s1220_s14 = sphi %s1256_s14, %s1400_s14   ;;  %s1216_s13 = sphi %s1254_s13, %s1399_s13   ;;  %s1212_s12 = sphi %s1252_s12, %s1398_s12  }
   0x4   : > { %p26_p0 = scmp.ge.s32.totalorder %s25_s17, 3  ;;  %p49_p2 = scmp.eq.s32.totalorder %s1228_s16, 0 }
   0x5   : > { %s41_s19 = sadd.s32 1, %s1216_s13  ;;  %p975_p5 = scmp.ge.s32.totalorder %s1228_s16, 3 }
   0x6   : > { %s1403_s17 = smov (%p26_p0, %s25_s17), 0  ;;  %p50_p3 = por %p49_p2, %p48_p1 }
   0x7   : > { %s37_s18 = ssub.s32 %s1224_s15, %s1403_s17  ;;  %164 = sbr.rel (%p975_p5) target bundleno = 23 (0x17), region = 20 }
   0x8   : > { %p39_p4 = scmp.eq.s32.totalorder %s37_s18, 0 }
   0xa   : > { %s1287_s20 = scalar_select %p39_p4, %s1216_s13, %s41_s19  }
   0xe   : > { %167 = sbr.rel (!%p50_p3) target bundleno = 23 (0x17), region = 24  ;;  %s169_s21 = sand.u32 (%p50_p3), 1, %s1216_s13  }
   0xf   : > { %s1052_s22 = smul.u32 (%p50_p3), 12, %s1224_s15 }
  0x10   : > { %s1066_s23 = smul.u32 (%p50_p3), 48, %s169_s21 }
  0x11   : > { %s177_s26 = scalar_lea.vmem (%p50_p3), %s1394_s0, %s1052_s22 }
  0x12   : > { %v192_v0 = vld [vmem:[%s177_s26] sm:$0xff] (%p50_p3)  ;;  %v196_v2 = vld [vmem:[%s177_s26 + $0x48] sm:$0xff] (%p50_p3)  ;;  %s171_s27 = scalar_lea.vmem (%p50_p3), [#allocation3], %s1066_s23  ;;  %v981_v6 = vld [vmem:[%s177_s26 + $0x50] sm:$0xf] (%p50_p3) }
  0x13   : > { %v194_v1 = vld [vmem:[%s177_s26 + $0x24] sm:$0xff] (%p50_p3)  ;;  %193 = vst [vmem:[%s171_s27] sm:$0xff] (%p50_p3), %v192_v0  ;;  %197 = vst [vmem:[%s171_s27 + $0x18] sm:$0xff] (%p50_p3), %v196_v2  ;;  %v198_v3 = vld [vmem:[%s177_s26 + $0x6c] sm:$0xff] (%p50_p3) }
  0x14   : > { %195 = vst [vmem:[%s171_s27 + $0xc] sm:$0xff] (%p50_p3), %v194_v1  ;;  %v977_v4 = vld [vmem:[%s177_s26 + $0x8] sm:$0xf] (%p50_p3)  ;;  %v979_v5 = vld [vmem:[%s177_s26 + $0x2c] sm:$0xf] (%p50_p3)  ;;  %199 = vst [vmem:[%s171_s27 + $0x24] sm:$0xff] (%p50_p3), %v198_v3 }
  0x15   : > { %978 = vst [vmem:[%s171_s27 + $0x8] sm:$0xf] %v977_v4  ;;  %980 = vst [vmem:[%s171_s27 + $0x14] sm:$0xf] %v979_v5  ;;  %v983_v7 = vld [vmem:[%s177_s26 + $0x74] sm:$0xf] }
  0x16   : > { %982 = vst [vmem:[%s171_s27 + $0x20] sm:$0xf] %v981_v6  ;;  %984 = vst [vmem:[%s171_s27 + $0x2c] sm:$0xf] %v983_v7 }
  0x17 PF: > { %p985_p6 = scmp.ge.s32.totalorder %s1228_s16, 1  ;;  %p234_p7 = scmp.lt.s32.totalorder %s1228_s16, 4 }
  0x19   : > { %p235_p8 = pnand %p985_p6, %p234_p7 }
  0x1a   : > { %s241_s28 = sand.u32 (!%p235_p8), 1, %s1212_s12   ;;  %s285_s29 = smul.u32 (!%p235_p8), 48, %s1220_s14 }
  0x1b   : > { %238 = sbr.rel (%p235_p8) target bundleno = 346 (0x15a), region = 54  ;;  %p988_p10 = scmp.ne.s32.totalorder (!%p235_p8), %s1220_s14, 0 }
  0x1c   : > { %s1067_s30 = smul.u32 (!%p235_p8), 48, %s241_s28  ;;  %p287_p9 = scmp.lt.s32.totalorder (!%p235_p8), %s285_s29, 143 }
  0x1e   : > { %s1304_s8 = scalar_lea.vmem (!%p235_p8), [#allocation3], %s1067_s30 }
  0x22   : > { %s1405_s29 = smov (!%p287_p9, %s285_s29), 143  ;;  %318 = sbr.rel (%p988_p10) target bundleno = 41 (0x29), region = 62 }
  0x23   : > { %s1053_s4 = sshll.u32 %s1405_s29, 3  ;;  %v1230_v8 = vmov (!%p988_p10), 0.0  }
  0x24   : > { %s1302_s7 = scalar_lea.vmem %s1395_s1, %s1053_s4  ;;  %319 = vst [vmem:[#allocation2] sm:$0xff] (!%p988_p10), %v1230_v8  ;;  %320 = vst [vmem:[#allocation2 + $0x8] sm:$0xff] (!%p988_p10), %v1230_v8 }
  0x25   : > { %321 = vst [vmem:[#allocation2 + $0x10] sm:$0xff] (!%p988_p10), %v1230_v8  ;;  %322 = vst [vmem:[#allocation2 + $0x18] sm:$0xff] (!%p988_p10), %v1230_v8 }
  0x26   : > { %323 = vst [vmem:[#allocation2 + $0x20] sm:$0xff] (!%p988_p10), %v1230_v8  ;;  %324 = vst [vmem:[#allocation2 + $0x28] sm:$0xff] (!%p988_p10), %v1230_v8 }
  0x27   : > { %325 = vst [vmem:[#allocation2 + $0x30] sm:$0xff] (!%p988_p10), %v1230_v8  ;;  %326 = vst [vmem:[#allocation2 + $0x38] sm:$0xff] (!%p988_p10), %v1230_v8 }
  0x29 PF: > { %v1110_v9 = vld [vmem:[%s1302_s7 + $0x4] ss:$8 sps:$4 sm:$0xff]   ;;  %v1112_v10 = vld [vmem:[%s1302_s7] ss:$8 sps:$4 sm:$0xff]   ;;  %v1231_v11 = vmov 0   ;;  %p1043_p11 = scmp.ne.s32.totalorder %s1220_s14, 2 }
  0x2a   : > { %748 = vmatprep.mubr.bf16.mxu0 %v1231_v11  ;;  %663 = vmatprep.subr.bf16.mxu1 %v1110_v9  ;;  %v1113_v12 = vld [vmem:[%s1302_s7 + $0x14] ss:$8 sps:$4 sm:$0xff]   ;;  %v1115_v13 = vld [vmem:[%s1302_s7 + $0x10] ss:$8 sps:$4 sm:$0xff]   ;;  %v1116_v14 = vld [vmem:[%s1302_s7 + $0x24] ss:$8 sps:$4 sm:$0xff]  }
  0x2b   : > { %664 = vmatpush1.bf16.msra.mxu1 %v1112_v10  ;;  %v1118_v15 = vld [vmem:[%s1302_s7 + $0x20] ss:$8 sps:$4 sm:$0xff]   ;;  %v1119_v16 = vld [vmem:[%s1302_s7 + $0x34] ss:$8 sps:$4 sm:$0xff]   ;;  %v1121_v17 = vld [vmem:[%s1302_s7 + $0x30] ss:$8 sps:$4 sm:$0xff]  }
  0x2c   : > { %665 = vmatprep.subr.bf16.mxu1 %v1113_v12  ;;  %v1134_v18 = vld [vmem:[%s1302_s7 + $0x104] ss:$8 sps:$4 sm:$0xff]   ;;  %v1136_v19 = vld [vmem:[%s1302_s7 + $0x100] ss:$8 sps:$4 sm:$0xff]   ;;  %v1140_v21 = vld [vmem:[%s1302_s7 + $0x114] ss:$8 sps:$4 sm:$0xff]  }
  0x2d   : > { %v1122_v20 = vld [vmem:[%s1302_s7 + $0x44] ss:$8 sps:$4 sm:$0xff]   ;;  %716 = vmatprep.subr.bf16.mxu0 %v1134_v18  ;;  %v1142_v22 = vld [vmem:[%s1302_s7 + $0x110] ss:$8 sps:$4 sm:$0xff]   ;;  %v1124_v23 = vld [vmem:[%s1302_s7 + $0x40] ss:$8 sps:$4 sm:$0xff]  }
  0x2e   : > { %717 = vmatpush1.bf16.msra.mxu0 %v1136_v19  ;;  %v1125_v24 = vld [vmem:[%s1302_s7 + $0x54] ss:$8 sps:$4 sm:$0xff]   ;;  %v1146_v25 = vld [vmem:[%s1302_s7 + $0x124] ss:$8 sps:$4 sm:$0xff]   ;;  %v1148_v26 = vld [vmem:[%s1302_s7 + $0x120] ss:$8 sps:$4 sm:$0xff]  }
  0x2f   : > { %666 = vmatpush1.bf16.msra.mxu1 %v1115_v13  ;;  %718 = vmatprep.subr.bf16.mxu0 %v1140_v21  ;;  %v1127_v27 = vld [vmem:[%s1302_s7 + $0x50] ss:$8 sps:$4 sm:$0xff]   ;;  %v1152_v28 = vld [vmem:[%s1302_s7 + $0x134] ss:$8 sps:$4 sm:$0xff]   ;;  %v1128_v29 = vld [vmem:[%s1302_s7 + $0x64] ss:$8 sps:$4 sm:$0xff]  }
  0x30   : > { %667 = vmatprep.subr.bf16.mxu1 %v1116_v14  ;;  %v1154_v30 = vld [vmem:[%s1302_s7 + $0x130] ss:$8 sps:$4 sm:$0xff]   ;;  %v1130_v31 = vld [vmem:[%s1302_s7 + $0x60] ss:$8 sps:$4 sm:$0xff]   ;;  %v1158_v32 = vld [vmem:[%s1302_s7 + $0x144] ss:$8 sps:$4 sm:$0xff]  }
  0x31   : > { %v1131_v33 = vld [vmem:[%s1302_s7 + $0x74] ss:$8 sps:$4 sm:$0xff]   ;;  %v1160_v34 = vld [vmem:[%s1302_s7 + $0x140] ss:$8 sps:$4 sm:$0xff]   ;;  %v1133_v35 = vld [vmem:[%s1302_s7 + $0x70] ss:$8 sps:$4 sm:$0xff]  }
  0x32   : > { %719 = vmatpush1.bf16.msra.mxu0 %v1142_v22  ;;  %v1164_v36 = vld [vmem:[%s1302_s7 + $0x154] ss:$8 sps:$4 sm:$0xff]   ;;  %v1137_v37 = vld [vmem:[%s1302_s7 + $0x84] ss:$8 sps:$4 sm:$0xff]   ;;  %v1166_v38 = vld [vmem:[%s1302_s7 + $0x150] ss:$8 sps:$4 sm:$0xff]  }
  0x33   : > { %668 = vmatpush1.bf16.msra.mxu1 %v1118_v15  ;;  %720 = vmatprep.subr.bf16.mxu0 %v1146_v25  ;;  %v1139_v39 = vld [vmem:[%s1302_s7 + $0x80] ss:$8 sps:$4 sm:$0xff]   ;;  %v1170_v40 = vld [vmem:[%s1302_s7 + $0x164] ss:$8 sps:$4 sm:$0xff]   ;;  %v1143_v41 = vld [vmem:[%s1302_s7 + $0x94] ss:$8 sps:$4 sm:$0xff]  }
  0x34   : > { %669 = vmatprep.subr.bf16.mxu1 %v1119_v16  ;;  %v1145_v42 = vld [vmem:[%s1302_s7 + $0x90] ss:$8 sps:$4 sm:$0xff]   ;;  %v1172_v43 = vld [vmem:[%s1302_s7 + $0x160] ss:$8 sps:$4 sm:$0xff]   ;;  %v1176_v45 = vld [vmem:[%s1302_s7 + $0x174] ss:$8 sps:$4 sm:$0xff]  }
  0x35   : > { %v1185_v44 = vld [vmem:[%s1304_s8 + $0x4] ss:$12 sps:$4 sm:$0xff]   ;;  %v1182_v50 = vld [vmem:[%s1304_s8 + $0x8] ss:$12 sps:$4 sm:$0xff]   ;;  %v1186_v55 = vld [vmem:[%s1304_s8 + $0x20] ss:$12 sps:$4 sm:$0xff]  }
  0x36   : > { %721 = vmatpush1.bf16.msra.mxu0 %v1148_v26  ;;  %v1149_v46 = vld [vmem:[%s1302_s7 + $0xa4] ss:$8 sps:$4 sm:$0xff]   ;;  %695 = vmatprep.mubr.bf16.mxu1 %v1185_v44  ;;  %v1178_v47 = vld [vmem:[%s1302_s7 + $0x170] ss:$8 sps:$4 sm:$0xff]   ;;  %v1151_v48 = vld [vmem:[%s1302_s7 + $0xa0] ss:$8 sps:$4 sm:$0xff]  }
  0x37   : > { %670 = vmatpush1.bf16.msra.mxu1 %v1121_v17  ;;  %722 = vmatprep.subr.bf16.mxu0 %v1152_v28  ;;  %v1155_v49 = vld [vmem:[%s1302_s7 + $0xb4] ss:$8 sps:$4 sm:$0xff]   ;;  %v1157_v51 = vld [vmem:[%s1302_s7 + $0xb0] ss:$8 sps:$4 sm:$0xff]   ;;  %v1161_v52 = vld [vmem:[%s1302_s7 + $0xc4] ss:$8 sps:$4 sm:$0xff]  }
  0x38   : > { %671 = vmatprep.subr.bf16.mxu1 %v1122_v20  ;;  %v1163_v53 = vld [vmem:[%s1302_s7 + $0xc0] ss:$8 sps:$4 sm:$0xff]   ;;  %v1167_v54 = vld [vmem:[%s1302_s7 + $0xd4] ss:$8 sps:$4 sm:$0xff]   ;;  %v1169_v56 = vld [vmem:[%s1302_s7 + $0xd0] ss:$8 sps:$4 sm:$0xff]  }
  0x39   : > { %v1173_v57 = vld [vmem:[%s1302_s7 + $0xe4] ss:$8 sps:$4 sm:$0xff]   ;;  %v1175_v58 = vld [vmem:[%s1302_s7 + $0xe0] ss:$8 sps:$4 sm:$0xff]   ;;  %v1179_v59 = vld [vmem:[%s1302_s7 + $0xf4] ss:$8 sps:$4 sm:$0xff]  }
  0x3a   : > { %723 = vmatpush1.bf16.msra.mxu0 %v1154_v30  ;;  %v1181_v60 = vld [vmem:[%s1302_s7 + $0xf0] ss:$8 sps:$4 sm:$0xff]   ;;  %v327_v8 = vld [vmem:[#allocation2] sm:$0xff] }
  0x3b   : > { %672 = vmatpush1.bf16.msra.mxu1 %v1124_v23  ;;  %724 = vmatprep.subr.bf16.mxu0 %v1158_v32  ;;  %v1183_v61 = vld [vmem:[%s1304_s8] ss:$12 sps:$4 sm:$0xff]   ;;  %v1187_v62 = vld [vmem:[%s1304_s8 + $0x1c] ss:$12 sps:$4 sm:$0xff]   ;;  %v1189_v63 = vld [vmem:[%s1304_s8 + $0x18] ss:$12 sps:$4 sm:$0xff]  }
  0x3c   : > { %673 = vmatprep.subr.bf16.mxu1 %v1125_v24  ;;  %v329_v14 = vld [vmem:[#allocation2 + $0x10] sm:$0xff]  ;;  %v330_v18 = vld [vmem:[#allocation2 + $0x18] sm:$0xff]  ;;  %v331_v24 = vld [vmem:[#allocation2 + $0x20] sm:$0xff] }
  0x3d   : > { %v333_v30 = vld [vmem:[#allocation2 + $0x30] sm:$0xff] }
  0x3e   : > { %725 = vmatpush1.bf16.msra.mxu0 %v1160_v34  ;;  %v334_v34 = vld [vmem:[#allocation2 + $0x38] sm:$0xff] }
  0x3f   : > { %674 = vmatpush1.bf16.msra.mxu1 %v1127_v27  ;;  %726 = vmatprep.subr.bf16.mxu0 %v1164_v36  ;;  %v332_v27 = vld [vmem:[#allocation2 + $0x28] sm:$0xff] }
  0x40   : > { %675 = vmatprep.subr.bf16.mxu1 %v1128_v29 }
  0x42   : > { %727 = vmatpush1.bf16.msra.mxu0 %v1166_v38 }
  0x43   : > { %676 = vmatpush1.bf16.msra.mxu1 %v1130_v31  ;;  %728 = vmatprep.subr.bf16.mxu0 %v1170_v40  ;;  %v799_v40 = vlaneseq (!%p1043_p11) }
  0x44   : > { %677 = vmatprep.subr.bf16.mxu1 %v1131_v33 }
  0x46   : > { %729 = vmatpush1.bf16.msra.mxu0 %v1172_v43 }
  0x47   : > { %678 = vmatpush1.bf16.msra.mxu1 %v1133_v35  ;;  %730 = vmatprep.subr.bf16.mxu0 %v1176_v45 }
  0x48   : > { %679 = vmatprep.subr.bf16.mxu1 %v1137_v37 }
  0x4a   : > { %731 = vmatpush1.bf16.msra.mxu0 %v1178_v47 }
  0x4b   : > { %680 = vmatpush1.bf16.msra.mxu1 %v1139_v39 }
  0x4c   : > { %681 = vmatprep.subr.bf16.mxu1 %v1143_v41  ;;  %v800_v41 = vshrl.u32 (!%p1043_p11), %v799_v40, 7 }
  0x4d   : > { %749 = vmatmul.mubr.bf16.vlgmr.msra.gmra.mrb[0].mxu0 %v1182_v50 }
  0x4e   : > { %758 = vmatprep.mubr.bf16.mxu0 %v1231_v11  ;;  %v328_v11 = vld [vmem:[#allocation2 + $0x8] sm:$0xff]  ;;  %v801_v45 = vsub.s32 (!%p1043_p11), 0, %v800_v41 }
  0x4f   : > { %682 = vmatpush1.bf16.msra.mxu1 %v1145_v42  ;;  %v797_v42 = vld [vmem:[%s1396_s2] sm:$0x3] (!%p1043_p11) }
  0x50   : > { %683 = vmatprep.subr.bf16.mxu1 %v1149_v46  ;;  %v805_v46 = vsub.s32 (!%p1043_p11), 1, %v800_v41  ;;  %v802_v50 = vrot.slane (!%p1043_p11), %v797_v42, %v801_v45 }
  0x53   : > { %684 = vmatpush1.bf16.msra.mxu1 %v1151_v48 }
  0x54   : > { %685 = vmatprep.subr.bf16.mxu1 %v1155_v49 }
  0x55   : > { %759 = vmatmul.mubr.bf16.gmra.mrb[4].mxu0 %v1186_v55 }
  0x57   : > { %686 = vmatpush1.bf16.msra.mxu1 %v1157_v51  ;;  %v806_v51 = vrot.slane (!%p1043_p11), %v797_v42, %v805_v46 }
  0x58   : > { %687 = vmatprep.subr.bf16.mxu1 %v1161_v52 }
  0x5b   : > { %688 = vmatpush1.bf16.msra.mxu1 %v1163_v53 }
  0x5c   : > { %689 = vmatprep.subr.bf16.mxu1 %v1167_v54 }
  0x5f   : > { %690 = vmatpush1.bf16.msra.mxu1 %v1169_v56 }
  0x60   : > { %691 = vmatprep.subr.bf16.mxu1 %v1173_v57 }
  0x63   : > { %692 = vmatpush1.bf16.msra.mxu1 %v1175_v58 }
  0x64   : > { %693 = vmatprep.subr.bf16.mxu1 %v1179_v59 }
  0x67   : > { %694 = vmatpush1.bf16.msra.mxu1 %v1181_v60 }
  0x6a   : > { %696 = vmatmul.mubr.bf16.vlgmr.msra.gmra.mrb[0].mxu1 %v1183_v61 }
  0x6b   : > { %705 = vmatprep.mubr.bf16.mxu1 %v1187_v62 }
  0x72   : > { %706 = vmatmul.mubr.bf16.gmra.mrb[4].mxu1 %v1189_v63 }
 0x120   : > { %v750_v0 = vpop.f32.mrb[0].mxu0 }
 0x121   : > { %v752_v1 = vpop.f32.mrb[1].mxu0 }
 0x122   : > { %v754_v2 = vpop.f32.mrb[2].mxu0 }
 0x123   : > { %v756_v3 = vpop.f32.mrb[3].mxu0 }
 0x128   : > { %v760_v4 = vpop.f32.mrb[4].mxu0 }
 0x129   : > { %v762_v5 = vpop.f32.mrb[5].mxu0 }
 0x12a   : > { %v764_v6 = vpop.f32.mrb[6].mxu0 }
 0x12b   : > { %v766_v7 = vpop.f32.mrb[7].mxu0 }
 0x13d   : > { %v697_v9 = vpop.f32.mrb[0].mxu1 }
 0x13e   : > { %v751_v10 = vadd.f32 %v750_v0, %v697_v9  ;;  %v699_v12 = vpop.f32.mrb[1].mxu1 }
 0x13f   : > { %v753_v13 = vadd.f32 %v752_v1, %v699_v12  ;;  %v701_v15 = vpop.f32.mrb[2].mxu1 }
 0x140   : > { %v769_v16 = vadd.f32 %v751_v10, %v327_v8  ;;  %v755_v17 = vadd.f32 %v754_v2, %v701_v15  ;;  %v703_v19 = vpop.f32.mrb[3].mxu1 }
 0x141   : > { %v770_v20 = vadd.f32 %v753_v13, %v328_v11  ;;  %v757_v21 = vadd.f32 %v756_v3, %v703_v19 }
 0x142   : > { %777 = vst [vmem:[#allocation2] sm:$0xff] %v769_v16  ;;  %v771_v22 = vadd.f32 %v755_v17, %v329_v14 }
 0x143   : > { %778 = vst [vmem:[#allocation2 + $0x8] sm:$0xff] %v770_v20  ;;  %v772_v23 = vadd.f32 %v757_v21, %v330_v18 }
 0x144   : > { %779 = vst [vmem:[#allocation2 + $0x10] sm:$0xff] %v771_v22 }
 0x145   : > { %780 = vst [vmem:[#allocation2 + $0x18] sm:$0xff] %v772_v23  ;;  %v707_v25 = vpop.f32.mrb[4].mxu1 }
 0x146   : > { %v761_v26 = vadd.f32 %v760_v4, %v707_v25  ;;  %v709_v28 = vpop.f32.mrb[5].mxu1 }
 0x147   : > { %v763_v29 = vadd.f32 %v762_v5, %v709_v28  ;;  %v711_v31 = vpop.f32.mrb[6].mxu1  ;;  %788 = sbr.rel (%p1043_p11) target bundleno = 346 (0x15a), region = 66 }
 0x148   : > { %v773_v32 = vadd.f32 %v761_v26, %v331_v24  ;;  %v765_v33 = vadd.f32 %v764_v6, %v711_v31  ;;  %v713_v35 = vpop.f32.mrb[7].mxu1 }
 0x149   : > { %v774_v36 = vadd.f32 %v763_v29, %v332_v27  ;;  %v767_v37 = vadd.f32 %v766_v7, %v713_v35  ;;  %v789_v43 = vld [vmem:[#allocation2] sm:$0xff] (!%p1043_p11) }
 0x14a   : > { %781 = vst [vmem:[#allocation2 + $0x20] sm:$0xff] %v773_v32  ;;  %v775_v38 = vadd.f32 %v765_v33, %v333_v30  ;;  %v790_v44 = vld [vmem:[#allocation2 + $0x8] sm:$0xff] (!%p1043_p11)  ;;  %v809_v55 = vadd.f32 (!%p1043_p11), %v802_v50, %v789_v43 }
 0x14b   : > { %782 = vst [vmem:[#allocation2 + $0x28] sm:$0xff] %v774_v36  ;;  %v776_v39 = vadd.f32 %v767_v37, %v334_v34  ;;  %v791_v47 = vld [vmem:[#allocation2 + $0x10] sm:$0xff] (!%p1043_p11)  ;;  %v810_v56 = vadd.f32 (!%p1043_p11), %v806_v51, %v790_v44 }
 0x14c   : > { %783 = vst [vmem:[#allocation2 + $0x30] sm:$0xff] %v775_v38  ;;  %v792_v48 = vld [vmem:[#allocation2 + $0x18] sm:$0xff] (!%p1043_p11)  ;;  %v811_v57 = vadd.f32 (!%p1043_p11), %v802_v50, %v791_v47 }
 0x14d   : > { %784 = vst [vmem:[#allocation2 + $0x38] sm:$0xff] %v776_v39  ;;  %v812_v58 = vadd.f32 (!%p1043_p11), %v806_v51, %v792_v48  ;;  %v1054_v63 = vpack.c.bf16 (!%p1043_p11), %v810_v56, %v809_v55 }
 0x14f   : > { %v1055_v0 = vpack.c.bf16 %v812_v58, %v811_v57  ;;  %841 = vst [vmem:[%s1397_s3] sm:$0xff] %v1054_v63 }
 0x151   : > { %v793_v49 = vld [vmem:[#allocation2 + $0x20] sm:$0xff]  ;;  %842 = vst [vmem:[%s1397_s3 + $0x8] sm:$0xff] %v1055_v0 }
 0x152   : > { %v794_v52 = vld [vmem:[#allocation2 + $0x28] sm:$0xff]  ;;  %v813_v59 = vadd.f32 %v802_v50, %v793_v49 }
 0x153   : > { %v795_v53 = vld [vmem:[#allocation2 + $0x30] sm:$0xff]  ;;  %v814_v60 = vadd.f32 %v806_v51, %v794_v52 }
 0x154   : > { %v796_v54 = vld [vmem:[#allocation2 + $0x38] sm:$0xff]  ;;  %v815_v61 = vadd.f32 %v802_v50, %v795_v53 }
 0x155   : > { %v816_v62 = vadd.f32 %v806_v51, %v796_v54  ;;  %v1056_v1 = vpack.c.bf16 %v814_v60, %v813_v59 }
 0x157   : > { %v1057_v2 = vpack.c.bf16 %v816_v62, %v815_v61  ;;  %843 = vst [vmem:[%s1397_s3 + $0x10] sm:$0xff] %v1056_v1 }
 0x159   : > { %844 = vst [vmem:[%s1397_s3 + $0x18] sm:$0xff] %v1057_v2 }
 0x15a PF: > { %s13_s16 = sadd.s32 1, %s1228_s16   ;;  %s1398_s12 = smov %s1216_s13 }
 0x15b   : > { %p10_p12 = scmp.ge.s32.totalorder %s13_s16, 5   ;;  %s1399_s13 = smov %s1287_s20 }
 0x15c   : > { %s1400_s14 = smov %s1224_s15  ;;  %s1401_s15 = smov %s1403_s17 }
 0x15d   :  { %12 = sbr.rel (!%p10_p12) target bundleno = 3 (0x3), region = 113 }

// kernel: generator_forward.35
= control target key start
LH: loop header
LB: loop body
LE: loop exit
PB: predicated region body
PF: predicated region fallthrough
CT: control target
= control target key end

     0   :  { %s458_s9 = smov 0   ;;  %s460_s10 = smov 0   ;;  %s516_s0 = inlined_call_operand.vmem [shape: bf16[2,16,256], index: 0, kind: input, shape index: {}]   ;;  %s517_s1 = inlined_call_operand.vmem [shape: f32[2,1,256], index: 1, kind: output, shape index: {0}]   ;;  %s518_s2 = inlined_call_operand.vmem [shape: f32[2,1,256], index: 2, kind: output, shape index: {1}]  }
   0x1   :  { %s462_s11 = smov 0  }
   0x2 LB: > { %s25_s12 = sadd.s32 1, %s435_s10  ;;  %p383_p0 = scmp.ge.s32.totalorder %s439_s11, 1  ;;  %s439_s11 = sphi %s462_s11, %s13_s11   ;;  %s435_s10 = sphi %s460_s10, %s522_s10   ;;  %s431_s9 = sphi %s458_s9, %s521_s9  }
   0x3   : > { %p27_p1 = scmp.ge.s32.totalorder %s25_s12, 2  ;;  %p135_p2 = scmp.lt.s32.totalorder %s439_s11, 3 }
   0x5   : > { %s524_s12 = smov (%p27_p1, %s25_s12), 0  ;;  %p136_p3 = pnand %p383_p0, %p135_p2 }
   0x6   : > { %p166_p4 = scmp.lt.s32.totalorder (!%p136_p3), %s431_s9, 1  ;;  %v188_v0 = vlaneseq (!%p136_p3)  ;;  %v441_v2 = vmov (!%p136_p3), 0.0   ;;  %v442_v21 = vmov (!%p136_p3), 1966171168  }
   0x7   : > { %139 = sbr.rel (%p136_p3) target bundleno = 46 (0x2e), region = 24  ;;  %v219_v22 = vunpack.c.l.s4 (!%p136_p3), %v442_v21 }
   0x8   : > { %vm476_vm0 = vcmp.lt.s32.totalorder (!%p136_p3), %v188_v0, 256  ;;  %v222_v32 = vshrl.u32 (!%p136_p3), %v188_v0, 7 }
   0x9   : > { %v220_v31 = vunpack.c.0.s8 (!%p136_p3), %v219_v22 }
   0xb   : > { %v223_v41 = vsub.s32 (!%p136_p3), %v220_v31, %v222_v32 }
   0xe   : > { %s526_s9 = smov (!%p166_p4, %s431_s9), 1 }
   0xf   : > { %s390_s13 = sshll.u32 %s526_s9, 4  ;;  %s386_s14 = sshll.u32 %s526_s9, 1 }
  0x10   : > { %s174_s17 = scalar_lea.vmem %s516_s0, %s390_s13  ;;  %s486_s20 = scalar_lea.vmem %s517_s1, %s386_s14 }
  0x11   : > { %192 = vst.msk [vmem:[%s486_s20] sm:$0x3] %vm476_vm0, %v441_v2  ;;  %v194_v3 = vld [vmem:[%s174_s17] sm:$0xff]  ;;  %v195_v4 = vld [vmem:[%s174_s17 + $0x8] sm:$0xff]  ;;  %s494_s23 = scalar_lea.vmem %s518_s2, %s386_s14 }
  0x12   : > { %v196_v5 = vunpack.c.l.bf16 %v194_v3  ;;  %v197_v6 = vunpack.c.h.bf16 %v194_v3  ;;  %v198_v7 = vunpack.c.l.bf16 %v195_v4  ;;  %v199_v8 = vunpack.c.h.bf16 %v195_v4  ;;  %193 = vst.msk [vmem:[%s494_s23] sm:$0x3] %vm476_vm0, %v441_v2 }
  0x14   : > { %v201_v9 = vadd.f32 %v198_v7, %v196_v5  ;;  %v208_v10 = vadd.f32 %v199_v8, %v197_v6  ;;  %v240_v11 = vmul.f32 %v196_v5, %v196_v5  ;;  %v241_v12 = vmul.f32 %v197_v6, %v197_v6 }
  0x15   : > { %v242_v13 = vmul.f32 %v198_v7, %v198_v7  ;;  %v243_v14 = vmul.f32 %v199_v8, %v199_v8 }
  0x16   : > { %v202_v15 = vrot.slane %v201_v9, 4  ;;  %v209_v16 = vrot.slane %v208_v10, 4 }
  0x17   : > { %v244_v17 = vadd.f32 %v242_v13, %v240_v11  ;;  %v251_v18 = vadd.f32 %v243_v14, %v241_v12 }
  0x18   : > { %v203_v19 = vadd.f32 %v202_v15, %v201_v9  ;;  %v210_v20 = vadd.f32 %v209_v16, %v208_v10  ;;  %v200_v48 = vld [vmem:[%s486_s20] sm:$0x3] }
  0x19   : > { %v245_v23 = vrot.slane %v244_v17, 4  ;;  %v252_v24 = vrot.slane %v251_v18, 4  ;;  %v239_v53 = vld [vmem:[%s494_s23] sm:$0x3] }
  0x1a   : > { %v204_v25 = vrot.slane %v203_v19, 2  ;;  %v211_v26 = vrot.slane %v210_v20, 2 }
  0x1b   : > { %v246_v27 = vadd.f32 %v245_v23, %v244_v17  ;;  %v253_v28 = vadd.f32 %v252_v24, %v251_v18 }
  0x1c   : > { %v205_v29 = vadd.f32 %v204_v25, %v203_v19  ;;  %v212_v30 = vadd.f32 %v211_v26, %v210_v20 }
  0x1d   : > { %v247_v33 = vrot.slane %v246_v27, 2  ;;  %v254_v34 = vrot.slane %v253_v28, 2 }
  0x1e   : > { %v206_v35 = vrot.slane %v205_v29, 1  ;;  %v213_v36 = vrot.slane %v212_v30, 1 }
  0x1f   : > { %v248_v37 = vadd.f32 %v247_v33, %v246_v27  ;;  %v255_v38 = vadd.f32 %v254_v34, %v253_v28 }
  0x20   : > { %v207_v39 = vadd.f32 %v206_v35, %v205_v29  ;;  %v214_v40 = vadd.f32 %v213_v36, %v212_v30 }
  0x21   : > { %v249_v42 = vrot.slane %v248_v37, 1  ;;  %v256_v43 = vrot.slane %v255_v38, 1 }
  0x22   : > { %v217_v44 = vcombine.low %v207_v39, %v214_v40 }
  0x23   : > { %v250_v45 = vadd.f32 %v249_v42, %v248_v37  ;;  %v257_v46 = vadd.f32 %v256_v43, %v255_v38 }
  0x24   : > { %v224_v47 = vrot.slane %v217_v44, %v223_v41 }
  0x25   : > { %v260_v49 = vcombine.low %v250_v45, %v257_v46 }
  0x26   : > { %v231_v50 = vrot.slane %v224_v47, %v223_v41 }
  0x27   : > { %v267_v51 = vrot.slane %v260_v49, %v223_v41 }
  0x28   : > { %v233_v52 = vadd.f32 %v231_v50, %v200_v48 }
  0x29   : > { %v274_v54 = vrot.slane %v267_v51, %v223_v41 }
  0x2a   : > { %238 = vst.msk [vmem:[%s486_s20] sm:$0x3] %vm476_vm0, %v233_v52 }
  0x2b   : > { %v276_v55 = vadd.f32 %v274_v54, %v239_v53 }
  0x2d   : > { %277 = vst.msk [vmem:[%s494_s23] sm:$0x3] %vm476_vm0, %v276_v55 }
  0x2e PF: > { %s13_s11 = sadd.s32 1, %s439_s11   ;;  %s521_s9 = smov %s435_s10 }
  0x2f   : > { %p10_p5 = scmp.ge.s32.totalorder %s13_s11, 4   ;;  %s522_s10 = smov %s524_s12 }
  0x31   :  { %12 = sbr.rel (!%p10_p5) target bundleno = 2 (0x2), region = 70 }

// kernel: generator_forward.36
= control target key start
LH: loop header
LB: loop body
LE: loop exit
PB: predicated region body
PF: predicated region fallthrough
CT: control target
= control target key end

     0   :  { %s521_s12 = smov 0   ;;  %s523_s13 = smov 0   ;;  %s568_s0 = inlined_call_operand.vmem [shape: bf16[2,16,256], index: 0, kind: input, shape index: {}]   ;;  %s569_s1 = inlined_call_operand.vmem [shape: f32[2,1,256], index: 1, kind: input, shape index: {}]   ;;  %s570_s2 = inlined_call_operand.vmem [shape: f32[2,1,256], index: 2, kind: input, shape index: {}]   ;;  %s571_s3 = inlined_call_operand.vmem [shape: bf16[2,16,256], index: 3, kind: output, shape index: {}]  }
   0x1   :  { %s525_s14 = smov 0  }
   0x2 LB: > { %s25_s15 = sadd.s32 1, %s495_s13  ;;  %p436_p0 = scmp.ge.s32.totalorder %s499_s14, 1  ;;  %s499_s14 = sphi %s525_s14, %s13_s14   ;;  %s495_s13 = sphi %s523_s13, %s573_s13   ;;  %s491_s12 = sphi %s521_s12, %s572_s12  }
   0x3   : > { %p27_p1 = scmp.ge.s32.totalorder %s25_s15, 2  ;;  %p177_p2 = scmp.lt.s32.totalorder %s499_s14, 3 }
   0x5   : > { %s575_s15 = smov (%p27_p1, %s25_s15), 0  ;;  %p178_p3 = pnand %p436_p0, %p177_p2 }
   0x6   : > { %p220_p4 = scmp.lt.s32.totalorder (!%p178_p3), %s491_s12, 1  ;;  %v263_v5 = vlaneseq (!%p178_p3) }
   0x7   : > { %181 = sbr.rel (%p178_p3) target bundleno = 48 (0x30), region = 32 }
   0x8   : > { %v264_v8 = vshrl.u32 (!%p178_p3), %v263_v5, 7 }
   0xa   : > { %v265_v11 = vsub.s32 (!%p178_p3), 0, %v264_v8  ;;  %v269_v12 = vsub.s32 (!%p178_p3), 1, %v264_v8 }
   0xe   : > { %s577_s12 = smov (!%p220_p4, %s491_s12), 1 }
   0xf   : > { %s439_s16 = sshll.u32 %s577_s12, 1  ;;  %s447_s23 = sshll.u32 %s577_s12, 4 }
  0x10   : > { %s233_s19 = scalar_lea.vmem %s569_s1, %s439_s16  ;;  %s237_s22 = scalar_lea.vmem %s570_s2, %s439_s16 }
  0x11   : > { %v255_v0 = vld [vmem:[%s233_s19] sm:$0x3]  ;;  %s228_s26 = scalar_lea.vmem %s568_s0, %s447_s23  ;;  %s247_s29 = scalar_lea.vmem %s571_s3, %s447_s23 }
  0x12   : > { %v257_v1 = vld [vmem:[%s237_s22] sm:$0x3]  ;;  %v256_v2 = vmul.f32 0.0625, %v255_v0  ;;  %v250_v13 = vld [vmem:[%s228_s26 + $0x8] sm:$0xff] }
  0x13   : > { %v258_v3 = vmul.f32 0.0625, %v257_v1  ;;  %v249_v10 = vld [vmem:[%s228_s26] sm:$0xff]  ;;  %v253_v16 = vunpack.c.l.bf16 %v250_v13  ;;  %v254_v17 = vunpack.c.h.bf16 %v250_v13 }
  0x14   : > { %v259_v4 = vmul.f32 %v256_v2, %v256_v2  ;;  %v251_v14 = vunpack.c.l.bf16 %v249_v10  ;;  %v252_v15 = vunpack.c.h.bf16 %v249_v10  ;;  %v266_v18 = vrot.slane %v256_v2, %v265_v11 }
  0x15   : > { %v270_v19 = vrot.slane %v256_v2, %v269_v12 }
  0x16   : > { %v260_v6 = vsub.f32 %v258_v3, %v259_v4  ;;  %v273_v20 = vsub.f32 %v251_v14, %v266_v18  ;;  %v275_v22 = vsub.f32 %v253_v16, %v266_v18 }
  0x17   : > { %v274_v21 = vsub.f32 %v252_v15, %v270_v19  ;;  %v276_v23 = vsub.f32 %v254_v17, %v270_v19 }
  0x18   : > { %v261_v7 = vmax.f32 %v260_v6, 0.0 }
  0x1a   : > { %v277_v9 = vadd.f32 1e-05, %v261_v7 }
  0x1c   : > { %475 = vrsqrt.f32 %v277_v9 }
  0x26   : > { %v476_v24 = vpop.eup %475 }
  0x27   : > { %v283_v25 = vrot.slane %v476_v24, %v265_v11  ;;  %v287_v26 = vrot.slane %v476_v24, %v269_v12 }
  0x29   : > { %v290_v27 = vmul.f32 %v283_v25, %v273_v20  ;;  %v291_v28 = vmul.f32 %v287_v26, %v274_v21  ;;  %v292_v29 = vmul.f32 %v283_v25, %v275_v22  ;;  %v293_v30 = vmul.f32 %v287_v26, %v276_v23 }
  0x2b   : > { %v294_v31 = vmax.f32 %v290_v27, 0.0  ;;  %v295_v32 = vmax.f32 %v291_v28, 0.0  ;;  %v296_v33 = vmax.f32 %v292_v29, 0.0  ;;  %v297_v34 = vmax.f32 %v293_v30, 0.0 }
  0x2d   : > { %v449_v35 = vpack.c.bf16 %v295_v32, %v294_v31  ;;  %v450_v36 = vpack.c.bf16 %v297_v34, %v296_v33 }
  0x2f   : > { %310 = vst [vmem:[%s247_s29] sm:$0xff] %v449_v35  ;;  %311 = vst [vmem:[%s247_s29 + $0x8] sm:$0xff] %v450_v36 }
  0x30 PF: > { %s13_s14 = sadd.s32 1, %s499_s14   ;;  %s572_s12 = smov %s495_s13 }
  0x31   : > { %p10_p5 = scmp.ge.s32.totalorder %s13_s14, 4   ;;  %s573_s13 = smov %s575_s15 }
  0x33   :  { %12 = sbr.rel (!%p10_p5) target bundleno = 2 (0x2), region = 68 }

// kernel: generator_forward.42
= control target key start
LH: loop header
LB: loop body
LE: loop exit
PB: predicated region body
PF: predicated region fallthrough
CT: control target
= control target key end

     0   :  { %s622_s15 = smov 0   ;;  %s624_s16 = smov 0   ;;  %s669_s0 = inlined_call_operand.vmem [shape: bf16[2,16,256], index: 0, kind: input, shape index: {}]   ;;  %s670_s1 = inlined_call_operand.vmem [shape: bf16[2,16,256], index: 1, kind: input, shape index: {}]   ;;  %s671_s2 = inlined_call_operand.vmem [shape: f32[2,1,256], index: 2, kind: input, shape index: {}]   ;;  %s672_s3 = inlined_call_operand.vmem [shape: f32[2,1,256], index: 3, kind: input, shape index: {}]   ;;  %s673_s4 = inlined_call_operand.vmem [shape: bf16[2,16,256], index: 4, kind: output, shape index: {}]  }
   0x1   :  { %s626_s17 = smov 0  }
   0x2 LB: > { %s26_s18 = sadd.s32 1, %s591_s16  ;;  %p529_p0 = scmp.ge.s32.totalorder %s595_s17, 1  ;;  %s595_s17 = sphi %s626_s17, %s14_s17   ;;  %s591_s16 = sphi %s624_s16, %s675_s16   ;;  %s587_s15 = sphi %s622_s15, %s674_s15  }
   0x3   : > { %p28_p1 = scmp.ge.s32.totalorder %s26_s18, 2  ;;  %p220_p2 = scmp.lt.s32.totalorder %s595_s17, 3 }
   0x5   : > { %s677_s18 = smov (%p28_p1, %s26_s18), 0  ;;  %p221_p3 = pnand %p529_p0, %p220_p2 }
   0x6   : > { %p275_p4 = scmp.lt.s32.totalorder (!%p221_p3), %s587_s15, 1  ;;  %v329_v5 = vlaneseq (!%p221_p3) }
   0x7   : > { %224 = sbr.rel (%p221_p3) target bundleno = 48 (0x30), region = 36 }
   0x8   : > { %v330_v8 = vshrl.u32 (!%p221_p3), %v329_v5, 7 }
   0xa   : > { %v331_v11 = vsub.s32 (!%p221_p3), 0, %v330_v8  ;;  %v335_v12 = vsub.s32 (!%p221_p3), 1, %v330_v8 }
   0xe   : > { %s679_s15 = smov (!%p275_p4, %s587_s15), 1 }
   0xf   : > { %s534_s19 = sshll.u32 %s679_s15, 1  ;;  %s646_s26 = sshll.u32 %s679_s15, 4 }
  0x10   : > { %s299_s22 = scalar_lea.vmem %s671_s2, %s534_s19  ;;  %s303_s25 = scalar_lea.vmem %s672_s3, %s534_s19 }
  0x11   : > { %v321_v0 = vld [vmem:[%s299_s22] sm:$0x3]  ;;  %s283_s29 = scalar_lea.vmem %s669_s0, %s646_s26  ;;  %s294_s6 = scalar_lea.vmem %s670_s1, %s646_s26 }
  0x12   : > { %v323_v1 = vld [vmem:[%s303_s25] sm:$0x3]  ;;  %v322_v2 = vmul.f32 0.0625, %v321_v0  ;;  %v316_v13 = vld [vmem:[%s283_s29 + $0x8] sm:$0xff]  ;;  %s313_s9 = scalar_lea.vmem %s673_s4, %s646_s26 }
  0x13   : > { %v324_v3 = vmul.f32 0.0625, %v323_v1  ;;  %v315_v10 = vld [vmem:[%s283_s29] sm:$0xff]  ;;  %v319_v16 = vunpack.c.l.bf16 %v316_v13  ;;  %v320_v17 = vunpack.c.h.bf16 %v316_v13  ;;  %v361_v21 = vld [vmem:[%s294_s6 + $0x8] sm:$0xff] }
  0x14   : > { %v325_v4 = vmul.f32 %v322_v2, %v322_v2  ;;  %v317_v14 = vunpack.c.l.bf16 %v315_v10  ;;  %v318_v15 = vunpack.c.h.bf16 %v315_v10  ;;  %v332_v18 = vrot.slane %v322_v2, %v331_v11  ;;  %v360_v20 = vld [vmem:[%s294_s6] sm:$0xff] }
  0x15   : > { %v336_v19 = vrot.slane %v322_v2, %v335_v12  ;;  %v362_v27 = vunpack.c.l.bf16 %v360_v20  ;;  %v363_v28 = vunpack.c.h.bf16 %v360_v20  ;;  %v364_v31 = vunpack.c.l.bf16 %v361_v21 }
  0x16   : > { %v326_v6 = vsub.f32 %v324_v3, %v325_v4  ;;  %v339_v22 = vsub.f32 %v317_v14, %v332_v18  ;;  %v341_v24 = vsub.f32 %v319_v16, %v332_v18  ;;  %v365_v32 = vunpack.c.h.bf16 %v361_v21 }
  0x17   : > { %v340_v23 = vsub.f32 %v318_v15, %v336_v19  ;;  %v342_v25 = vsub.f32 %v320_v17, %v336_v19 }
  0x18   : > { %v327_v7 = vmax.f32 %v326_v6, 0.0 }
  0x1a   : > { %v343_v9 = vadd.f32 1e-05, %v327_v7 }
  0x1c   : > { %571 = vrsqrt.f32 %v343_v9 }
  0x26   : > { %v572_v26 = vpop.eup %571 }
  0x27   : > { %v349_v29 = vrot.slane %v572_v26, %v331_v11  ;;  %v353_v30 = vrot.slane %v572_v26, %v335_v12 }
  0x29   : > { %v356_v33 = vmul.f32 %v349_v29, %v339_v22  ;;  %v357_v34 = vmul.f32 %v353_v30, %v340_v23  ;;  %v358_v35 = vmul.f32 %v349_v29, %v341_v24  ;;  %v359_v36 = vmul.f32 %v353_v30, %v342_v25 }
  0x2b   : > { %v366_v37 = vadd.f32 %v362_v27, %v356_v33  ;;  %v367_v38 = vadd.f32 %v363_v28, %v357_v34  ;;  %v368_v39 = vadd.f32 %v364_v31, %v358_v35  ;;  %v369_v40 = vadd.f32 %v365_v32, %v359_v36 }
  0x2d   : > { %v545_v41 = vpack.c.bf16 %v367_v38, %v366_v37  ;;  %v546_v42 = vpack.c.bf16 %v369_v40, %v368_v39 }
  0x2f   : > { %382 = vst [vmem:[%s313_s9] sm:$0xff] %v545_v41  ;;  %383 = vst [vmem:[%s313_s9 + $0x8] sm:$0xff] %v546_v42 }
  0x30 PF: > { %s14_s17 = sadd.s32 1, %s595_s17   ;;  %s674_s15 = smov %s591_s16 }
  0x31   : > { %p11_p5 = scmp.ge.s32.totalorder %s14_s17, 4   ;;  %s675_s16 = smov %s677_s18 }
  0x33   :  { %13 = sbr.rel (!%p11_p5) target bundleno = 2 (0x2), region = 75 }

// kernel: generator_forward.37
= control target key start
LH: loop header
LB: loop body
LE: loop exit
PB: predicated region body
PF: predicated region fallthrough
CT: control target
= control target key end

     0   :  { %s1785_s12 = smov 0   ;;  %s1787_s13 = smov 0   ;;  %s1979_s0 = inlined_call_operand.vmem [shape: bf16[32,2304], index: 0, kind: input, shape index: {}]   ;;  %s1980_s1 = inlined_call_operand.vmem [shape: bf16[2304,256], index: 1, kind: input, shape index: {}]   ;;  %s1981_s2 = inlined_call_operand.vmem [shape: f32[1,256], index: 2, kind: input, shape index: {}]   ;;  %s1982_s3 = inlined_call_operand.vmem [shape: bf16[32,256], index: 3, kind: output, shape index: {}]  }
   0x1   :  { %s1789_s14 = smov 0   ;;  %s1791_s15 = smov 0  }
   0x2   :  { %s1793_s16 = smov 0  }
   0x3 LB: > { %s25_s17 = sadd.s32 1, %s1758_s15  ;;  %p48_p1 = scmp.ne.s32.totalorder %s1750_s13, %s1746_s12  ;;  %s1762_s16 = sphi %s1793_s16, %s13_s16   ;;  %s1758_s15 = sphi %s1791_s15, %s1986_s15   ;;  %s1754_s14 = sphi %s1789_s14, %s1985_s14   ;;  %s1750_s13 = sphi %s1787_s13, %s1984_s13   ;;  %s1746_s12 = sphi %s1785_s12, %s1983_s12  }
   0x4   : > { %p26_p0 = scmp.ge.s32.totalorder %s25_s17, 3  ;;  %p49_p2 = scmp.eq.s32.totalorder %s1762_s16, 0 }
   0x5   : > { %s41_s19 = sadd.s32 1, %s1750_s13  ;;  %p1342_p5 = scmp.ge.s32.totalorder %s1762_s16, 3 }
   0x6   : > { %s1988_s17 = smov (%p26_p0, %s25_s17), 0  ;;  %p50_p3 = por %p49_p2, %p48_p1 }
   0x7   : > { %s37_s18 = ssub.s32 %s1758_s15, %s1988_s17  ;;  %164 = sbr.rel (%p1342_p5) target bundleno = 25 (0x19), region = 20 }
   0x8   : > { %p39_p4 = scmp.eq.s32.totalorder %s37_s18, 0 }
   0xa   : > { %s1820_s20 = scalar_select %p39_p4, %s1750_s13, %s41_s19  }
   0xe   : > { %167 = sbr.rel (!%p50_p3) target bundleno = 25 (0x19), region = 24  ;;  %s169_s21 = sand.u32 (%p50_p3), 1, %s1750_s13  }
   0xf   : > { %s1465_s22 = smul.u32 (%p50_p3), 24, %s1758_s15 }
  0x10   : > { %s1519_s23 = smul.u32 (%p50_p3), 96, %s169_s21 }
  0x11   : > { %s177_s26 = scalar_lea.vmem (%p50_p3), %s1979_s0, %s1465_s22 }
  0x12   : > { %v190_v0 = vld [vmem:[%s177_s26] sm:$0xff] (%p50_p3)  ;;  %v192_v1 = vld [vmem:[%s177_s26 + $0x8] sm:$0xff] (%p50_p3)  ;;  %v194_v2 = vld [vmem:[%s177_s26 + $0x10] sm:$0xff] (%p50_p3)  ;;  %s171_s27 = scalar_lea.vmem (%p50_p3), [#allocation3], %s1519_s23 }
  0x13   : > { %191 = vst [vmem:[%s171_s27] sm:$0xff] (%p50_p3), %v190_v0  ;;  %193 = vst [vmem:[%s171_s27 + $0x8] sm:$0xff] (%p50_p3), %v192_v1  ;;  %v196_v3 = vld [vmem:[%s177_s26 + $0x48] sm:$0xff] (%p50_p3)  ;;  %v198_v4 = vld [vmem:[%s177_s26 + $0x50] sm:$0xff] (%p50_p3) }
  0x14   : > { %195 = vst [vmem:[%s171_s27 + $0x10] sm:$0xff] (%p50_p3), %v194_v2  ;;  %v200_v5 = vld [vmem:[%s177_s26 + $0x58] sm:$0xff] (%p50_p3)  ;;  %197 = vst [vmem:[%s171_s27 + $0x18] sm:$0xff] (%p50_p3), %v196_v3  ;;  %v202_v6 = vld [vmem:[%s177_s26 + $0x90] sm:$0xff] (%p50_p3) }
  0x15   : > { %199 = vst [vmem:[%s171_s27 + $0x20] sm:$0xff] %v198_v4  ;;  %201 = vst [vmem:[%s171_s27 + $0x28] sm:$0xff] %v200_v5  ;;  %v204_v7 = vld [vmem:[%s177_s26 + $0x98] sm:$0xff]  ;;  %v206_v8 = vld [vmem:[%s177_s26 + $0xa0] sm:$0xff] }
  0x16   : > { %203 = vst [vmem:[%s171_s27 + $0x30] sm:$0xff] %v202_v6  ;;  %205 = vst [vmem:[%s171_s27 + $0x38] sm:$0xff] %v204_v7  ;;  %v208_v9 = vld [vmem:[%s177_s26 + $0xd8] sm:$0xff]  ;;  %v210_v10 = vld [vmem:[%s177_s26 + $0xe0] sm:$0xff] }
  0x17   : > { %207 = vst [vmem:[%s171_s27 + $0x40] sm:$0xff] %v206_v8  ;;  %v212_v11 = vld [vmem:[%s177_s26 + $0xe8] sm:$0xff]  ;;  %209 = vst [vmem:[%s171_s27 + $0x48] sm:$0xff] %v208_v9 }
  0x18   : > { %211 = vst [vmem:[%s171_s27 + $0x50] sm:$0xff] %v210_v10  ;;  %213 = vst [vmem:[%s171_s27 + $0x58] sm:$0xff] %v212_v11 }
  0x19 PF: > { %p1344_p6 = scmp.ge.s32.totalorder %s1762_s16, 1  ;;  %p233_p7 = scmp.lt.s32.totalorder %s1762_s16, 4 }
  0x1b   : > { %p234_p8 = pnand %p1344_p6, %p233_p7 }
  0x1c   : > { %s240_s28 = sand.u32 (!%p234_p8), 1, %s1746_s12   ;;  %s284_s29 = smul.u32 (!%p234_p8), 96, %s1754_s14 }
  0x1d   : > { %237 = sbr.rel (%p234_p8) target bundleno = 405 (0x195), region = 51  ;;  %p1347_p10 = scmp.ne.s32.totalorder (!%p234_p8), %s1754_s14, 0 }
  0x1e   : > { %s1520_s30 = smul.u32 (!%p234_p8), 96, %s240_s28  ;;  %p286_p9 = scmp.lt.s32.totalorder (!%p234_p8), %s284_s29, 287 }
  0x20   : > { %s1837_s8 = scalar_lea.vmem (!%p234_p8), [#allocation3], %s1520_s30 }
  0x24   : > { %s1990_s29 = smov (!%p286_p9, %s284_s29), 287  ;;  %316 = sbr.rel (%p1347_p10) target bundleno = 43 (0x2b), region = 59 }
  0x25   : > { %s1466_s4 = sshll.u32 %s1990_s29, 3  ;;  %v1764_v12 = vmov (!%p1347_p10), 0.0  }
  0x26   : > { %s1835_s7 = scalar_lea.vmem %s1980_s1, %s1466_s4  ;;  %317 = vst [vmem:[#allocation2] sm:$0xff] (!%p1347_p10), %v1764_v12  ;;  %318 = vst [vmem:[#allocation2 + $0x8] sm:$0xff] (!%p1347_p10), %v1764_v12 }
  0x27   : > { %319 = vst [vmem:[#allocation2 + $0x10] sm:$0xff] (!%p1347_p10), %v1764_v12  ;;  %320 = vst [vmem:[#allocation2 + $0x18] sm:$0xff] (!%p1347_p10), %v1764_v12 }
  0x28   : > { %321 = vst [vmem:[#allocation2 + $0x20] sm:$0xff] (!%p1347_p10), %v1764_v12  ;;  %322 = vst [vmem:[#allocation2 + $0x28] sm:$0xff] (!%p1347_p10), %v1764_v12 }
  0x29   : > { %323 = vst [vmem:[#allocation2 + $0x30] sm:$0xff] (!%p1347_p10), %v1764_v12  ;;  %324 = vst [vmem:[#allocation2 + $0x38] sm:$0xff] (!%p1347_p10), %v1764_v12 }
  0x2b PF: > { %v1562_v13 = vld [vmem:[%s1835_s7 + $0x4] ss:$8 sps:$4 sm:$0xff]   ;;  %v1566_v15 = vld [vmem:[%s1835_s7] ss:$8 sps:$4 sm:$0xff]   ;;  %v1568_v17 = vld [vmem:[%s1835_s7 + $0x14] ss:$8 sps:$4 sm:$0xff]  }
  0x2c   : > { %v1564_v14 = vld [vmem:[%s1835_s7 + $0x104] ss:$8 sps:$4 sm:$0xff]   ;;  %981 = vmatprep.subr.bf16.mxu1 %v1562_v13  ;;  %v1567_v16 = vld [vmem:[%s1835_s7 + $0x100] ss:$8 sps:$4 sm:$0xff]   ;;  %v1570_v18 = vld [vmem:[%s1835_s7 + $0x114] ss:$8 sps:$4 sm:$0xff]  }
  0x2d   : > { %1034 = vmatprep.subr.bf16.mxu0 %v1564_v14  ;;  %982 = vmatpush1.bf16.msra.mxu1 %v1566_v15  ;;  %v1572_v19 = vld [vmem:[%s1835_s7 + $0x10] ss:$8 sps:$4 sm:$0xff]   ;;  %v1574_v21 = vld [vmem:[%s1835_s7 + $0x24] ss:$8 sps:$4 sm:$0xff]   ;;  %v1578_v23 = vld [vmem:[%s1835_s7 + $0x20] ss:$8 sps:$4 sm:$0xff]  }
  0x2e   : > { %1035 = vmatpush1.bf16.msra.mxu0 %v1567_v16  ;;  %983 = vmatprep.subr.bf16.mxu1 %v1568_v17  ;;  %v1573_v20 = vld [vmem:[%s1835_s7 + $0x110] ss:$8 sps:$4 sm:$0xff]   ;;  %v1576_v22 = vld [vmem:[%s1835_s7 + $0x124] ss:$8 sps:$4 sm:$0xff]   ;;  %v1579_v24 = vld [vmem:[%s1835_s7 + $0x120] ss:$8 sps:$4 sm:$0xff]  }
  0x2f   : > { %1036 = vmatprep.subr.bf16.mxu0 %v1570_v18  ;;  %v1580_v25 = vld [vmem:[%s1835_s7 + $0x34] ss:$8 sps:$4 sm:$0xff]   ;;  %v1584_v27 = vld [vmem:[%s1835_s7 + $0x30] ss:$8 sps:$4 sm:$0xff]   ;;  %v1586_v29 = vld [vmem:[%s1835_s7 + $0x44] ss:$8 sps:$4 sm:$0xff]  }
  0x30   : > { %v1582_v26 = vld [vmem:[%s1835_s7 + $0x134] ss:$8 sps:$4 sm:$0xff]   ;;  %v1585_v28 = vld [vmem:[%s1835_s7 + $0x130] ss:$8 sps:$4 sm:$0xff]   ;;  %v1588_v30 = vld [vmem:[%s1835_s7 + $0x144] ss:$8 sps:$4 sm:$0xff]  }
  0x31   : > { %984 = vmatpush1.bf16.msra.mxu1 %v1572_v19  ;;  %v1590_v31 = vld [vmem:[%s1835_s7 + $0x40] ss:$8 sps:$4 sm:$0xff]   ;;  %v1592_v33 = vld [vmem:[%s1835_s7 + $0x54] ss:$8 sps:$4 sm:$0xff]   ;;  %v1596_v35 = vld [vmem:[%s1835_s7 + $0x50] ss:$8 sps:$4 sm:$0xff]  }
  0x32   : > { %1037 = vmatpush1.bf16.msra.mxu0 %v1573_v20  ;;  %985 = vmatprep.subr.bf16.mxu1 %v1574_v21  ;;  %v1591_v32 = vld [vmem:[%s1835_s7 + $0x140] ss:$8 sps:$4 sm:$0xff]   ;;  %v1594_v34 = vld [vmem:[%s1835_s7 + $0x154] ss:$8 sps:$4 sm:$0xff]   ;;  %v1597_v36 = vld [vmem:[%s1835_s7 + $0x150] ss:$8 sps:$4 sm:$0xff]  }
  0x33   : > { %1038 = vmatprep.subr.bf16.mxu0 %v1576_v22  ;;  %v1598_v37 = vld [vmem:[%s1835_s7 + $0x64] ss:$8 sps:$4 sm:$0xff]   ;;  %v1602_v39 = vld [vmem:[%s1835_s7 + $0x60] ss:$8 sps:$4 sm:$0xff]   ;;  %v1604_v41 = vld [vmem:[%s1835_s7 + $0x74] ss:$8 sps:$4 sm:$0xff]  }
  0x34   : > { %v1600_v38 = vld [vmem:[%s1835_s7 + $0x164] ss:$8 sps:$4 sm:$0xff]   ;;  %v1603_v40 = vld [vmem:[%s1835_s7 + $0x160] ss:$8 sps:$4 sm:$0xff]   ;;  %v1606_v42 = vld [vmem:[%s1835_s7 + $0x174] ss:$8 sps:$4 sm:$0xff]  }
  0x35   : > { %986 = vmatpush1.bf16.msra.mxu1 %v1578_v23  ;;  %v1608_v43 = vld [vmem:[%s1835_s7 + $0x70] ss:$8 sps:$4 sm:$0xff]   ;;  %v1610_v45 = vld [vmem:[%s1835_s7 + $0x84] ss:$8 sps:$4 sm:$0xff]   ;;  %v1614_v47 = vld [vmem:[%s1835_s7 + $0x80] ss:$8 sps:$4 sm:$0xff]  }
  0x36   : > { %1039 = vmatpush1.bf16.msra.mxu0 %v1579_v24  ;;  %987 = vmatprep.subr.bf16.mxu1 %v1580_v25  ;;  %v1609_v44 = vld [vmem:[%s1835_s7 + $0x170] ss:$8 sps:$4 sm:$0xff]   ;;  %v1612_v46 = vld [vmem:[%s1835_s7 + $0x184] ss:$8 sps:$4 sm:$0xff]   ;;  %v1615_v48 = vld [vmem:[%s1835_s7 + $0x180] ss:$8 sps:$4 sm:$0xff]  }
  0x37   : > { %1040 = vmatprep.subr.bf16.mxu0 %v1582_v26  ;;  %v1616_v49 = vld [vmem:[%s1835_s7 + $0x94] ss:$8 sps:$4 sm:$0xff]   ;;  %v1620_v51 = vld [vmem:[%s1835_s7 + $0x90] ss:$8 sps:$4 sm:$0xff]   ;;  %v1622_v53 = vld [vmem:[%s1835_s7 + $0xa4] ss:$8 sps:$4 sm:$0xff]  }
  0x38   : > { %v1618_v50 = vld [vmem:[%s1835_s7 + $0x194] ss:$8 sps:$4 sm:$0xff]   ;;  %v1621_v52 = vld [vmem:[%s1835_s7 + $0x190] ss:$8 sps:$4 sm:$0xff]   ;;  %v1624_v54 = vld [vmem:[%s1835_s7 + $0x1a4] ss:$8 sps:$4 sm:$0xff]  }
  0x39   : > { %988 = vmatpush1.bf16.msra.mxu1 %v1584_v27  ;;  %v1626_v55 = vld [vmem:[%s1835_s7 + $0xa0] ss:$8 sps:$4 sm:$0xff]   ;;  %v1628_v57 = vld [vmem:[%s1835_s7 + $0xb4] ss:$8 sps:$4 sm:$0xff]   ;;  %v1632_v59 = vld [vmem:[%s1835_s7 + $0xb0] ss:$8 sps:$4 sm:$0xff]  }
  0x3a   : > { %1041 = vmatpush1.bf16.msra.mxu0 %v1585_v28  ;;  %989 = vmatprep.subr.bf16.mxu1 %v1586_v29  ;;  %v1627_v56 = vld [vmem:[%s1835_s7 + $0x1a0] ss:$8 sps:$4 sm:$0xff]   ;;  %v1630_v58 = vld [vmem:[%s1835_s7 + $0x1b4] ss:$8 sps:$4 sm:$0xff]   ;;  %v1633_v60 = vld [vmem:[%s1835_s7 + $0x1b0] ss:$8 sps:$4 sm:$0xff]  }
  0x3b   : > { %1042 = vmatprep.subr.bf16.mxu0 %v1588_v30  ;;  %v1634_v61 = vld [vmem:[%s1835_s7 + $0xc4] ss:$8 sps:$4 sm:$0xff]   ;;  %v1638_v1 = vld [vmem:[%s1835_s7 + $0xc0] ss:$8 sps:$4 sm:$0xff]   ;;  %v1640_v3 = vld [vmem:[%s1835_s7 + $0xd4] ss:$8 sps:$4 sm:$0xff]  }
  0x3c   : > { %v1660_v62 = vld [vmem:[%s1837_s8 + $0x4] ss:$24 sps:$4 sm:$0xff]   ;;  %v1639_v2 = vld [vmem:[%s1835_s7 + $0x1c0] ss:$8 sps:$4 sm:$0xff]   ;;  %v1644_v5 = vld [vmem:[%s1835_s7 + $0xd0] ss:$8 sps:$4 sm:$0xff]  }
  0x3d   : > { %990 = vmatpush1.bf16.msra.mxu1 %v1590_v31  ;;  %v1636_v63 = vld [vmem:[%s1835_s7 + $0x1c4] ss:$8 sps:$4 sm:$0xff]   ;;  %1013 = vmatprep.mubr.bf16.mxu1 %v1660_v62  ;;  %v1642_v4 = vld [vmem:[%s1835_s7 + $0x1d4] ss:$8 sps:$4 sm:$0xff]   ;;  %v1645_v6 = vld [vmem:[%s1835_s7 + $0x1d0] ss:$8 sps:$4 sm:$0xff]  }
  0x3e   : > { %1043 = vmatpush1.bf16.msra.mxu0 %v1591_v32  ;;  %991 = vmatprep.subr.bf16.mxu1 %v1592_v33  ;;  %v1663_v0 = vld [vmem:[%s1837_s8 + $0xc] ss:$24 sps:$4 sm:$0xff]   ;;  %v1650_v9 = vld [vmem:[%s1835_s7 + $0xe0] ss:$8 sps:$4 sm:$0xff]   ;;  %v1652_v11 = vld [vmem:[%s1835_s7 + $0xf4] ss:$8 sps:$4 sm:$0xff]  }
  0x3f   : > { %1044 = vmatprep.subr.bf16.mxu0 %v1594_v34  ;;  %1066 = vmatprep.mubr.bf16.mxu0 %v1663_v0  ;;  %v1646_v7 = vld [vmem:[%s1835_s7 + $0xe4] ss:$8 sps:$4 sm:$0xff]   ;;  %v1651_v10 = vld [vmem:[%s1835_s7 + $0x1e0] ss:$8 sps:$4 sm:$0xff]   ;;  %v1654_v12 = vld [vmem:[%s1835_s7 + $0x1f4] ss:$8 sps:$4 sm:$0xff]  }
  0x40   : > { %v1648_v8 = vld [vmem:[%s1835_s7 + $0x1e4] ss:$8 sps:$4 sm:$0xff]   ;;  %v1656_v13 = vld [vmem:[%s1835_s7 + $0xf0] ss:$8 sps:$4 sm:$0xff]   ;;  %v1661_v17 = vld [vmem:[%s1837_s8 + $0x8] ss:$24 sps:$4 sm:$0xff]  }
  0x41   : > { %992 = vmatpush1.bf16.msra.mxu1 %v1596_v35  ;;  %v1657_v14 = vld [vmem:[%s1835_s7 + $0x1f0] ss:$8 sps:$4 sm:$0xff]   ;;  %v1666_v15 = vld [vmem:[%s1835_s7 + $0x204] ss:$8 sps:$4 sm:$0xff]   ;;  %v1664_v18 = vld [vmem:[%s1835_s7 + $0x200] ss:$8 sps:$4 sm:$0xff]  }
  0x42   : > { %1045 = vmatpush1.bf16.msra.mxu0 %v1597_v36  ;;  %993 = vmatprep.subr.bf16.mxu1 %v1598_v37  ;;  %v1658_v16 = vld [vmem:[%s1837_s8] ss:$24 sps:$4 sm:$0xff]   ;;  %v1669_v19 = vld [vmem:[%s1835_s7 + $0x214] ss:$8 sps:$4 sm:$0xff]   ;;  %v1672_v23 = vld [vmem:[%s1835_s7 + $0x224] ss:$8 sps:$4 sm:$0xff]  }
  0x43   : > { %1046 = vmatprep.subr.bf16.mxu0 %v1600_v38  ;;  %v1703_v20 = vld [vmem:[%s1837_s8 + $0x34] ss:$24 sps:$4 sm:$0xff]   ;;  %v1667_v22 = vld [vmem:[%s1835_s7 + $0x210] ss:$8 sps:$4 sm:$0xff]   ;;  %v1670_v26 = vld [vmem:[%s1835_s7 + $0x220] ss:$8 sps:$4 sm:$0xff]  }
  0x44   : > { %v1705_v21 = vld [vmem:[%s1837_s8 + $0x3c] ss:$24 sps:$4 sm:$0xff]   ;;  %v1710_v24 = vld [vmem:[%s1837_s8 + $0x30] ss:$24 sps:$4 sm:$0xff]   ;;  %v1678_v31 = vld [vmem:[%s1835_s7 + $0x244] ss:$8 sps:$4 sm:$0xff]  }
  0x45   : > { %994 = vmatpush1.bf16.msra.mxu1 %v1602_v39  ;;  %v1711_v25 = vld [vmem:[%s1837_s8 + $0x38] ss:$24 sps:$4 sm:$0xff]   ;;  %v1675_v27 = vld [vmem:[%s1835_s7 + $0x234] ss:$8 sps:$4 sm:$0xff]   ;;  %v1676_v32 = vld [vmem:[%s1835_s7 + $0x240] ss:$8 sps:$4 sm:$0xff]  }
  0x46   : > { %1047 = vmatpush1.bf16.msra.mxu0 %v1603_v40  ;;  %995 = vmatprep.subr.bf16.mxu1 %v1604_v41  ;;  %v1720_v28 = vld [vmem:[%s1837_s8 + $0x14] ss:$24 sps:$4 sm:$0xff]   ;;  %v1723_v29 = vld [vmem:[%s1837_s8 + $0x44] ss:$24 sps:$4 sm:$0xff]   ;;  %v1673_v30 = vld [vmem:[%s1835_s7 + $0x230] ss:$8 sps:$4 sm:$0xff]  }
  0x47   : > { %1048 = vmatprep.subr.bf16.mxu0 %v1606_v42  ;;  %v1681_v33 = vld [vmem:[%s1835_s7 + $0x254] ss:$8 sps:$4 sm:$0xff]   ;;  %v1679_v34 = vld [vmem:[%s1835_s7 + $0x250] ss:$8 sps:$4 sm:$0xff]   ;;  %v1684_v35 = vld [vmem:[%s1835_s7 + $0x264] ss:$8 sps:$4 sm:$0xff]  }
  0x48   : > { %v1682_v36 = vld [vmem:[%s1835_s7 + $0x260] ss:$8 sps:$4 sm:$0xff]   ;;  %v1687_v37 = vld [vmem:[%s1835_s7 + $0x274] ss:$8 sps:$4 sm:$0xff]   ;;  %v1685_v38 = vld [vmem:[%s1835_s7 + $0x270] ss:$8 sps:$4 sm:$0xff]  }
  0x49   : > { %996 = vmatpush1.bf16.msra.mxu1 %v1608_v43  ;;  %v1690_v39 = vld [vmem:[%s1835_s7 + $0x284] ss:$8 sps:$4 sm:$0xff]   ;;  %v1688_v40 = vld [vmem:[%s1835_s7 + $0x280] ss:$8 sps:$4 sm:$0xff]   ;;  %v1693_v41 = vld [vmem:[%s1835_s7 + $0x294] ss:$8 sps:$4 sm:$0xff]  }
  0x4a   : > { %1049 = vmatpush1.bf16.msra.mxu0 %v1609_v44  ;;  %997 = vmatprep.subr.bf16.mxu1 %v1610_v45  ;;  %v1691_v42 = vld [vmem:[%s1835_s7 + $0x290] ss:$8 sps:$4 sm:$0xff]   ;;  %v1696_v43 = vld [vmem:[%s1835_s7 + $0x2a4] ss:$8 sps:$4 sm:$0xff]   ;;  %v1694_v44 = vld [vmem:[%s1835_s7 + $0x2a0] ss:$8 sps:$4 sm:$0xff]  }
  0x4b   : > { %1050 = vmatprep.subr.bf16.mxu0 %v1612_v46  ;;  %v1699_v45 = vld [vmem:[%s1835_s7 + $0x2b4] ss:$8 sps:$4 sm:$0xff]   ;;  %v1697_v46 = vld [vmem:[%s1835_s7 + $0x2b0] ss:$8 sps:$4 sm:$0xff]   ;;  %p1456_p11 = scmp.ne.s32.totalorder %s1754_s14, 2 }
  0x4d   : > { %998 = vmatpush1.bf16.msra.mxu1 %v1614_v47  ;;  %v1702_v47 = vld [vmem:[%s1835_s7 + $0x2c4] ss:$8 sps:$4 sm:$0xff]  }
  0x4e   : > { %1051 = vmatpush1.bf16.msra.mxu0 %v1615_v48  ;;  %999 = vmatprep.subr.bf16.mxu1 %v1616_v49  ;;  %v1700_v48 = vld [vmem:[%s1835_s7 + $0x2c0] ss:$8 sps:$4 sm:$0xff]   ;;  %v1709_v49 = vld [vmem:[%s1835_s7 + $0x2d4] ss:$8 sps:$4 sm:$0xff]  }
  0x4f   : > { %1052 = vmatprep.subr.bf16.mxu0 %v1618_v50  ;;  %v1707_v50 = vld [vmem:[%s1835_s7 + $0x2d0] ss:$8 sps:$4 sm:$0xff]  }
  0x51   : > { %1000 = vmatpush1.bf16.msra.mxu1 %v1620_v51  ;;  %v1714_v51 = vld [vmem:[%s1835_s7 + $0x2e4] ss:$8 sps:$4 sm:$0xff]  }
  0x52   : > { %1053 = vmatpush1.bf16.msra.mxu0 %v1621_v52  ;;  %1001 = vmatprep.subr.bf16.mxu1 %v1622_v53  ;;  %v1712_v52 = vld [vmem:[%s1835_s7 + $0x2e0] ss:$8 sps:$4 sm:$0xff]   ;;  %v1717_v53 = vld [vmem:[%s1835_s7 + $0x2f4] ss:$8 sps:$4 sm:$0xff]  }
  0x53   : > { %1054 = vmatprep.subr.bf16.mxu0 %v1624_v54  ;;  %v1715_v54 = vld [vmem:[%s1835_s7 + $0x2f0] ss:$8 sps:$4 sm:$0xff]  }
  0x55   : > { %1002 = vmatpush1.bf16.msra.mxu1 %v1626_v55  ;;  %v1718_v55 = vld [vmem:[%s1837_s8 + $0x10] ss:$24 sps:$4 sm:$0xff]  }
  0x56   : > { %1055 = vmatpush1.bf16.msra.mxu0 %v1627_v56  ;;  %1003 = vmatprep.subr.bf16.mxu1 %v1628_v57  ;;  %v1721_v56 = vld [vmem:[%s1837_s8 + $0x40] ss:$24 sps:$4 sm:$0xff]  }
  0x57   : > { %1056 = vmatprep.subr.bf16.mxu0 %v1630_v58 }
  0x59   : > { %1004 = vmatpush1.bf16.msra.mxu1 %v1632_v59 }
  0x5a   : > { %1057 = vmatpush1.bf16.msra.mxu0 %v1633_v60  ;;  %1005 = vmatprep.subr.bf16.mxu1 %v1634_v61 }
  0x5b   : > { %1058 = vmatprep.subr.bf16.mxu0 %v1636_v63 }
  0x5d   : > { %1006 = vmatpush1.bf16.msra.mxu1 %v1638_v1 }
  0x5e   : > { %1059 = vmatpush1.bf16.msra.mxu0 %v1639_v2  ;;  %1007 = vmatprep.subr.bf16.mxu1 %v1640_v3 }
  0x5f   : > { %1060 = vmatprep.subr.bf16.mxu0 %v1642_v4 }
  0x61   : > { %1008 = vmatpush1.bf16.msra.mxu1 %v1644_v5 }
  0x62   : > { %1061 = vmatpush1.bf16.msra.mxu0 %v1645_v6  ;;  %1009 = vmatprep.subr.bf16.mxu1 %v1646_v7 }
  0x63   : > { %1062 = vmatprep.subr.bf16.mxu0 %v1648_v8 }
  0x65   : > { %1010 = vmatpush1.bf16.msra.mxu1 %v1650_v9  ;;  %v325_v9 = vld [vmem:[#allocation2] sm:$0xff] }
  0x66   : > { %1063 = vmatpush1.bf16.msra.mxu0 %v1651_v10  ;;  %1011 = vmatprep.subr.bf16.mxu1 %v1652_v11  ;;  %v329_v11 = vld [vmem:[#allocation2 + $0x20] sm:$0xff] }
  0x67   : > { %1064 = vmatprep.subr.bf16.mxu0 %v1654_v12 }
  0x69   : > { %1012 = vmatpush1.bf16.msra.mxu1 %v1656_v13 }
  0x6a   : > { %1065 = vmatpush1.bf16.msra.mxu0 %v1657_v14  ;;  %1471 = vmatprep.subr.bf16.mxu1 %v1666_v15 }
  0x6b   : > { %1087 = vmatprep.subr.bf16.mxu0 %v1666_v15  ;;  %v326_v15 = vld [vmem:[#allocation2 + $0x8] sm:$0xff] }
  0x6c   : > { %1014 = vmatmul.mubr.bf16.vlgmr.msra.gmra.mrb[0].mxu1 %v1658_v16 }
  0x6d   : > { %1067 = vmatmul.mubr.bf16.vlgmr.msra.gmra.mrb[0].mxu0 %v1661_v17  ;;  %1487 = vmatpush1.bf16.msra.mxu1 %v1664_v18  ;;  %v330_v17 = vld [vmem:[#allocation2 + $0x28] sm:$0xff] }
  0x6e   : > { %1088 = vmatpush1.bf16.msra.mxu0 %v1664_v18  ;;  %1472 = vmatprep.subr.bf16.mxu1 %v1669_v19 }
  0x6f   : > { %1089 = vmatprep.subr.bf16.mxu0 %v1669_v19  ;;  %1023 = vmatprep.mubr.bf16.mxu1 %v1703_v20 }
  0x70   : > { %1076 = vmatprep.mubr.bf16.mxu0 %v1705_v21  ;;  %v327_v21 = vld [vmem:[#allocation2 + $0x10] sm:$0xff] }
  0x71   : > { %1488 = vmatpush1.bf16.msra.mxu1 %v1667_v22 }
  0x72   : > { %1090 = vmatpush1.bf16.msra.mxu0 %v1667_v22  ;;  %1473 = vmatprep.subr.bf16.mxu1 %v1672_v23 }
  0x73   : > { %1091 = vmatprep.subr.bf16.mxu0 %v1672_v23  ;;  %v331_v23 = vld [vmem:[#allocation2 + $0x30] sm:$0xff] }
  0x74   : > { %1024 = vmatmul.mubr.bf16.gmra.mrb[4].mxu1 %v1710_v24 }
  0x75   : > { %1077 = vmatmul.mubr.bf16.gmra.mrb[4].mxu0 %v1711_v25  ;;  %1489 = vmatpush1.bf16.msra.mxu1 %v1670_v26 }
  0x76   : > { %1092 = vmatpush1.bf16.msra.mxu0 %v1670_v26  ;;  %1474 = vmatprep.subr.bf16.mxu1 %v1675_v27 }
  0x77   : > { %1093 = vmatprep.subr.bf16.mxu0 %v1675_v27  ;;  %1119 = vmatprep.mubr.bf16.mxu0 %v1720_v28 }
  0x78   : > { %1129 = vmatprep.mubr.bf16.mxu1 %v1723_v29  ;;  %v328_v29 = vld [vmem:[#allocation2 + $0x18] sm:$0xff] }
  0x79   : > { %1490 = vmatpush1.bf16.msra.mxu1 %v1673_v30 }
  0x7a   : > { %1094 = vmatpush1.bf16.msra.mxu0 %v1673_v30  ;;  %1475 = vmatprep.subr.bf16.mxu1 %v1678_v31 }
  0x7b   : > { %1095 = vmatprep.subr.bf16.mxu0 %v1678_v31  ;;  %v332_v31 = vld [vmem:[#allocation2 + $0x38] sm:$0xff] }
  0x7d   : > { %1491 = vmatpush1.bf16.msra.mxu1 %v1676_v32 }
  0x7e   : > { %1096 = vmatpush1.bf16.msra.mxu0 %v1676_v32  ;;  %1476 = vmatprep.subr.bf16.mxu1 %v1681_v33 }
  0x7f   : > { %1097 = vmatprep.subr.bf16.mxu0 %v1681_v33 }
  0x81   : > { %1492 = vmatpush1.bf16.msra.mxu1 %v1679_v34 }
  0x82   : > { %1098 = vmatpush1.bf16.msra.mxu0 %v1679_v34  ;;  %1477 = vmatprep.subr.bf16.mxu1 %v1684_v35 }
  0x83   : > { %1099 = vmatprep.subr.bf16.mxu0 %v1684_v35 }
  0x85   : > { %1493 = vmatpush1.bf16.msra.mxu1 %v1682_v36 }
  0x86   : > { %1100 = vmatpush1.bf16.msra.mxu0 %v1682_v36  ;;  %1478 = vmatprep.subr.bf16.mxu1 %v1687_v37 }
  0x87   : > { %1101 = vmatprep.subr.bf16.mxu0 %v1687_v37 }
  0x89   : > { %1494 = vmatpush1.bf16.msra.mxu1 %v1685_v38 }
  0x8a   : > { %1102 = vmatpush1.bf16.msra.mxu0 %v1685_v38  ;;  %1479 = vmatprep.subr.bf16.mxu1 %v1690_v39 }
  0x8b   : > { %1103 = vmatprep.subr.bf16.mxu0 %v1690_v39 }
  0x8d   : > { %1495 = vmatpush1.bf16.msra.mxu1 %v1688_v40 }
  0x8e   : > { %1104 = vmatpush1.bf16.msra.mxu0 %v1688_v40  ;;  %1480 = vmatprep.subr.bf16.mxu1 %v1693_v41 }
  0x8f   : > { %1105 = vmatprep.subr.bf16.mxu0 %v1693_v41  ;;  %v1170_v41 = vlaneseq (!%p1456_p11) }
  0x91   : > { %1496 = vmatpush1.bf16.msra.mxu1 %v1691_v42 }
  0x92   : > { %1106 = vmatpush1.bf16.msra.mxu0 %v1691_v42  ;;  %1481 = vmatprep.subr.bf16.mxu1 %v1696_v43  ;;  %v1171_v42 = vshrl.u32 (!%p1456_p11), %v1170_v41, 7 }
  0x93   : > { %1107 = vmatprep.subr.bf16.mxu0 %v1696_v43  ;;  %v1168_v43 = vld [vmem:[%s1981_s2] sm:$0x3] (!%p1456_p11) }
  0x95   : > { %1497 = vmatpush1.bf16.msra.mxu1 %v1694_v44 }
  0x96   : > { %1108 = vmatpush1.bf16.msra.mxu0 %v1694_v44  ;;  %1482 = vmatprep.subr.bf16.mxu1 %v1699_v45 }
  0x97   : > { %1109 = vmatprep.subr.bf16.mxu0 %v1699_v45 }
  0x99   : > { %1498 = vmatpush1.bf16.msra.mxu1 %v1697_v46 }
  0x9a   : > { %1110 = vmatpush1.bf16.msra.mxu0 %v1697_v46  ;;  %1483 = vmatprep.subr.bf16.mxu1 %v1702_v47  ;;  %v1172_v46 = vsub.s32 (!%p1456_p11), 0, %v1171_v42 }
  0x9b   : > { %1111 = vmatprep.subr.bf16.mxu0 %v1702_v47  ;;  %v1176_v47 = vsub.s32 (!%p1456_p11), 1, %v1171_v42 }
  0x9d   : > { %1499 = vmatpush1.bf16.msra.mxu1 %v1700_v48 }
  0x9e   : > { %1112 = vmatpush1.bf16.msra.mxu0 %v1700_v48  ;;  %1484 = vmatprep.subr.bf16.mxu1 %v1709_v49 }
  0x9f   : > { %1113 = vmatprep.subr.bf16.mxu0 %v1709_v49 }
  0xa1   : > { %1500 = vmatpush1.bf16.msra.mxu1 %v1707_v50 }
  0xa2   : > { %1114 = vmatpush1.bf16.msra.mxu0 %v1707_v50  ;;  %1485 = vmatprep.subr.bf16.mxu1 %v1714_v51 }
  0xa3   : > { %1115 = vmatprep.subr.bf16.mxu0 %v1714_v51  ;;  %v1173_v51 = vrot.slane (!%p1456_p11), %v1168_v43, %v1172_v46 }
  0xa5   : > { %1501 = vmatpush1.bf16.msra.mxu1 %v1712_v52 }
  0xa6   : > { %1116 = vmatpush1.bf16.msra.mxu0 %v1712_v52  ;;  %1486 = vmatprep.subr.bf16.mxu1 %v1717_v53  ;;  %v1177_v52 = vrot.slane (!%p1456_p11), %v1168_v43, %v1176_v47 }
  0xa7   : > { %1117 = vmatprep.subr.bf16.mxu0 %v1717_v53 }
  0xa9   : > { %1502 = vmatpush1.bf16.msra.mxu1 %v1715_v54 }
  0xaa   : > { %1118 = vmatpush1.bf16.msra.mxu0 %v1715_v54 }
  0xac   : > { %1130 = vmatmul.mubr.bf16.vlgmr.msra.gmra.mrb[8].mxu1 %v1721_v56 }
  0xad   : > { %1120 = vmatmul.mubr.bf16.vlgmr.msra.gmra.mrb[0].mxu0 %v1718_v55 }
 0x13f   : > { %v1015_v57 = vpop.f32.mrb[0].mxu1 }
 0x140   : > { %v1017_v58 = vpop.f32.mrb[1].mxu1 }
 0x141   : > { %v1019_v59 = vpop.f32.mrb[2].mxu1 }
 0x142   : > { %v1021_v60 = vpop.f32.mrb[3].mxu1 }
 0x147   : > { %v1025_v61 = vpop.f32.mrb[4].mxu1 }
 0x148   : > { %v1078_v62 = vpop.f32.mrb[4].mxu0  ;;  %v1027_v0 = vpop.f32.mrb[5].mxu1 }
 0x149   : > { %v1079_v63 = vadd.f32 %v1078_v62, %v1025_v61  ;;  %v1080_v1 = vpop.f32.mrb[5].mxu0  ;;  %v1029_v3 = vpop.f32.mrb[6].mxu1 }
 0x14a   : > { %v1081_v2 = vadd.f32 %v1080_v1, %v1027_v0  ;;  %v1082_v4 = vpop.f32.mrb[6].mxu0  ;;  %v1031_v6 = vpop.f32.mrb[7].mxu1 }
 0x14b   : > { %v1083_v5 = vadd.f32 %v1082_v4, %v1029_v3  ;;  %v1084_v7 = vpop.f32.mrb[7].mxu0 }
 0x14c   : > { %v1085_v8 = vadd.f32 %v1084_v7, %v1031_v6 }
 0x17f   : > { %v1131_v12 = vpop.f32.mrb[8].mxu1 }
 0x180   : > { %v1121_v10 = vpop.f32.mrb[0].mxu0  ;;  %v1132_v14 = vadd.f32 %v1131_v12, %v1079_v63  ;;  %v1133_v18 = vpop.f32.mrb[9].mxu1 }
 0x181   : > { %v1503_v13 = vadd.f32 %v1121_v10, %v1015_v57  ;;  %v1123_v16 = vpop.f32.mrb[1].mxu0  ;;  %v1134_v20 = vadd.f32 %v1133_v18, %v1081_v2  ;;  %v1135_v24 = vpop.f32.mrb[10].mxu1 }
 0x182   : > { %v1504_v19 = vadd.f32 %v1123_v16, %v1017_v58  ;;  %v1125_v22 = vpop.f32.mrb[2].mxu0  ;;  %v1144_v26 = vadd.f32 %v1132_v14, %v329_v11  ;;  %v1136_v28 = vadd.f32 %v1135_v24, %v1083_v5  ;;  %v1137_v32 = vpop.f32.mrb[11].mxu1  ;;  %1159 = sbr.rel (%p1456_p11) target bundleno = 405 (0x195), region = 63 }
 0x183   : > { %v1140_v25 = vadd.f32 %v1503_v13, %v325_v9  ;;  %v1505_v27 = vadd.f32 %v1125_v22, %v1019_v59  ;;  %v1127_v30 = vpop.f32.mrb[3].mxu0  ;;  %v1145_v34 = vadd.f32 %v1134_v20, %v330_v17  ;;  %v1138_v36 = vadd.f32 %v1137_v32, %v1085_v8 }
 0x184   : > { %v1141_v33 = vadd.f32 %v1504_v19, %v326_v15  ;;  %v1506_v35 = vadd.f32 %v1127_v30, %v1021_v60  ;;  %1152 = vst [vmem:[#allocation2 + $0x20] sm:$0xff] %v1144_v26  ;;  %v1146_v38 = vadd.f32 %v1136_v28, %v331_v23 }
 0x185   : > { %1148 = vst [vmem:[#allocation2] sm:$0xff] %v1140_v25  ;;  %v1142_v37 = vadd.f32 %v1505_v27, %v327_v21  ;;  %1153 = vst [vmem:[#allocation2 + $0x28] sm:$0xff] %v1145_v34  ;;  %v1147_v40 = vadd.f32 %v1138_v36, %v332_v31 }
 0x186   : > { %1149 = vst [vmem:[#allocation2 + $0x8] sm:$0xff] %v1141_v33  ;;  %v1143_v39 = vadd.f32 %v1506_v35, %v328_v29  ;;  %1154 = vst [vmem:[#allocation2 + $0x30] sm:$0xff] %v1146_v38 }
 0x187   : > { %1150 = vst [vmem:[#allocation2 + $0x10] sm:$0xff] %v1142_v37  ;;  %1155 = vst [vmem:[#allocation2 + $0x38] sm:$0xff] %v1147_v40 }
 0x188   : > { %1151 = vst [vmem:[#allocation2 + $0x18] sm:$0xff] %v1143_v39 }
 0x18b   : > { %v1164_v50 = vld [vmem:[#allocation2 + $0x20] sm:$0xff] }
 0x18c   : > { %v1160_v44 = vld [vmem:[#allocation2] sm:$0xff]  ;;  %v1165_v53 = vld [vmem:[#allocation2 + $0x28] sm:$0xff]  ;;  %v1184_v60 = vadd.f32 %v1173_v51, %v1164_v50 }
 0x18d   : > { %v1161_v45 = vld [vmem:[#allocation2 + $0x8] sm:$0xff]  ;;  %v1166_v54 = vld [vmem:[#allocation2 + $0x30] sm:$0xff]  ;;  %v1180_v56 = vadd.f32 %v1173_v51, %v1160_v44  ;;  %v1185_v61 = vadd.f32 %v1177_v52, %v1165_v53 }
 0x18e   : > { %v1162_v48 = vld [vmem:[#allocation2 + $0x10] sm:$0xff]  ;;  %v1167_v55 = vld [vmem:[#allocation2 + $0x38] sm:$0xff]  ;;  %v1181_v57 = vadd.f32 %v1177_v52, %v1161_v45  ;;  %v1186_v62 = vadd.f32 %v1173_v51, %v1166_v54 }
 0x18f   : > { %v1163_v49 = vld [vmem:[#allocation2 + $0x18] sm:$0xff]  ;;  %v1182_v58 = vadd.f32 %v1173_v51, %v1162_v48  ;;  %v1187_v63 = vadd.f32 %v1177_v52, %v1167_v55  ;;  %v1469_v2 = vpack.c.bf16 %v1185_v61, %v1184_v60 }
 0x190   : > { %v1183_v59 = vadd.f32 %v1177_v52, %v1163_v49  ;;  %v1467_v0 = vpack.c.bf16 %v1181_v57, %v1180_v56 }
 0x191   : > { %v1470_v3 = vpack.c.bf16 %v1187_v63, %v1186_v62  ;;  %1214 = vst [vmem:[%s1982_s3 + $0x10] sm:$0xff] %v1469_v2 }
 0x192   : > { %v1468_v1 = vpack.c.bf16 %v1183_v59, %v1182_v58  ;;  %1212 = vst [vmem:[%s1982_s3] sm:$0xff] %v1467_v0 }
 0x193   : > { %1215 = vst [vmem:[%s1982_s3 + $0x18] sm:$0xff] %v1470_v3 }
 0x194   : > { %1213 = vst [vmem:[%s1982_s3 + $0x8] sm:$0xff] %v1468_v1 }
 0x195 PF: > { %s13_s16 = sadd.s32 1, %s1762_s16   ;;  %s1983_s12 = smov %s1750_s13 }
 0x196   : > { %p10_p12 = scmp.ge.s32.totalorder %s13_s16, 5   ;;  %s1984_s13 = smov %s1820_s20 }
 0x197   : > { %s1985_s14 = smov %s1758_s15  ;;  %s1986_s15 = smov %s1988_s17 }
 0x198   :  { %12 = sbr.rel (!%p10_p12) target bundleno = 3 (0x3), region = 104 }

// kernel: generator_forward.49
= control target key start
LH: loop header
LB: loop body
LE: loop exit
PB: predicated region body
PF: predicated region fallthrough
CT: control target
= control target key end

     0   :  { %s2255_s12 = smov 0   ;;  %s2257_s13 = smov 0   ;;  %s2591_s0 = inlined_call_operand.vmem [shape: bf16[128,2304], index: 0, kind: input, shape index: {}]   ;;  %s2592_s1 = inlined_call_operand.vmem [shape: bf16[2304,128], index: 1, kind: input, shape index: {}]   ;;  %s2593_s2 = inlined_call_operand.vmem [shape: f32[1,128], index: 2, kind: input, shape index: {}]   ;;  %s2594_s3 = inlined_call_operand.vmem [shape: bf16[128,128], index: 3, kind: output, shape index: {}]  }
   0x1   :  { %s2259_s14 = smov 0   ;;  %s2261_s15 = smov 0  }
   0x2   :  { %s2263_s16 = smov 0  }
   0x3 LB: > { %s25_s17 = sadd.s32 1, %s2228_s15  ;;  %p48_p1 = scmp.ne.s32.totalorder %s2220_s13, %s2216_s12  ;;  %s2232_s16 = sphi %s2263_s16, %s13_s16   ;;  %s2228_s15 = sphi %s2261_s15, %s2598_s15   ;;  %s2224_s14 = sphi %s2259_s14, %s2597_s14   ;;  %s2220_s13 = sphi %s2257_s13, %s2596_s13   ;;  %s2216_s12 = sphi %s2255_s12, %s2595_s12  }
   0x4   : > { %p26_p0 = scmp.ge.s32.totalorder %s25_s17, 3  ;;  %p49_p2 = scmp.eq.s32.totalorder %s2232_s16, 0 }
   0x5   : > { %s41_s19 = sadd.s32 1, %s2220_s13  ;;  %p1636_p5 = scmp.ge.s32.totalorder %s2232_s16, 3 }
   0x6   : > { %s2600_s17 = smov (%p26_p0, %s25_s17), 0  ;;  %p50_p3 = por %p49_p2, %p48_p1 }
   0x7   : > { %s37_s18 = ssub.s32 %s2228_s15, %s2600_s17  ;;  %162 = sbr.rel (%p1636_p5) target bundleno = 43 (0x2b), region = 20 }
   0x8   : > { %p39_p4 = scmp.eq.s32.totalorder %s37_s18, 0 }
   0xa   : > { %s2290_s20 = scalar_select %p39_p4, %s2220_s13, %s41_s19  }
   0xe   : > { %165 = sbr.rel (!%p50_p3) target bundleno = 43 (0x2b), region = 24  ;;  %s167_s21 = sand.u32 (%p50_p3), 1, %s2220_s13  }
   0xf   : > { %s1759_s22 = smul.u32 (%p50_p3), 24, %s2228_s15 }
  0x10   : > { %s2031_s23 = smul.u32 (%p50_p3), 384, %s167_s21 }
  0x11   : > { %s2298_s26 = scalar_lea.vmem (%p50_p3), %s2591_s0, %s1759_s22 }
  0x12   : > { %v188_v0 = vld [vmem:[%s2298_s26] sm:$0xff] (%p50_p3)  ;;  %v190_v1 = vld [vmem:[%s2298_s26 + $0x8] sm:$0xff] (%p50_p3)  ;;  %v192_v2 = vld [vmem:[%s2298_s26 + $0x10] sm:$0xff] (%p50_p3)  ;;  %s2303_s27 = scalar_lea.vmem (%p50_p3), [#allocation3], %s2031_s23 }
  0x13   : > { %189 = vst [vmem:[%s2303_s27] sm:$0xff] (%p50_p3), %v188_v0  ;;  %191 = vst [vmem:[%s2303_s27 + $0x8] sm:$0xff] (%p50_p3), %v190_v1  ;;  %v194_v3 = vld [vmem:[%s2298_s26 + $0x48] sm:$0xff] (%p50_p3)  ;;  %v196_v4 = vld [vmem:[%s2298_s26 + $0x50] sm:$0xff] (%p50_p3) }
  0x14   : > { %193 = vst [vmem:[%s2303_s27 + $0x10] sm:$0xff] (%p50_p3), %v192_v2  ;;  %v198_v5 = vld [vmem:[%s2298_s26 + $0x58] sm:$0xff] (%p50_p3)  ;;  %195 = vst [vmem:[%s2303_s27 + $0x18] sm:$0xff] (%p50_p3), %v194_v3  ;;  %v200_v6 = vld [vmem:[%s2298_s26 + $0x90] sm:$0xff] (%p50_p3) }
  0x15   : > { %197 = vst [vmem:[%s2303_s27 + $0x20] sm:$0xff] %v196_v4  ;;  %199 = vst [vmem:[%s2303_s27 + $0x28] sm:$0xff] %v198_v5  ;;  %v202_v7 = vld [vmem:[%s2298_s26 + $0x98] sm:$0xff]  ;;  %v204_v8 = vld [vmem:[%s2298_s26 + $0xa0] sm:$0xff] }
  0x16   : > { %201 = vst [vmem:[%s2303_s27 + $0x30] sm:$0xff] %v200_v6  ;;  %203 = vst [vmem:[%s2303_s27 + $0x38] sm:$0xff] %v202_v7  ;;  %v206_v9 = vld [vmem:[%s2298_s26 + $0xd8] sm:$0xff]  ;;  %v208_v10 = vld [vmem:[%s2298_s26 + $0xe0] sm:$0xff] }
  0x17   : > { %205 = vst [vmem:[%s2303_s27 + $0x40] sm:$0xff] %v204_v8  ;;  %v210_v11 = vld [vmem:[%s2298_s26 + $0xe8] sm:$0xff]  ;;  %207 = vst [vmem:[%s2303_s27 + $0x48] sm:$0xff] %v206_v9  ;;  %v212_v12 = vld [vmem:[%s2298_s26 + $0x120] sm:$0xff] }
  0x18   : > { %209 = vst [vmem:[%s2303_s27 + $0x50] sm:$0xff] %v208_v10  ;;  %211 = vst [vmem:[%s2303_s27 + $0x58] sm:$0xff] %v210_v11  ;;  %v214_v13 = vld [vmem:[%s2298_s26 + $0x128] sm:$0xff]  ;;  %v216_v14 = vld [vmem:[%s2298_s26 + $0x130] sm:$0xff] }
  0x19   : > { %213 = vst [vmem:[%s2303_s27 + $0x60] sm:$0xff] %v212_v12  ;;  %215 = vst [vmem:[%s2303_s27 + $0x68] sm:$0xff] %v214_v13  ;;  %v218_v15 = vld [vmem:[%s2298_s26 + $0x168] sm:$0xff]  ;;  %v220_v16 = vld [vmem:[%s2298_s26 + $0x170] sm:$0xff] }
  0x1a   : > { %217 = vst [vmem:[%s2303_s27 + $0x70] sm:$0xff] %v216_v14  ;;  %v222_v17 = vld [vmem:[%s2298_s26 + $0x178] sm:$0xff]  ;;  %219 = vst [vmem:[%s2303_s27 + $0x78] sm:$0xff] %v218_v15  ;;  %v224_v18 = vld [vmem:[%s2298_s26 + $0x1b0] sm:$0xff] }
  0x1b   : > { %221 = vst [vmem:[%s2303_s27 + $0x80] sm:$0xff] %v220_v16  ;;  %223 = vst [vmem:[%s2303_s27 + $0x88] sm:$0xff] %v222_v17  ;;  %v226_v19 = vld [vmem:[%s2298_s26 + $0x1b8] sm:$0xff]  ;;  %v228_v20 = vld [vmem:[%s2298_s26 + $0x1c0] sm:$0xff] }
  0x1c   : > { %225 = vst [vmem:[%s2303_s27 + $0x90] sm:$0xff] %v224_v18  ;;  %227 = vst [vmem:[%s2303_s27 + $0x98] sm:$0xff] %v226_v19  ;;  %v230_v21 = vld [vmem:[%s2298_s26 + $0x1f8] sm:$0xff]  ;;  %v232_v22 = vld [vmem:[%s2298_s26 + $0x200] sm:$0xff] }
  0x1d   : > { %229 = vst [vmem:[%s2303_s27 + $0xa0] sm:$0xff] %v228_v20  ;;  %v234_v23 = vld [vmem:[%s2298_s26 + $0x208] sm:$0xff]  ;;  %231 = vst [vmem:[%s2303_s27 + $0xa8] sm:$0xff] %v230_v21  ;;  %v236_v24 = vld [vmem:[%s2298_s26 + $0x240] sm:$0xff] }
  0x1e   : > { %233 = vst [vmem:[%s2303_s27 + $0xb0] sm:$0xff] %v232_v22  ;;  %235 = vst [vmem:[%s2303_s27 + $0xb8] sm:$0xff] %v234_v23  ;;  %v238_v25 = vld [vmem:[%s2298_s26 + $0x248] sm:$0xff]  ;;  %v240_v26 = vld [vmem:[%s2298_s26 + $0x250] sm:$0xff] }
  0x1f   : > { %237 = vst [vmem:[%s2303_s27 + $0xc0] sm:$0xff] %v236_v24  ;;  %239 = vst [vmem:[%s2303_s27 + $0xc8] sm:$0xff] %v238_v25  ;;  %v242_v27 = vld [vmem:[%s2298_s26 + $0x288] sm:$0xff]  ;;  %v244_v28 = vld [vmem:[%s2298_s26 + $0x290] sm:$0xff] }
  0x20   : > { %241 = vst [vmem:[%s2303_s27 + $0xd0] sm:$0xff] %v240_v26  ;;  %v246_v29 = vld [vmem:[%s2298_s26 + $0x298] sm:$0xff]  ;;  %243 = vst [vmem:[%s2303_s27 + $0xd8] sm:$0xff] %v242_v27  ;;  %v248_v30 = vld [vmem:[%s2298_s26 + $0x2d0] sm:$0xff] }
  0x21   : > { %245 = vst [vmem:[%s2303_s27 + $0xe0] sm:$0xff] %v244_v28  ;;  %247 = vst [vmem:[%s2303_s27 + $0xe8] sm:$0xff] %v246_v29  ;;  %v250_v31 = vld [vmem:[%s2298_s26 + $0x2d8] sm:$0xff]  ;;  %v252_v32 = vld [vmem:[%s2298_s26 + $0x2e0] sm:$0xff] }
  0x22   : > { %249 = vst [vmem:[%s2303_s27 + $0xf0] sm:$0xff] %v248_v30  ;;  %251 = vst [vmem:[%s2303_s27 + $0xf8] sm:$0xff] %v250_v31  ;;  %v254_v33 = vld [vmem:[%s2298_s26 + $0x318] sm:$0xff]  ;;  %v256_v34 = vld [vmem:[%s2298_s26 + $0x320] sm:$0xff] }
  0x23   : > { %253 = vst [vmem:[%s2303_s27 + $0x100] sm:$0xff] %v252_v32  ;;  %v258_v35 = vld [vmem:[%s2298_s26 + $0x328] sm:$0xff]  ;;  %255 = vst [vmem:[%s2303_s27 + $0x108] sm:$0xff] %v254_v33  ;;  %v260_v36 = vld [vmem:[%s2298_s26 + $0x360] sm:$0xff] }
  0x24   : > { %257 = vst [vmem:[%s2303_s27 + $0x110] sm:$0xff] %v256_v34  ;;  %259 = vst [vmem:[%s2303_s27 + $0x118] sm:$0xff] %v258_v35  ;;  %v262_v37 = vld [vmem:[%s2298_s26 + $0x368] sm:$0xff]  ;;  %v264_v38 = vld [vmem:[%s2298_s26 + $0x370] sm:$0xff] }
  0x25   : > { %261 = vst [vmem:[%s2303_s27 + $0x120] sm:$0xff] %v260_v36  ;;  %263 = vst [vmem:[%s2303_s27 + $0x128] sm:$0xff] %v262_v37  ;;  %v266_v39 = vld [vmem:[%s2298_s26 + $0x3a8] sm:$0xff]  ;;  %v268_v40 = vld [vmem:[%s2298_s26 + $0x3b0] sm:$0xff] }
  0x26   : > { %265 = vst [vmem:[%s2303_s27 + $0x130] sm:$0xff] %v264_v38  ;;  %v270_v41 = vld [vmem:[%s2298_s26 + $0x3b8] sm:$0xff]  ;;  %267 = vst [vmem:[%s2303_s27 + $0x138] sm:$0xff] %v266_v39  ;;  %v272_v42 = vld [vmem:[%s2298_s26 + $0x3f0] sm:$0xff] }
  0x27   : > { %269 = vst [vmem:[%s2303_s27 + $0x140] sm:$0xff] %v268_v40  ;;  %271 = vst [vmem:[%s2303_s27 + $0x148] sm:$0xff] %v270_v41  ;;  %v274_v43 = vld [vmem:[%s2298_s26 + $0x3f8] sm:$0xff]  ;;  %v276_v44 = vld [vmem:[%s2298_s26 + $0x400] sm:$0xff] }
  0x28   : > { %273 = vst [vmem:[%s2303_s27 + $0x150] sm:$0xff] %v272_v42  ;;  %275 = vst [vmem:[%s2303_s27 + $0x158] sm:$0xff] %v274_v43  ;;  %v278_v45 = vld [vmem:[%s2298_s26 + $0x438] sm:$0xff]  ;;  %v280_v46 = vld [vmem:[%s2298_s26 + $0x440] sm:$0xff] }
  0x29   : > { %277 = vst [vmem:[%s2303_s27 + $0x160] sm:$0xff] %v276_v44  ;;  %v282_v47 = vld [vmem:[%s2298_s26 + $0x448] sm:$0xff]  ;;  %279 = vst [vmem:[%s2303_s27 + $0x168] sm:$0xff] %v278_v45 }
  0x2a   : > { %281 = vst [vmem:[%s2303_s27 + $0x170] sm:$0xff] %v280_v46  ;;  %283 = vst [vmem:[%s2303_s27 + $0x178] sm:$0xff] %v282_v47 }
  0x2b PF: > { %p1638_p6 = scmp.ge.s32.totalorder %s2232_s16, 1  ;;  %p300_p7 = scmp.lt.s32.totalorder %s2232_s16, 4 }
  0x2d   : > { %p301_p8 = pnand %p1638_p6, %p300_p7 }
  0x2e   : > { %s307_s28 = sand.u32 (!%p301_p8), 1, %s2216_s12   ;;  %s346_s29 = smul.u32 (!%p301_p8), 96, %s2224_s14 }
  0x2f   : > { %304 = sbr.rel (%p301_p8) target bundleno = 421 (0x1a5), region = 51  ;;  %p1640_p10 = scmp.ne.s32.totalorder (!%p301_p8), %s2224_s14, 0 }
  0x30   : > { %s2032_s30 = smul.u32 (!%p301_p8), 384, %s307_s28  ;;  %p347_p9 = scmp.lt.s32.totalorder (!%p301_p8), %s346_s29, 287 }
  0x32   : > { %s2407_s8 = scalar_lea.vmem (!%p301_p8), [#allocation3], %s2032_s30 }
  0x36   : > { %s2602_s29 = smov (!%p347_p9, %s346_s29), 287  ;;  %371 = sbr.rel (%p1640_p10) target bundleno = 64 (0x40), region = 59 }
  0x37   : > { %s1639_s4 = sshll.u32 %s2602_s29, 2  ;;  %v2234_v48 = vmov (!%p1640_p10), 0.0  }
  0x38   : > { %s2405_s7 = scalar_lea.vmem %s2592_s1, %s1639_s4  ;;  %372 = vst [vmem:[#allocation2] sm:$0xff] (!%p1640_p10), %v2234_v48  ;;  %373 = vst [vmem:[#allocation2 + $0x8] sm:$0xff] (!%p1640_p10), %v2234_v48 }
  0x39   : > { %374 = vst [vmem:[#allocation2 + $0x10] sm:$0xff] (!%p1640_p10), %v2234_v48  ;;  %375 = vst [vmem:[#allocation2 + $0x18] sm:$0xff] (!%p1640_p10), %v2234_v48 }
  0x3a   : > { %376 = vst [vmem:[#allocation2 + $0x20] sm:$0xff] (!%p1640_p10), %v2234_v48  ;;  %377 = vst [vmem:[#allocation2 + $0x28] sm:$0xff] (!%p1640_p10), %v2234_v48 }
  0x3b   : > { %378 = vst [vmem:[#allocation2 + $0x30] sm:$0xff] (!%p1640_p10), %v2234_v48  ;;  %379 = vst [vmem:[#allocation2 + $0x38] sm:$0xff] (!%p1640_p10), %v2234_v48 }
  0x3c   : > { %380 = vst [vmem:[#allocation2 + $0x40] sm:$0xff] (!%p1640_p10), %v2234_v48  ;;  %381 = vst [vmem:[#allocation2 + $0x48] sm:$0xff] (!%p1640_p10), %v2234_v48 }
  0x3d   : > { %382 = vst [vmem:[#allocation2 + $0x50] sm:$0xff] %v2234_v48  ;;  %383 = vst [vmem:[#allocation2 + $0x58] sm:$0xff] %v2234_v48 }
  0x3e   : > { %384 = vst [vmem:[#allocation2 + $0x60] sm:$0xff] %v2234_v48  ;;  %385 = vst [vmem:[#allocation2 + $0x68] sm:$0xff] %v2234_v48 }
  0x3f   : > { %386 = vst [vmem:[#allocation2 + $0x70] sm:$0xff] %v2234_v48  ;;  %387 = vst [vmem:[#allocation2 + $0x78] sm:$0xff] %v2234_v48 }
  0x40 PF: > { %v2074_v49 = vld [vmem:[%s2405_s7 + $0x40] sm:$0xff]   ;;  %v2076_v51 = vld [vmem:[%s2405_s7 + $0x48] sm:$0xff]   ;;  %v2078_v53 = vld [vmem:[%s2405_s7 + $0x50] sm:$0xff]   ;;  %p1737_p11 = scmp.ne.s32.totalorder %s2224_s14, 2 }
  0x41   : > { %v2075_v50 = vld [vmem:[%s2405_s7] sm:$0xff]   ;;  %1823 = vmatprep.subr.bf16.mxu0 %v2074_v49  ;;  %2015 = vmatprep.subr.bf16.mxu1 %v2074_v49  ;;  %v2077_v52 = vld [vmem:[%s2405_s7 + $0x8] sm:$0xff]   ;;  %v2079_v54 = vld [vmem:[%s2405_s7 + $0x10] sm:$0xff]  }
  0x42   : > { %1824 = vmatpush3.bf16.msra.mxu0 %v2075_v50  ;;  %2023 = vmatpush3.bf16.msra.mxu1 %v2075_v50  ;;  %v2080_v55 = vld [vmem:[%s2405_s7 + $0x58] sm:$0xff]   ;;  %v2082_v57 = vld [vmem:[%s2405_s7 + $0x60] sm:$0xff]   ;;  %v2084_v59 = vld [vmem:[%s2405_s7 + $0x68] sm:$0xff]  }
  0x43   : > { %1825 = vmatprep.subr.bf16.mxu0 %v2076_v51  ;;  %2016 = vmatprep.subr.bf16.mxu1 %v2076_v51  ;;  %v2081_v56 = vld [vmem:[%s2405_s7 + $0x18] sm:$0xff]   ;;  %v2083_v58 = vld [vmem:[%s2405_s7 + $0x20] sm:$0xff]   ;;  %v2085_v62 = vld [vmem:[%s2405_s7 + $0x28] sm:$0xff]  }
  0x44   : > { %v2092_v60 = vld [vmem:[%s2407_s8 + $0x4] ss:$24 sps:$4 sm:$0xff]   ;;  %v2086_v63 = vld [vmem:[%s2405_s7 + $0x70] sm:$0xff]   ;;  %v2090_v3 = vld [vmem:[%s2407_s8] ss:$24 sps:$4 sm:$0xff]  }
  0x45   : > { %v2095_v61 = vld [vmem:[%s2407_s8 + $0xc4] ss:$24 sps:$4 sm:$0xff]   ;;  %1108 = vmatprep.mubr.bf16.mxu0 %v2092_v60  ;;  %v2087_v0 = vld [vmem:[%s2405_s7 + $0x30] sm:$0xff]   ;;  %v2093_v4 = vld [vmem:[%s2407_s8 + $0xc0] ss:$24 sps:$4 sm:$0xff]  }
  0x46   : > { %1826 = vmatpush3.bf16.msra.mxu0 %v2077_v52  ;;  %2024 = vmatpush3.bf16.msra.mxu1 %v2077_v52  ;;  %v2088_v1 = vld [vmem:[%s2405_s7 + $0x78] sm:$0xff]   ;;  %v2096_v5 = vld [vmem:[%s2405_s7 + $0xc0] sm:$0xff]   ;;  %v2100_v9 = vld [vmem:[%s2405_s7 + $0xc8] sm:$0xff]  }
  0x47   : > { %1827 = vmatprep.subr.bf16.mxu0 %v2078_v53  ;;  %2017 = vmatprep.subr.bf16.mxu1 %v2078_v53  ;;  %v2089_v2 = vld [vmem:[%s2405_s7 + $0x38] sm:$0xff]   ;;  %v2097_v6 = vld [vmem:[%s2405_s7 + $0x140] sm:$0xff]   ;;  %v2101_v10 = vld [vmem:[%s2405_s7 + $0x148] sm:$0xff]  }
  0x48   : > { %1140 = vmatprep.mubr.bf16.mxu1 %v2095_v61  ;;  %v2098_v7 = vld [vmem:[%s2405_s7 + $0x80] sm:$0xff]   ;;  %v2104_v11 = vld [vmem:[%s2407_s8 + $0x34] ss:$24 sps:$4 sm:$0xff]   ;;  %v2108_v16 = vld [vmem:[%s2407_s8 + $0x30] ss:$24 sps:$4 sm:$0xff]  }
  0x49   : > { %v2099_v8 = vld [vmem:[%s2405_s7 + $0x100] sm:$0xff]   ;;  %v2102_v12 = vld [vmem:[%s2405_s7 + $0x88] sm:$0xff]   ;;  %v2110_v15 = vld [vmem:[%s2405_s7 + $0xd0] sm:$0xff]  }
  0x4a   : > { %1828 = vmatpush3.bf16.msra.mxu0 %v2079_v54  ;;  %2025 = vmatpush3.bf16.msra.mxu1 %v2079_v54  ;;  %v2106_v13 = vld [vmem:[%s2407_s8 + $0xf4] ss:$24 sps:$4 sm:$0xff]   ;;  %v2109_v18 = vld [vmem:[%s2407_s8 + $0xf0] ss:$24 sps:$4 sm:$0xff]   ;;  %v2114_v21 = vld [vmem:[%s2405_s7 + $0xd8] sm:$0xff]  }
  0x4b   : > { %1829 = vmatprep.subr.bf16.mxu0 %v2080_v55  ;;  %2018 = vmatprep.subr.bf16.mxu1 %v2080_v55  ;;  %v2103_v14 = vld [vmem:[%s2405_s7 + $0x108] sm:$0xff]   ;;  %v2111_v17 = vld [vmem:[%s2405_s7 + $0x150] sm:$0xff]   ;;  %v2115_v22 = vld [vmem:[%s2405_s7 + $0x158] sm:$0xff]  }
  0x4c   : > { %v2112_v19 = vld [vmem:[%s2405_s7 + $0x90] sm:$0xff]   ;;  %v2118_v23 = vld [vmem:[%s2407_s8 + $0x64] ss:$24 sps:$4 sm:$0xff]   ;;  %v2122_v28 = vld [vmem:[%s2407_s8 + $0x60] ss:$24 sps:$4 sm:$0xff]  }
  0x4d   : > { %v2113_v20 = vld [vmem:[%s2405_s7 + $0x110] sm:$0xff]   ;;  %v2116_v24 = vld [vmem:[%s2405_s7 + $0x98] sm:$0xff]   ;;  %v2124_v27 = vld [vmem:[%s2405_s7 + $0xe0] sm:$0xff]  }
  0x4e   : > { %1830 = vmatpush3.bf16.msra.mxu0 %v2081_v56  ;;  %2026 = vmatpush3.bf16.msra.mxu1 %v2081_v56  ;;  %v2120_v25 = vld [vmem:[%s2407_s8 + $0x124] ss:$24 sps:$4 sm:$0xff]   ;;  %v2123_v29 = vld [vmem:[%s2407_s8 + $0x120] ss:$24 sps:$4 sm:$0xff]   ;;  %v2128_v33 = vld [vmem:[%s2405_s7 + $0xe8] sm:$0xff]  }
  0x4f   : > { %1831 = vmatprep.subr.bf16.mxu0 %v2082_v57  ;;  %2019 = vmatprep.subr.bf16.mxu1 %v2082_v57  ;;  %v2117_v26 = vld [vmem:[%s2405_s7 + $0x118] sm:$0xff]   ;;  %v2125_v30 = vld [vmem:[%s2405_s7 + $0x160] sm:$0xff]   ;;  %v2129_v34 = vld [vmem:[%s2405_s7 + $0x168] sm:$0xff]  }
  0x50   : > { %v2126_v31 = vld [vmem:[%s2405_s7 + $0xa0] sm:$0xff]   ;;  %v2132_v35 = vld [vmem:[%s2407_s8 + $0x94] ss:$24 sps:$4 sm:$0xff]   ;;  %v2136_v40 = vld [vmem:[%s2407_s8 + $0x90] ss:$24 sps:$4 sm:$0xff]  }
  0x51   : > { %v2127_v32 = vld [vmem:[%s2405_s7 + $0x120] sm:$0xff]   ;;  %v2134_v36 = vld [vmem:[%s2407_s8 + $0x154] ss:$24 sps:$4 sm:$0xff]   ;;  %v2137_v41 = vld [vmem:[%s2407_s8 + $0x150] ss:$24 sps:$4 sm:$0xff]  }
  0x52   : > { %1832 = vmatpush3.bf16.msra.mxu0 %v2083_v58  ;;  %2027 = vmatpush3.bf16.msra.mxu1 %v2083_v58  ;;  %v2130_v37 = vld [vmem:[%s2405_s7 + $0xa8] sm:$0xff]   ;;  %v2138_v39 = vld [vmem:[%s2405_s7 + $0xf0] sm:$0xff]   ;;  %v2142_v45 = vld [vmem:[%s2405_s7 + $0xf8] sm:$0xff]  }
  0x53   : > { %1833 = vmatprep.subr.bf16.mxu0 %v2084_v59  ;;  %2020 = vmatprep.subr.bf16.mxu1 %v2084_v59  ;;  %v2131_v38 = vld [vmem:[%s2405_s7 + $0x128] sm:$0xff]   ;;  %v2139_v42 = vld [vmem:[%s2405_s7 + $0x170] sm:$0xff]   ;;  %v2143_v46 = vld [vmem:[%s2405_s7 + $0x178] sm:$0xff]  }
  0x54   : > { %v2140_v43 = vld [vmem:[%s2405_s7 + $0xb0] sm:$0xff]   ;;  %v2144_v47 = vld [vmem:[%s2405_s7 + $0xb8] sm:$0xff]   ;;  %v2148_v49 = vld [vmem:[%s2407_s8 + $0xc] ss:$24 sps:$4 sm:$0xff]  }
  0x55   : > { %v2141_v44 = vld [vmem:[%s2405_s7 + $0x130] sm:$0xff]   ;;  %v2145_v48 = vld [vmem:[%s2405_s7 + $0x138] sm:$0xff]   ;;  %v2146_v50 = vld [vmem:[%s2407_s8 + $0x8] ss:$24 sps:$4 sm:$0xff]  }
  0x56   : > { %1834 = vmatpush3.bf16.msra.mxu0 %v2085_v62  ;;  %2028 = vmatpush3.bf16.msra.mxu1 %v2085_v62  ;;  %v2151_v51 = vld [vmem:[%s2407_s8 + $0x14] ss:$24 sps:$4 sm:$0xff]   ;;  %v2149_v52 = vld [vmem:[%s2407_s8 + $0x10] ss:$24 sps:$4 sm:$0xff]   ;;  %v2154_v54 = vld [vmem:[%s2407_s8 + $0x44] ss:$24 sps:$4 sm:$0xff]  }
  0x57   : > { %1835 = vmatprep.subr.bf16.mxu0 %v2086_v63  ;;  %2021 = vmatprep.subr.bf16.mxu1 %v2086_v63  ;;  %v2152_v53 = vld [vmem:[%s2407_s8 + $0x3c] ss:$24 sps:$4 sm:$0xff]   ;;  %v2156_v55 = vld [vmem:[%s2407_s8 + $0x38] ss:$24 sps:$4 sm:$0xff]   ;;  %v2158_v57 = vld [vmem:[%s2407_s8 + $0x6c] ss:$24 sps:$4 sm:$0xff]  }
  0x58   : > { %v2157_v56 = vld [vmem:[%s2407_s8 + $0x40] ss:$24 sps:$4 sm:$0xff]   ;;  %v2160_v58 = vld [vmem:[%s2407_s8 + $0x74] ss:$24 sps:$4 sm:$0xff]   ;;  %v2163_v60 = vld [vmem:[%s2407_s8 + $0x70] ss:$24 sps:$4 sm:$0xff]  }
  0x59   : > { %v2162_v59 = vld [vmem:[%s2407_s8 + $0x68] ss:$24 sps:$4 sm:$0xff]   ;;  %v2164_v61 = vld [vmem:[%s2407_s8 + $0x9c] ss:$24 sps:$4 sm:$0xff]   ;;  %v2168_v63 = vld [vmem:[%s2407_s8 + $0x98] ss:$24 sps:$4 sm:$0xff]  }
  0x5a   : > { %1836 = vmatpush3.bf16.msra.mxu0 %v2087_v0  ;;  %2029 = vmatpush3.bf16.msra.mxu1 %v2087_v0  ;;  %v2166_v62 = vld [vmem:[%s2407_s8 + $0xa4] ss:$24 sps:$4 sm:$0xff]   ;;  %v2169_v0 = vld [vmem:[%s2407_s8 + $0xa0] ss:$24 sps:$4 sm:$0xff]  }
  0x5b   : > { %1837 = vmatprep.subr.bf16.mxu0 %v2088_v1  ;;  %2022 = vmatprep.subr.bf16.mxu1 %v2088_v1  ;;  %v2170_v1 = vld [vmem:[%s2407_s8 + $0xcc] ss:$24 sps:$4 sm:$0xff]  }
  0x5e   : > { %1838 = vmatpush3.bf16.msra.mxu0 %v2089_v2  ;;  %2030 = vmatpush3.bf16.msra.mxu1 %v2089_v2  ;;  %v2172_v2 = vld [vmem:[%s2407_s8 + $0xd4] ss:$24 sps:$4 sm:$0xff]  }
  0x5f   : > { %1887 = vmatprep.subr.bf16.mxu1 %v2096_v5  ;;  %1951 = vmatprep.subr.bf16.mxu0 %v2097_v6  ;;  %v2176_v5 = vld [vmem:[%s2407_s8 + $0xfc] ss:$24 sps:$4 sm:$0xff]  }
  0x60   : > { %v2178_v6 = vld [vmem:[%s2407_s8 + $0x104] ss:$24 sps:$4 sm:$0xff]  }
  0x61   : > { %1109 = vmatmul.mubr.bf16.vlgmr.msra.gmra.mrb[0].mxu0 %v2090_v3  ;;  %1141 = vmatmul.mubr.bf16.vlgmr.msra.gmra.mrb[0].mxu1 %v2093_v4  ;;  %v2174_v3 = vld [vmem:[%s2407_s8 + $0xc8] ss:$24 sps:$4 sm:$0xff]  }
  0x62   : > { %1888 = vmatpush3.bf16.msra.mxu1 %v2098_v7  ;;  %1952 = vmatpush3.bf16.msra.mxu0 %v2099_v8  ;;  %v2175_v4 = vld [vmem:[%s2407_s8 + $0xd0] ss:$24 sps:$4 sm:$0xff]   ;;  %v2181_v8 = vld [vmem:[%s2407_s8 + $0x100] ss:$24 sps:$4 sm:$0xff]  }
  0x63   : > { %1889 = vmatprep.subr.bf16.mxu1 %v2100_v9  ;;  %1953 = vmatprep.subr.bf16.mxu0 %v2101_v10  ;;  %v2180_v7 = vld [vmem:[%s2407_s8 + $0xf8] ss:$24 sps:$4 sm:$0xff]   ;;  %v2182_v9 = vld [vmem:[%s2407_s8 + $0x12c] ss:$24 sps:$4 sm:$0xff]  }
  0x64   : > { %1116 = vmatprep.mubr.bf16.mxu0 %v2104_v11  ;;  %1148 = vmatprep.mubr.bf16.mxu1 %v2106_v13  ;;  %v2184_v10 = vld [vmem:[%s2407_s8 + $0x134] ss:$24 sps:$4 sm:$0xff]   ;;  %v2186_v11 = vld [vmem:[%s2407_s8 + $0x128] ss:$24 sps:$4 sm:$0xff]  }
  0x65   : > { %v2188_v13 = vld [vmem:[%s2407_s8 + $0x15c] ss:$24 sps:$4 sm:$0xff]  }
  0x66   : > { %1890 = vmatpush3.bf16.msra.mxu1 %v2102_v12  ;;  %1954 = vmatpush3.bf16.msra.mxu0 %v2103_v14  ;;  %v2187_v12 = vld [vmem:[%s2407_s8 + $0x130] ss:$24 sps:$4 sm:$0xff]   ;;  %v2190_v14 = vld [vmem:[%s2407_s8 + $0x164] ss:$24 sps:$4 sm:$0xff]  }
  0x67   : > { %1891 = vmatprep.subr.bf16.mxu1 %v2110_v15  ;;  %1955 = vmatprep.subr.bf16.mxu0 %v2111_v17  ;;  %v2192_v15 = vld [vmem:[%s2407_s8 + $0x158] ss:$24 sps:$4 sm:$0xff]  }
  0x69   : > { %1117 = vmatmul.mubr.bf16.gmra.mrb[4].mxu0 %v2108_v16  ;;  %1149 = vmatmul.mubr.bf16.gmra.mrb[4].mxu1 %v2109_v18  ;;  %v2193_v16 = vld [vmem:[%s2407_s8 + $0x160] ss:$24 sps:$4 sm:$0xff]  }
  0x6a   : > { %1892 = vmatpush3.bf16.msra.mxu1 %v2112_v19  ;;  %1956 = vmatpush3.bf16.msra.mxu0 %v2113_v20 }
  0x6b   : > { %1893 = vmatprep.subr.bf16.mxu1 %v2114_v21  ;;  %1957 = vmatprep.subr.bf16.mxu0 %v2115_v22 }
  0x6c   : > { %1124 = vmatprep.mubr.bf16.mxu0 %v2118_v23  ;;  %1156 = vmatprep.mubr.bf16.mxu1 %v2120_v25 }
  0x6e   : > { %1894 = vmatpush3.bf16.msra.mxu1 %v2116_v24  ;;  %1958 = vmatpush3.bf16.msra.mxu0 %v2117_v26 }
  0x6f   : > { %1895 = vmatprep.subr.bf16.mxu1 %v2124_v27  ;;  %1959 = vmatprep.subr.bf16.mxu0 %v2125_v30 }
  0x71   : > { %1125 = vmatmul.mubr.bf16.gmra.mrb[8].mxu0 %v2122_v28  ;;  %1157 = vmatmul.mubr.bf16.gmra.mrb[8].mxu1 %v2123_v29 }
  0x72   : > { %1896 = vmatpush3.bf16.msra.mxu1 %v2126_v31  ;;  %1960 = vmatpush3.bf16.msra.mxu0 %v2127_v32 }
  0x73   : > { %1897 = vmatprep.subr.bf16.mxu1 %v2128_v33  ;;  %1961 = vmatprep.subr.bf16.mxu0 %v2129_v34 }
  0x74   : > { %1132 = vmatprep.mubr.bf16.mxu0 %v2132_v35  ;;  %1164 = vmatprep.mubr.bf16.mxu1 %v2134_v36 }
  0x76   : > { %1898 = vmatpush3.bf16.msra.mxu1 %v2130_v37  ;;  %1962 = vmatpush3.bf16.msra.mxu0 %v2131_v38 }
  0x77   : > { %1899 = vmatprep.subr.bf16.mxu1 %v2138_v39  ;;  %1963 = vmatprep.subr.bf16.mxu0 %v2139_v42 }
  0x79   : > { %1133 = vmatmul.mubr.bf16.gmra.mrb[12].mxu0 %v2136_v40  ;;  %1165 = vmatmul.mubr.bf16.gmra.mrb[12].mxu1 %v2137_v41 }
  0x7a   : > { %1900 = vmatpush3.bf16.msra.mxu1 %v2140_v43  ;;  %1964 = vmatpush3.bf16.msra.mxu0 %v2141_v44 }
  0x7b   : > { %1901 = vmatprep.subr.bf16.mxu1 %v2142_v45  ;;  %1965 = vmatprep.subr.bf16.mxu0 %v2143_v46 }
  0x7c   : > { %1205 = vmatprep.mubr.bf16.mxu1 %v2148_v49  ;;  %1302 = vmatprep.mubr.bf16.mxu0 %v2151_v51 }
  0x7e   : > { %1902 = vmatpush3.bf16.msra.mxu1 %v2144_v47  ;;  %1966 = vmatpush3.bf16.msra.mxu0 %v2145_v48 }
  0x81   : > { %1206 = vmatmul.mubr.bf16.vlgmr.msra.gmra.mrb[16].mxu1 %v2146_v50  ;;  %1303 = vmatmul.mubr.bf16.vlgmr.msra.gmra.mrb[16].mxu0 %v2149_v52 }
  0x82   : > { %1213 = vmatprep.mubr.bf16.mxu1 %v2152_v53  ;;  %1310 = vmatprep.mubr.bf16.mxu0 %v2154_v54 }
  0x89   : > { %1214 = vmatmul.mubr.bf16.gmra.mrb[20].mxu1 %v2156_v55  ;;  %1311 = vmatmul.mubr.bf16.gmra.mrb[20].mxu0 %v2157_v56 }
  0x8a   : > { %1221 = vmatprep.mubr.bf16.mxu1 %v2158_v57  ;;  %1318 = vmatprep.mubr.bf16.mxu0 %v2160_v58 }
  0x91   : > { %1222 = vmatmul.mubr.bf16.gmra.mrb[24].mxu1 %v2162_v59  ;;  %1319 = vmatmul.mubr.bf16.gmra.mrb[24].mxu0 %v2163_v60 }
  0x92   : > { %1229 = vmatprep.mubr.bf16.mxu1 %v2164_v61  ;;  %1326 = vmatprep.mubr.bf16.mxu0 %v2166_v62 }
  0x99   : > { %1230 = vmatmul.mubr.bf16.gmra.mrb[28].mxu1 %v2168_v63  ;;  %1327 = vmatmul.mubr.bf16.gmra.mrb[28].mxu0 %v2169_v0 }
  0x9a   : > { %1237 = vmatprep.mubr.bf16.mxu1 %v2170_v1  ;;  %1334 = vmatprep.mubr.bf16.mxu0 %v2172_v2 }
  0xa1   : > { %1238 = vmatmul.mubr.bf16.gmra.mrb[32].mxu1 %v2174_v3  ;;  %1335 = vmatmul.mubr.bf16.gmra.mrb[32].mxu0 %v2175_v4 }
  0xa2   : > { %1245 = vmatprep.mubr.bf16.mxu1 %v2176_v5  ;;  %1342 = vmatprep.mubr.bf16.mxu0 %v2178_v6 }
  0xa9   : > { %1246 = vmatmul.mubr.bf16.gmra.mrb[36].mxu1 %v2180_v7  ;;  %1343 = vmatmul.mubr.bf16.gmra.mrb[36].mxu0 %v2181_v8 }
  0xaa   : > { %1253 = vmatprep.mubr.bf16.mxu1 %v2182_v9  ;;  %1350 = vmatprep.mubr.bf16.mxu0 %v2184_v10 }
  0xb1   : > { %1254 = vmatmul.mubr.bf16.gmra.mrb[40].mxu1 %v2186_v11  ;;  %1351 = vmatmul.mubr.bf16.gmra.mrb[40].mxu0 %v2187_v12 }
  0xb2   : > { %1261 = vmatprep.mubr.bf16.mxu1 %v2188_v13  ;;  %1358 = vmatprep.mubr.bf16.mxu0 %v2190_v14  ;;  %v388_v14 = vld [vmem:[#allocation2] sm:$0xff] }
  0xb9   : > { %1262 = vmatmul.mubr.bf16.gmra.mrb[44].mxu1 %v2192_v15  ;;  %1359 = vmatmul.mubr.bf16.gmra.mrb[44].mxu0 %v2193_v16 }
 0x134   : > { %v1839_v17 = vpop.f32.mrb[0].mxu0  ;;  %v1863_v18 = vpop.f32.mrb[0].mxu1 }
 0x135   : > { %v1840_v19 = vpop.f32.mrb[1].mxu0  ;;  %v1864_v20 = vpop.f32.mrb[1].mxu1 }
 0x136   : > { %v1841_v21 = vadd.f32 %v1840_v19, %v1839_v17  ;;  %v2506_v22 = vadd.f32 %v1864_v20, %v1863_v18  ;;  %v1842_v23 = vpop.f32.mrb[2].mxu0  ;;  %v1866_v24 = vpop.f32.mrb[2].mxu1  ;;  %v389_v17 = vld [vmem:[#allocation2 + $0x8] sm:$0xff] }
 0x137   : > { %v1843_v25 = vpop.f32.mrb[3].mxu0  ;;  %v1867_v26 = vpop.f32.mrb[3].mxu1 }
 0x138   : > { %v1844_v27 = vadd.f32 %v1843_v25, %v1842_v23  ;;  %v2508_v28 = vadd.f32 %v1867_v26, %v1866_v24 }
 0x13c   : > { %v1845_v29 = vpop.f32.mrb[4].mxu0  ;;  %v1869_v30 = vpop.f32.mrb[4].mxu1 }
 0x13d   : > { %v1846_v31 = vpop.f32.mrb[5].mxu0  ;;  %v1870_v32 = vpop.f32.mrb[5].mxu1 }
 0x13e   : > { %v2510_v33 = vadd.f32 %v1846_v31, %v1845_v29  ;;  %v2512_v34 = vadd.f32 %v1870_v32, %v1869_v30  ;;  %v1848_v35 = vpop.f32.mrb[6].mxu0  ;;  %v1872_v36 = vpop.f32.mrb[6].mxu1 }
 0x13f   : > { %v1849_v37 = vpop.f32.mrb[7].mxu0  ;;  %v1873_v38 = vpop.f32.mrb[7].mxu1 }
 0x140   : > { %v2514_v39 = vadd.f32 %v1849_v37, %v1848_v35  ;;  %v2516_v40 = vadd.f32 %v1873_v38, %v1872_v36  ;;  %v390_v38 = vld [vmem:[#allocation2 + $0x10] sm:$0xff] }
 0x144   : > { %v1851_v41 = vpop.f32.mrb[8].mxu0  ;;  %v1875_v42 = vpop.f32.mrb[8].mxu1 }
 0x145   : > { %v1852_v43 = vpop.f32.mrb[9].mxu0  ;;  %v1876_v44 = vpop.f32.mrb[9].mxu1 }
 0x146   : > { %v2518_v45 = vadd.f32 %v1852_v43, %v1851_v41  ;;  %v2520_v46 = vadd.f32 %v1876_v44, %v1875_v42  ;;  %v1854_v47 = vpop.f32.mrb[10].mxu0  ;;  %v1878_v48 = vpop.f32.mrb[10].mxu1  ;;  %v391_v43 = vld [vmem:[#allocation2 + $0x18] sm:$0xff] }
 0x147   : > { %v1855_v49 = vpop.f32.mrb[11].mxu0  ;;  %v1879_v50 = vpop.f32.mrb[11].mxu1 }
 0x148   : > { %v2522_v51 = vadd.f32 %v1855_v49, %v1854_v47  ;;  %v2524_v52 = vadd.f32 %v1879_v50, %v1878_v48 }
 0x14c   : > { %v1857_v53 = vpop.f32.mrb[12].mxu0  ;;  %v1881_v54 = vpop.f32.mrb[12].mxu1 }
 0x14d   : > { %v1858_v55 = vpop.f32.mrb[13].mxu0  ;;  %v1882_v56 = vpop.f32.mrb[13].mxu1 }
 0x14e   : > { %v2526_v57 = vadd.f32 %v1858_v55, %v1857_v53  ;;  %v2528_v58 = vadd.f32 %v1882_v56, %v1881_v54  ;;  %v1860_v59 = vpop.f32.mrb[14].mxu0  ;;  %v1884_v60 = vpop.f32.mrb[14].mxu1 }
 0x14f   : > { %v1861_v61 = vpop.f32.mrb[15].mxu0  ;;  %v1885_v62 = vpop.f32.mrb[15].mxu1 }
 0x150   : > { %v2530_v63 = vadd.f32 %v1861_v61, %v1860_v59  ;;  %v2532_v0 = vadd.f32 %v1885_v62, %v1884_v60 }
 0x154   : > { %v1903_v1 = vpop.f32.mrb[16].mxu1  ;;  %v1967_v2 = vpop.f32.mrb[16].mxu0 }
 0x155   : > { %v1904_v3 = vpop.f32.mrb[17].mxu1  ;;  %v1968_v4 = vpop.f32.mrb[17].mxu0 }
 0x156   : > { %v1905_v5 = vadd.f32 %v1904_v3, %v1903_v1  ;;  %v1969_v6 = vadd.f32 %v1968_v4, %v1967_v2  ;;  %v1906_v7 = vpop.f32.mrb[18].mxu1  ;;  %v1970_v8 = vpop.f32.mrb[18].mxu0  ;;  %v392_v2 = vld [vmem:[#allocation2 + $0x20] sm:$0xff] }
 0x157   : > { %v1907_v9 = vpop.f32.mrb[19].mxu1  ;;  %v1971_v10 = vpop.f32.mrb[19].mxu0 }
 0x158   : > { %v1208_v11 = vadd.f32 %v1905_v5, %v1841_v21  ;;  %v1908_v12 = vadd.f32 %v1907_v9, %v1906_v7  ;;  %v1972_v13 = vadd.f32 %v1971_v10, %v1970_v8  ;;  %v393_v5 = vld [vmem:[#allocation2 + $0x28] sm:$0xff] }
 0x15a   : > { %v1305_v15 = vadd.f32 %v1969_v6, %v1208_v11  ;;  %v1211_v16 = vadd.f32 %v1908_v12, %v1844_v27 }
 0x15c   : > { %v1367_v18 = vadd.f32 %v1305_v15, %v388_v14  ;;  %v1308_v19 = vadd.f32 %v1972_v13, %v1211_v16  ;;  %v1909_v20 = vpop.f32.mrb[20].mxu1  ;;  %v1973_v23 = vpop.f32.mrb[20].mxu0 }
 0x15d   : > { %v1910_v24 = vpop.f32.mrb[21].mxu1  ;;  %v1974_v25 = vpop.f32.mrb[21].mxu0 }
 0x15e   : > { %1383 = vst [vmem:[#allocation2] sm:$0xff] %v1367_v18  ;;  %v1368_v26 = vadd.f32 %v1308_v19, %v389_v17  ;;  %v1911_v29 = vadd.f32 %v1910_v24, %v1909_v20  ;;  %v1975_v30 = vadd.f32 %v1974_v25, %v1973_v23  ;;  %v1912_v31 = vpop.f32.mrb[22].mxu1  ;;  %v1976_v32 = vpop.f32.mrb[22].mxu0  ;;  %v394_v20 = vld [vmem:[#allocation2 + $0x30] sm:$0xff]  ;;  %v395_v25 = vld [vmem:[#allocation2 + $0x38] sm:$0xff] }
 0x15f   : > { %v1913_v35 = vpop.f32.mrb[23].mxu1  ;;  %v1977_v21 = vpop.f32.mrb[23].mxu0 }
 0x160   : > { %1384 = vst [vmem:[#allocation2 + $0x8] sm:$0xff] %v1368_v26  ;;  %v1216_v36 = vadd.f32 %v1911_v29, %v2510_v33  ;;  %v1914_v37 = vadd.f32 %v1913_v35, %v1912_v31  ;;  %v1978_v27 = vadd.f32 %v1977_v21, %v1976_v32 }
 0x162   : > { %v1313_v41 = vadd.f32 %v1975_v30, %v1216_v36  ;;  %v1219_v42 = vadd.f32 %v1914_v37, %v2514_v39 }
 0x164   : > { %v1369_v44 = vadd.f32 %v1313_v41, %v390_v38  ;;  %v1316_v47 = vadd.f32 %v1978_v27, %v1219_v42  ;;  %v1915_v48 = vpop.f32.mrb[24].mxu1  ;;  %v1979_v49 = vpop.f32.mrb[24].mxu0 }
 0x165   : > { %v1916_v50 = vpop.f32.mrb[25].mxu1  ;;  %v1980_v53 = vpop.f32.mrb[25].mxu0 }
 0x166   : > { %1385 = vst [vmem:[#allocation2 + $0x10] sm:$0xff] %v1369_v44  ;;  %v1370_v54 = vadd.f32 %v1316_v47, %v391_v43  ;;  %v1917_v55 = vadd.f32 %v1916_v50, %v1915_v48  ;;  %v1981_v56 = vadd.f32 %v1980_v53, %v1979_v49  ;;  %v1918_v59 = vpop.f32.mrb[26].mxu1  ;;  %v1982_v60 = vpop.f32.mrb[26].mxu0  ;;  %v396_v44 = vld [vmem:[#allocation2 + $0x40] sm:$0xff]  ;;  %v397_v49 = vld [vmem:[#allocation2 + $0x48] sm:$0xff] }
 0x167   : > { %v1919_v33 = vpop.f32.mrb[27].mxu1  ;;  %v1983_v61 = vpop.f32.mrb[27].mxu0 }
 0x168   : > { %1386 = vst [vmem:[#allocation2 + $0x18] sm:$0xff] %v1370_v54  ;;  %v1224_v62 = vadd.f32 %v1917_v55, %v2518_v45  ;;  %v1920_v1 = vadd.f32 %v1919_v33, %v1918_v59  ;;  %v1984_v39 = vadd.f32 %v1983_v61, %v1982_v60 }
 0x16a   : > { %v1321_v3 = vadd.f32 %v1981_v56, %v1224_v62  ;;  %v1227_v4 = vadd.f32 %v1920_v1, %v2522_v51 }
 0x16c   : > { %v1371_v6 = vadd.f32 %v1321_v3, %v392_v2  ;;  %v1324_v7 = vadd.f32 %v1984_v39, %v1227_v4  ;;  %v1921_v8 = vpop.f32.mrb[28].mxu1  ;;  %v1985_v9 = vpop.f32.mrb[28].mxu0  ;;  %v398_v4 = vld [vmem:[#allocation2 + $0x50] sm:$0xff] }
 0x16d   : > { %v1922_v10 = vpop.f32.mrb[29].mxu1  ;;  %v1986_v11 = vpop.f32.mrb[29].mxu0 }
 0x16e   : > { %1387 = vst [vmem:[#allocation2 + $0x20] sm:$0xff] %v1371_v6  ;;  %v1372_v12 = vadd.f32 %v1324_v7, %v393_v5  ;;  %v1923_v13 = vadd.f32 %v1922_v10, %v1921_v8  ;;  %v1987_v14 = vadd.f32 %v1986_v11, %v1985_v9  ;;  %v1924_v15 = vpop.f32.mrb[30].mxu1  ;;  %v1988_v16 = vpop.f32.mrb[30].mxu0  ;;  %v399_v7 = vld [vmem:[#allocation2 + $0x58] sm:$0xff] }
 0x16f   : > { %v1925_v45 = vpop.f32.mrb[31].mxu1  ;;  %v1989_v17 = vpop.f32.mrb[31].mxu0 }
 0x170   : > { %1388 = vst [vmem:[#allocation2 + $0x28] sm:$0xff] %v1372_v12  ;;  %v1232_v18 = vadd.f32 %v1923_v13, %v2526_v57  ;;  %v1926_v19 = vadd.f32 %v1925_v45, %v1924_v15  ;;  %v1990_v51 = vadd.f32 %v1989_v17, %v1988_v16 }
 0x172   : > { %v1329_v23 = vadd.f32 %v1987_v14, %v1232_v18  ;;  %v1235_v24 = vadd.f32 %v1926_v19, %v2530_v63 }
 0x174   : > { %v1373_v26 = vadd.f32 %v1329_v23, %v394_v20  ;;  %v1332_v29 = vadd.f32 %v1990_v51, %v1235_v24  ;;  %v1927_v30 = vpop.f32.mrb[32].mxu1  ;;  %v1991_v31 = vpop.f32.mrb[32].mxu0  ;;  %v400_v20 = vld [vmem:[#allocation2 + $0x60] sm:$0xff] }
 0x175   : > { %v1928_v32 = vpop.f32.mrb[33].mxu1  ;;  %v1992_v35 = vpop.f32.mrb[33].mxu0 }
 0x176   : > { %1389 = vst [vmem:[#allocation2 + $0x30] sm:$0xff] %v1373_v26  ;;  %v1374_v21 = vadd.f32 %v1332_v29, %v395_v25  ;;  %v1929_v36 = vadd.f32 %v1928_v32, %v1927_v30  ;;  %v1993_v37 = vadd.f32 %v1992_v35, %v1991_v31  ;;  %v1930_v27 = vpop.f32.mrb[34].mxu1  ;;  %v1994_v38 = vpop.f32.mrb[34].mxu0  ;;  %v401_v25 = vld [vmem:[#allocation2 + $0x68] sm:$0xff] }
 0x177   : > { %v1931_v57 = vpop.f32.mrb[35].mxu1  ;;  %v1995_v41 = vpop.f32.mrb[35].mxu0 }
 0x178   : > { %1390 = vst [vmem:[#allocation2 + $0x38] sm:$0xff] %v1374_v21  ;;  %v1240_v42 = vadd.f32 %v1929_v36, %v2506_v22  ;;  %v1932_v43 = vadd.f32 %v1931_v57, %v1930_v27  ;;  %v1996_v63 = vadd.f32 %v1995_v41, %v1994_v38 }
 0x17a   : > { %v1337_v47 = vadd.f32 %v1993_v37, %v1240_v42  ;;  %v1243_v48 = vadd.f32 %v1932_v43, %v2508_v28  ;;  %v402_v43 = vld [vmem:[#allocation2 + $0x70] sm:$0xff] }
 0x17c   : > { %v1375_v50 = vadd.f32 %v1337_v47, %v396_v44  ;;  %v1340_v53 = vadd.f32 %v1996_v63, %v1243_v48  ;;  %v1933_v54 = vpop.f32.mrb[36].mxu1  ;;  %v1997_v55 = vpop.f32.mrb[36].mxu0  ;;  %v403_v47 = vld [vmem:[#allocation2 + $0x78] sm:$0xff] }
 0x17d   : > { %v1934_v56 = vpop.f32.mrb[37].mxu1  ;;  %v1998_v59 = vpop.f32.mrb[37].mxu0 }
 0x17e   : > { %1391 = vst [vmem:[#allocation2 + $0x40] sm:$0xff] %v1375_v50  ;;  %v1376_v60 = vadd.f32 %v1340_v53, %v397_v49  ;;  %v1935_v33 = vadd.f32 %v1934_v56, %v1933_v54  ;;  %v1999_v61 = vadd.f32 %v1998_v59, %v1997_v55  ;;  %v1936_v62 = vpop.f32.mrb[38].mxu1  ;;  %v2000_v1 = vpop.f32.mrb[38].mxu0  ;;  %v1403_v53 = vld [vmem:[#allocation2] sm:$0xff] (!%p1737_p11)  ;;  %v1404_v54 = vld [vmem:[#allocation2 + $0x8] sm:$0xff] (!%p1737_p11)  ;;  %v1405_v59 = vld [vmem:[#allocation2 + $0x10] sm:$0xff] (!%p1737_p11) }
 0x17f   : > { %v1937_v22 = vpop.f32.mrb[39].mxu1  ;;  %v2001_v39 = vpop.f32.mrb[39].mxu0 }
 0x180   : > { %1392 = vst [vmem:[#allocation2 + $0x48] sm:$0xff] %v1376_v60  ;;  %v1248_v2 = vadd.f32 %v1935_v33, %v2512_v34  ;;  %v1938_v3 = vadd.f32 %v1937_v22, %v1936_v62  ;;  %v2002_v28 = vadd.f32 %v2001_v39, %v2000_v1  ;;  %v1406_v60 = vld [vmem:[#allocation2 + $0x18] sm:$0xff] (!%p1737_p11)  ;;  %v1408_v62 = vld [vmem:[#allocation2 + $0x28] sm:$0xff] (!%p1737_p11)  ;;  %v1409_v22 = vld [vmem:[#allocation2 + $0x30] sm:$0xff] (!%p1737_p11) }
 0x181   : > { %v1410_v39 = vld [vmem:[#allocation2 + $0x38] sm:$0xff] (!%p1737_p11) }
 0x182   : > { %v1345_v5 = vadd.f32 %v1999_v61, %v1248_v2  ;;  %v1251_v6 = vadd.f32 %v1938_v3, %v2516_v40 }
 0x184   : > { %v1377_v8 = vadd.f32 %v1345_v5, %v398_v4  ;;  %v1348_v9 = vadd.f32 %v2002_v28, %v1251_v6  ;;  %v1939_v10 = vpop.f32.mrb[40].mxu1  ;;  %v2003_v11 = vpop.f32.mrb[40].mxu0 }
 0x185   : > { %v1940_v12 = vpop.f32.mrb[41].mxu1  ;;  %v2004_v13 = vpop.f32.mrb[41].mxu0  ;;  %v1411_v5 = vld [vmem:[#allocation2 + $0x40] sm:$0xff] (!%p1737_p11) }
 0x186   : > { %1393 = vst [vmem:[#allocation2 + $0x50] sm:$0xff] %v1377_v8  ;;  %v1378_v14 = vadd.f32 %v1348_v9, %v399_v7  ;;  %v1941_v15 = vadd.f32 %v1940_v12, %v1939_v10  ;;  %v2005_v16 = vadd.f32 %v2004_v13, %v2003_v11  ;;  %v1942_v45 = vpop.f32.mrb[42].mxu1  ;;  %v2006_v17 = vpop.f32.mrb[42].mxu0 }
 0x187   : > { %v1943_v34 = vpop.f32.mrb[43].mxu1  ;;  %v2007_v18 = vpop.f32.mrb[43].mxu0  ;;  %v1412_v6 = vld [vmem:[#allocation2 + $0x48] sm:$0xff] (!%p1737_p11) }
 0x188   : > { %1394 = vst [vmem:[#allocation2 + $0x58] sm:$0xff] %v1378_v14  ;;  %v1256_v19 = vadd.f32 %v1941_v15, %v2520_v46  ;;  %v1944_v51 = vadd.f32 %v1943_v34, %v1942_v45  ;;  %v2008_v40 = vadd.f32 %v2007_v18, %v2006_v17 }
 0x18a   : > { %v1353_v23 = vadd.f32 %v2005_v16, %v1256_v19  ;;  %v1259_v24 = vadd.f32 %v1944_v51, %v2524_v52 }
 0x18c   : > { %v1379_v26 = vadd.f32 %v1353_v23, %v400_v20  ;;  %v1356_v29 = vadd.f32 %v2008_v40, %v1259_v24  ;;  %v1945_v30 = vpop.f32.mrb[44].mxu1  ;;  %v2009_v31 = vpop.f32.mrb[44].mxu0 }
 0x18d   : > { %v1946_v32 = vpop.f32.mrb[45].mxu1  ;;  %v2010_v35 = vpop.f32.mrb[45].mxu0  ;;  %v1413_v7 = vld [vmem:[#allocation2 + $0x50] sm:$0xff] (!%p1737_p11) }
 0x18e   : > { %1395 = vst [vmem:[#allocation2 + $0x60] sm:$0xff] %v1379_v26  ;;  %v1380_v21 = vadd.f32 %v1356_v29, %v401_v25  ;;  %v1947_v36 = vadd.f32 %v1946_v32, %v1945_v30  ;;  %v2011_v37 = vadd.f32 %v2010_v35, %v2009_v31  ;;  %v1948_v27 = vpop.f32.mrb[46].mxu1  ;;  %v2012_v38 = vpop.f32.mrb[46].mxu0 }
 0x18f   : > { %v1949_v46 = vpop.f32.mrb[47].mxu1  ;;  %v2013_v57 = vpop.f32.mrb[47].mxu0  ;;  %v1414_v11 = vld [vmem:[#allocation2 + $0x58] sm:$0xff] (!%p1737_p11) }
 0x190   : > { %1396 = vst [vmem:[#allocation2 + $0x68] sm:$0xff] %v1380_v21  ;;  %v1264_v41 = vadd.f32 %v1947_v36, %v2528_v58  ;;  %v1950_v42 = vadd.f32 %v1949_v46, %v1948_v27  ;;  %v2014_v52 = vadd.f32 %v2013_v57, %v2012_v38  ;;  %v1738_v58 = vld [vmem:[%s2593_s2] ss:$0 sm:$0xff] (!%p1737_p11) }
 0x191   : > { %v1426_v55 = vadd.f32 (!%p1737_p11), %v1738_v58, %v1403_v53  ;;  %v1427_v56 = vadd.f32 (!%p1737_p11), %v1738_v58, %v1404_v54  ;;  %v1428_v33 = vadd.f32 (!%p1737_p11), %v1738_v58, %v1405_v59  ;;  %v1429_v61 = vadd.f32 (!%p1737_p11), %v1738_v58, %v1406_v60 }
 0x192   : > { %v1361_v63 = vadd.f32 %v2011_v37, %v1264_v41  ;;  %v1267_v44 = vadd.f32 %v1950_v42, %v2532_v0  ;;  %1402 = sbr.rel (%p1737_p11) target bundleno = 421 (0x1a5), region = 63  ;;  %v1407_v0 = vld [vmem:[#allocation2 + $0x20] sm:$0xff] (!%p1737_p11)  ;;  %v1431_v3 = vadd.f32 (!%p1737_p11), %v1738_v58, %v1408_v62  ;;  %v1432_v28 = vadd.f32 (!%p1737_p11), %v1738_v58, %v1409_v22 }
 0x193   : > { %v1430_v1 = vadd.f32 (!%p1737_p11), %v1738_v58, %v1407_v0  ;;  %v1779_v2 = vpack.c.bf16 (!%p1737_p11), %v1427_v56, %v1426_v55  ;;  %v1433_v4 = vadd.f32 (!%p1737_p11), %v1738_v58, %v1410_v39  ;;  %v1784_v8 = vpack.c.bf16 (!%p1737_p11), %v1429_v61, %v1428_v33 }
 0x194   : > { %v1381_v48 = vadd.f32 %v1361_v63, %v402_v43  ;;  %v1364_v49 = vadd.f32 %v2014_v52, %v1267_v44  ;;  %v1434_v9 = vadd.f32 (!%p1737_p11), %v1738_v58, %v1411_v5  ;;  %v1435_v10 = vadd.f32 (!%p1737_p11), %v1738_v58, %v1412_v6 }
 0x195   : > { %v1436_v12 = vadd.f32 (!%p1737_p11), %v1738_v58, %v1413_v7  ;;  %v1415_v13 = vld [vmem:[#allocation2 + $0x60] sm:$0xff] (!%p1737_p11)  ;;  %1780 = vst [vmem:[%s2594_s3] sm:$0xff] (!%p1737_p11), %v1779_v2   ;;  %v1789_v15 = vpack.c.bf16 (!%p1737_p11), %v1431_v3, %v1430_v1  ;;  %v1794_v16 = vpack.c.bf16 (!%p1737_p11), %v1433_v4, %v1432_v28  ;;  %v1437_v45 = vadd.f32 (!%p1737_p11), %v1738_v58, %v1414_v11 }
 0x196   : > { %1397 = vst [vmem:[#allocation2 + $0x70] sm:$0xff] %v1381_v48  ;;  %v1382_v50 = vadd.f32 %v1364_v49, %v403_v47  ;;  %v1438_v17 = vadd.f32 (!%p1737_p11), %v1738_v58, %v1415_v13  ;;  %1816 = vst [vmem:[%s2594_s3 + $0x8] sm:$0xff] (!%p1737_p11), %v1784_v8   ;;  %v1799_v19 = vpack.c.bf16 (!%p1737_p11), %v1435_v10, %v1434_v9 }
 0x197   : > { %v1416_v14 = vld [vmem:[#allocation2 + $0x68] sm:$0xff] (!%p1737_p11)  ;;  %1817 = vst [vmem:[%s2594_s3 + $0x10] sm:$0xff] (!%p1737_p11), %v1789_v15   ;;  %1818 = vst [vmem:[%s2594_s3 + $0x18] sm:$0xff] (!%p1737_p11), %v1794_v16   ;;  %v1804_v23 = vpack.c.bf16 (!%p1737_p11), %v1437_v45, %v1436_v12 }
 0x198   : > { %1398 = vst [vmem:[#allocation2 + $0x78] sm:$0xff] %v1382_v50  ;;  %v1439_v51 = vadd.f32 (!%p1737_p11), %v1738_v58, %v1416_v14  ;;  %1819 = vst [vmem:[%s2594_s3 + $0x20] sm:$0xff] (!%p1737_p11), %v1799_v19  }
 0x199   : > { %1820 = vst [vmem:[%s2594_s3 + $0x28] sm:$0xff] %v1804_v23  }
 0x19a   : > { %v1809_v24 = vpack.c.bf16 %v1439_v51, %v1438_v17 }
 0x19c   : > { %1821 = vst [vmem:[%s2594_s3 + $0x30] sm:$0xff] %v1809_v24  }
 0x19d   : > { %v1417_v34 = vld [vmem:[#allocation2 + $0x70] sm:$0xff] }
 0x19e   : > { %v1440_v40 = vadd.f32 %v1738_v58, %v1417_v34 }
 0x19f   : > { %v1418_v18 = vld [vmem:[#allocation2 + $0x78] sm:$0xff] }
 0x1a0   : > { %v1441_v20 = vadd.f32 %v1738_v58, %v1418_v18 }
 0x1a2   : > { %v1814_v25 = vpack.c.bf16 %v1441_v20, %v1440_v40 }
 0x1a4   : > { %1822 = vst [vmem:[%s2594_s3 + $0x38] sm:$0xff] %v1814_v25  }
 0x1a5 PF: > { %s13_s16 = sadd.s32 1, %s2232_s16   ;;  %s2595_s12 = smov %s2220_s13 }
 0x1a6   : > { %p10_p12 = scmp.ge.s32.totalorder %s13_s16, 5   ;;  %s2596_s13 = smov %s2290_s20 }
 0x1a7   : > { %s2597_s14 = smov %s2228_s15  ;;  %s2598_s15 = smov %s2600_s17 }
 0x1a8   :  { %12 = sbr.rel (!%p10_p12) target bundleno = 3 (0x3), region = 104 }

// kernel: generator_forward.52
= control target key start
LH: loop header
LB: loop body
LE: loop exit
PB: predicated region body
PF: predicated region fallthrough
CT: control target
= control target key end

     0   :  { %s2468_s12 = smov 0   ;;  %s2470_s13 = smov 0   ;;  %s2855_s0 = inlined_call_operand.vmem [shape: bf16[512,1152], index: 0, kind: input, shape index: {}]   ;;  %s2856_s1 = inlined_call_operand.vmem [shape: bf16[1152,128], index: 1, kind: input, shape index: {}]   ;;  %s2857_s2 = inlined_call_operand.vmem [shape: f32[1,128], index: 2, kind: input, shape index: {}]   ;;  %s2858_s3 = inlined_call_operand.vmem [shape: bf16[512,128], index: 3, kind: output, shape index: {}]  }
   0x1   :  { %s2472_s14 = smov 0   ;;  %s2474_s15 = smov 0  }
   0x2   :  { %s2476_s16 = smov 0   ;;  %s2478_s17 = smov 0  }
   0x3   :  { %s2480_s18 = smov 0  }
   0x4 LB: > { %s25_s19 = sadd.s32 1, %s2437_s16  ;;  %s32_s20 = sadd.s32 1, %s2441_s17  ;;  %s2445_s18 = sphi %s2480_s18, %s13_s18   ;;  %s2441_s17 = sphi %s2478_s17, %s2864_s17   ;;  %s2437_s16 = sphi %s2476_s16, %s2863_s16   ;;  %s2433_s15 = sphi %s2474_s15, %s2862_s15   ;;  %s2429_s14 = sphi %s2472_s14, %s2861_s14   ;;  %s2425_s13 = sphi %s2470_s13, %s2860_s13   ;;  %s2421_s12 = sphi %s2468_s12, %s2859_s12  }
   0x5   : > { %p26_p0 = scmp.ge.s32.totalorder %s25_s19, 3  ;;  %p48_p1 = scmp.ne.s32.totalorder %s2425_s13, %s2421_s12 }
   0x6   : > { %p49_p2 = scmp.eq.s32.totalorder %s2445_s18, 0  ;;  %s41_s24 = sadd.s32 1, %s2425_s13 }
   0x7   : > { %s2866_s19 = smov (%p26_p0, %s25_s19), 0  ;;  %s2868_s20 = smov (!%p26_p0, %s32_s20), %s2441_s17 }
   0x8   : > { %p50_p3 = por %p49_p2, %p48_p1  ;;  %p34_p4 = scmp.ge.s32.totalorder %s2868_s20, 2 }
   0x9   : > { %s37_s21 = ssub.s32 %s2437_s16, %s2866_s19  ;;  %p1735_p6 = scmp.ge.s32.totalorder %s2445_s18, 6 }
   0xa   : > { %s2870_s20 = smov (%p34_p4, %s2868_s20), 0 }
   0xb   : > { %s36_s22 = ssub.s32 %s2441_s17, %s2870_s20  ;;  %162 = sbr.rel (%p1735_p6) target bundleno = 64 (0x40), region = 20 }
   0xc   : > { %s38_s23 = sor.u32 %s37_s21, %s36_s22 }
   0xd   : > { %p39_p5 = scmp.eq.s32.totalorder %s38_s23, 0 }
   0xf   : > { %s2519_s25 = scalar_select %p39_p5, %s2425_s13, %s41_s24  }
  0x12   : > { %165 = sbr.rel (!%p50_p3) target bundleno = 64 (0x40), region = 24  ;;  %s167_s26 = sand.u32 (%p50_p3), 1, %s2425_s13  }
  0x13   : > { %s171_s27 = smul.u32 (%p50_p3), 3, %s2437_s16 }
  0x14   : > { %s2243_s28 = smul.u32 (%p50_p3), 384, %s167_s26 }
  0x15   : > { %s2244_s29 = smul.u32 (%p50_p3), 288, %s2441_s17 }
  0x16   : > { %s2533_s8 = scalar_lea.vmem (%p50_p3), [#allocation3], %s2243_s28 }
  0x17   : > { %s173_s30 = sadd.s32 (%p50_p3), %s2244_s29, %s171_s27 }
  0x18   : > { %s1738_s4 = sshll.u32 (%p50_p3), %s173_s30, 2 }
  0x19   : > { %s2528_s7 = scalar_lea.vmem %s2855_s0, %s1738_s4 }
  0x1a   : > { %v190_v0 = vld [vmem:[%s2528_s7] sm:$0xff]  ;;  %v194_v2 = vld [vmem:[%s2528_s7 + $0x48] sm:$0xff]  ;;  %v198_v4 = vld [vmem:[%s2528_s7 + $0x90] sm:$0xff] }
  0x1b   : > { %v192_v1 = vld [vmem:[%s2528_s7 + $0x24] sm:$0xff]  ;;  %191 = vst [vmem:[%s2533_s8] sm:$0xff] %v190_v0  ;;  %195 = vst [vmem:[%s2533_s8 + $0x18] sm:$0xff] %v194_v2  ;;  %v196_v3 = vld [vmem:[%s2528_s7 + $0x6c] sm:$0xff] }
  0x1c   : > { %193 = vst [vmem:[%s2533_s8 + $0xc] sm:$0xff] %v192_v1  ;;  %v200_v5 = vld [vmem:[%s2528_s7 + $0xb4] sm:$0xff]  ;;  %197 = vst [vmem:[%s2533_s8 + $0x24] sm:$0xff] %v196_v3  ;;  %v204_v7 = vld [vmem:[%s2528_s7 + $0xfc] sm:$0xff] }
  0x1d   : > { %199 = vst [vmem:[%s2533_s8 + $0x30] sm:$0xff] %v198_v4  ;;  %201 = vst [vmem:[%s2533_s8 + $0x3c] sm:$0xff] %v200_v5  ;;  %v202_v6 = vld [vmem:[%s2528_s7 + $0xd8] sm:$0xff]  ;;  %v206_v8 = vld [vmem:[%s2528_s7 + $0x120] sm:$0xff] }
  0x1e   : > { %203 = vst [vmem:[%s2533_s8 + $0x48] sm:$0xff] %v202_v6  ;;  %205 = vst [vmem:[%s2533_s8 + $0x54] sm:$0xff] %v204_v7  ;;  %v208_v9 = vld [vmem:[%s2528_s7 + $0x144] sm:$0xff]  ;;  %v212_v11 = vld [vmem:[%s2528_s7 + $0x18c] sm:$0xff] }
  0x1f   : > { %207 = vst [vmem:[%s2533_s8 + $0x60] sm:$0xff] %v206_v8  ;;  %v210_v10 = vld [vmem:[%s2528_s7 + $0x168] sm:$0xff]  ;;  %209 = vst [vmem:[%s2533_s8 + $0x6c] sm:$0xff] %v208_v9  ;;  %v214_v12 = vld [vmem:[%s2528_s7 + $0x1b0] sm:$0xff] }
  0x20   : > { %211 = vst [vmem:[%s2533_s8 + $0x78] sm:$0xff] %v210_v10  ;;  %213 = vst [vmem:[%s2533_s8 + $0x84] sm:$0xff] %v212_v11  ;;  %v216_v13 = vld [vmem:[%s2528_s7 + $0x1d4] sm:$0xff]  ;;  %v220_v15 = vld [vmem:[%s2528_s7 + $0x21c] sm:$0xff] }
  0x21   : > { %v218_v14 = vld [vmem:[%s2528_s7 + $0x1f8] sm:$0xff]  ;;  %215 = vst [vmem:[%s2533_s8 + $0x90] sm:$0xff] %v214_v12  ;;  %217 = vst [vmem:[%s2533_s8 + $0x9c] sm:$0xff] %v216_v13  ;;  %v222_v16 = vld [vmem:[%s2528_s7 + $0x240] sm:$0xff] }
  0x22   : > { %219 = vst [vmem:[%s2533_s8 + $0xa8] sm:$0xff] %v218_v14  ;;  %v224_v17 = vld [vmem:[%s2528_s7 + $0x264] sm:$0xff]  ;;  %221 = vst [vmem:[%s2533_s8 + $0xb4] sm:$0xff] %v220_v15  ;;  %v228_v19 = vld [vmem:[%s2528_s7 + $0x2ac] sm:$0xff] }
  0x23   : > { %223 = vst [vmem:[%s2533_s8 + $0xc0] sm:$0xff] %v222_v16  ;;  %225 = vst [vmem:[%s2533_s8 + $0xcc] sm:$0xff] %v224_v17  ;;  %v226_v18 = vld [vmem:[%s2528_s7 + $0x288] sm:$0xff]  ;;  %v230_v20 = vld [vmem:[%s2528_s7 + $0x2d0] sm:$0xff] }
  0x24   : > { %227 = vst [vmem:[%s2533_s8 + $0xd8] sm:$0xff] %v226_v18  ;;  %229 = vst [vmem:[%s2533_s8 + $0xe4] sm:$0xff] %v228_v19  ;;  %v232_v21 = vld [vmem:[%s2528_s7 + $0x2f4] sm:$0xff]  ;;  %v236_v23 = vld [vmem:[%s2528_s7 + $0x33c] sm:$0xff] }
  0x25   : > { %231 = vst [vmem:[%s2533_s8 + $0xf0] sm:$0xff] %v230_v20  ;;  %v234_v22 = vld [vmem:[%s2528_s7 + $0x318] sm:$0xff]  ;;  %233 = vst [vmem:[%s2533_s8 + $0xfc] sm:$0xff] %v232_v21  ;;  %v238_v24 = vld [vmem:[%s2528_s7 + $0x360] sm:$0xff] }
  0x26   : > { %235 = vst [vmem:[%s2533_s8 + $0x108] sm:$0xff] %v234_v22  ;;  %237 = vst [vmem:[%s2533_s8 + $0x114] sm:$0xff] %v236_v23  ;;  %v240_v25 = vld [vmem:[%s2528_s7 + $0x384] sm:$0xff]  ;;  %v244_v27 = vld [vmem:[%s2528_s7 + $0x3cc] sm:$0xff] }
  0x27   : > { %v242_v26 = vld [vmem:[%s2528_s7 + $0x3a8] sm:$0xff]  ;;  %239 = vst [vmem:[%s2533_s8 + $0x120] sm:$0xff] %v238_v24  ;;  %241 = vst [vmem:[%s2533_s8 + $0x12c] sm:$0xff] %v240_v25  ;;  %v246_v28 = vld [vmem:[%s2528_s7 + $0x3f0] sm:$0xff] }
  0x28   : > { %243 = vst [vmem:[%s2533_s8 + $0x138] sm:$0xff] %v242_v26  ;;  %v248_v29 = vld [vmem:[%s2528_s7 + $0x414] sm:$0xff]  ;;  %245 = vst [vmem:[%s2533_s8 + $0x144] sm:$0xff] %v244_v27  ;;  %v252_v31 = vld [vmem:[%s2528_s7 + $0x45c] sm:$0xff] }
  0x29   : > { %247 = vst [vmem:[%s2533_s8 + $0x150] sm:$0xff] %v246_v28  ;;  %249 = vst [vmem:[%s2533_s8 + $0x15c] sm:$0xff] %v248_v29  ;;  %v250_v30 = vld [vmem:[%s2528_s7 + $0x438] sm:$0xff]  ;;  %v1739_v32 = vld [vmem:[%s2528_s7 + $0x8] sm:$0xf] }
  0x2a   : > { %251 = vst [vmem:[%s2533_s8 + $0x168] sm:$0xff] %v250_v30  ;;  %253 = vst [vmem:[%s2533_s8 + $0x174] sm:$0xff] %v252_v31  ;;  %v1741_v33 = vld [vmem:[%s2528_s7 + $0x2c] sm:$0xf]  ;;  %v1743_v34 = vld [vmem:[%s2528_s7 + $0x50] sm:$0xf] }
  0x2b   : > { %1740 = vst [vmem:[%s2533_s8 + $0x8] sm:$0xf] %v1739_v32  ;;  %v1745_v35 = vld [vmem:[%s2528_s7 + $0x74] sm:$0xf]  ;;  %1742 = vst [vmem:[%s2533_s8 + $0x14] sm:$0xf] %v1741_v33 }
  0x2c   : > { %1744 = vst [vmem:[%s2533_s8 + $0x20] sm:$0xf] %v1743_v34  ;;  %1746 = vst [vmem:[%s2533_s8 + $0x2c] sm:$0xf] %v1745_v35  ;;  %v1747_v36 = vld [vmem:[%s2528_s7 + $0x98] sm:$0xf] }
  0x2d   : > { %v1749_v37 = vld [vmem:[%s2528_s7 + $0xbc] sm:$0xf]  ;;  %v1751_v38 = vld [vmem:[%s2528_s7 + $0xe0] sm:$0xf]  ;;  %1748 = vst [vmem:[%s2533_s8 + $0x38] sm:$0xf] %v1747_v36 }
  0x2e   : > { %1750 = vst [vmem:[%s2533_s8 + $0x44] sm:$0xf] %v1749_v37  ;;  %1752 = vst [vmem:[%s2533_s8 + $0x50] sm:$0xf] %v1751_v38  ;;  %v1753_v39 = vld [vmem:[%s2528_s7 + $0x104] sm:$0xf] }
  0x2f   : > { %v1755_v40 = vld [vmem:[%s2528_s7 + $0x128] sm:$0xf]  ;;  %v1757_v41 = vld [vmem:[%s2528_s7 + $0x14c] sm:$0xf]  ;;  %1754 = vst [vmem:[%s2533_s8 + $0x5c] sm:$0xf] %v1753_v39 }
  0x30   : > { %1756 = vst [vmem:[%s2533_s8 + $0x68] sm:$0xf] %v1755_v40  ;;  %1758 = vst [vmem:[%s2533_s8 + $0x74] sm:$0xf] %v1757_v41  ;;  %v1759_v42 = vld [vmem:[%s2528_s7 + $0x170] sm:$0xf] }
  0x31   : > { %v1761_v43 = vld [vmem:[%s2528_s7 + $0x194] sm:$0xf]  ;;  %v1763_v44 = vld [vmem:[%s2528_s7 + $0x1b8] sm:$0xf]  ;;  %1760 = vst [vmem:[%s2533_s8 + $0x80] sm:$0xf] %v1759_v42 }
  0x32   : > { %1762 = vst [vmem:[%s2533_s8 + $0x8c] sm:$0xf] %v1761_v43  ;;  %1764 = vst [vmem:[%s2533_s8 + $0x98] sm:$0xf] %v1763_v44  ;;  %v1765_v45 = vld [vmem:[%s2528_s7 + $0x1dc] sm:$0xf] }
  0x33   : > { %v1767_v46 = vld [vmem:[%s2528_s7 + $0x200] sm:$0xf]  ;;  %v1769_v47 = vld [vmem:[%s2528_s7 + $0x224] sm:$0xf]  ;;  %1766 = vst [vmem:[%s2533_s8 + $0xa4] sm:$0xf] %v1765_v45 }
  0x34   : > { %1768 = vst [vmem:[%s2533_s8 + $0xb0] sm:$0xf] %v1767_v46  ;;  %1770 = vst [vmem:[%s2533_s8 + $0xbc] sm:$0xf] %v1769_v47  ;;  %v1771_v48 = vld [vmem:[%s2528_s7 + $0x248] sm:$0xf] }
  0x35   : > { %v1773_v49 = vld [vmem:[%s2528_s7 + $0x26c] sm:$0xf]  ;;  %v1775_v50 = vld [vmem:[%s2528_s7 + $0x290] sm:$0xf]  ;;  %1772 = vst [vmem:[%s2533_s8 + $0xc8] sm:$0xf] %v1771_v48 }
  0x36   : > { %1774 = vst [vmem:[%s2533_s8 + $0xd4] sm:$0xf] %v1773_v49  ;;  %1776 = vst [vmem:[%s2533_s8 + $0xe0] sm:$0xf] %v1775_v50  ;;  %v1777_v51 = vld [vmem:[%s2528_s7 + $0x2b4] sm:$0xf] }
  0x37   : > { %v1779_v52 = vld [vmem:[%s2528_s7 + $0x2d8] sm:$0xf]  ;;  %v1781_v53 = vld [vmem:[%s2528_s7 + $0x2fc] sm:$0xf]  ;;  %1778 = vst [vmem:[%s2533_s8 + $0xec] sm:$0xf] %v1777_v51 }
  0x38   : > { %1780 = vst [vmem:[%s2533_s8 + $0xf8] sm:$0xf] %v1779_v52  ;;  %1782 = vst [vmem:[%s2533_s8 + $0x104] sm:$0xf] %v1781_v53  ;;  %v1783_v54 = vld [vmem:[%s2528_s7 + $0x320] sm:$0xf] }
  0x39   : > { %v1785_v55 = vld [vmem:[%s2528_s7 + $0x344] sm:$0xf]  ;;  %v1787_v56 = vld [vmem:[%s2528_s7 + $0x368] sm:$0xf]  ;;  %1784 = vst [vmem:[%s2533_s8 + $0x110] sm:$0xf] %v1783_v54 }
  0x3a   : > { %1786 = vst [vmem:[%s2533_s8 + $0x11c] sm:$0xf] %v1785_v55  ;;  %1788 = vst [vmem:[%s2533_s8 + $0x128] sm:$0xf] %v1787_v56  ;;  %v1789_v57 = vld [vmem:[%s2528_s7 + $0x38c] sm:$0xf] }
  0x3b   : > { %v1791_v58 = vld [vmem:[%s2528_s7 + $0x3b0] sm:$0xf]  ;;  %v1793_v59 = vld [vmem:[%s2528_s7 + $0x3d4] sm:$0xf]  ;;  %1790 = vst [vmem:[%s2533_s8 + $0x134] sm:$0xf] %v1789_v57 }
  0x3c   : > { %1792 = vst [vmem:[%s2533_s8 + $0x140] sm:$0xf] %v1791_v58  ;;  %1794 = vst [vmem:[%s2533_s8 + $0x14c] sm:$0xf] %v1793_v59  ;;  %v1795_v60 = vld [vmem:[%s2528_s7 + $0x3f8] sm:$0xf] }
  0x3d   : > { %v1797_v61 = vld [vmem:[%s2528_s7 + $0x41c] sm:$0xf]  ;;  %v1799_v62 = vld [vmem:[%s2528_s7 + $0x440] sm:$0xf]  ;;  %1796 = vst [vmem:[%s2533_s8 + $0x158] sm:$0xf] %v1795_v60 }
  0x3e   : > { %1798 = vst [vmem:[%s2533_s8 + $0x164] sm:$0xf] %v1797_v61  ;;  %1800 = vst [vmem:[%s2533_s8 + $0x170] sm:$0xf] %v1799_v62  ;;  %v1801_v63 = vld [vmem:[%s2528_s7 + $0x464] sm:$0xf] }
  0x3f   : > { %1802 = vst [vmem:[%s2533_s8 + $0x17c] sm:$0xf] %v1801_v63 }
  0x40 PF: > { %p1803_p7 = scmp.ge.s32.totalorder %s2445_s18, 1  ;;  %p341_p8 = scmp.lt.s32.totalorder %s2445_s18, 7 }
  0x42   : > { %p342_p9 = pnand %p1803_p7, %p341_p8 }
  0x43   : > { %s348_s9 = sand.u32 (!%p342_p9), 1, %s2421_s12   ;;  %s387_s10 = smul.u32 (!%p342_p9), 48, %s2429_s14 }
  0x44   : > { %345 = sbr.rel (%p342_p9) target bundleno = 448 (0x1c0), region = 54  ;;  %s1805_s21 = sshll.u32 (!%p342_p9), %s2433_s15, 5 }
  0x45   : > { %s2245_s11 = smul.u32 (!%p342_p9), 384, %s348_s9  ;;  %p388_p10 = scmp.lt.s32.totalorder (!%p342_p9), %s387_s10, 143 }
  0x46   : > { %p400_p11 = scmp.lt.s32.totalorder (!%p342_p9), %s1805_s21, 63  ;;  %p1807_p12 = scmp.ne.s32.totalorder (!%p342_p9), %s2429_s14, 0 }
  0x47   : > { %s2675_s12 = scalar_lea.vmem (!%p342_p9), [#allocation3], %s2245_s11 }
  0x4b   : > { %s2872_s10 = smov (!%p388_p10, %s387_s10), 143  ;;  %s2874_s21 = smov (!%p400_p11, %s1805_s21), 63 }
  0x4c   : > { %s1804_s22 = sshll.u32 %s2872_s10, 2  ;;  %s1806_s27 = sshll.u32 %s2874_s21, 2  ;;  %v2447_v0 = vmov (!%p1807_p12), 0.0  }
  0x4d   : > { %s2668_s26 = scalar_lea.vmem %s2856_s1, %s1804_s22  ;;  %s2673_s30 = scalar_lea.vmem %s2858_s3, %s1806_s27  ;;  %413 = vst [vmem:[#allocation2] sm:$0xff] (!%p1807_p12), %v2447_v0  ;;  %414 = vst [vmem:[#allocation2 + $0x8] sm:$0xff] (!%p1807_p12), %v2447_v0 }
  0x4e   : > { %412 = sbr.rel (%p1807_p12) target bundleno = 93 (0x5d), region = 62  ;;  %415 = vst [vmem:[#allocation2 + $0x10] sm:$0xff] (!%p1807_p12), %v2447_v0  ;;  %416 = vst [vmem:[#allocation2 + $0x18] sm:$0xff] (!%p1807_p12), %v2447_v0 }
  0x4f   : > { %417 = vst [vmem:[#allocation2 + $0x20] sm:$0xff] (!%p1807_p12), %v2447_v0  ;;  %418 = vst [vmem:[#allocation2 + $0x28] sm:$0xff] (!%p1807_p12), %v2447_v0 }
  0x50   : > { %419 = vst [vmem:[#allocation2 + $0x30] sm:$0xff] (!%p1807_p12), %v2447_v0  ;;  %420 = vst [vmem:[#allocation2 + $0x38] sm:$0xff] (!%p1807_p12), %v2447_v0 }
  0x51   : > { %421 = vst [vmem:[#allocation2 + $0x40] sm:$0xff] (!%p1807_p12), %v2447_v0  ;;  %422 = vst [vmem:[#allocation2 + $0x48] sm:$0xff] (!%p1807_p12), %v2447_v0 }
  0x52   : > { %423 = vst [vmem:[#allocation2 + $0x50] sm:$0xff] (!%p1807_p12), %v2447_v0  ;;  %424 = vst [vmem:[#allocation2 + $0x58] sm:$0xff] (!%p1807_p12), %v2447_v0 }
  0x53   : > { %425 = vst [vmem:[#allocation2 + $0x60] sm:$0xff] (!%p1807_p12), %v2447_v0  ;;  %426 = vst [vmem:[#allocation2 + $0x68] sm:$0xff] (!%p1807_p12), %v2447_v0 }
  0x54   : > { %427 = vst [vmem:[#allocation2 + $0x70] sm:$0xff] (!%p1807_p12), %v2447_v0  ;;  %428 = vst [vmem:[#allocation2 + $0x78] sm:$0xff] (!%p1807_p12), %v2447_v0 }
  0x55   : > { %429 = vst [vmem:[#allocation2 + $0x80] sm:$0xff] %v2447_v0  ;;  %430 = vst [vmem:[#allocation2 + $0x88] sm:$0xff] %v2447_v0 }
  0x56   : > { %431 = vst [vmem:[#allocation2 + $0x90] sm:$0xff] %v2447_v0  ;;  %432 = vst [vmem:[#allocation2 + $0x98] sm:$0xff] %v2447_v0 }
  0x57   : > { %433 = vst [vmem:[#allocation2 + $0xa0] sm:$0xff] %v2447_v0  ;;  %434 = vst [vmem:[#allocation2 + $0xa8] sm:$0xff] %v2447_v0 }
  0x58   : > { %435 = vst [vmem:[#allocation2 + $0xb0] sm:$0xff] %v2447_v0  ;;  %436 = vst [vmem:[#allocation2 + $0xb8] sm:$0xff] %v2447_v0 }
  0x59   : > { %437 = vst [vmem:[#allocation2 + $0xc0] sm:$0xff] %v2447_v0  ;;  %438 = vst [vmem:[#allocation2 + $0xc8] sm:$0xff] %v2447_v0 }
  0x5a   : > { %439 = vst [vmem:[#allocation2 + $0xd0] sm:$0xff] %v2447_v0  ;;  %440 = vst [vmem:[#allocation2 + $0xd8] sm:$0xff] %v2447_v0 }
  0x5b   : > { %441 = vst [vmem:[#allocation2 + $0xe0] sm:$0xff] %v2447_v0  ;;  %442 = vst [vmem:[#allocation2 + $0xe8] sm:$0xff] %v2447_v0 }
  0x5c   : > { %443 = vst [vmem:[#allocation2 + $0xf0] sm:$0xff] %v2447_v0  ;;  %444 = vst [vmem:[#allocation2 + $0xf8] sm:$0xff] %v2447_v0 }
  0x5d PF: > { %v2303_v1 = vld [vmem:[%s2668_s26 + $0x40] sm:$0xff]   ;;  %v2305_v3 = vld [vmem:[%s2668_s26 + $0x48] sm:$0xff]   ;;  %v2307_v5 = vld [vmem:[%s2668_s26 + $0x50] sm:$0xff]   ;;  %p1880_p13 = scmp.ne.s32.totalorder %s2429_s14, 2 }
  0x5e   : > { %v2304_v2 = vld [vmem:[%s2668_s26] sm:$0xff]   ;;  %2043 = vmatprep.subr.bf16.mxu0 %v2303_v1  ;;  %2227 = vmatprep.subr.bf16.mxu1 %v2303_v1  ;;  %v2306_v4 = vld [vmem:[%s2668_s26 + $0x8] sm:$0xff]   ;;  %v2308_v6 = vld [vmem:[%s2668_s26 + $0x10] sm:$0xff]  }
  0x5f   : > { %2044 = vmatpush3.bf16.msra.mxu0 %v2304_v2  ;;  %2235 = vmatpush3.bf16.msra.mxu1 %v2304_v2  ;;  %v2309_v7 = vld [vmem:[%s2668_s26 + $0x58] sm:$0xff]   ;;  %v2311_v9 = vld [vmem:[%s2668_s26 + $0x60] sm:$0xff]   ;;  %v2313_v11 = vld [vmem:[%s2668_s26 + $0x68] sm:$0xff]  }
  0x60   : > { %2045 = vmatprep.subr.bf16.mxu0 %v2305_v3  ;;  %2228 = vmatprep.subr.bf16.mxu1 %v2305_v3  ;;  %v2310_v8 = vld [vmem:[%s2668_s26 + $0x18] sm:$0xff]   ;;  %v2312_v10 = vld [vmem:[%s2668_s26 + $0x20] sm:$0xff]   ;;  %v2314_v14 = vld [vmem:[%s2668_s26 + $0x28] sm:$0xff]  }
  0x61   : > { %v2321_v12 = vld [vmem:[%s2675_s12 + $0x4] ss:$12 sps:$4 sm:$0xff]   ;;  %v2317_v17 = vld [vmem:[%s2668_s26 + $0x78] sm:$0xff]   ;;  %v2319_v20 = vld [vmem:[%s2675_s12] ss:$12 sps:$4 sm:$0xff]  }
  0x62   : > { %v2324_v13 = vld [vmem:[%s2675_s12 + $0x124] ss:$12 sps:$4 sm:$0xff]   ;;  %1021 = vmatprep.mubr.bf16.mxu0 %v2321_v12  ;;  %v2318_v18 = vld [vmem:[%s2668_s26 + $0x38] sm:$0xff]   ;;  %v2322_v21 = vld [vmem:[%s2675_s12 + $0x120] ss:$12 sps:$4 sm:$0xff]  }
  0x63   : > { %2046 = vmatpush3.bf16.msra.mxu0 %v2306_v4  ;;  %2236 = vmatpush3.bf16.msra.mxu1 %v2306_v4  ;;  %v2315_v15 = vld [vmem:[%s2668_s26 + $0x70] sm:$0xff]   ;;  %v2325_v19 = vld [vmem:[%s2668_s26 + $0x80] sm:$0xff]   ;;  %v2327_v22 = vld [vmem:[%s2675_s12 + $0x1c] ss:$12 sps:$4 sm:$0xff]  }
  0x64   : > { %2047 = vmatprep.subr.bf16.mxu0 %v2307_v5  ;;  %2229 = vmatprep.subr.bf16.mxu1 %v2307_v5  ;;  %v2316_v16 = vld [vmem:[%s2668_s26 + $0x30] sm:$0xff]   ;;  %v2326_v23 = vld [vmem:[%s2668_s26 + $0x88] sm:$0xff]   ;;  %v2331_v25 = vld [vmem:[%s2675_s12 + $0x18] ss:$12 sps:$4 sm:$0xff]  }
  0x65   : > { %1117 = vmatprep.mubr.bf16.mxu1 %v2324_v13  ;;  %v2329_v24 = vld [vmem:[%s2675_s12 + $0x13c] ss:$12 sps:$4 sm:$0xff]   ;;  %v2333_v26 = vld [vmem:[%s2668_s26 + $0x90] sm:$0xff]   ;;  %v2332_v27 = vld [vmem:[%s2675_s12 + $0x138] ss:$12 sps:$4 sm:$0xff]  }
  0x66   : > { %v2334_v28 = vld [vmem:[%s2668_s26 + $0x98] sm:$0xff]   ;;  %v2335_v29 = vld [vmem:[%s2675_s12 + $0x34] ss:$12 sps:$4 sm:$0xff]   ;;  %v2342_v34 = vld [vmem:[%s2668_s26 + $0xa8] sm:$0xff]  }
  0x67   : > { %2048 = vmatpush3.bf16.msra.mxu0 %v2308_v6  ;;  %2237 = vmatpush3.bf16.msra.mxu1 %v2308_v6  ;;  %v2337_v30 = vld [vmem:[%s2675_s12 + $0x154] ss:$12 sps:$4 sm:$0xff]   ;;  %v2339_v32 = vld [vmem:[%s2675_s12 + $0x30] ss:$12 sps:$4 sm:$0xff]   ;;  %v2343_v35 = vld [vmem:[%s2675_s12 + $0x4c] ss:$12 sps:$4 sm:$0xff]  }
  0x68   : > { %2049 = vmatprep.subr.bf16.mxu0 %v2309_v7  ;;  %2230 = vmatprep.subr.bf16.mxu1 %v2309_v7  ;;  %v2341_v31 = vld [vmem:[%s2668_s26 + $0xa0] sm:$0xff]   ;;  %v2340_v33 = vld [vmem:[%s2675_s12 + $0x150] ss:$12 sps:$4 sm:$0xff]   ;;  %v2345_v36 = vld [vmem:[%s2675_s12 + $0x16c] ss:$12 sps:$4 sm:$0xff]  }
  0x69   : > { %v2349_v37 = vld [vmem:[%s2668_s26 + $0xb0] sm:$0xff]   ;;  %v2350_v41 = vld [vmem:[%s2668_s26 + $0xb8] sm:$0xff]   ;;  %v2354_v43 = vld [vmem:[%s2675_s12 + $0x60] ss:$12 sps:$4 sm:$0xff]  }
  0x6a   : > { %v2347_v38 = vld [vmem:[%s2675_s12 + $0x48] ss:$12 sps:$4 sm:$0xff]   ;;  %v2351_v40 = vld [vmem:[%s2675_s12 + $0x64] ss:$12 sps:$4 sm:$0xff]   ;;  %v2355_v44 = vld [vmem:[%s2675_s12 + $0x20] ss:$12 sps:$4 sm:$0xff]  }
  0x6b   : > { %2050 = vmatpush3.bf16.msra.mxu0 %v2310_v8  ;;  %2238 = vmatpush3.bf16.msra.mxu1 %v2310_v8  ;;  %v2348_v39 = vld [vmem:[%s2675_s12 + $0x168] ss:$12 sps:$4 sm:$0xff]   ;;  %v2358_v46 = vld [vmem:[%s2675_s12 + $0x38] ss:$12 sps:$4 sm:$0xff]   ;;  %v2360_v48 = vld [vmem:[%s2675_s12 + $0x50] ss:$12 sps:$4 sm:$0xff]  }
  0x6c   : > { %2051 = vmatprep.subr.bf16.mxu0 %v2311_v9  ;;  %2231 = vmatprep.subr.bf16.mxu1 %v2311_v9  ;;  %v2353_v42 = vld [vmem:[%s2675_s12 + $0x8] ss:$12 sps:$4 sm:$0xff]   ;;  %v2359_v47 = vld [vmem:[%s2675_s12 + $0x78] ss:$12 sps:$4 sm:$0xff]   ;;  %v2364_v51 = vld [vmem:[%s2675_s12 + $0x90] ss:$12 sps:$4 sm:$0xff]  }
  0x6d   : > { %v2356_v45 = vld [vmem:[%s2675_s12 + $0x7c] ss:$12 sps:$4 sm:$0xff]   ;;  %v2361_v49 = vld [vmem:[%s2675_s12 + $0x94] ss:$12 sps:$4 sm:$0xff]   ;;  %v2366_v53 = vld [vmem:[%s2675_s12 + $0xac] ss:$12 sps:$4 sm:$0xff]  }
  0x6e   : > { %v2363_v50 = vld [vmem:[%s2675_s12 + $0x68] ss:$12 sps:$4 sm:$0xff]   ;;  %v2365_v52 = vld [vmem:[%s2675_s12 + $0x80] ss:$12 sps:$4 sm:$0xff]   ;;  %v2368_v54 = vld [vmem:[%s2675_s12 + $0x98] ss:$12 sps:$4 sm:$0xff]  }
  0x6f   : > { %2052 = vmatpush3.bf16.msra.mxu0 %v2312_v10  ;;  %2239 = vmatpush3.bf16.msra.mxu1 %v2312_v10  ;;  %v2369_v55 = vld [vmem:[%s2675_s12 + $0xa8] ss:$12 sps:$4 sm:$0xff]   ;;  %v2370_v56 = vld [vmem:[%s2675_s12 + $0xb0] ss:$12 sps:$4 sm:$0xff]   ;;  %v2374_v59 = vld [vmem:[%s2675_s12 + $0xc0] ss:$12 sps:$4 sm:$0xff]  }
  0x70   : > { %2053 = vmatprep.subr.bf16.mxu0 %v2313_v11  ;;  %2232 = vmatprep.subr.bf16.mxu1 %v2313_v11  ;;  %v2371_v57 = vld [vmem:[%s2675_s12 + $0xc4] ss:$12 sps:$4 sm:$0xff]   ;;  %v2373_v58 = vld [vmem:[%s2675_s12 + $0xc8] ss:$12 sps:$4 sm:$0xff]   ;;  %v2375_v60 = vld [vmem:[%s2675_s12 + $0xe0] ss:$12 sps:$4 sm:$0xff]  }
  0x71   : > { %v2376_v61 = vld [vmem:[%s2675_s12 + $0xdc] ss:$12 sps:$4 sm:$0xff]   ;;  %v2378_v62 = vld [vmem:[%s2675_s12 + $0xf8] ss:$12 sps:$4 sm:$0xff]   ;;  %v2381_v1 = vld [vmem:[%s2675_s12 + $0xf4] ss:$12 sps:$4 sm:$0xff]  }
  0x72   : > { %v2379_v63 = vld [vmem:[%s2675_s12 + $0xd8] ss:$12 sps:$4 sm:$0xff]   ;;  %v2380_v0 = vld [vmem:[%s2675_s12 + $0x110] ss:$12 sps:$4 sm:$0xff]   ;;  %v2383_v2 = vld [vmem:[%s2675_s12 + $0x128] ss:$12 sps:$4 sm:$0xff]  }
  0x73   : > { %2054 = vmatpush3.bf16.msra.mxu0 %v2314_v14  ;;  %2240 = vmatpush3.bf16.msra.mxu1 %v2314_v14  ;;  %v2384_v3 = vld [vmem:[%s2675_s12 + $0xf0] ss:$12 sps:$4 sm:$0xff]   ;;  %v2385_v4 = vld [vmem:[%s2675_s12 + $0x140] ss:$12 sps:$4 sm:$0xff]   ;;  %v2388_v6 = vld [vmem:[%s2675_s12 + $0x158] ss:$12 sps:$4 sm:$0xff]  }
  0x74   : > { %2055 = vmatprep.subr.bf16.mxu0 %v2315_v15  ;;  %2233 = vmatprep.subr.bf16.mxu1 %v2315_v15  ;;  %v2386_v5 = vld [vmem:[%s2675_s12 + $0x10c] ss:$12 sps:$4 sm:$0xff]   ;;  %v2389_v7 = vld [vmem:[%s2675_s12 + $0x108] ss:$12 sps:$4 sm:$0xff]   ;;  %v2390_v8 = vld [vmem:[%s2675_s12 + $0x170] ss:$12 sps:$4 sm:$0xff]  }
  0x77   : > { %2056 = vmatpush3.bf16.msra.mxu0 %v2316_v16  ;;  %2241 = vmatpush3.bf16.msra.mxu1 %v2316_v16 }
  0x78   : > { %2057 = vmatprep.subr.bf16.mxu0 %v2317_v17  ;;  %2234 = vmatprep.subr.bf16.mxu1 %v2317_v17 }
  0x7b   : > { %2058 = vmatpush3.bf16.msra.mxu0 %v2318_v18  ;;  %2242 = vmatpush3.bf16.msra.mxu1 %v2318_v18 }
  0x7c   : > { %2179 = vmatprep.subr.bf16.mxu1 %v2325_v19 }
  0x7e   : > { %1022 = vmatmul.mubr.bf16.vlgmr.msra.gmra.mrb[0].mxu0 %v2319_v20  ;;  %1118 = vmatmul.mubr.bf16.vlgmr.msra.gmra.mrb[0].mxu1 %v2322_v21 }
  0x7f   : > { %2180 = vmatpush3.bf16.msra.mxu1 %v2325_v19  ;;  %1029 = vmatprep.mubr.bf16.mxu0 %v2327_v22 }
  0x80   : > { %2181 = vmatprep.subr.bf16.mxu1 %v2326_v23  ;;  %1125 = vmatprep.mubr.bf16.mxu1 %v2329_v24 }
  0x83   : > { %2182 = vmatpush3.bf16.msra.mxu1 %v2326_v23 }
  0x84   : > { %2183 = vmatprep.subr.bf16.mxu1 %v2333_v26 }
  0x86   : > { %1030 = vmatmul.mubr.bf16.gmra.mrb[4].mxu0 %v2331_v25  ;;  %1126 = vmatmul.mubr.bf16.gmra.mrb[4].mxu1 %v2332_v27 }
  0x87   : > { %2184 = vmatpush3.bf16.msra.mxu1 %v2333_v26  ;;  %1037 = vmatprep.mubr.bf16.mxu0 %v2335_v29 }
  0x88   : > { %2185 = vmatprep.subr.bf16.mxu1 %v2334_v28  ;;  %1133 = vmatprep.mubr.bf16.mxu1 %v2337_v30 }
  0x8b   : > { %2186 = vmatpush3.bf16.msra.mxu1 %v2334_v28 }
  0x8c   : > { %2187 = vmatprep.subr.bf16.mxu1 %v2341_v31 }
  0x8e   : > { %1038 = vmatmul.mubr.bf16.gmra.mrb[8].mxu0 %v2339_v32  ;;  %1134 = vmatmul.mubr.bf16.gmra.mrb[8].mxu1 %v2340_v33 }
  0x8f   : > { %2188 = vmatpush3.bf16.msra.mxu1 %v2341_v31  ;;  %1045 = vmatprep.mubr.bf16.mxu0 %v2343_v35 }
  0x90   : > { %2189 = vmatprep.subr.bf16.mxu1 %v2342_v34  ;;  %1141 = vmatprep.mubr.bf16.mxu1 %v2345_v36 }
  0x93   : > { %2190 = vmatpush3.bf16.msra.mxu1 %v2342_v34 }
  0x94   : > { %2191 = vmatprep.subr.bf16.mxu1 %v2349_v37 }
  0x96   : > { %1046 = vmatmul.mubr.bf16.gmra.mrb[12].mxu0 %v2347_v38  ;;  %1142 = vmatmul.mubr.bf16.gmra.mrb[12].mxu1 %v2348_v39 }
  0x97   : > { %2192 = vmatpush3.bf16.msra.mxu1 %v2349_v37  ;;  %1053 = vmatprep.mubr.bf16.mxu0 %v2351_v40 }
  0x98   : > { %2193 = vmatprep.subr.bf16.mxu1 %v2350_v41  ;;  %2195 = vmatprep.mubr.bf16.mxu1 %v2353_v42 }
  0x9b   : > { %2194 = vmatpush3.bf16.msra.mxu1 %v2350_v41 }
  0x9e   : > { %1054 = vmatmul.mubr.bf16.gmra.mrb[16].mxu0 %v2354_v43  ;;  %2196 = vmatmul.mubr.bf16.vlgmr.msra.gmra.mrb[16].mxu1 %v2355_v44 }
  0x9f   : > { %1061 = vmatprep.mubr.bf16.mxu0 %v2356_v45  ;;  %2199 = vmatprep.mubr.bf16.mxu1 %v2358_v46 }
  0xa6   : > { %1062 = vmatmul.mubr.bf16.gmra.mrb[20].mxu0 %v2359_v47  ;;  %2200 = vmatmul.mubr.bf16.gmra.mrb[20].mxu1 %v2360_v48 }
  0xa7   : > { %1069 = vmatprep.mubr.bf16.mxu0 %v2361_v49  ;;  %2203 = vmatprep.mubr.bf16.mxu1 %v2363_v50 }
  0xae   : > { %1070 = vmatmul.mubr.bf16.gmra.mrb[24].mxu0 %v2364_v51  ;;  %2204 = vmatmul.mubr.bf16.gmra.mrb[24].mxu1 %v2365_v52 }
  0xaf   : > { %1077 = vmatprep.mubr.bf16.mxu0 %v2366_v53  ;;  %2207 = vmatprep.mubr.bf16.mxu1 %v2368_v54 }
  0xb6   : > { %1078 = vmatmul.mubr.bf16.gmra.mrb[28].mxu0 %v2369_v55  ;;  %2208 = vmatmul.mubr.bf16.gmra.mrb[28].mxu1 %v2370_v56 }
  0xb7   : > { %1085 = vmatprep.mubr.bf16.mxu0 %v2371_v57  ;;  %2211 = vmatprep.mubr.bf16.mxu1 %v2373_v58  ;;  %v447_v58 = vld [vmem:[#allocation2 + $0x10] sm:$0xff] }
  0xbe   : > { %1086 = vmatmul.mubr.bf16.gmra.mrb[32].mxu0 %v2374_v59  ;;  %2212 = vmatmul.mubr.bf16.gmra.mrb[32].mxu1 %v2375_v60 }
  0xbf   : > { %1093 = vmatprep.mubr.bf16.mxu0 %v2376_v61  ;;  %2215 = vmatprep.mubr.bf16.mxu1 %v2378_v62  ;;  %v445_v62 = vld [vmem:[#allocation2] sm:$0xff] }
  0xc6   : > { %1094 = vmatmul.mubr.bf16.gmra.mrb[36].mxu0 %v2379_v63  ;;  %2216 = vmatmul.mubr.bf16.gmra.mrb[36].mxu1 %v2380_v0 }
  0xc7   : > { %1101 = vmatprep.mubr.bf16.mxu0 %v2381_v1  ;;  %2219 = vmatprep.mubr.bf16.mxu1 %v2383_v2 }
  0xce   : > { %1102 = vmatmul.mubr.bf16.gmra.mrb[40].mxu0 %v2384_v3  ;;  %2220 = vmatmul.mubr.bf16.gmra.mrb[40].mxu1 %v2385_v4  ;;  %v448_v3 = vld [vmem:[#allocation2 + $0x18] sm:$0xff] }
  0xcf   : > { %1109 = vmatprep.mubr.bf16.mxu0 %v2386_v5  ;;  %2223 = vmatprep.mubr.bf16.mxu1 %v2388_v6 }
  0xd6   : > { %1110 = vmatmul.mubr.bf16.gmra.mrb[44].mxu0 %v2389_v7  ;;  %2224 = vmatmul.mubr.bf16.gmra.mrb[44].mxu1 %v2390_v8  ;;  %v446_v8 = vld [vmem:[#allocation2 + $0x8] sm:$0xff] }
 0x151   : > { %v2059_v9 = vpop.f32.mrb[0].mxu0  ;;  %v2131_v10 = vpop.f32.mrb[0].mxu1 }
 0x152   : > { %v2060_v11 = vpop.f32.mrb[1].mxu0  ;;  %v2132_v12 = vpop.f32.mrb[1].mxu1 }
 0x153   : > { %v2061_v13 = vadd.f32 %v2060_v11, %v2059_v9  ;;  %v2750_v14 = vadd.f32 %v2132_v12, %v2131_v10  ;;  %v2062_v15 = vpop.f32.mrb[2].mxu0  ;;  %v2134_v16 = vpop.f32.mrb[2].mxu1 }
 0x154   : > { %v2063_v17 = vpop.f32.mrb[3].mxu0  ;;  %v2135_v18 = vpop.f32.mrb[3].mxu1 }
 0x155   : > { %v2064_v19 = vadd.f32 %v2063_v17, %v2062_v15  ;;  %v2752_v20 = vadd.f32 %v2135_v18, %v2134_v16  ;;  %v451_v18 = vld [vmem:[#allocation2 + $0x30] sm:$0xff] }
 0x159   : > { %v2065_v21 = vpop.f32.mrb[4].mxu0  ;;  %v2137_v22 = vpop.f32.mrb[4].mxu1 }
 0x15a   : > { %v2066_v23 = vpop.f32.mrb[5].mxu0  ;;  %v2138_v24 = vpop.f32.mrb[5].mxu1 }
 0x15b   : > { %v2067_v25 = vadd.f32 %v2066_v23, %v2065_v21  ;;  %v2754_v26 = vadd.f32 %v2138_v24, %v2137_v22  ;;  %v2068_v27 = vpop.f32.mrb[6].mxu0  ;;  %v2140_v28 = vpop.f32.mrb[6].mxu1  ;;  %v449_v23 = vld [vmem:[#allocation2 + $0x20] sm:$0xff] }
 0x15c   : > { %v2069_v29 = vpop.f32.mrb[7].mxu0  ;;  %v2141_v30 = vpop.f32.mrb[7].mxu1 }
 0x15d   : > { %v2070_v31 = vadd.f32 %v2069_v29, %v2068_v27  ;;  %v2756_v32 = vadd.f32 %v2141_v30, %v2140_v28  ;;  %v452_v29 = vld [vmem:[#allocation2 + $0x38] sm:$0xff] }
 0x161   : > { %v2071_v33 = vpop.f32.mrb[8].mxu0  ;;  %v2143_v34 = vpop.f32.mrb[8].mxu1 }
 0x162   : > { %v2072_v35 = vpop.f32.mrb[9].mxu0  ;;  %v2144_v36 = vpop.f32.mrb[9].mxu1 }
 0x163   : > { %v2073_v37 = vadd.f32 %v2072_v35, %v2071_v33  ;;  %v2758_v38 = vadd.f32 %v2144_v36, %v2143_v34  ;;  %v2074_v39 = vpop.f32.mrb[10].mxu0  ;;  %v2146_v40 = vpop.f32.mrb[10].mxu1  ;;  %v450_v34 = vld [vmem:[#allocation2 + $0x28] sm:$0xff] }
 0x164   : > { %v2075_v41 = vpop.f32.mrb[11].mxu0  ;;  %v2147_v42 = vpop.f32.mrb[11].mxu1 }
 0x165   : > { %v2076_v43 = vadd.f32 %v2075_v41, %v2074_v39  ;;  %v2760_v44 = vadd.f32 %v2147_v42, %v2146_v40 }
 0x169   : > { %v2077_v45 = vpop.f32.mrb[12].mxu0  ;;  %v2149_v46 = vpop.f32.mrb[12].mxu1 }
 0x16a   : > { %v2078_v47 = vpop.f32.mrb[13].mxu0  ;;  %v2150_v48 = vpop.f32.mrb[13].mxu1 }
 0x16b   : > { %v2079_v49 = vadd.f32 %v2078_v47, %v2077_v45  ;;  %v2762_v50 = vadd.f32 %v2150_v48, %v2149_v46  ;;  %v2080_v51 = vpop.f32.mrb[14].mxu0  ;;  %v2152_v52 = vpop.f32.mrb[14].mxu1  ;;  %v455_v46 = vld [vmem:[#allocation2 + $0x50] sm:$0xff] }
 0x16c   : > { %v2081_v53 = vpop.f32.mrb[15].mxu0  ;;  %v2153_v54 = vpop.f32.mrb[15].mxu1 }
 0x16d   : > { %v2082_v55 = vadd.f32 %v2081_v53, %v2080_v51  ;;  %v2764_v56 = vadd.f32 %v2153_v54, %v2152_v52 }
 0x171   : > { %v2083_v57 = vpop.f32.mrb[16].mxu0  ;;  %v2197_v59 = vpop.f32.mrb[16].mxu1 }
 0x172   : > { %v1193_v60 = vadd.f32 %v2197_v59, %v2067_v25  ;;  %v2084_v61 = vpop.f32.mrb[17].mxu0  ;;  %v1184_v63 = vpop.f32.mrb[17].mxu1 }
 0x173   : > { %v2085_v0 = vadd.f32 %v2084_v61, %v2083_v57  ;;  %v1185_v1 = vadd.f32 %v2061_v13, %v1184_v63  ;;  %v2086_v2 = vpop.f32.mrb[18].mxu0  ;;  %v2198_v4 = vpop.f32.mrb[18].mxu1 }
 0x174   : > { %v1313_v5 = vadd.f32 %v1193_v60, %v447_v58  ;;  %v1196_v6 = vadd.f32 %v2198_v4, %v2070_v31  ;;  %v2087_v7 = vpop.f32.mrb[19].mxu0  ;;  %v1187_v9 = vpop.f32.mrb[19].mxu1  ;;  %v454_v60 = vld [vmem:[#allocation2 + $0x48] sm:$0xff] }
 0x175   : > { %v1311_v10 = vadd.f32 %v1185_v1, %v445_v62  ;;  %v2088_v11 = vadd.f32 %v2087_v7, %v2086_v2  ;;  %v1188_v12 = vadd.f32 %v2064_v19, %v1187_v9 }
 0x176   : > { %1345 = vst [vmem:[#allocation2 + $0x10] sm:$0xff] %v1313_v5  ;;  %v1314_v15 = vadd.f32 %v1196_v6, %v448_v3  ;;  %v457_v6 = vld [vmem:[#allocation2 + $0x60] sm:$0xff] }
 0x177   : > { %1343 = vst [vmem:[#allocation2] sm:$0xff] %v1311_v10  ;;  %v1312_v16 = vadd.f32 %v1188_v12, %v446_v8 }
 0x178   : > { %1346 = vst [vmem:[#allocation2 + $0x18] sm:$0xff] %v1314_v15  ;;  %v459_v15 = vld [vmem:[#allocation2 + $0x70] sm:$0xff] }
 0x179   : > { %1344 = vst [vmem:[#allocation2 + $0x8] sm:$0xff] %v1312_v16  ;;  %v2089_v17 = vpop.f32.mrb[20].mxu0  ;;  %v2201_v13 = vpop.f32.mrb[20].mxu1 }
 0x17a   : > { %v1209_v21 = vadd.f32 %v2201_v13, %v2079_v49  ;;  %v2090_v22 = vpop.f32.mrb[21].mxu0  ;;  %v1200_v24 = vpop.f32.mrb[21].mxu1  ;;  %v453_v49 = vld [vmem:[#allocation2 + $0x40] sm:$0xff] }
 0x17b   : > { %v2091_v25 = vadd.f32 %v2090_v22, %v2089_v17  ;;  %v1201_v27 = vadd.f32 %v2073_v37, %v1200_v24  ;;  %v2092_v28 = vpop.f32.mrb[22].mxu0  ;;  %v2202_v30 = vpop.f32.mrb[22].mxu1  ;;  %v458_v17 = vld [vmem:[#allocation2 + $0x68] sm:$0xff] }
 0x17c   : > { %v1317_v31 = vadd.f32 %v1209_v21, %v451_v18  ;;  %v1212_v19 = vadd.f32 %v2202_v30, %v2082_v55  ;;  %v2093_v33 = vpop.f32.mrb[23].mxu0  ;;  %v1203_v35 = vpop.f32.mrb[23].mxu1  ;;  %v456_v55 = vld [vmem:[#allocation2 + $0x58] sm:$0xff] }
 0x17d   : > { %v1315_v36 = vadd.f32 %v1201_v27, %v449_v23  ;;  %v2094_v39 = vadd.f32 %v2093_v33, %v2092_v28  ;;  %v1204_v40 = vadd.f32 %v2076_v43, %v1203_v35  ;;  %v460_v23 = vld [vmem:[#allocation2 + $0x78] sm:$0xff] }
 0x17e   : > { %1349 = vst [vmem:[#allocation2 + $0x30] sm:$0xff] %v1317_v31  ;;  %v1318_v41 = vadd.f32 %v1212_v19, %v452_v29 }
 0x17f   : > { %1347 = vst [vmem:[#allocation2 + $0x20] sm:$0xff] %v1315_v36  ;;  %v1316_v42 = vadd.f32 %v1204_v40, %v450_v34  ;;  %v461_v36 = vld [vmem:[#allocation2 + $0x80] sm:$0xff] }
 0x180   : > { %1350 = vst [vmem:[#allocation2 + $0x38] sm:$0xff] %v1318_v41 }
 0x181   : > { %1348 = vst [vmem:[#allocation2 + $0x28] sm:$0xff] %v1316_v42  ;;  %v2095_v45 = vpop.f32.mrb[24].mxu0  ;;  %v2205_v37 = vpop.f32.mrb[24].mxu1 }
 0x182   : > { %v1225_v47 = vadd.f32 %v2205_v37, %v2091_v25  ;;  %v2096_v48 = vpop.f32.mrb[25].mxu0  ;;  %v1216_v51 = vpop.f32.mrb[25].mxu1 }
 0x183   : > { %v2097_v52 = vadd.f32 %v2096_v48, %v2095_v45  ;;  %v1217_v53 = vadd.f32 %v2085_v0, %v1216_v51  ;;  %v2098_v54 = vpop.f32.mrb[26].mxu0  ;;  %v2206_v57 = vpop.f32.mrb[26].mxu1  ;;  %v462_v45 = vld [vmem:[#allocation2 + $0x88] sm:$0xff] }
 0x184   : > { %v1321_v58 = vadd.f32 %v1225_v47, %v455_v46  ;;  %v1228_v43 = vadd.f32 %v2206_v57, %v2094_v39  ;;  %v2099_v59 = vpop.f32.mrb[27].mxu0  ;;  %v1219_v61 = vpop.f32.mrb[27].mxu1  ;;  %v463_v57 = vld [vmem:[#allocation2 + $0x90] sm:$0xff] }
 0x185   : > { %v1319_v62 = vadd.f32 %v1217_v53, %v453_v49  ;;  %v2100_v63 = vadd.f32 %v2099_v59, %v2098_v54  ;;  %v1220_v1 = vadd.f32 %v2088_v11, %v1219_v61  ;;  %v464_v61 = vld [vmem:[#allocation2 + $0x98] sm:$0xff] }
 0x186   : > { %1353 = vst [vmem:[#allocation2 + $0x50] sm:$0xff] %v1321_v58  ;;  %v1322_v2 = vadd.f32 %v1228_v43, %v456_v55 }
 0x187   : > { %1351 = vst [vmem:[#allocation2 + $0x40] sm:$0xff] %v1319_v62  ;;  %v1320_v3 = vadd.f32 %v1220_v1, %v454_v60 }
 0x188   : > { %1354 = vst [vmem:[#allocation2 + $0x58] sm:$0xff] %v1322_v2 }
 0x189   : > { %1352 = vst [vmem:[#allocation2 + $0x48] sm:$0xff] %v1320_v3  ;;  %v2101_v4 = vpop.f32.mrb[28].mxu0  ;;  %v2209_v5 = vpop.f32.mrb[28].mxu1  ;;  %v471_v3 = vld [vmem:[#allocation2 + $0xd0] sm:$0xff] }
 0x18a   : > { %v2102_v0 = vpop.f32.mrb[29].mxu0  ;;  %v1232_v7 = vpop.f32.mrb[29].mxu1 }
 0x18b   : > { %v2103_v8 = vadd.f32 %v2102_v0, %v2101_v4  ;;  %v1233_v9 = vadd.f32 %v2097_v52, %v1232_v7  ;;  %v2104_v10 = vpop.f32.mrb[30].mxu0  ;;  %v2210_v12 = vpop.f32.mrb[30].mxu1 }
 0x18c   : > { %v2105_v16 = vpop.f32.mrb[31].mxu0  ;;  %v1235_v18 = vpop.f32.mrb[31].mxu1 }
 0x18d   : > { %v1241_v11 = vadd.f32 %v2209_v5, %v2103_v8  ;;  %v1323_v13 = vadd.f32 %v1233_v9, %v457_v6  ;;  %v2106_v21 = vadd.f32 %v2105_v16, %v2104_v10  ;;  %v1236_v22 = vadd.f32 %v2100_v63, %v1235_v18  ;;  %v469_v6 = vld [vmem:[#allocation2 + $0xc0] sm:$0xff] }
 0x18f   : > { %v1325_v24 = vadd.f32 %v1241_v11, %v459_v15  ;;  %1355 = vst [vmem:[#allocation2 + $0x60] sm:$0xff] %v1323_v13  ;;  %v1244_v25 = vadd.f32 %v2210_v12, %v2106_v21  ;;  %v1324_v27 = vadd.f32 %v1236_v22, %v458_v17  ;;  %v472_v12 = vld [vmem:[#allocation2 + $0xd8] sm:$0xff]  ;;  %v465_v17 = vld [vmem:[#allocation2 + $0xa0] sm:$0xff]  ;;  %v470_v13 = vld [vmem:[#allocation2 + $0xc8] sm:$0xff] }
 0x191   : > { %1357 = vst [vmem:[#allocation2 + $0x70] sm:$0xff] %v1325_v24  ;;  %v1326_v28 = vadd.f32 %v1244_v25, %v460_v23  ;;  %1356 = vst [vmem:[#allocation2 + $0x68] sm:$0xff] %v1324_v27  ;;  %v2107_v29 = vpop.f32.mrb[32].mxu0  ;;  %v2213_v30 = vpop.f32.mrb[32].mxu1  ;;  %v466_v27 = vld [vmem:[#allocation2 + $0xa8] sm:$0xff] }
 0x192   : > { %v2108_v31 = vpop.f32.mrb[33].mxu0  ;;  %v1248_v19 = vpop.f32.mrb[33].mxu1 }
 0x193   : > { %1358 = vst [vmem:[#allocation2 + $0x78] sm:$0xff] %v1326_v28  ;;  %v2109_v33 = vadd.f32 %v2108_v31, %v2107_v29  ;;  %v2110_v34 = vpop.f32.mrb[34].mxu0  ;;  %v2214_v35 = vpop.f32.mrb[34].mxu1  ;;  %v475_v31 = vld [vmem:[#allocation2 + $0xf0] sm:$0xff] }
 0x194   : > { %v2111_v39 = vpop.f32.mrb[35].mxu0  ;;  %v1251_v40 = vpop.f32.mrb[35].mxu1 }
 0x195   : > { %v1249_v41 = vadd.f32 %v2109_v33, %v1248_v19  ;;  %v2112_v42 = vadd.f32 %v2111_v39, %v2110_v34 }
 0x197   : > { %v1327_v46 = vadd.f32 %v1249_v41, %v461_v36  ;;  %v1252_v37 = vadd.f32 %v2112_v42, %v1251_v40  ;;  %v476_v41 = vld [vmem:[#allocation2 + $0xf8] sm:$0xff] }
 0x199   : > { %1359 = vst [vmem:[#allocation2 + $0x80] sm:$0xff] %v1327_v46  ;;  %v1328_v47 = vadd.f32 %v1252_v37, %v462_v45  ;;  %v2113_v48 = vpop.f32.mrb[36].mxu0  ;;  %v2766_v49 = vpop.f32.mrb[36].mxu1  ;;  %v467_v46 = vld [vmem:[#allocation2 + $0xb0] sm:$0xff] }
 0x19a   : > { %v2114_v51 = vpop.f32.mrb[37].mxu0  ;;  %v1264_v52 = vpop.f32.mrb[37].mxu1 }
 0x19b   : > { %1360 = vst [vmem:[#allocation2 + $0x88] sm:$0xff] %v1328_v47  ;;  %v2115_v53 = vadd.f32 %v2114_v51, %v2113_v48  ;;  %v2116_v54 = vpop.f32.mrb[38].mxu0  ;;  %v2768_v55 = vpop.f32.mrb[38].mxu1  ;;  %v474_v48 = vld [vmem:[#allocation2 + $0xe8] sm:$0xff] }
 0x19c   : > { %v2117_v58 = vpop.f32.mrb[39].mxu0  ;;  %v1267_v43 = vpop.f32.mrb[39].mxu1 }
 0x19d   : > { %v1257_v59 = vadd.f32 %v2213_v30, %v2115_v53  ;;  %v2118_v60 = vadd.f32 %v2117_v58, %v2116_v54  ;;  %v468_v58 = vld [vmem:[#allocation2 + $0xb8] sm:$0xff] }
 0x19f   : > { %v1329_v62 = vadd.f32 %v1257_v59, %v463_v57  ;;  %v1260_v63 = vadd.f32 %v2214_v35, %v2118_v60  ;;  %v473_v35 = vld [vmem:[#allocation2 + $0xe0] sm:$0xff]  ;;  %v1380_v60 = vld [vmem:[#allocation2 + $0x8] sm:$0xff] (!%p1880_p13) }
 0x1a1   : > { %1361 = vst [vmem:[#allocation2 + $0x90] sm:$0xff] %v1329_v62  ;;  %v1330_v1 = vadd.f32 %v1260_v63, %v464_v61  ;;  %v2119_v2 = vpop.f32.mrb[40].mxu0  ;;  %v2221_v4 = vpop.f32.mrb[40].mxu1  ;;  %v1381_v62 = vld [vmem:[#allocation2 + $0x10] sm:$0xff] (!%p1880_p13)  ;;  %v1382_v63 = vld [vmem:[#allocation2 + $0x18] sm:$0xff] (!%p1880_p13) }
 0x1a2   : > { %v1289_v5 = vadd.f32 %v2221_v4, %v2754_v26  ;;  %v2120_v0 = vpop.f32.mrb[41].mxu0  ;;  %v1280_v7 = vpop.f32.mrb[41].mxu1  ;;  %v1384_v4 = vld [vmem:[#allocation2 + $0x28] sm:$0xff] (!%p1880_p13) }
 0x1a3   : > { %1362 = vst [vmem:[#allocation2 + $0x98] sm:$0xff] %v1330_v1  ;;  %v2121_v8 = vadd.f32 %v2120_v0, %v2119_v2  ;;  %v1281_v9 = vadd.f32 %v2750_v14, %v1280_v7  ;;  %v2122_v10 = vpop.f32.mrb[42].mxu0  ;;  %v2222_v15 = vpop.f32.mrb[42].mxu1  ;;  %v1383_v1 = vld [vmem:[#allocation2 + $0x20] sm:$0xff] (!%p1880_p13)  ;;  %v1385_v0 = vld [vmem:[#allocation2 + $0x30] sm:$0xff] (!%p1880_p13) }
 0x1a4   : > { %v1337_v16 = vadd.f32 %v1289_v5, %v471_v3  ;;  %v1292_v18 = vadd.f32 %v2222_v15, %v2756_v32  ;;  %v2123_v11 = vpop.f32.mrb[43].mxu0  ;;  %v1283_v21 = vpop.f32.mrb[43].mxu1  ;;  %v1388_v15 = vld [vmem:[#allocation2 + $0x48] sm:$0xff] (!%p1880_p13) }
 0x1a5   : > { %v1265_v22 = vadd.f32 %v2121_v8, %v1264_v52  ;;  %v1335_v23 = vadd.f32 %v1281_v9, %v469_v6  ;;  %v2124_v26 = vadd.f32 %v2123_v11, %v2122_v10  ;;  %v1284_v24 = vadd.f32 %v2752_v20, %v1283_v21  ;;  %v1386_v6 = vld [vmem:[#allocation2 + $0x38] sm:$0xff] (!%p1880_p13) }
 0x1a6   : > { %1369 = vst [vmem:[#allocation2 + $0xd0] sm:$0xff] %v1337_v16  ;;  %v1338_v25 = vadd.f32 %v1292_v18, %v472_v12  ;;  %v1387_v12 = vld [vmem:[#allocation2 + $0x40] sm:$0xff] (!%p1880_p13)  ;;  %v1389_v16 = vld [vmem:[#allocation2 + $0x50] sm:$0xff] (!%p1880_p13) }
 0x1a7   : > { %v1331_v28 = vadd.f32 %v1265_v22, %v465_v17  ;;  %1367 = vst [vmem:[#allocation2 + $0xc0] sm:$0xff] %v1335_v23  ;;  %v1268_v14 = vadd.f32 %v2124_v26, %v1267_v43  ;;  %v1336_v29 = vadd.f32 %v1284_v24, %v470_v13  ;;  %v1390_v13 = vld [vmem:[#allocation2 + $0x58] sm:$0xff] (!%p1880_p13)  ;;  %v1391_v22 = vld [vmem:[#allocation2 + $0x60] sm:$0xff] (!%p1880_p13)  ;;  %v1392_v23 = vld [vmem:[#allocation2 + $0x68] sm:$0xff] (!%p1880_p13) }
 0x1a8   : > { %1370 = vst [vmem:[#allocation2 + $0xd8] sm:$0xff] %v1338_v25 }
 0x1a9   : > { %1363 = vst [vmem:[#allocation2 + $0xa0] sm:$0xff] %v1331_v28  ;;  %v1332_v30 = vadd.f32 %v1268_v14, %v466_v27  ;;  %1368 = vst [vmem:[#allocation2 + $0xc8] sm:$0xff] %v1336_v29  ;;  %v2125_v32 = vpop.f32.mrb[44].mxu0  ;;  %v2225_v19 = vpop.f32.mrb[44].mxu1  ;;  %v1393_v28 = vld [vmem:[#allocation2 + $0x70] sm:$0xff] (!%p1880_p13)  ;;  %v1394_v14 = vld [vmem:[#allocation2 + $0x78] sm:$0xff] (!%p1880_p13) }
 0x1aa   : > { %v1305_v33 = vadd.f32 %v2225_v19, %v2762_v50  ;;  %v2126_v34 = vpop.f32.mrb[45].mxu0  ;;  %v1296_v36 = vpop.f32.mrb[45].mxu1  ;;  %v1395_v29 = vld [vmem:[#allocation2 + $0x80] sm:$0xff] (!%p1880_p13) }
 0x1ab   : > { %1364 = vst [vmem:[#allocation2 + $0xa8] sm:$0xff] %v1332_v30  ;;  %v2127_v20 = vadd.f32 %v2126_v34, %v2125_v32  ;;  %v1297_v39 = vadd.f32 %v2758_v38, %v1296_v36  ;;  %v2128_v40 = vpop.f32.mrb[46].mxu0  ;;  %v2226_v42 = vpop.f32.mrb[46].mxu1  ;;  %v1397_v34 = vld [vmem:[#allocation2 + $0x90] sm:$0xff] (!%p1880_p13) }
 0x1ac   : > { %v1341_v45 = vadd.f32 %v1305_v33, %v475_v31  ;;  %v1308_v37 = vadd.f32 %v2226_v42, %v2764_v56  ;;  %v2129_v47 = vpop.f32.mrb[47].mxu0  ;;  %v1299_v51 = vpop.f32.mrb[47].mxu1  ;;  %v1396_v33 = vld [vmem:[#allocation2 + $0x88] sm:$0xff] (!%p1880_p13) }
 0x1ad   : > { %v1273_v52 = vadd.f32 %v2766_v49, %v2127_v20  ;;  %v1339_v50 = vadd.f32 %v1297_v39, %v473_v35  ;;  %v2130_v53 = vadd.f32 %v2129_v47, %v2128_v40  ;;  %v1300_v54 = vadd.f32 %v2760_v44, %v1299_v51  ;;  %1378 = sbr.rel (%p1880_p13) target bundleno = 448 (0x1c0), region = 66  ;;  %v1379_v49 = vld [vmem:[#allocation2] sm:$0xff] (!%p1880_p13)  ;;  %v1398_v35 = vld [vmem:[#allocation2 + $0x98] sm:$0xff] (!%p1880_p13) }
 0x1ae   : > { %1373 = vst [vmem:[#allocation2 + $0xf0] sm:$0xff] %v1341_v45  ;;  %v1342_v57 = vadd.f32 %v1308_v37, %v476_v41  ;;  %v2784_v44 = vld [vmem:[%s2857_s2] ss:$0 sm:$0xff] (!%p1880_p13) }
 0x1af   : > { %v1333_v38 = vadd.f32 %v1273_v52, %v467_v46  ;;  %1371 = vst [vmem:[#allocation2 + $0xe0] sm:$0xff] %v1339_v50  ;;  %v1276_v43 = vadd.f32 %v2768_v55, %v2130_v53  ;;  %v1340_v59 = vadd.f32 %v1300_v54, %v474_v48  ;;  %v1418_v61 = vadd.f32 (!%p1880_p13), %v2784_v44, %v1379_v49  ;;  %v1403_v52 = vld [vmem:[#allocation2 + $0xc0] sm:$0xff] (!%p1880_p13) }
 0x1b0   : > { %1374 = vst [vmem:[#allocation2 + $0xf8] sm:$0xff] %v1342_v57  ;;  %v1419_v55 = vadd.f32 (!%p1880_p13), %v2784_v44, %v1380_v60  ;;  %v1420_v2 = vadd.f32 (!%p1880_p13), %v2784_v44, %v1381_v62  ;;  %v1421_v3 = vadd.f32 (!%p1880_p13), %v2784_v44, %v1382_v63  ;;  %v1422_v5 = vadd.f32 (!%p1880_p13), %v2784_v44, %v1383_v1  ;;  %v1399_v41 = vld [vmem:[#allocation2 + $0xa0] sm:$0xff] (!%p1880_p13)  ;;  %v1404_v50 = vld [vmem:[#allocation2 + $0xc8] sm:$0xff] (!%p1880_p13) }
 0x1b1   : > { %1365 = vst [vmem:[#allocation2 + $0xb0] sm:$0xff] %v1333_v38  ;;  %v1334_v56 = vadd.f32 %v1276_v43, %v468_v58  ;;  %1372 = vst [vmem:[#allocation2 + $0xe8] sm:$0xff] %v1340_v59  ;;  %v1423_v8 = vadd.f32 (!%p1880_p13), %v2784_v44, %v1384_v4  ;;  %v1424_v9 = vadd.f32 (!%p1880_p13), %v2784_v44, %v1385_v0  ;;  %v1405_v38 = vld [vmem:[#allocation2 + $0xd0] sm:$0xff] (!%p1880_p13)  ;;  %v1406_v43 = vld [vmem:[#allocation2 + $0xd8] sm:$0xff] (!%p1880_p13) }
 0x1b2   : > { %v1951_v7 = vpack.c.bf16 (!%p1880_p13), %v1419_v55, %v1418_v61  ;;  %v1425_v10 = vadd.f32 (!%p1880_p13), %v2784_v44, %v1386_v6  ;;  %v1956_v17 = vpack.c.bf16 (!%p1880_p13), %v1421_v3, %v1420_v2  ;;  %v1426_v18 = vadd.f32 (!%p1880_p13), %v2784_v44, %v1387_v12  ;;  %v1400_v42 = vld [vmem:[#allocation2 + $0xa8] sm:$0xff] (!%p1880_p13) }
 0x1b3   : > { %1366 = vst [vmem:[#allocation2 + $0xb8] sm:$0xff] %v1334_v56  ;;  %v1427_v11 = vadd.f32 (!%p1880_p13), %v2784_v44, %v1388_v15  ;;  %v1428_v21 = vadd.f32 (!%p1880_p13), %v2784_v44, %v1389_v16  ;;  %v1961_v26 = vpack.c.bf16 (!%p1880_p13), %v1423_v8, %v1422_v5  ;;  %v1429_v25 = vadd.f32 (!%p1880_p13), %v2784_v44, %v1390_v13 }
 0x1b4   : > { %1952 = vst [vmem:[%s2673_s30] sm:$0xff] %v1951_v7   ;;  %v1966_v24 = vpack.c.bf16 %v1425_v10, %v1424_v9  ;;  %v1430_v27 = vadd.f32 %v2784_v44, %v1391_v22  ;;  %2028 = vst [vmem:[%s2673_s30 + $0x8] sm:$0xff] %v1956_v17   ;;  %v1431_v32 = vadd.f32 %v2784_v44, %v1392_v23 }
 0x1b5   : > { %v1971_v30 = vpack.c.bf16 %v1427_v11, %v1426_v18  ;;  %v1432_v31 = vadd.f32 %v2784_v44, %v1393_v28  ;;  %v1433_v19 = vadd.f32 %v2784_v44, %v1394_v14  ;;  %2029 = vst [vmem:[%s2673_s30 + $0x10] sm:$0xff] %v1961_v26   ;;  %v1976_v36 = vpack.c.bf16 %v1429_v25, %v1428_v21  ;;  %v1409_v62 = vld [vmem:[#allocation2 + $0xf0] sm:$0xff] }
 0x1b6   : > { %2030 = vst [vmem:[%s2673_s30 + $0x18] sm:$0xff] %v1966_v24   ;;  %v1434_v20 = vadd.f32 %v2784_v44, %v1395_v29  ;;  %v1435_v39 = vadd.f32 %v2784_v44, %v1396_v33  ;;  %v1436_v40 = vadd.f32 %v2784_v44, %v1397_v34  ;;  %v1981_v46 = vpack.c.bf16 %v1431_v32, %v1430_v27  ;;  %v1407_v59 = vld [vmem:[#allocation2 + $0xe0] sm:$0xff] }
 0x1b7   : > { %2031 = vst [vmem:[%s2673_s30 + $0x20] sm:$0xff] %v1971_v30   ;;  %v1986_v37 = vpack.c.bf16 %v1433_v19, %v1432_v31  ;;  %v1437_v47 = vadd.f32 %v2784_v44, %v1398_v35  ;;  %v1438_v48 = vadd.f32 %v2784_v44, %v1399_v41  ;;  %2032 = vst [vmem:[%s2673_s30 + $0x28] sm:$0xff] %v1976_v36   ;;  %v1410_v63 = vld [vmem:[#allocation2 + $0xf8] sm:$0xff] }
 0x1b8   : > { %v1401_v45 = vld [vmem:[#allocation2 + $0xb0] sm:$0xff]  ;;  %v1991_v53 = vpack.c.bf16 %v1435_v39, %v1434_v20  ;;  %v1439_v54 = vadd.f32 %v2784_v44, %v1400_v42  ;;  %2033 = vst [vmem:[%s2673_s30 + $0x30] sm:$0xff] %v1981_v46   ;;  %v1442_v49 = vadd.f32 %v2784_v44, %v1403_v52  ;;  %v1443_v60 = vadd.f32 %v2784_v44, %v1404_v50  ;;  %v1408_v55 = vld [vmem:[#allocation2 + $0xe8] sm:$0xff] }
 0x1b9   : > { %v1440_v57 = vadd.f32 %v2784_v44, %v1401_v45  ;;  %2034 = vst [vmem:[%s2673_s30 + $0x38] sm:$0xff] %v1986_v37   ;;  %v1996_v56 = vpack.c.bf16 %v1437_v47, %v1436_v40  ;;  %v1444_v61 = vadd.f32 %v2784_v44, %v1405_v38  ;;  %v1445_v3 = vadd.f32 %v2784_v44, %v1406_v43 }
 0x1ba   : > { %v1402_v51 = vld [vmem:[#allocation2 + $0xb8] sm:$0xff]  ;;  %2035 = vst [vmem:[%s2673_s30 + $0x40] sm:$0xff] %v1991_v53   ;;  %v2001_v1 = vpack.c.bf16 %v1439_v54, %v1438_v48  ;;  %v1446_v4 = vadd.f32 %v2784_v44, %v1407_v59  ;;  %v2011_v5 = vpack.c.bf16 %v1443_v60, %v1442_v49  ;;  %v1447_v0 = vadd.f32 %v2784_v44, %v1408_v55 }
 0x1bb   : > { %v1441_v58 = vadd.f32 %v2784_v44, %v1402_v51  ;;  %2036 = vst [vmem:[%s2673_s30 + $0x48] sm:$0xff] %v1996_v56   ;;  %v1448_v6 = vadd.f32 %v2784_v44, %v1409_v62  ;;  %v1449_v7 = vadd.f32 %v2784_v44, %v1410_v63  ;;  %v2016_v8 = vpack.c.bf16 %v1445_v3, %v1444_v61 }
 0x1bc   : > { %2037 = vst [vmem:[%s2673_s30 + $0x50] sm:$0xff] %v2001_v1   ;;  %2039 = vst [vmem:[%s2673_s30 + $0x60] sm:$0xff] %v2011_v5   ;;  %v2021_v9 = vpack.c.bf16 %v1447_v0, %v1446_v4 }
 0x1bd   : > { %v2006_v2 = vpack.c.bf16 %v1441_v58, %v1440_v57  ;;  %v2026_v10 = vpack.c.bf16 %v1449_v7, %v1448_v6  ;;  %2040 = vst [vmem:[%s2673_s30 + $0x68] sm:$0xff] %v2016_v8  }
 0x1be   : > { %2041 = vst [vmem:[%s2673_s30 + $0x70] sm:$0xff] %v2021_v9  }
 0x1bf   : > { %2038 = vst [vmem:[%s2673_s30 + $0x58] sm:$0xff] %v2006_v2   ;;  %2042 = vst [vmem:[%s2673_s30 + $0x78] sm:$0xff] %v2026_v10  }
 0x1c0 PF: > { %s13_s18 = sadd.s32 1, %s2445_s18   ;;  %s2859_s12 = smov %s2425_s13 }
 0x1c1   : > { %p10_p0 = scmp.ge.s32.totalorder %s13_s18, 8   ;;  %s2860_s13 = smov %s2519_s25 }
 0x1c2   : > { %s2861_s14 = smov %s2437_s16  ;;  %s2862_s15 = smov %s2441_s17 }
 0x1c3   : > { %s2863_s16 = smov %s2866_s19  ;;  %s2864_s17 = smov %s2870_s20 }
 0x1c4   :  { %12 = sbr.rel (!%p10_p0) target bundleno = 4 (0x4), region = 113 }

// kernel: generator_forward.55
= control target key start
LH: loop header
LB: loop body
LE: loop exit
PB: predicated region body
PF: predicated region fallthrough
CT: control target
= control target key end

     0   :  { %s3046_s12 = smov 0   ;;  %s3048_s13 = smov 0   ;;  %s3645_s0 = inlined_call_operand.vmem [shape: bf16[512,3200], index: 0, kind: input, shape index: {}]   ;;  %s3646_s1 = inlined_call_operand.vmem [shape: bf16[3200,128], index: 1, kind: input, shape index: {}]   ;;  %s3647_s2 = inlined_call_operand.vmem [shape: f32[1,128], index: 2, kind: input, shape index: {}]   ;;  %s3648_s3 = inlined_call_operand.vmem [shape: f32[512,128], index: 3, kind: output, shape index: {}]  }
   0x1   :  { %s3050_s14 = smov 0   ;;  %s3052_s15 = smov 0  }
   0x2   :  { %s3054_s16 = smov 0   ;;  %s3056_s17 = smov 0  }
   0x3   :  { %s3058_s18 = smov 0  }
   0x4 LB: > { %s25_s19 = sadd.s32 1, %s3015_s16  ;;  %s32_s20 = sadd.s32 1, %s3019_s17  ;;  %s3023_s18 = sphi %s3058_s18, %s13_s18   ;;  %s3019_s17 = sphi %s3056_s17, %s3654_s17   ;;  %s3015_s16 = sphi %s3054_s16, %s3653_s16   ;;  %s3011_s15 = sphi %s3052_s15, %s3652_s15   ;;  %s3007_s14 = sphi %s3050_s14, %s3651_s14   ;;  %s3003_s13 = sphi %s3048_s13, %s3650_s13   ;;  %s2999_s12 = sphi %s3046_s12, %s3649_s12  }
   0x5   : > { %p26_p0 = scmp.ge.s32.totalorder %s25_s19, 5  ;;  %p48_p1 = scmp.ne.s32.totalorder %s3003_s13, %s2999_s12 }
   0x6   : > { %p49_p2 = scmp.eq.s32.totalorder %s3023_s18, 0  ;;  %s41_s24 = sadd.s32 1, %s3003_s13 }
   0x7   : > { %s3656_s19 = smov (%p26_p0, %s25_s19), 0  ;;  %s3658_s20 = smov (!%p26_p0, %s32_s20), %s3019_s17 }
   0x8   : > { %p50_p3 = por %p49_p2, %p48_p1  ;;  %p34_p4 = scmp.ge.s32.totalorder %s3658_s20, 2 }
   0x9   : > { %s37_s21 = ssub.s32 %s3015_s16, %s3656_s19  ;;  %p2184_p6 = scmp.ge.s32.totalorder %s3023_s18, 10 }
   0xa   : > { %s3660_s20 = smov (%p34_p4, %s3658_s20), 0 }
   0xb   : > { %s36_s22 = ssub.s32 %s3019_s17, %s3660_s20  ;;  %162 = sbr.rel (%p2184_p6) target bundleno = 80 (0x50), region = 20 }
   0xc   : > { %s38_s23 = sor.u32 %s37_s21, %s36_s22 }
   0xd   : > { %p39_p5 = scmp.eq.s32.totalorder %s38_s23, 0 }
   0xf   : > { %s3097_s25 = scalar_select %p39_p5, %s3003_s13, %s41_s24  }
  0x12   : > { %165 = sbr.rel (!%p50_p3) target bundleno = 80 (0x50), region = 24  ;;  %s167_s26 = sand.u32 (%p50_p3), 1, %s3003_s13  }
  0x13   : > { %s171_s27 = smul.u32 (%p50_p3), 5, %s3015_s16 }
  0x14   : > { %s2693_s28 = smul.u32 (%p50_p3), 640, %s167_s26 }
  0x15   : > { %s2694_s29 = smul.u32 (%p50_p3), 800, %s3019_s17 }
  0x16   : > { %s3111_s8 = scalar_lea.vmem (%p50_p3), [#allocation3], %s2693_s28 }
  0x17   : > { %s173_s30 = sadd.s32 (%p50_p3), %s2694_s29, %s171_s27 }
  0x18   : > { %s2187_s4 = sshll.u32 (%p50_p3), %s173_s30, 2 }
  0x19   : > { %s3106_s7 = scalar_lea.vmem %s3645_s0, %s2187_s4 }
  0x1a   : > { %v190_v0 = vld [vmem:[%s3106_s7] sm:$0xff]  ;;  %v192_v1 = vld [vmem:[%s3106_s7 + $0x8] sm:$0xff]  ;;  %v200_v5 = vld [vmem:[%s3106_s7 + $0xd0] sm:$0xff] }
  0x1b   : > { %v194_v2 = vld [vmem:[%s3106_s7 + $0x64] sm:$0xff]  ;;  %191 = vst [vmem:[%s3111_s8] sm:$0xff] %v190_v0  ;;  %193 = vst [vmem:[%s3111_s8 + $0x8] sm:$0xff] %v192_v1  ;;  %v196_v3 = vld [vmem:[%s3106_s7 + $0x6c] sm:$0xff] }
  0x1c   : > { %195 = vst [vmem:[%s3111_s8 + $0x14] sm:$0xff] %v194_v2  ;;  %v198_v4 = vld [vmem:[%s3106_s7 + $0xc8] sm:$0xff]  ;;  %197 = vst [vmem:[%s3111_s8 + $0x1c] sm:$0xff] %v196_v3  ;;  %v204_v7 = vld [vmem:[%s3106_s7 + $0x134] sm:$0xff] }
  0x1d   : > { %199 = vst [vmem:[%s3111_s8 + $0x28] sm:$0xff] %v198_v4  ;;  %201 = vst [vmem:[%s3111_s8 + $0x30] sm:$0xff] %v200_v5  ;;  %v202_v6 = vld [vmem:[%s3106_s7 + $0x12c] sm:$0xff]  ;;  %v208_v9 = vld [vmem:[%s3106_s7 + $0x198] sm:$0xff] }
  0x1e   : > { %v206_v8 = vld [vmem:[%s3106_s7 + $0x190] sm:$0xff]  ;;  %203 = vst [vmem:[%s3111_s8 + $0x3c] sm:$0xff] %v202_v6  ;;  %205 = vst [vmem:[%s3111_s8 + $0x44] sm:$0xff] %v204_v7  ;;  %v212_v11 = vld [vmem:[%s3106_s7 + $0x1fc] sm:$0xff] }
  0x1f   : > { %207 = vst [vmem:[%s3111_s8 + $0x50] sm:$0xff] %v206_v8  ;;  %v210_v10 = vld [vmem:[%s3106_s7 + $0x1f4] sm:$0xff]  ;;  %209 = vst [vmem:[%s3111_s8 + $0x58] sm:$0xff] %v208_v9  ;;  %v216_v13 = vld [vmem:[%s3106_s7 + $0x260] sm:$0xff] }
  0x20   : > { %211 = vst [vmem:[%s3111_s8 + $0x64] sm:$0xff] %v210_v10  ;;  %213 = vst [vmem:[%s3111_s8 + $0x6c] sm:$0xff] %v212_v11  ;;  %v214_v12 = vld [vmem:[%s3106_s7 + $0x258] sm:$0xff]  ;;  %v220_v15 = vld [vmem:[%s3106_s7 + $0x2c4] sm:$0xff] }
  0x21   : > { %v218_v14 = vld [vmem:[%s3106_s7 + $0x2bc] sm:$0xff]  ;;  %215 = vst [vmem:[%s3111_s8 + $0x78] sm:$0xff] %v214_v12  ;;  %217 = vst [vmem:[%s3111_s8 + $0x80] sm:$0xff] %v216_v13  ;;  %v224_v17 = vld [vmem:[%s3106_s7 + $0x328] sm:$0xff] }
  0x22   : > { %219 = vst [vmem:[%s3111_s8 + $0x8c] sm:$0xff] %v218_v14  ;;  %v222_v16 = vld [vmem:[%s3106_s7 + $0x320] sm:$0xff]  ;;  %221 = vst [vmem:[%s3111_s8 + $0x94] sm:$0xff] %v220_v15  ;;  %v228_v19 = vld [vmem:[%s3106_s7 + $0x38c] sm:$0xff] }
  0x23   : > { %223 = vst [vmem:[%s3111_s8 + $0xa0] sm:$0xff] %v222_v16  ;;  %225 = vst [vmem:[%s3111_s8 + $0xa8] sm:$0xff] %v224_v17  ;;  %v226_v18 = vld [vmem:[%s3106_s7 + $0x384] sm:$0xff]  ;;  %v232_v21 = vld [vmem:[%s3106_s7 + $0x3f0] sm:$0xff] }
  0x24   : > { %v230_v20 = vld [vmem:[%s3106_s7 + $0x3e8] sm:$0xff]  ;;  %227 = vst [vmem:[%s3111_s8 + $0xb4] sm:$0xff] %v226_v18  ;;  %229 = vst [vmem:[%s3111_s8 + $0xbc] sm:$0xff] %v228_v19  ;;  %v236_v23 = vld [vmem:[%s3106_s7 + $0x454] sm:$0xff] }
  0x25   : > { %231 = vst [vmem:[%s3111_s8 + $0xc8] sm:$0xff] %v230_v20  ;;  %v234_v22 = vld [vmem:[%s3106_s7 + $0x44c] sm:$0xff]  ;;  %233 = vst [vmem:[%s3111_s8 + $0xd0] sm:$0xff] %v232_v21  ;;  %v240_v25 = vld [vmem:[%s3106_s7 + $0x4b8] sm:$0xff] }
  0x26   : > { %235 = vst [vmem:[%s3111_s8 + $0xdc] sm:$0xff] %v234_v22  ;;  %237 = vst [vmem:[%s3111_s8 + $0xe4] sm:$0xff] %v236_v23  ;;  %v238_v24 = vld [vmem:[%s3106_s7 + $0x4b0] sm:$0xff]  ;;  %v244_v27 = vld [vmem:[%s3106_s7 + $0x51c] sm:$0xff] }
  0x27   : > { %v242_v26 = vld [vmem:[%s3106_s7 + $0x514] sm:$0xff]  ;;  %239 = vst [vmem:[%s3111_s8 + $0xf0] sm:$0xff] %v238_v24  ;;  %241 = vst [vmem:[%s3111_s8 + $0xf8] sm:$0xff] %v240_v25  ;;  %v248_v29 = vld [vmem:[%s3106_s7 + $0x580] sm:$0xff] }
  0x28   : > { %243 = vst [vmem:[%s3111_s8 + $0x104] sm:$0xff] %v242_v26  ;;  %v246_v28 = vld [vmem:[%s3106_s7 + $0x578] sm:$0xff]  ;;  %245 = vst [vmem:[%s3111_s8 + $0x10c] sm:$0xff] %v244_v27  ;;  %v252_v31 = vld [vmem:[%s3106_s7 + $0x5e4] sm:$0xff] }
  0x29   : > { %247 = vst [vmem:[%s3111_s8 + $0x118] sm:$0xff] %v246_v28  ;;  %249 = vst [vmem:[%s3111_s8 + $0x120] sm:$0xff] %v248_v29  ;;  %v250_v30 = vld [vmem:[%s3106_s7 + $0x5dc] sm:$0xff]  ;;  %v256_v33 = vld [vmem:[%s3106_s7 + $0x648] sm:$0xff] }
  0x2a   : > { %v254_v32 = vld [vmem:[%s3106_s7 + $0x640] sm:$0xff]  ;;  %251 = vst [vmem:[%s3111_s8 + $0x12c] sm:$0xff] %v250_v30  ;;  %253 = vst [vmem:[%s3111_s8 + $0x134] sm:$0xff] %v252_v31  ;;  %v260_v35 = vld [vmem:[%s3106_s7 + $0x6ac] sm:$0xff] }
  0x2b   : > { %255 = vst [vmem:[%s3111_s8 + $0x140] sm:$0xff] %v254_v32  ;;  %v258_v34 = vld [vmem:[%s3106_s7 + $0x6a4] sm:$0xff]  ;;  %257 = vst [vmem:[%s3111_s8 + $0x148] sm:$0xff] %v256_v33  ;;  %v264_v37 = vld [vmem:[%s3106_s7 + $0x710] sm:$0xff] }
  0x2c   : > { %259 = vst [vmem:[%s3111_s8 + $0x154] sm:$0xff] %v258_v34  ;;  %261 = vst [vmem:[%s3111_s8 + $0x15c] sm:$0xff] %v260_v35  ;;  %v262_v36 = vld [vmem:[%s3106_s7 + $0x708] sm:$0xff]  ;;  %v268_v39 = vld [vmem:[%s3106_s7 + $0x774] sm:$0xff] }
  0x2d   : > { %v266_v38 = vld [vmem:[%s3106_s7 + $0x76c] sm:$0xff]  ;;  %263 = vst [vmem:[%s3111_s8 + $0x168] sm:$0xff] %v262_v36  ;;  %265 = vst [vmem:[%s3111_s8 + $0x170] sm:$0xff] %v264_v37  ;;  %v272_v41 = vld [vmem:[%s3106_s7 + $0x7d8] sm:$0xff] }
  0x2e   : > { %267 = vst [vmem:[%s3111_s8 + $0x17c] sm:$0xff] %v266_v38  ;;  %v270_v40 = vld [vmem:[%s3106_s7 + $0x7d0] sm:$0xff]  ;;  %269 = vst [vmem:[%s3111_s8 + $0x184] sm:$0xff] %v268_v39  ;;  %v276_v43 = vld [vmem:[%s3106_s7 + $0x83c] sm:$0xff] }
  0x2f   : > { %271 = vst [vmem:[%s3111_s8 + $0x190] sm:$0xff] %v270_v40  ;;  %273 = vst [vmem:[%s3111_s8 + $0x198] sm:$0xff] %v272_v41  ;;  %v274_v42 = vld [vmem:[%s3106_s7 + $0x834] sm:$0xff]  ;;  %v280_v45 = vld [vmem:[%s3106_s7 + $0x8a0] sm:$0xff] }
  0x30   : > { %v278_v44 = vld [vmem:[%s3106_s7 + $0x898] sm:$0xff]  ;;  %275 = vst [vmem:[%s3111_s8 + $0x1a4] sm:$0xff] %v274_v42  ;;  %277 = vst [vmem:[%s3111_s8 + $0x1ac] sm:$0xff] %v276_v43  ;;  %v284_v47 = vld [vmem:[%s3106_s7 + $0x904] sm:$0xff] }
  0x31   : > { %279 = vst [vmem:[%s3111_s8 + $0x1b8] sm:$0xff] %v278_v44  ;;  %v282_v46 = vld [vmem:[%s3106_s7 + $0x8fc] sm:$0xff]  ;;  %281 = vst [vmem:[%s3111_s8 + $0x1c0] sm:$0xff] %v280_v45  ;;  %v288_v49 = vld [vmem:[%s3106_s7 + $0x968] sm:$0xff] }
  0x32   : > { %283 = vst [vmem:[%s3111_s8 + $0x1cc] sm:$0xff] %v282_v46  ;;  %285 = vst [vmem:[%s3111_s8 + $0x1d4] sm:$0xff] %v284_v47  ;;  %v286_v48 = vld [vmem:[%s3106_s7 + $0x960] sm:$0xff]  ;;  %v292_v51 = vld [vmem:[%s3106_s7 + $0x9cc] sm:$0xff] }
  0x33   : > { %v290_v50 = vld [vmem:[%s3106_s7 + $0x9c4] sm:$0xff]  ;;  %287 = vst [vmem:[%s3111_s8 + $0x1e0] sm:$0xff] %v286_v48  ;;  %289 = vst [vmem:[%s3111_s8 + $0x1e8] sm:$0xff] %v288_v49  ;;  %v296_v53 = vld [vmem:[%s3106_s7 + $0xa30] sm:$0xff] }
  0x34   : > { %291 = vst [vmem:[%s3111_s8 + $0x1f4] sm:$0xff] %v290_v50  ;;  %v294_v52 = vld [vmem:[%s3106_s7 + $0xa28] sm:$0xff]  ;;  %293 = vst [vmem:[%s3111_s8 + $0x1fc] sm:$0xff] %v292_v51  ;;  %v300_v55 = vld [vmem:[%s3106_s7 + $0xa94] sm:$0xff] }
  0x35   : > { %295 = vst [vmem:[%s3111_s8 + $0x208] sm:$0xff] %v294_v52  ;;  %297 = vst [vmem:[%s3111_s8 + $0x210] sm:$0xff] %v296_v53  ;;  %v298_v54 = vld [vmem:[%s3106_s7 + $0xa8c] sm:$0xff]  ;;  %v304_v57 = vld [vmem:[%s3106_s7 + $0xaf8] sm:$0xff] }
  0x36   : > { %v302_v56 = vld [vmem:[%s3106_s7 + $0xaf0] sm:$0xff]  ;;  %299 = vst [vmem:[%s3111_s8 + $0x21c] sm:$0xff] %v298_v54  ;;  %301 = vst [vmem:[%s3111_s8 + $0x224] sm:$0xff] %v300_v55  ;;  %v308_v59 = vld [vmem:[%s3106_s7 + $0xb5c] sm:$0xff] }
  0x37   : > { %303 = vst [vmem:[%s3111_s8 + $0x230] sm:$0xff] %v302_v56  ;;  %v306_v58 = vld [vmem:[%s3106_s7 + $0xb54] sm:$0xff]  ;;  %305 = vst [vmem:[%s3111_s8 + $0x238] sm:$0xff] %v304_v57  ;;  %v312_v61 = vld [vmem:[%s3106_s7 + $0xbc0] sm:$0xff] }
  0x38   : > { %307 = vst [vmem:[%s3111_s8 + $0x244] sm:$0xff] %v306_v58  ;;  %309 = vst [vmem:[%s3111_s8 + $0x24c] sm:$0xff] %v308_v59  ;;  %v310_v60 = vld [vmem:[%s3106_s7 + $0xbb8] sm:$0xff]  ;;  %v316_v63 = vld [vmem:[%s3106_s7 + $0xc24] sm:$0xff] }
  0x39   : > { %v314_v62 = vld [vmem:[%s3106_s7 + $0xc1c] sm:$0xff]  ;;  %311 = vst [vmem:[%s3111_s8 + $0x258] sm:$0xff] %v310_v60  ;;  %313 = vst [vmem:[%s3111_s8 + $0x260] sm:$0xff] %v312_v61  ;;  %v2188_v0 = vld [vmem:[%s3106_s7 + $0x10] sm:$0xf] }
  0x3a   : > { %315 = vst [vmem:[%s3111_s8 + $0x26c] sm:$0xff] %v314_v62  ;;  %v2190_v1 = vld [vmem:[%s3106_s7 + $0x74] sm:$0xf]  ;;  %317 = vst [vmem:[%s3111_s8 + $0x274] sm:$0xff] %v316_v63  ;;  %v2192_v2 = vld [vmem:[%s3106_s7 + $0xd8] sm:$0xf] }
  0x3b   : > { %2189 = vst [vmem:[%s3111_s8 + $0x10] sm:$0xf] %v2188_v0  ;;  %2191 = vst [vmem:[%s3111_s8 + $0x24] sm:$0xf] %v2190_v1  ;;  %v2194_v3 = vld [vmem:[%s3106_s7 + $0x13c] sm:$0xf] }
  0x3c   : > { %v2196_v4 = vld [vmem:[%s3106_s7 + $0x1a0] sm:$0xf]  ;;  %2193 = vst [vmem:[%s3111_s8 + $0x38] sm:$0xf] %v2192_v2  ;;  %2195 = vst [vmem:[%s3111_s8 + $0x4c] sm:$0xf] %v2194_v3 }
  0x3d   : > { %2197 = vst [vmem:[%s3111_s8 + $0x60] sm:$0xf] %v2196_v4  ;;  %v2198_v5 = vld [vmem:[%s3106_s7 + $0x204] sm:$0xf]  ;;  %v2200_v6 = vld [vmem:[%s3106_s7 + $0x268] sm:$0xf] }
  0x3e   : > { %v2202_v7 = vld [vmem:[%s3106_s7 + $0x2cc] sm:$0xf]  ;;  %2199 = vst [vmem:[%s3111_s8 + $0x74] sm:$0xf] %v2198_v5  ;;  %2201 = vst [vmem:[%s3111_s8 + $0x88] sm:$0xf] %v2200_v6 }
  0x3f   : > { %2203 = vst [vmem:[%s3111_s8 + $0x9c] sm:$0xf] %v2202_v7  ;;  %v2204_v8 = vld [vmem:[%s3106_s7 + $0x330] sm:$0xf]  ;;  %v2206_v9 = vld [vmem:[%s3106_s7 + $0x394] sm:$0xf] }
  0x40   : > { %v2208_v10 = vld [vmem:[%s3106_s7 + $0x3f8] sm:$0xf]  ;;  %2205 = vst [vmem:[%s3111_s8 + $0xb0] sm:$0xf] %v2204_v8  ;;  %2207 = vst [vmem:[%s3111_s8 + $0xc4] sm:$0xf] %v2206_v9 }
  0x41   : > { %2209 = vst [vmem:[%s3111_s8 + $0xd8] sm:$0xf] %v2208_v10  ;;  %v2210_v11 = vld [vmem:[%s3106_s7 + $0x45c] sm:$0xf]  ;;  %v2212_v12 = vld [vmem:[%s3106_s7 + $0x4c0] sm:$0xf] }
  0x42   : > { %v2214_v13 = vld [vmem:[%s3106_s7 + $0x524] sm:$0xf]  ;;  %2211 = vst [vmem:[%s3111_s8 + $0xec] sm:$0xf] %v2210_v11  ;;  %2213 = vst [vmem:[%s3111_s8 + $0x100] sm:$0xf] %v2212_v12 }
  0x43   : > { %2215 = vst [vmem:[%s3111_s8 + $0x114] sm:$0xf] %v2214_v13  ;;  %v2216_v14 = vld [vmem:[%s3106_s7 + $0x588] sm:$0xf]  ;;  %v2218_v15 = vld [vmem:[%s3106_s7 + $0x5ec] sm:$0xf] }
  0x44   : > { %v2220_v16 = vld [vmem:[%s3106_s7 + $0x650] sm:$0xf]  ;;  %2217 = vst [vmem:[%s3111_s8 + $0x128] sm:$0xf] %v2216_v14  ;;  %2219 = vst [vmem:[%s3111_s8 + $0x13c] sm:$0xf] %v2218_v15 }
  0x45   : > { %2221 = vst [vmem:[%s3111_s8 + $0x150] sm:$0xf] %v2220_v16  ;;  %v2222_v17 = vld [vmem:[%s3106_s7 + $0x6b4] sm:$0xf]  ;;  %v2224_v18 = vld [vmem:[%s3106_s7 + $0x718] sm:$0xf] }
  0x46   : > { %v2226_v19 = vld [vmem:[%s3106_s7 + $0x77c] sm:$0xf]  ;;  %2223 = vst [vmem:[%s3111_s8 + $0x164] sm:$0xf] %v2222_v17  ;;  %2225 = vst [vmem:[%s3111_s8 + $0x178] sm:$0xf] %v2224_v18 }
  0x47   : > { %2227 = vst [vmem:[%s3111_s8 + $0x18c] sm:$0xf] %v2226_v19  ;;  %v2228_v20 = vld [vmem:[%s3106_s7 + $0x7e0] sm:$0xf]  ;;  %v2230_v21 = vld [vmem:[%s3106_s7 + $0x844] sm:$0xf] }
  0x48   : > { %v2232_v22 = vld [vmem:[%s3106_s7 + $0x8a8] sm:$0xf]  ;;  %2229 = vst [vmem:[%s3111_s8 + $0x1a0] sm:$0xf] %v2228_v20  ;;  %2231 = vst [vmem:[%s3111_s8 + $0x1b4] sm:$0xf] %v2230_v21 }
  0x49   : > { %2233 = vst [vmem:[%s3111_s8 + $0x1c8] sm:$0xf] %v2232_v22  ;;  %v2234_v23 = vld [vmem:[%s3106_s7 + $0x90c] sm:$0xf]  ;;  %v2236_v24 = vld [vmem:[%s3106_s7 + $0x970] sm:$0xf] }
  0x4a   : > { %v2238_v25 = vld [vmem:[%s3106_s7 + $0x9d4] sm:$0xf]  ;;  %2235 = vst [vmem:[%s3111_s8 + $0x1dc] sm:$0xf] %v2234_v23  ;;  %2237 = vst [vmem:[%s3111_s8 + $0x1f0] sm:$0xf] %v2236_v24 }
  0x4b   : > { %2239 = vst [vmem:[%s3111_s8 + $0x204] sm:$0xf] %v2238_v25  ;;  %v2240_v26 = vld [vmem:[%s3106_s7 + $0xa38] sm:$0xf]  ;;  %v2242_v27 = vld [vmem:[%s3106_s7 + $0xa9c] sm:$0xf] }
  0x4c   : > { %v2244_v28 = vld [vmem:[%s3106_s7 + $0xb00] sm:$0xf]  ;;  %2241 = vst [vmem:[%s3111_s8 + $0x218] sm:$0xf] %v2240_v26  ;;  %2243 = vst [vmem:[%s3111_s8 + $0x22c] sm:$0xf] %v2242_v27 }
  0x4d   : > { %2245 = vst [vmem:[%s3111_s8 + $0x240] sm:$0xf] %v2244_v28  ;;  %v2246_v29 = vld [vmem:[%s3106_s7 + $0xb64] sm:$0xf]  ;;  %v2248_v30 = vld [vmem:[%s3106_s7 + $0xbc8] sm:$0xf] }
  0x4e   : > { %v2250_v31 = vld [vmem:[%s3106_s7 + $0xc2c] sm:$0xf]  ;;  %2247 = vst [vmem:[%s3111_s8 + $0x254] sm:$0xf] %v2246_v29  ;;  %2249 = vst [vmem:[%s3111_s8 + $0x268] sm:$0xf] %v2248_v30 }
  0x4f   : > { %2251 = vst [vmem:[%s3111_s8 + $0x27c] sm:$0xf] %v2250_v31 }
  0x50 PF: > { %p2252_p7 = scmp.ge.s32.totalorder %s3023_s18, 1  ;;  %p405_p8 = scmp.lt.s32.totalorder %s3023_s18, 11 }
  0x52   : > { %p406_p9 = pnand %p2252_p7, %p405_p8 }
  0x53   : > { %s412_s9 = sand.u32 (!%p406_p9), 1, %s2999_s12   ;;  %s451_s10 = smul.u32 (!%p406_p9), 80, %s3007_s14 }
  0x54   : > { %409 = sbr.rel (%p406_p9) target bundleno = 556 (0x22c), region = 54  ;;  %s2254_s21 = sshll.u32 (!%p406_p9), %s3011_s15, 5 }
  0x55   : > { %s2695_s11 = smul.u32 (!%p406_p9), 640, %s412_s9  ;;  %p452_p10 = scmp.lt.s32.totalorder (!%p406_p9), %s451_s10, 399 }
  0x56   : > { %p464_p11 = scmp.lt.s32.totalorder (!%p406_p9), %s2254_s21, 63  ;;  %p2256_p12 = scmp.ne.s32.totalorder (!%p406_p9), %s3007_s14, 0 }
  0x57   : > { %s3317_s12 = scalar_lea.vmem (!%p406_p9), [#allocation3], %s2695_s11 }
  0x5b   : > { %s3662_s10 = smov (!%p452_p10, %s451_s10), 399  ;;  %s3664_s21 = smov (!%p464_p11, %s2254_s21), 63 }
  0x5c   : > { %s2253_s22 = sshll.u32 %s3662_s10, 2  ;;  %s2255_s27 = sshll.u32 %s3664_s21, 3  ;;  %v3025_v32 = vmov (!%p2256_p12), 0.0  }
  0x5d   : > { %s3310_s26 = scalar_lea.vmem %s3646_s1, %s2253_s22  ;;  %s3315_s30 = scalar_lea.vmem %s3648_s3, %s2255_s27  ;;  %477 = vst [vmem:[#allocation2] sm:$0xff] (!%p2256_p12), %v3025_v32  ;;  %478 = vst [vmem:[#allocation2 + $0x8] sm:$0xff] (!%p2256_p12), %v3025_v32 }
  0x5e   : > { %476 = sbr.rel (%p2256_p12) target bundleno = 109 (0x6d), region = 62  ;;  %479 = vst [vmem:[#allocation2 + $0x10] sm:$0xff] (!%p2256_p12), %v3025_v32  ;;  %480 = vst [vmem:[#allocation2 + $0x18] sm:$0xff] (!%p2256_p12), %v3025_v32 }
  0x5f   : > { %481 = vst [vmem:[#allocation2 + $0x20] sm:$0xff] (!%p2256_p12), %v3025_v32  ;;  %482 = vst [vmem:[#allocation2 + $0x28] sm:$0xff] (!%p2256_p12), %v3025_v32 }
  0x60   : > { %483 = vst [vmem:[#allocation2 + $0x30] sm:$0xff] (!%p2256_p12), %v3025_v32  ;;  %484 = vst [vmem:[#allocation2 + $0x38] sm:$0xff] (!%p2256_p12), %v3025_v32 }
  0x61   : > { %485 = vst [vmem:[#allocation2 + $0x40] sm:$0xff] (!%p2256_p12), %v3025_v32  ;;  %486 = vst [vmem:[#allocation2 + $0x48] sm:$0xff] (!%p2256_p12), %v3025_v32 }
  0x62   : > { %487 = vst [vmem:[#allocation2 + $0x50] sm:$0xff] (!%p2256_p12), %v3025_v32  ;;  %488 = vst [vmem:[#allocation2 + $0x58] sm:$0xff] (!%p2256_p12), %v3025_v32 }
  0x63   : > { %489 = vst [vmem:[#allocation2 + $0x60] sm:$0xff] (!%p2256_p12), %v3025_v32  ;;  %490 = vst [vmem:[#allocation2 + $0x68] sm:$0xff] (!%p2256_p12), %v3025_v32 }
  0x64   : > { %491 = vst [vmem:[#allocation2 + $0x70] sm:$0xff] (!%p2256_p12), %v3025_v32  ;;  %492 = vst [vmem:[#allocation2 + $0x78] sm:$0xff] (!%p2256_p12), %v3025_v32 }
  0x65   : > { %493 = vst [vmem:[#allocation2 + $0x80] sm:$0xff] %v3025_v32  ;;  %494 = vst [vmem:[#allocation2 + $0x88] sm:$0xff] %v3025_v32 }
  0x66   : > { %495 = vst [vmem:[#allocation2 + $0x90] sm:$0xff] %v3025_v32  ;;  %496 = vst [vmem:[#allocation2 + $0x98] sm:$0xff] %v3025_v32 }
  0x67   : > { %497 = vst [vmem:[#allocation2 + $0xa0] sm:$0xff] %v3025_v32  ;;  %498 = vst [vmem:[#allocation2 + $0xa8] sm:$0xff] %v3025_v32 }
  0x68   : > { %499 = vst [vmem:[#allocation2 + $0xb0] sm:$0xff] %v3025_v32  ;;  %500 = vst [vmem:[#allocation2 + $0xb8] sm:$0xff] %v3025_v32 }
  0x69   : > { %501 = vst [vmem:[#allocation2 + $0xc0] sm:$0xff] %v3025_v32  ;;  %502 = vst [vmem:[#allocation2 + $0xc8] sm:$0xff] %v3025_v32 }
  0x6a   : > { %503 = vst [vmem:[#allocation2 + $0xd0] sm:$0xff] %v3025_v32  ;;  %504 = vst [vmem:[#allocation2 + $0xd8] sm:$0xff] %v3025_v32 }
  0x6b   : > { %505 = vst [vmem:[#allocation2 + $0xe0] sm:$0xff] %v3025_v32  ;;  %506 = vst [vmem:[#allocation2 + $0xe8] sm:$0xff] %v3025_v32 }
  0x6c   : > { %507 = vst [vmem:[#allocation2 + $0xf0] sm:$0xff] %v3025_v32  ;;  %508 = vst [vmem:[#allocation2 + $0xf8] sm:$0xff] %v3025_v32 }
  0x6d PF: > { %v2753_v33 = vld [vmem:[%s3310_s26 + $0x40] sm:$0xff]   ;;  %v2755_v35 = vld [vmem:[%s3310_s26 + $0x48] sm:$0xff]   ;;  %v2757_v37 = vld [vmem:[%s3310_s26 + $0x50] sm:$0xff]   ;;  %p2377_p13 = scmp.ne.s32.totalorder %s3007_s14, 4 }
  0x6e   : > { %v2754_v34 = vld [vmem:[%s3310_s26] sm:$0xff]   ;;  %2381 = vmatprep.subr.bf16.mxu0 %v2753_v33  ;;  %2677 = vmatprep.subr.bf16.mxu1 %v2753_v33  ;;  %v2756_v36 = vld [vmem:[%s3310_s26 + $0x8] sm:$0xff]   ;;  %v2758_v38 = vld [vmem:[%s3310_s26 + $0x10] sm:$0xff]  }
  0x6f   : > { %2382 = vmatpush3.bf16.msra.mxu0 %v2754_v34  ;;  %2685 = vmatpush3.bf16.msra.mxu1 %v2754_v34  ;;  %v2759_v39 = vld [vmem:[%s3310_s26 + $0x58] sm:$0xff]   ;;  %v2761_v41 = vld [vmem:[%s3310_s26 + $0x60] sm:$0xff]   ;;  %v2763_v43 = vld [vmem:[%s3310_s26 + $0x68] sm:$0xff]  }
  0x70   : > { %2383 = vmatprep.subr.bf16.mxu0 %v2755_v35  ;;  %2678 = vmatprep.subr.bf16.mxu1 %v2755_v35  ;;  %v2760_v40 = vld [vmem:[%s3310_s26 + $0x18] sm:$0xff]   ;;  %v2762_v42 = vld [vmem:[%s3310_s26 + $0x20] sm:$0xff]   ;;  %v2764_v46 = vld [vmem:[%s3310_s26 + $0x28] sm:$0xff]  }
  0x71   : > { %v2771_v44 = vld [vmem:[%s3317_s12 + $0x4] ss:$20 sps:$4 sm:$0xff]   ;;  %v2765_v47 = vld [vmem:[%s3310_s26 + $0x70] sm:$0xff]   ;;  %v2777_v56 = vld [vmem:[%s3310_s26 + $0xc8] sm:$0xff]  }
  0x72   : > { %v2774_v45 = vld [vmem:[%s3317_s12 + $0x1e4] ss:$20 sps:$4 sm:$0xff]   ;;  %1405 = vmatprep.mubr.bf16.mxu0 %v2771_v44  ;;  %v2766_v48 = vld [vmem:[%s3310_s26 + $0x30] sm:$0xff]   ;;  %v2780_v57 = vld [vmem:[%s3317_s12 + $0x2c] ss:$20 sps:$4 sm:$0xff]  }
  0x73   : > { %2384 = vmatpush3.bf16.msra.mxu0 %v2756_v36  ;;  %2686 = vmatpush3.bf16.msra.mxu1 %v2756_v36  ;;  %v2767_v49 = vld [vmem:[%s3310_s26 + $0x78] sm:$0xff]   ;;  %v2775_v51 = vld [vmem:[%s3310_s26 + $0xc0] sm:$0xff]   ;;  %v2797_v59 = vld [vmem:[%s3310_s26 + $0x108] sm:$0xff]  }
  0x74   : > { %2385 = vmatprep.subr.bf16.mxu0 %v2757_v37  ;;  %2679 = vmatprep.subr.bf16.mxu1 %v2757_v37  ;;  %v2768_v50 = vld [vmem:[%s3310_s26 + $0x38] sm:$0xff]   ;;  %v2778_v52 = vld [vmem:[%s3310_s26 + $0x100] sm:$0xff]   ;;  %v2779_v60 = vld [vmem:[%s3310_s26 + $0x88] sm:$0xff]  }
  0x75   : > { %1501 = vmatprep.mubr.bf16.mxu1 %v2774_v45  ;;  %v2769_v53 = vld [vmem:[%s3317_s12] ss:$20 sps:$4 sm:$0xff]   ;;  %v2784_v61 = vld [vmem:[%s3317_s12 + $0x28] ss:$20 sps:$4 sm:$0xff]   ;;  %v2794_v6 = vld [vmem:[%s3317_s12 + $0x50] ss:$20 sps:$4 sm:$0xff]  }
  0x76   : > { %v2772_v54 = vld [vmem:[%s3317_s12 + $0x1e0] ss:$20 sps:$4 sm:$0xff]   ;;  %v2785_v63 = vld [vmem:[%s3317_s12 + $0x208] ss:$20 sps:$4 sm:$0xff]   ;;  %v2795_v8 = vld [vmem:[%s3317_s12 + $0x230] ss:$20 sps:$4 sm:$0xff]  }
  0x77   : > { %2386 = vmatpush3.bf16.msra.mxu0 %v2758_v38  ;;  %2687 = vmatpush3.bf16.msra.mxu1 %v2758_v38  ;;  %v2776_v55 = vld [vmem:[%s3310_s26 + $0x80] sm:$0xff]   ;;  %v2786_v62 = vld [vmem:[%s3310_s26 + $0xd0] sm:$0xff]   ;;  %v2788_v2 = vld [vmem:[%s3310_s26 + $0xd8] sm:$0xff]  }
  0x78   : > { %2387 = vmatprep.subr.bf16.mxu0 %v2759_v39  ;;  %2680 = vmatprep.subr.bf16.mxu1 %v2759_v39  ;;  %v2782_v58 = vld [vmem:[%s3317_s12 + $0x20c] ss:$20 sps:$4 sm:$0xff]   ;;  %v2787_v0 = vld [vmem:[%s3310_s26 + $0x90] sm:$0xff]   ;;  %v2789_v4 = vld [vmem:[%s3310_s26 + $0x98] sm:$0xff]  }
  0x79   : > { %v2790_v1 = vld [vmem:[%s3317_s12 + $0x54] ss:$20 sps:$4 sm:$0xff]   ;;  %v2796_v5 = vld [vmem:[%s3310_s26 + $0xe0] sm:$0xff]   ;;  %v2801_v11 = vld [vmem:[%s3317_s12 + $0x7c] ss:$20 sps:$4 sm:$0xff]  }
  0x7a   : > { %v2792_v3 = vld [vmem:[%s3317_s12 + $0x234] ss:$20 sps:$4 sm:$0xff]   ;;  %v2798_v9 = vld [vmem:[%s3310_s26 + $0xa0] sm:$0xff]   ;;  %v2803_v12 = vld [vmem:[%s3317_s12 + $0x25c] ss:$20 sps:$4 sm:$0xff]  }
  0x7b   : > { %2388 = vmatpush3.bf16.msra.mxu0 %v2760_v40  ;;  %2688 = vmatpush3.bf16.msra.mxu1 %v2760_v40  ;;  %v2810_v7 = vld [vmem:[%s3310_s26 + $0x110] sm:$0xff]   ;;  %v2799_v10 = vld [vmem:[%s3310_s26 + $0xe8] sm:$0xff]   ;;  %v2824_v14 = vld [vmem:[%s3310_s26 + $0x118] sm:$0xff]  }
  0x7c   : > { %2389 = vmatprep.subr.bf16.mxu0 %v2761_v41  ;;  %2681 = vmatprep.subr.bf16.mxu1 %v2761_v41  ;;  %v2800_v13 = vld [vmem:[%s3310_s26 + $0xa8] sm:$0xff]   ;;  %v2807_v17 = vld [vmem:[%s3310_s26 + $0xf0] sm:$0xff]   ;;  %v2809_v19 = vld [vmem:[%s3310_s26 + $0xf8] sm:$0xff]  }
  0x7d   : > { %v2805_v15 = vld [vmem:[%s3317_s12 + $0x78] ss:$20 sps:$4 sm:$0xff]   ;;  %v2808_v18 = vld [vmem:[%s3310_s26 + $0xb0] sm:$0xff]   ;;  %v2831_v21 = vld [vmem:[%s3310_s26 + $0x120] sm:$0xff]  }
  0x7e   : > { %v2806_v16 = vld [vmem:[%s3317_s12 + $0x258] ss:$20 sps:$4 sm:$0xff]   ;;  %v2814_v24 = vld [vmem:[%s3317_s12 + $0x8] ss:$20 sps:$4 sm:$0xff]   ;;  %v2817_v25 = vld [vmem:[%s3317_s12 + $0xa0] ss:$20 sps:$4 sm:$0xff]  }
  0x7f   : > { %2390 = vmatpush3.bf16.msra.mxu0 %v2762_v42  ;;  %2689 = vmatpush3.bf16.msra.mxu1 %v2762_v42  ;;  %v2812_v20 = vld [vmem:[%s3317_s12 + $0xa4] ss:$20 sps:$4 sm:$0xff]   ;;  %v2816_v22 = vld [vmem:[%s3317_s12 + $0xc] ss:$20 sps:$4 sm:$0xff]   ;;  %v2820_v28 = vld [vmem:[%s3317_s12 + $0x34] ss:$20 sps:$4 sm:$0xff]  }
  0x80   : > { %2391 = vmatprep.subr.bf16.mxu0 %v2763_v43  ;;  %2682 = vmatprep.subr.bf16.mxu1 %v2763_v43  ;;  %v2811_v23 = vld [vmem:[%s3310_s26 + $0xb8] sm:$0xff]   ;;  %v2844_v26 = vld [vmem:[%s3310_s26 + $0x128] sm:$0xff]   ;;  %v2851_v29 = vld [vmem:[%s3310_s26 + $0x130] sm:$0xff]  }
  0x81   : > { %v2818_v27 = vld [vmem:[%s3317_s12 + $0xcc] ss:$20 sps:$4 sm:$0xff]   ;;  %v2822_v30 = vld [vmem:[%s3317_s12 + $0xc8] ss:$20 sps:$4 sm:$0xff]   ;;  %v2823_v31 = vld [vmem:[%s3317_s12 + $0x30] ss:$20 sps:$4 sm:$0xff]  }
  0x82   : > { %v2825_v32 = vld [vmem:[%s3317_s12 + $0xf4] ss:$20 sps:$4 sm:$0xff]   ;;  %v2827_v33 = vld [vmem:[%s3317_s12 + $0x5c] ss:$20 sps:$4 sm:$0xff]   ;;  %v2830_v36 = vld [vmem:[%s3317_s12 + $0x58] ss:$20 sps:$4 sm:$0xff]  }
  0x83   : > { %2392 = vmatpush3.bf16.msra.mxu0 %v2764_v46  ;;  %2690 = vmatpush3.bf16.msra.mxu1 %v2764_v46  ;;  %v2864_v34 = vld [vmem:[%s3310_s26 + $0x138] sm:$0xff]   ;;  %v2829_v35 = vld [vmem:[%s3317_s12 + $0xf0] ss:$20 sps:$4 sm:$0xff]   ;;  %v2837_v40 = vld [vmem:[%s3317_s12 + $0x80] ss:$20 sps:$4 sm:$0xff]  }
  0x84   : > { %2393 = vmatprep.subr.bf16.mxu0 %v2765_v47  ;;  %2683 = vmatprep.subr.bf16.mxu1 %v2765_v47  ;;  %v2832_v37 = vld [vmem:[%s3317_s12 + $0x11c] ss:$20 sps:$4 sm:$0xff]   ;;  %v2834_v38 = vld [vmem:[%s3317_s12 + $0x84] ss:$20 sps:$4 sm:$0xff]   ;;  %v2840_v42 = vld [vmem:[%s3317_s12 + $0xac] ss:$20 sps:$4 sm:$0xff]  }
  0x85   : > { %v2836_v39 = vld [vmem:[%s3317_s12 + $0x118] ss:$20 sps:$4 sm:$0xff]   ;;  %v2842_v43 = vld [vmem:[%s3317_s12 + $0x140] ss:$20 sps:$4 sm:$0xff]   ;;  %v2843_v44 = vld [vmem:[%s3317_s12 + $0xa8] ss:$20 sps:$4 sm:$0xff]  }
  0x86   : > { %v2838_v41 = vld [vmem:[%s3317_s12 + $0x144] ss:$20 sps:$4 sm:$0xff]   ;;  %v2845_v45 = vld [vmem:[%s3317_s12 + $0x16c] ss:$20 sps:$4 sm:$0xff]   ;;  %v2847_v46 = vld [vmem:[%s3317_s12 + $0xd4] ss:$20 sps:$4 sm:$0xff]  }
  0x87   : > { %2394 = vmatpush3.bf16.msra.mxu0 %v2766_v48  ;;  %2691 = vmatpush3.bf16.msra.mxu1 %v2766_v48  ;;  %v2849_v47 = vld [vmem:[%s3317_s12 + $0x168] ss:$20 sps:$4 sm:$0xff]   ;;  %v2850_v48 = vld [vmem:[%s3317_s12 + $0xd0] ss:$20 sps:$4 sm:$0xff]  }
  0x88   : > { %2395 = vmatprep.subr.bf16.mxu0 %v2767_v49  ;;  %2684 = vmatprep.subr.bf16.mxu1 %v2767_v49  ;;  %v2852_v49 = vld [vmem:[%s3317_s12 + $0x194] ss:$20 sps:$4 sm:$0xff]  }
  0x8b   : > { %2396 = vmatpush3.bf16.msra.mxu0 %v2768_v50  ;;  %2692 = vmatpush3.bf16.msra.mxu1 %v2768_v50  ;;  %v2854_v50 = vld [vmem:[%s3317_s12 + $0xfc] ss:$20 sps:$4 sm:$0xff]  }
  0x8c   : > { %2493 = vmatprep.subr.bf16.mxu1 %v2775_v51  ;;  %2629 = vmatprep.subr.bf16.mxu0 %v2778_v52  ;;  %v2856_v51 = vld [vmem:[%s3317_s12 + $0x190] ss:$20 sps:$4 sm:$0xff]  }
  0x8e   : > { %1406 = vmatmul.mubr.bf16.vlgmr.msra.gmra.mrb[0].mxu0 %v2769_v53  ;;  %1502 = vmatmul.mubr.bf16.vlgmr.msra.gmra.mrb[0].mxu1 %v2772_v54  ;;  %v2858_v53 = vld [vmem:[%s3317_s12 + $0x1bc] ss:$20 sps:$4 sm:$0xff]   ;;  %v2860_v54 = vld [vmem:[%s3317_s12 + $0x124] ss:$20 sps:$4 sm:$0xff]  }
  0x8f   : > { %2494 = vmatpush3.bf16.msra.mxu1 %v2776_v55  ;;  %2630 = vmatpush3.bf16.msra.mxu0 %v2778_v52  ;;  %v2857_v52 = vld [vmem:[%s3317_s12 + $0xf8] ss:$20 sps:$4 sm:$0xff]  }
  0x90   : > { %2495 = vmatprep.subr.bf16.mxu1 %v2777_v56  ;;  %1413 = vmatprep.mubr.bf16.mxu0 %v2780_v57  ;;  %v2862_v55 = vld [vmem:[%s3317_s12 + $0x1b8] ss:$20 sps:$4 sm:$0xff]   ;;  %v2863_v56 = vld [vmem:[%s3317_s12 + $0x120] ss:$20 sps:$4 sm:$0xff]  }
  0x91   : > { %1509 = vmatprep.mubr.bf16.mxu1 %v2782_v58  ;;  %2631 = vmatprep.subr.bf16.mxu0 %v2797_v59  ;;  %v2865_v57 = vld [vmem:[%s3317_s12 + $0x14c] ss:$20 sps:$4 sm:$0xff]   ;;  %v2867_v58 = vld [vmem:[%s3317_s12 + $0x10] ss:$20 sps:$4 sm:$0xff]  }
  0x93   : > { %2496 = vmatpush3.bf16.msra.mxu1 %v2779_v60  ;;  %2632 = vmatpush3.bf16.msra.mxu0 %v2797_v59  ;;  %v2868_v59 = vld [vmem:[%s3317_s12 + $0x148] ss:$20 sps:$4 sm:$0xff]   ;;  %v2869_v60 = vld [vmem:[%s3317_s12 + $0x38] ss:$20 sps:$4 sm:$0xff]  }
  0x94   : > { %2497 = vmatprep.subr.bf16.mxu1 %v2786_v62  ;;  %2633 = vmatprep.subr.bf16.mxu0 %v2810_v7  ;;  %v2872_v62 = vld [vmem:[%s3317_s12 + $0x60] ss:$20 sps:$4 sm:$0xff]  }
  0x96   : > { %1414 = vmatmul.mubr.bf16.gmra.mrb[4].mxu0 %v2784_v61  ;;  %1510 = vmatmul.mubr.bf16.gmra.mrb[4].mxu1 %v2785_v63  ;;  %v2870_v61 = vld [vmem:[%s3317_s12 + $0x174] ss:$20 sps:$4 sm:$0xff]   ;;  %v2873_v63 = vld [vmem:[%s3317_s12 + $0x170] ss:$20 sps:$4 sm:$0xff]  }
  0x97   : > { %2498 = vmatpush3.bf16.msra.mxu1 %v2787_v0  ;;  %1421 = vmatprep.mubr.bf16.mxu0 %v2790_v1  ;;  %v2874_v0 = vld [vmem:[%s3317_s12 + $0x88] ss:$20 sps:$4 sm:$0xff]  }
  0x98   : > { %2499 = vmatprep.subr.bf16.mxu1 %v2788_v2  ;;  %1517 = vmatprep.mubr.bf16.mxu1 %v2792_v3  ;;  %v2875_v1 = vld [vmem:[%s3317_s12 + $0x19c] ss:$20 sps:$4 sm:$0xff]   ;;  %v2878_v3 = vld [vmem:[%s3317_s12 + $0x198] ss:$20 sps:$4 sm:$0xff]  }
  0x99   : > { %2634 = vmatpush3.bf16.msra.mxu0 %v2810_v7  ;;  %v2877_v2 = vld [vmem:[%s3317_s12 + $0xb0] ss:$20 sps:$4 sm:$0xff]   ;;  %v2883_v7 = vld [vmem:[%s3317_s12 + $0x1c0] ss:$20 sps:$4 sm:$0xff]  }
  0x9a   : > { %2635 = vmatprep.subr.bf16.mxu0 %v2824_v14 }
  0x9b   : > { %2500 = vmatpush3.bf16.msra.mxu1 %v2789_v4  ;;  %v2879_v4 = vld [vmem:[%s3317_s12 + $0xd8] ss:$20 sps:$4 sm:$0xff]  }
  0x9c   : > { %2501 = vmatprep.subr.bf16.mxu1 %v2796_v5  ;;  %v2880_v5 = vld [vmem:[%s3317_s12 + $0x1c4] ss:$20 sps:$4 sm:$0xff]  }
  0x9d   : > { %2636 = vmatpush3.bf16.msra.mxu0 %v2824_v14  ;;  %v2892_v14 = vld [vmem:[%s3317_s12 + $0x1a0] ss:$20 sps:$4 sm:$0xff]  }
  0x9e   : > { %1422 = vmatmul.mubr.bf16.gmra.mrb[8].mxu0 %v2794_v6  ;;  %1518 = vmatmul.mubr.bf16.gmra.mrb[8].mxu1 %v2795_v8  ;;  %v2882_v6 = vld [vmem:[%s3317_s12 + $0x100] ss:$20 sps:$4 sm:$0xff]   ;;  %v2884_v8 = vld [vmem:[%s3317_s12 + $0x128] ss:$20 sps:$4 sm:$0xff]  }
  0x9f   : > { %2502 = vmatpush3.bf16.msra.mxu1 %v2798_v9  ;;  %1429 = vmatprep.mubr.bf16.mxu0 %v2801_v11  ;;  %v2885_v9 = vld [vmem:[%s3317_s12 + $0x1ec] ss:$20 sps:$4 sm:$0xff]   ;;  %v2888_v11 = vld [vmem:[%s3317_s12 + $0x1e8] ss:$20 sps:$4 sm:$0xff]  }
  0xa0   : > { %2503 = vmatprep.subr.bf16.mxu1 %v2799_v10  ;;  %1525 = vmatprep.mubr.bf16.mxu1 %v2803_v12  ;;  %v2887_v10 = vld [vmem:[%s3317_s12 + $0x150] ss:$20 sps:$4 sm:$0xff]   ;;  %v2889_v12 = vld [vmem:[%s3317_s12 + $0x178] ss:$20 sps:$4 sm:$0xff]  }
  0xa1   : > { %2637 = vmatprep.subr.bf16.mxu0 %v2831_v21 }
  0xa2   : > { %2638 = vmatpush3.bf16.msra.mxu0 %v2831_v21  ;;  %v2900_v21 = vld [vmem:[%s3317_s12 + $0x264] ss:$20 sps:$4 sm:$0xff]  }
  0xa3   : > { %2504 = vmatpush3.bf16.msra.mxu1 %v2800_v13  ;;  %2639 = vmatprep.subr.bf16.mxu0 %v2844_v26  ;;  %v2890_v13 = vld [vmem:[%s3317_s12 + $0x214] ss:$20 sps:$4 sm:$0xff]  }
  0xa4   : > { %2505 = vmatprep.subr.bf16.mxu1 %v2807_v17  ;;  %v2895_v17 = vld [vmem:[%s3317_s12 + $0x23c] ss:$20 sps:$4 sm:$0xff]  }
  0xa6   : > { %1430 = vmatmul.mubr.bf16.gmra.mrb[12].mxu0 %v2805_v15  ;;  %1526 = vmatmul.mubr.bf16.gmra.mrb[12].mxu1 %v2806_v16  ;;  %v2893_v15 = vld [vmem:[%s3317_s12 + $0x210] ss:$20 sps:$4 sm:$0xff]   ;;  %v2894_v16 = vld [vmem:[%s3317_s12 + $0x1c8] ss:$20 sps:$4 sm:$0xff]  }
  0xa7   : > { %2506 = vmatpush3.bf16.msra.mxu1 %v2808_v18  ;;  %1437 = vmatprep.mubr.bf16.mxu0 %v2812_v20  ;;  %v2897_v18 = vld [vmem:[%s3317_s12 + $0x1f0] ss:$20 sps:$4 sm:$0xff]   ;;  %v2899_v20 = vld [vmem:[%s3317_s12 + $0x218] ss:$20 sps:$4 sm:$0xff]  }
  0xa8   : > { %2507 = vmatprep.subr.bf16.mxu1 %v2809_v19  ;;  %1566 = vmatprep.mubr.bf16.mxu1 %v2816_v22  ;;  %v2898_v19 = vld [vmem:[%s3317_s12 + $0x238] ss:$20 sps:$4 sm:$0xff]   ;;  %v2902_v22 = vld [vmem:[%s3317_s12 + $0x240] ss:$20 sps:$4 sm:$0xff]  }
  0xa9   : > { %2640 = vmatpush3.bf16.msra.mxu0 %v2844_v26 }
  0xaa   : > { %2641 = vmatprep.subr.bf16.mxu0 %v2851_v29 }
  0xab   : > { %2508 = vmatpush3.bf16.msra.mxu1 %v2811_v23  ;;  %v2903_v23 = vld [vmem:[%s3317_s12 + $0x260] ss:$20 sps:$4 sm:$0xff]  }
  0xad   : > { %2642 = vmatpush3.bf16.msra.mxu0 %v2851_v29 }
  0xae   : > { %1438 = vmatmul.mubr.bf16.gmra.mrb[16].mxu0 %v2817_v25  ;;  %1567 = vmatmul.mubr.bf16.vlgmr.msra.gmra.mrb[16].mxu1 %v2814_v24  ;;  %v2904_v24 = vld [vmem:[%s3317_s12 + $0x268] ss:$20 sps:$4 sm:$0xff]  }
  0xaf   : > { %1445 = vmatprep.mubr.bf16.mxu0 %v2818_v27  ;;  %1574 = vmatprep.mubr.bf16.mxu1 %v2820_v28 }
  0xb0   : > { %2643 = vmatprep.subr.bf16.mxu0 %v2864_v34 }
  0xb1   : > { %2644 = vmatpush3.bf16.msra.mxu0 %v2864_v34 }
  0xb6   : > { %1446 = vmatmul.mubr.bf16.gmra.mrb[20].mxu0 %v2822_v30  ;;  %1575 = vmatmul.mubr.bf16.gmra.mrb[20].mxu1 %v2823_v31 }
  0xb7   : > { %1453 = vmatprep.mubr.bf16.mxu0 %v2825_v32  ;;  %1582 = vmatprep.mubr.bf16.mxu1 %v2827_v33 }
  0xbe   : > { %1454 = vmatmul.mubr.bf16.gmra.mrb[24].mxu0 %v2829_v35  ;;  %1583 = vmatmul.mubr.bf16.gmra.mrb[24].mxu1 %v2830_v36 }
  0xbf   : > { %1461 = vmatprep.mubr.bf16.mxu0 %v2832_v37  ;;  %1590 = vmatprep.mubr.bf16.mxu1 %v2834_v38 }
  0xc6   : > { %1462 = vmatmul.mubr.bf16.gmra.mrb[28].mxu0 %v2836_v39  ;;  %1591 = vmatmul.mubr.bf16.gmra.mrb[28].mxu1 %v2837_v40 }
  0xc7   : > { %1469 = vmatprep.mubr.bf16.mxu0 %v2838_v41  ;;  %1598 = vmatprep.mubr.bf16.mxu1 %v2840_v42 }
  0xce   : > { %1470 = vmatmul.mubr.bf16.gmra.mrb[32].mxu0 %v2842_v43  ;;  %1599 = vmatmul.mubr.bf16.gmra.mrb[32].mxu1 %v2843_v44 }
  0xcf   : > { %1477 = vmatprep.mubr.bf16.mxu0 %v2845_v45  ;;  %1606 = vmatprep.mubr.bf16.mxu1 %v2847_v46 }
  0xd6   : > { %1478 = vmatmul.mubr.bf16.gmra.mrb[36].mxu0 %v2849_v47  ;;  %1607 = vmatmul.mubr.bf16.gmra.mrb[36].mxu1 %v2850_v48 }
  0xd7   : > { %1485 = vmatprep.mubr.bf16.mxu0 %v2852_v49  ;;  %1614 = vmatprep.mubr.bf16.mxu1 %v2854_v50 }
  0xde   : > { %1486 = vmatmul.mubr.bf16.gmra.mrb[40].mxu0 %v2856_v51  ;;  %1615 = vmatmul.mubr.bf16.gmra.mrb[40].mxu1 %v2857_v52 }
  0xdf   : > { %1493 = vmatprep.mubr.bf16.mxu0 %v2858_v53  ;;  %1622 = vmatprep.mubr.bf16.mxu1 %v2860_v54 }
  0xe6   : > { %1494 = vmatmul.mubr.bf16.gmra.mrb[44].mxu0 %v2862_v55  ;;  %1623 = vmatmul.mubr.bf16.gmra.mrb[44].mxu1 %v2863_v56 }
  0xe7   : > { %1630 = vmatprep.mubr.bf16.mxu1 %v2865_v57  ;;  %2645 = vmatprep.mubr.bf16.mxu0 %v2867_v58 }
  0xee   : > { %1631 = vmatmul.mubr.bf16.gmra.mrb[48].mxu1 %v2868_v59  ;;  %2646 = vmatmul.mubr.bf16.vlgmr.msra.gmra.mrb[48].mxu0 %v2869_v60 }
  0xef   : > { %1638 = vmatprep.mubr.bf16.mxu1 %v2870_v61  ;;  %2649 = vmatprep.mubr.bf16.mxu0 %v2872_v62 }
  0xf6   : > { %1639 = vmatmul.mubr.bf16.gmra.mrb[52].mxu1 %v2873_v63  ;;  %2650 = vmatmul.mubr.bf16.gmra.mrb[52].mxu0 %v2874_v0 }
  0xf7   : > { %1646 = vmatprep.mubr.bf16.mxu1 %v2875_v1  ;;  %2653 = vmatprep.mubr.bf16.mxu0 %v2877_v2 }
  0xfe   : > { %1647 = vmatmul.mubr.bf16.gmra.mrb[56].mxu1 %v2878_v3  ;;  %2654 = vmatmul.mubr.bf16.gmra.mrb[56].mxu0 %v2879_v4 }
  0xff   : > { %1654 = vmatprep.mubr.bf16.mxu1 %v2880_v5  ;;  %2657 = vmatprep.mubr.bf16.mxu0 %v2882_v6 }
 0x106   : > { %1655 = vmatmul.mubr.bf16.gmra.mrb[60].mxu1 %v2883_v7  ;;  %2658 = vmatmul.mubr.bf16.gmra.mrb[60].mxu0 %v2884_v8 }
 0x107   : > { %1662 = vmatprep.mubr.bf16.mxu1 %v2885_v9  ;;  %2661 = vmatprep.mubr.bf16.mxu0 %v2887_v10 }
 0x10e   : > { %1663 = vmatmul.mubr.bf16.gmra.mrb[64].mxu1 %v2888_v11  ;;  %2662 = vmatmul.mubr.bf16.gmra.mrb[64].mxu0 %v2889_v12 }
 0x10f   : > { %1670 = vmatprep.mubr.bf16.mxu1 %v2890_v13  ;;  %2665 = vmatprep.mubr.bf16.mxu0 %v2892_v14 }
 0x116   : > { %1671 = vmatmul.mubr.bf16.gmra.mrb[68].mxu1 %v2893_v15  ;;  %2666 = vmatmul.mubr.bf16.gmra.mrb[68].mxu0 %v2894_v16 }
 0x117   : > { %1678 = vmatprep.mubr.bf16.mxu1 %v2895_v17  ;;  %2669 = vmatprep.mubr.bf16.mxu0 %v2897_v18 }
 0x11e   : > { %1679 = vmatmul.mubr.bf16.gmra.mrb[72].mxu1 %v2898_v19  ;;  %2670 = vmatmul.mubr.bf16.gmra.mrb[72].mxu0 %v2899_v20 }
 0x11f   : > { %1686 = vmatprep.mubr.bf16.mxu1 %v2900_v21  ;;  %2673 = vmatprep.mubr.bf16.mxu0 %v2902_v22 }
 0x126   : > { %1687 = vmatmul.mubr.bf16.gmra.mrb[76].mxu1 %v2903_v23  ;;  %2674 = vmatmul.mubr.bf16.gmra.mrb[76].mxu0 %v2904_v24 }
 0x161   : > { %v2469_v25 = vpop.f32.mrb[0].mxu1  ;;  %v2397_v26 = vpop.f32.mrb[0].mxu0 }
 0x162   : > { %v2470_v27 = vpop.f32.mrb[1].mxu1  ;;  %v2398_v28 = vpop.f32.mrb[1].mxu0 }
 0x163   : > { %v3440_v29 = vadd.f32 %v2470_v27, %v2469_v25  ;;  %v2472_v30 = vpop.f32.mrb[2].mxu1  ;;  %v2399_v31 = vadd.f32 %v2398_v28, %v2397_v26  ;;  %v2400_v32 = vpop.f32.mrb[2].mxu0 }
 0x164   : > { %v2473_v33 = vpop.f32.mrb[3].mxu1  ;;  %v2401_v34 = vpop.f32.mrb[3].mxu0 }
 0x165   : > { %v3442_v35 = vadd.f32 %v2473_v33, %v2472_v30  ;;  %v2402_v36 = vadd.f32 %v2401_v34, %v2400_v32 }
 0x169   : > { %v2475_v37 = vpop.f32.mrb[4].mxu1  ;;  %v2403_v38 = vpop.f32.mrb[4].mxu0 }
 0x16a   : > { %v2476_v39 = vpop.f32.mrb[5].mxu1  ;;  %v2404_v40 = vpop.f32.mrb[5].mxu0 }
 0x16b   : > { %v3444_v41 = vadd.f32 %v2476_v39, %v2475_v37  ;;  %v2478_v42 = vpop.f32.mrb[6].mxu1  ;;  %v2405_v43 = vadd.f32 %v2404_v40, %v2403_v38  ;;  %v2406_v44 = vpop.f32.mrb[6].mxu0 }
 0x16c   : > { %v2479_v45 = vpop.f32.mrb[7].mxu1  ;;  %v2407_v46 = vpop.f32.mrb[7].mxu0 }
 0x16d   : > { %v3446_v47 = vadd.f32 %v2479_v45, %v2478_v42  ;;  %v2408_v48 = vadd.f32 %v2407_v46, %v2406_v44 }
 0x171   : > { %v2481_v49 = vpop.f32.mrb[8].mxu1  ;;  %v2409_v50 = vpop.f32.mrb[8].mxu0 }
 0x172   : > { %v2482_v51 = vpop.f32.mrb[9].mxu1  ;;  %v2410_v52 = vpop.f32.mrb[9].mxu0 }
 0x173   : > { %v3448_v53 = vadd.f32 %v2482_v51, %v2481_v49  ;;  %v2484_v54 = vpop.f32.mrb[10].mxu1  ;;  %v2411_v55 = vadd.f32 %v2410_v52, %v2409_v50  ;;  %v2412_v56 = vpop.f32.mrb[10].mxu0 }
 0x174   : > { %v2485_v57 = vpop.f32.mrb[11].mxu1  ;;  %v2413_v58 = vpop.f32.mrb[11].mxu0 }
 0x175   : > { %v3450_v59 = vadd.f32 %v2485_v57, %v2484_v54  ;;  %v2414_v60 = vadd.f32 %v2413_v58, %v2412_v56 }
 0x179   : > { %v2487_v61 = vpop.f32.mrb[12].mxu1  ;;  %v2415_v62 = vpop.f32.mrb[12].mxu0 }
 0x17a   : > { %v2488_v63 = vpop.f32.mrb[13].mxu1  ;;  %v2416_v0 = vpop.f32.mrb[13].mxu0 }
 0x17b   : > { %v3452_v1 = vadd.f32 %v2488_v63, %v2487_v61  ;;  %v2490_v2 = vpop.f32.mrb[14].mxu1  ;;  %v2417_v3 = vadd.f32 %v2416_v0, %v2415_v62  ;;  %v2418_v4 = vpop.f32.mrb[14].mxu0 }
 0x17c   : > { %v2491_v5 = vpop.f32.mrb[15].mxu1  ;;  %v2419_v6 = vpop.f32.mrb[15].mxu0 }
 0x17d   : > { %v3454_v7 = vadd.f32 %v2491_v5, %v2490_v2  ;;  %v2420_v8 = vadd.f32 %v2419_v6, %v2418_v4 }
 0x181   : > { %v2509_v9 = vpop.f32.mrb[16].mxu1  ;;  %v2421_v10 = vpop.f32.mrb[16].mxu0 }
 0x182   : > { %v2510_v11 = vpop.f32.mrb[17].mxu1  ;;  %v2422_v12 = vpop.f32.mrb[17].mxu0 }
 0x183   : > { %v2511_v13 = vadd.f32 %v2510_v11, %v2509_v9  ;;  %v2512_v14 = vpop.f32.mrb[18].mxu1  ;;  %v2423_v15 = vadd.f32 %v2422_v12, %v2421_v10  ;;  %v2424_v16 = vpop.f32.mrb[18].mxu0 }
 0x184   : > { %v2513_v17 = vpop.f32.mrb[19].mxu1  ;;  %v2425_v18 = vpop.f32.mrb[19].mxu0 }
 0x185   : > { %v2514_v19 = vadd.f32 %v2513_v17, %v2512_v14  ;;  %v2426_v20 = vadd.f32 %v2425_v18, %v2424_v16  ;;  %v3456_v21 = vadd.f32 %v2511_v13, %v2399_v31 }
 0x187   : > { %v3458_v22 = vadd.f32 %v2514_v19, %v2402_v36 }
 0x189   : > { %v2515_v23 = vpop.f32.mrb[20].mxu1  ;;  %v2427_v24 = vpop.f32.mrb[20].mxu0 }
 0x18a   : > { %v2516_v25 = vpop.f32.mrb[21].mxu1  ;;  %v2428_v26 = vpop.f32.mrb[21].mxu0 }
 0x18b   : > { %v2517_v27 = vadd.f32 %v2516_v25, %v2515_v23  ;;  %v2518_v28 = vpop.f32.mrb[22].mxu1  ;;  %v2429_v30 = vadd.f32 %v2428_v26, %v2427_v24  ;;  %v2430_v32 = vpop.f32.mrb[22].mxu0 }
 0x18c   : > { %v2519_v33 = vpop.f32.mrb[23].mxu1  ;;  %v2431_v34 = vpop.f32.mrb[23].mxu0 }
 0x18d   : > { %v2520_v37 = vadd.f32 %v2519_v33, %v2518_v28  ;;  %v2432_v38 = vadd.f32 %v2431_v34, %v2430_v32  ;;  %v3460_v39 = vadd.f32 %v2517_v27, %v2405_v43 }
 0x18f   : > { %v3462_v40 = vadd.f32 %v2520_v37, %v2408_v48 }
 0x191   : > { %v2521_v31 = vpop.f32.mrb[24].mxu1  ;;  %v2433_v42 = vpop.f32.mrb[24].mxu0 }
 0x192   : > { %v2522_v36 = vpop.f32.mrb[25].mxu1  ;;  %v2434_v44 = vpop.f32.mrb[25].mxu0 }
 0x193   : > { %v2523_v45 = vadd.f32 %v2522_v36, %v2521_v31  ;;  %v2524_v46 = vpop.f32.mrb[26].mxu1  ;;  %v2435_v49 = vadd.f32 %v2434_v44, %v2433_v42  ;;  %v2436_v50 = vpop.f32.mrb[26].mxu0 }
 0x194   : > { %v2525_v51 = vpop.f32.mrb[27].mxu1  ;;  %v2437_v52 = vpop.f32.mrb[27].mxu0 }
 0x195   : > { %v2526_v54 = vadd.f32 %v2525_v51, %v2524_v46  ;;  %v2438_v56 = vadd.f32 %v2437_v52, %v2436_v50  ;;  %v3464_v57 = vadd.f32 %v2523_v45, %v2411_v55 }
 0x197   : > { %v3466_v58 = vadd.f32 %v2526_v54, %v2414_v60 }
 0x199   : > { %v2527_v43 = vpop.f32.mrb[28].mxu1  ;;  %v2439_v61 = vpop.f32.mrb[28].mxu0 }
 0x19a   : > { %v2528_v48 = vpop.f32.mrb[29].mxu1  ;;  %v2440_v62 = vpop.f32.mrb[29].mxu0 }
 0x19b   : > { %v2529_v63 = vadd.f32 %v2528_v48, %v2527_v43  ;;  %v2530_v0 = vpop.f32.mrb[30].mxu1  ;;  %v2441_v2 = vadd.f32 %v2440_v62, %v2439_v61  ;;  %v2442_v4 = vpop.f32.mrb[30].mxu0 }
 0x19c   : > { %v2531_v5 = vpop.f32.mrb[31].mxu1  ;;  %v2443_v6 = vpop.f32.mrb[31].mxu0 }
 0x19d   : > { %v2532_v9 = vadd.f32 %v2531_v5, %v2530_v0  ;;  %v2444_v10 = vadd.f32 %v2443_v6, %v2442_v4  ;;  %v3468_v11 = vadd.f32 %v2529_v63, %v2417_v3 }
 0x19f   : > { %v3470_v12 = vadd.f32 %v2532_v9, %v2420_v8 }
 0x1a1   : > { %v2533_v55 = vpop.f32.mrb[32].mxu1  ;;  %v2445_v13 = vpop.f32.mrb[32].mxu0 }
 0x1a2   : > { %v2534_v60 = vpop.f32.mrb[33].mxu1  ;;  %v2446_v14 = vpop.f32.mrb[33].mxu0 }
 0x1a3   : > { %v2535_v16 = vadd.f32 %v2534_v60, %v2533_v55  ;;  %v2536_v17 = vpop.f32.mrb[34].mxu1  ;;  %v3472_v18 = vadd.f32 %v2446_v14, %v2445_v13  ;;  %v2448_v19 = vpop.f32.mrb[34].mxu0 }
 0x1a4   : > { %v2537_v23 = vpop.f32.mrb[35].mxu1  ;;  %v2449_v24 = vpop.f32.mrb[35].mxu0 }
 0x1a5   : > { %v2538_v25 = vadd.f32 %v2537_v23, %v2536_v17  ;;  %v3474_v26 = vadd.f32 %v2449_v24, %v2448_v19  ;;  %v3476_v27 = vadd.f32 %v2535_v16, %v2423_v15 }
 0x1a7   : > { %v3478_v3 = vadd.f32 %v2538_v25, %v2426_v20 }
 0x1a9   : > { %v2539_v8 = vpop.f32.mrb[36].mxu1  ;;  %v2451_v28 = vpop.f32.mrb[36].mxu0 }
 0x1aa   : > { %v2540_v32 = vpop.f32.mrb[37].mxu1  ;;  %v2452_v33 = vpop.f32.mrb[37].mxu0 }
 0x1ab   : > { %v2541_v34 = vadd.f32 %v2540_v32, %v2539_v8  ;;  %v2542_v37 = vpop.f32.mrb[38].mxu1  ;;  %v3480_v31 = vadd.f32 %v2452_v33, %v2451_v28  ;;  %v2454_v42 = vpop.f32.mrb[38].mxu0  ;;  %v511_v28 = vld [vmem:[#allocation2 + $0x10] sm:$0xff] }
 0x1ac   : > { %v2543_v36 = vpop.f32.mrb[39].mxu1  ;;  %v2455_v44 = vpop.f32.mrb[39].mxu0 }
 0x1ad   : > { %v2544_v45 = vadd.f32 %v2543_v36, %v2542_v37  ;;  %v3482_v46 = vadd.f32 %v2455_v44, %v2454_v42  ;;  %v3484_v50 = vadd.f32 %v2541_v34, %v2429_v30  ;;  %v509_v37 = vld [vmem:[#allocation2] sm:$0xff] }
 0x1af   : > { %v3486_v15 = vadd.f32 %v2544_v45, %v2432_v38 }
 0x1b1   : > { %v2545_v20 = vpop.f32.mrb[40].mxu1  ;;  %v2457_v51 = vpop.f32.mrb[40].mxu0 }
 0x1b2   : > { %v2546_v52 = vpop.f32.mrb[41].mxu1  ;;  %v2458_v54 = vpop.f32.mrb[41].mxu0 }
 0x1b3   : > { %v2547_v43 = vadd.f32 %v2546_v52, %v2545_v20  ;;  %v2548_v61 = vpop.f32.mrb[42].mxu1  ;;  %v3488_v48 = vadd.f32 %v2458_v54, %v2457_v51  ;;  %v2460_v62 = vpop.f32.mrb[42].mxu0  ;;  %v512_v20 = vld [vmem:[#allocation2 + $0x18] sm:$0xff] }
 0x1b4   : > { %v2549_v63 = vpop.f32.mrb[43].mxu1  ;;  %v2461_v0 = vpop.f32.mrb[43].mxu0 }
 0x1b5   : > { %v2550_v4 = vadd.f32 %v2549_v63, %v2548_v61  ;;  %v3490_v5 = vadd.f32 %v2461_v0, %v2460_v62  ;;  %v3492_v6 = vadd.f32 %v2547_v43, %v2435_v49 }
 0x1b7   : > { %v3494_v30 = vadd.f32 %v2550_v4, %v2438_v56 }
 0x1b9   : > { %v2551_v38 = vpop.f32.mrb[44].mxu1  ;;  %v2463_v9 = vpop.f32.mrb[44].mxu0 }
 0x1ba   : > { %v2552_v55 = vpop.f32.mrb[45].mxu1  ;;  %v2464_v13 = vpop.f32.mrb[45].mxu0 }
 0x1bb   : > { %v2553_v60 = vadd.f32 %v2552_v55, %v2551_v38  ;;  %v2554_v14 = vpop.f32.mrb[46].mxu1  ;;  %v3496_v16 = vadd.f32 %v2464_v13, %v2463_v9  ;;  %v2466_v17 = vpop.f32.mrb[46].mxu0  ;;  %v515_v38 = vld [vmem:[#allocation2 + $0x30] sm:$0xff] }
 0x1bc   : > { %v2555_v19 = vpop.f32.mrb[47].mxu1  ;;  %v2467_v23 = vpop.f32.mrb[47].mxu0 }
 0x1bd   : > { %v2556_v24 = vadd.f32 %v2555_v19, %v2554_v14  ;;  %v3498_v25 = vadd.f32 %v2467_v23, %v2466_v17  ;;  %v3500_v8 = vadd.f32 %v2553_v60, %v2441_v2  ;;  %v513_v60 = vld [vmem:[#allocation2 + $0x20] sm:$0xff]  ;;  %v516_v19 = vld [vmem:[#allocation2 + $0x38] sm:$0xff] }
 0x1bf   : > { %v3502_v49 = vadd.f32 %v2556_v24, %v2444_v10  ;;  %v510_v10 = vld [vmem:[#allocation2 + $0x8] sm:$0xff] }
 0x1c1   : > { %v2557_v56 = vpop.f32.mrb[48].mxu1  ;;  %v2647_v32 = vpop.f32.mrb[48].mxu0 }
 0x1c2   : > { %v1738_v33 = vadd.f32 %v2647_v32, %v3460_v39  ;;  %v2558_v34 = vpop.f32.mrb[49].mxu1  ;;  %v1729_v42 = vpop.f32.mrb[49].mxu0 }
 0x1c3   : > { %v2559_v36 = vadd.f32 %v2558_v34, %v2557_v56  ;;  %v1730_v44 = vadd.f32 %v1729_v42, %v3456_v21  ;;  %v2560_v45 = vpop.f32.mrb[50].mxu1  ;;  %v2648_v51 = vpop.f32.mrb[50].mxu0 }
 0x1c4   : > { %v1858_v52 = vadd.f32 %v1738_v33, %v511_v28  ;;  %v1741_v2 = vadd.f32 %v2648_v51, %v3462_v40  ;;  %v2561_v54 = vpop.f32.mrb[51].mxu1  ;;  %v1732_v43 = vpop.f32.mrb[51].mxu0  ;;  %v514_v28 = vld [vmem:[#allocation2 + $0x28] sm:$0xff] }
 0x1c5   : > { %v1856_v61 = vadd.f32 %v1730_v44, %v509_v37  ;;  %v2562_v62 = vadd.f32 %v2561_v54, %v2560_v45  ;;  %v1733_v63 = vadd.f32 %v1732_v43, %v3458_v22  ;;  %v3509_v39 = vadd.f32 %v2559_v36, %v3472_v18  ;;  %v519_v44 = vld [vmem:[#allocation2 + $0x50] sm:$0xff] }
 0x1c6   : > { %1890 = vst [vmem:[#allocation2 + $0x10] sm:$0xff] %v1858_v52  ;;  %v1859_v0 = vadd.f32 %v1741_v2, %v512_v20  ;;  %v517_v52 = vld [vmem:[#allocation2 + $0x40] sm:$0xff] }
 0x1c7   : > { %1888 = vst [vmem:[#allocation2] sm:$0xff] %v1856_v61  ;;  %v1857_v21 = vadd.f32 %v1733_v63, %v510_v10  ;;  %v3512_v4 = vadd.f32 %v2562_v62, %v3474_v26  ;;  %v520_v10 = vld [vmem:[#allocation2 + $0x58] sm:$0xff]  ;;  %v518_v63 = vld [vmem:[#allocation2 + $0x48] sm:$0xff] }
 0x1c8   : > { %1891 = vst [vmem:[#allocation2 + $0x18] sm:$0xff] %v1859_v0 }
 0x1c9   : > { %1889 = vst [vmem:[#allocation2 + $0x8] sm:$0xff] %v1857_v21  ;;  %v2563_v40 = vpop.f32.mrb[52].mxu1  ;;  %v2651_v9 = vpop.f32.mrb[52].mxu0 }
 0x1ca   : > { %v1754_v55 = vadd.f32 %v2651_v9, %v3468_v11  ;;  %v2564_v13 = vpop.f32.mrb[53].mxu1  ;;  %v1745_v22 = vpop.f32.mrb[53].mxu0 }
 0x1cb   : > { %v2565_v14 = vadd.f32 %v2564_v13, %v2563_v40  ;;  %v1746_v18 = vadd.f32 %v1745_v22, %v3464_v57  ;;  %v2566_v17 = vpop.f32.mrb[54].mxu1  ;;  %v2652_v23 = vpop.f32.mrb[54].mxu0  ;;  %v523_v13 = vld [vmem:[#allocation2 + $0x70] sm:$0xff] }
 0x1cc   : > { %v1862_v24 = vadd.f32 %v1754_v55, %v515_v38  ;;  %v1757_v26 = vadd.f32 %v2652_v23, %v3470_v12  ;;  %v2567_v56 = vpop.f32.mrb[55].mxu1  ;;  %v1748_v32 = vpop.f32.mrb[55].mxu0  ;;  %v524_v23 = vld [vmem:[#allocation2 + $0x78] sm:$0xff] }
 0x1cd   : > { %v1860_v33 = vadd.f32 %v1746_v18, %v513_v60  ;;  %v2568_v34 = vadd.f32 %v2567_v56, %v2566_v17  ;;  %v1749_v37 = vadd.f32 %v1748_v32, %v3466_v58  ;;  %v3519_v11 = vadd.f32 %v2565_v14, %v3480_v31  ;;  %v521_v18 = vld [vmem:[#allocation2 + $0x60] sm:$0xff] }
 0x1ce   : > { %1894 = vst [vmem:[#allocation2 + $0x30] sm:$0xff] %v1862_v24  ;;  %v1863_v42 = vadd.f32 %v1757_v26, %v516_v19 }
 0x1cf   : > { %1892 = vst [vmem:[#allocation2 + $0x20] sm:$0xff] %v1860_v33  ;;  %v1861_v57 = vadd.f32 %v1749_v37, %v514_v28  ;;  %v3522_v36 = vadd.f32 %v2568_v34, %v3482_v46  ;;  %v522_v28 = vld [vmem:[#allocation2 + $0x68] sm:$0xff] }
 0x1d0   : > { %1895 = vst [vmem:[#allocation2 + $0x38] sm:$0xff] %v1863_v42 }
 0x1d1   : > { %1893 = vst [vmem:[#allocation2 + $0x28] sm:$0xff] %v1861_v57  ;;  %v2569_v12 = vpop.f32.mrb[56].mxu1  ;;  %v2655_v45 = vpop.f32.mrb[56].mxu0 }
 0x1d2   : > { %v1770_v20 = vadd.f32 %v2655_v45, %v3484_v50  ;;  %v2570_v51 = vpop.f32.mrb[57].mxu1  ;;  %v1761_v58 = vpop.f32.mrb[57].mxu0 }
 0x1d3   : > { %v2571_v2 = vadd.f32 %v2570_v51, %v2569_v12  ;;  %v1762_v31 = vadd.f32 %v1761_v58, %v3476_v27  ;;  %v2572_v54 = vpop.f32.mrb[58].mxu1  ;;  %v2656_v43 = vpop.f32.mrb[58].mxu0  ;;  %v525_v51 = vld [vmem:[#allocation2 + $0x80] sm:$0xff] }
 0x1d4   : > { %v1866_v61 = vadd.f32 %v1770_v20, %v519_v44  ;;  %v1773_v46 = vadd.f32 %v2656_v43, %v3486_v15  ;;  %v2573_v62 = vpop.f32.mrb[59].mxu1  ;;  %v1764_v0 = vpop.f32.mrb[59].mxu0  ;;  %v527_v44 = vld [vmem:[#allocation2 + $0x90] sm:$0xff]  ;;  %v526_v43 = vld [vmem:[#allocation2 + $0x88] sm:$0xff] }
 0x1d5   : > { %v1864_v21 = vadd.f32 %v1762_v31, %v517_v52  ;;  %v2574_v40 = vadd.f32 %v2573_v62, %v2572_v54  ;;  %v1765_v38 = vadd.f32 %v1764_v0, %v3478_v3  ;;  %v3529_v50 = vadd.f32 %v2571_v2, %v3488_v48  ;;  %v528_v2 = vld [vmem:[#allocation2 + $0x98] sm:$0xff] }
 0x1d6   : > { %1898 = vst [vmem:[#allocation2 + $0x50] sm:$0xff] %v1866_v61  ;;  %v1867_v9 = vadd.f32 %v1773_v46, %v520_v10 }
 0x1d7   : > { %1896 = vst [vmem:[#allocation2 + $0x40] sm:$0xff] %v1864_v21  ;;  %v1865_v27 = vadd.f32 %v1765_v38, %v518_v63  ;;  %v3532_v55 = vadd.f32 %v2574_v40, %v3490_v5  ;;  %v531_v38 = vld [vmem:[#allocation2 + $0xb0] sm:$0xff] }
 0x1d8   : > { %1899 = vst [vmem:[#allocation2 + $0x58] sm:$0xff] %v1867_v9 }
 0x1d9   : > { %1897 = vst [vmem:[#allocation2 + $0x48] sm:$0xff] %v1865_v27  ;;  %v2575_v15 = vpop.f32.mrb[60].mxu1  ;;  %v2659_v60 = vpop.f32.mrb[60].mxu0 }
 0x1da   : > { %v1786_v22 = vadd.f32 %v2659_v60, %v3500_v8  ;;  %v2576_v14 = vpop.f32.mrb[61].mxu1  ;;  %v1777_v3 = vpop.f32.mrb[61].mxu0 }
 0x1db   : > { %v2577_v17 = vadd.f32 %v2576_v14, %v2575_v15  ;;  %v1778_v48 = vadd.f32 %v1777_v3, %v3492_v6  ;;  %v2578_v19 = vpop.f32.mrb[62].mxu1  ;;  %v2660_v24 = vpop.f32.mrb[62].mxu0  ;;  %v529_v15 = vld [vmem:[#allocation2 + $0xa0] sm:$0xff] }
 0x1dc   : > { %v1870_v26 = vadd.f32 %v1786_v22, %v523_v13  ;;  %v1789_v5 = vadd.f32 %v2660_v24, %v3502_v49  ;;  %v2579_v56 = vpop.f32.mrb[63].mxu1  ;;  %v1780_v32 = vpop.f32.mrb[63].mxu0 }
 0x1dd   : > { %v1868_v33 = vadd.f32 %v1778_v48, %v521_v18  ;;  %v2580_v34 = vadd.f32 %v2579_v56, %v2578_v19  ;;  %v1781_v37 = vadd.f32 %v1780_v32, %v3494_v30  ;;  %v1657_v8 = vadd.f32 %v2577_v17, %v3496_v16  ;;  %v530_v48 = vld [vmem:[#allocation2 + $0xa8] sm:$0xff]  ;;  %v535_v32 = vld [vmem:[#allocation2 + $0xd0] sm:$0xff] }
 0x1de   : > { %1902 = vst [vmem:[#allocation2 + $0x70] sm:$0xff] %v1870_v26  ;;  %v1871_v42 = vadd.f32 %v1789_v5, %v524_v23 }
 0x1df   : > { %1900 = vst [vmem:[#allocation2 + $0x60] sm:$0xff] %v1868_v33  ;;  %v1869_v57 = vadd.f32 %v1781_v37, %v522_v28  ;;  %v1660_v6 = vadd.f32 %v2580_v34, %v3498_v25 }
 0x1e0   : > { %1903 = vst [vmem:[#allocation2 + $0x78] sm:$0xff] %v1871_v42 }
 0x1e1   : > { %1901 = vst [vmem:[#allocation2 + $0x68] sm:$0xff] %v1869_v57  ;;  %v2581_v12 = vpop.f32.mrb[64].mxu1  ;;  %v2663_v49 = vpop.f32.mrb[64].mxu0 }
 0x1e2   : > { %v1802_v45 = vadd.f32 %v2663_v49, %v3519_v11  ;;  %v2582_v20 = vpop.f32.mrb[65].mxu1  ;;  %v1793_v52 = vpop.f32.mrb[65].mxu0 }
 0x1e3   : > { %v2583_v58 = vadd.f32 %v2582_v20, %v2581_v12  ;;  %v1794_v30 = vadd.f32 %v1793_v52, %v3509_v39  ;;  %v2584_v16 = vpop.f32.mrb[66].mxu1  ;;  %v2664_v31 = vpop.f32.mrb[66].mxu0  ;;  %v536_v12 = vld [vmem:[#allocation2 + $0xd8] sm:$0xff]  ;;  %v534_v20 = vld [vmem:[#allocation2 + $0xc8] sm:$0xff] }
 0x1e4   : > { %v1874_v54 = vadd.f32 %v1802_v45, %v527_v44  ;;  %v1805_v10 = vadd.f32 %v2664_v31, %v3522_v36  ;;  %v2585_v25 = vpop.f32.mrb[67].mxu1  ;;  %v1796_v61 = vpop.f32.mrb[67].mxu0 }
 0x1e5   : > { %v1872_v46 = vadd.f32 %v1794_v30, %v525_v51  ;;  %v2586_v62 = vadd.f32 %v2585_v25, %v2584_v16  ;;  %v1797_v63 = vadd.f32 %v1796_v61, %v3512_v4  ;;  %v1665_v11 = vadd.f32 %v2583_v58, %v3440_v29  ;;  %v532_v29 = vld [vmem:[#allocation2 + $0xb8] sm:$0xff] }
 0x1e6   : > { %1906 = vst [vmem:[#allocation2 + $0x90] sm:$0xff] %v1874_v54  ;;  %v1875_v0 = vadd.f32 %v1805_v10, %v528_v2 }
 0x1e7   : > { %1904 = vst [vmem:[#allocation2 + $0x80] sm:$0xff] %v1872_v46  ;;  %v1873_v21 = vadd.f32 %v1797_v63, %v526_v43  ;;  %v1668_v39 = vadd.f32 %v2586_v62, %v3442_v35  ;;  %v537_v43 = vld [vmem:[#allocation2 + $0xe0] sm:$0xff] }
 0x1e8   : > { %1907 = vst [vmem:[#allocation2 + $0x98] sm:$0xff] %v1875_v0 }
 0x1e9   : > { %1905 = vst [vmem:[#allocation2 + $0x88] sm:$0xff] %v1873_v21  ;;  %v2587_v40 = vpop.f32.mrb[68].mxu1  ;;  %v2667_v36 = vpop.f32.mrb[68].mxu0  ;;  %v538_v21 = vld [vmem:[#allocation2 + $0xe8] sm:$0xff] }
 0x1ea   : > { %v1818_v9 = vadd.f32 %v2667_v36, %v1657_v8  ;;  %v2588_v27 = vpop.f32.mrb[69].mxu1  ;;  %v1809_v13 = vpop.f32.mrb[69].mxu0  ;;  %v533_v8 = vld [vmem:[#allocation2 + $0xc0] sm:$0xff] }
 0x1eb   : > { %v2589_v60 = vadd.f32 %v2588_v27, %v2587_v40  ;;  %v1810_v4 = vadd.f32 %v1809_v13, %v3529_v50  ;;  %v2590_v22 = vpop.f32.mrb[70].mxu1  ;;  %v2668_v14 = vpop.f32.mrb[70].mxu0  ;;  %v540_v13 = vld [vmem:[#allocation2 + $0xf8] sm:$0xff] }
 0x1ec   : > { %v1878_v18 = vadd.f32 %v1818_v9, %v531_v38  ;;  %v1821_v3 = vadd.f32 %v2668_v14, %v1660_v6  ;;  %v2591_v17 = vpop.f32.mrb[71].mxu1  ;;  %v1812_v35 = vpop.f32.mrb[71].mxu0  ;;  %v1925_v14 = vld [vmem:[#allocation2 + $0x8] sm:$0xff] (!%p2377_p13) }
 0x1ed   : > { %v1876_v19 = vadd.f32 %v1810_v4, %v529_v15  ;;  %v2592_v23 = vadd.f32 %v2591_v17, %v2590_v22  ;;  %v1813_v24 = vadd.f32 %v1812_v35, %v3532_v55  ;;  %v1673_v26 = vadd.f32 %v2589_v60, %v3444_v41  ;;  %v1927_v17 = vld [vmem:[#allocation2 + $0x18] sm:$0xff] (!%p2377_p13) }
 0x1ee   : > { %1910 = vst [vmem:[#allocation2 + $0xb0] sm:$0xff] %v1878_v18  ;;  %v1879_v5 = vadd.f32 %v1821_v3, %v532_v29  ;;  %v3558_v29 = vld [vmem:[%s3647_s2] ss:$0 sm:$0xff] (!%p2377_p13)  ;;  %v1926_v3 = vld [vmem:[#allocation2 + $0x10] sm:$0xff] (!%p2377_p13) }
 0x1ef   : > { %1908 = vst [vmem:[#allocation2 + $0xa0] sm:$0xff] %v1876_v19  ;;  %v1877_v56 = vadd.f32 %v1813_v24, %v530_v48  ;;  %v1676_v50 = vadd.f32 %v2592_v23, %v3446_v47  ;;  %v1964_v18 = vadd.f32 (!%p2377_p13), %v3558_v29, %v1925_v14  ;;  %v1928_v48 = vld [vmem:[#allocation2 + $0x20] sm:$0xff] (!%p2377_p13)  ;;  %v1965_v35 = vadd.f32 (!%p2377_p13), %v3558_v29, %v1926_v3  ;;  %v1929_v23 = vld [vmem:[#allocation2 + $0x28] sm:$0xff] (!%p2377_p13)  ;;  %v1930_v24 = vld [vmem:[#allocation2 + $0x30] sm:$0xff] (!%p2377_p13) }
 0x1f0   : > { %1911 = vst [vmem:[#allocation2 + $0xb8] sm:$0xff] %v1879_v5  ;;  %v1966_v19 = vadd.f32 (!%p2377_p13), %v3558_v29, %v1927_v17  ;;  %v1931_v5 = vld [vmem:[#allocation2 + $0x38] sm:$0xff] (!%p2377_p13) }
 0x1f1   : > { %1909 = vst [vmem:[#allocation2 + $0xa8] sm:$0xff] %v1877_v56  ;;  %v2593_v28 = vpop.f32.mrb[72].mxu1  ;;  %v2671_v33 = vpop.f32.mrb[72].mxu0  ;;  %v1968_v56 = vadd.f32 (!%p2377_p13), %v3558_v29, %v1929_v23 }
 0x1f2   : > { %v1834_v34 = vadd.f32 %v2671_v33, %v1673_v26  ;;  %v2594_v37 = vpop.f32.mrb[73].mxu1  ;;  %v1825_v42 = vpop.f32.mrb[73].mxu0  ;;  %v1967_v26 = vadd.f32 (!%p2377_p13), %v3558_v29, %v1928_v48  ;;  %v1970_v33 = vadd.f32 (!%p2377_p13), %v3558_v29, %v1931_v5 }
 0x1f3   : > { %v2595_v57 = vadd.f32 %v2594_v37, %v2593_v28  ;;  %v1826_v6 = vadd.f32 %v1825_v42, %v1665_v11  ;;  %v2596_v55 = vpop.f32.mrb[74].mxu1  ;;  %v2672_v41 = vpop.f32.mrb[74].mxu0  ;;  %v1969_v28 = vadd.f32 (!%p2377_p13), %v3558_v29, %v1930_v24 }
 0x1f4   : > { %v1882_v44 = vadd.f32 %v1834_v34, %v535_v32  ;;  %v1837_v49 = vadd.f32 %v2672_v41, %v1676_v50  ;;  %v2597_v45 = vpop.f32.mrb[75].mxu1  ;;  %v1828_v51 = vpop.f32.mrb[75].mxu0  ;;  %v1932_v50 = vld [vmem:[#allocation2 + $0x40] sm:$0xff] (!%p2377_p13)  ;;  %v1933_v32 = vld [vmem:[#allocation2 + $0x48] sm:$0xff] (!%p2377_p13)  ;;  %v1934_v34 = vld [vmem:[#allocation2 + $0x50] sm:$0xff] (!%p2377_p13) }
 0x1f5   : > { %v1880_v47 = vadd.f32 %v1826_v6, %v533_v8  ;;  %v2598_v52 = vadd.f32 %v2597_v45, %v2596_v55  ;;  %v1829_v58 = vadd.f32 %v1828_v51, %v1668_v39  ;;  %v1681_v30 = vadd.f32 %v2595_v57, %v3448_v53  ;;  %v1935_v8 = vld [vmem:[#allocation2 + $0x58] sm:$0xff] (!%p2377_p13)  ;;  %v1936_v57 = vld [vmem:[#allocation2 + $0x60] sm:$0xff] (!%p2377_p13)  ;;  %v1937_v55 = vld [vmem:[#allocation2 + $0x68] sm:$0xff] (!%p2377_p13) }
 0x1f6   : > { %1914 = vst [vmem:[#allocation2 + $0xd0] sm:$0xff] %v1882_v44  ;;  %v1883_v16 = vadd.f32 %v1837_v49, %v536_v12  ;;  %v1971_v37 = vadd.f32 (!%p2377_p13), %v3558_v29, %v1932_v50  ;;  %v1972_v42 = vadd.f32 (!%p2377_p13), %v3558_v29, %v1933_v32  ;;  %v1973_v6 = vadd.f32 (!%p2377_p13), %v3558_v29, %v1934_v34  ;;  %v1938_v41 = vld [vmem:[#allocation2 + $0x70] sm:$0xff] (!%p2377_p13)  ;;  %v1939_v49 = vld [vmem:[#allocation2 + $0x78] sm:$0xff] (!%p2377_p13) }
 0x1f7   : > { %1912 = vst [vmem:[#allocation2 + $0xc0] sm:$0xff] %v1880_v47  ;;  %v1881_v2 = vadd.f32 %v1829_v58, %v534_v20  ;;  %v1684_v31 = vadd.f32 %v2598_v52, %v3450_v59  ;;  %v539_v59 = vld [vmem:[#allocation2 + $0xf0] sm:$0xff]  ;;  %v1974_v12 = vadd.f32 (!%p2377_p13), %v3558_v29, %v1935_v8  ;;  %v1975_v44 = vadd.f32 (!%p2377_p13), %v3558_v29, %v1936_v57  ;;  %v1940_v20 = vld [vmem:[#allocation2 + $0x80] sm:$0xff] (!%p2377_p13)  ;;  %v1941_v52 = vld [vmem:[#allocation2 + $0x88] sm:$0xff] (!%p2377_p13) }
 0x1f8   : > { %1915 = vst [vmem:[#allocation2 + $0xd8] sm:$0xff] %v1883_v16  ;;  %v1976_v45 = vadd.f32 (!%p2377_p13), %v3558_v29, %v1937_v55  ;;  %v1977_v47 = vadd.f32 (!%p2377_p13), %v3558_v29, %v1938_v41  ;;  %v1942_v16 = vld [vmem:[#allocation2 + $0x90] sm:$0xff] (!%p2377_p13) }
 0x1f9   : > { %1913 = vst [vmem:[#allocation2 + $0xc8] sm:$0xff] %v1881_v2  ;;  %v2599_v54 = vpop.f32.mrb[76].mxu1  ;;  %v2675_v10 = vpop.f32.mrb[76].mxu0 }
 0x1fa   : > { %v2600_v25 = vpop.f32.mrb[77].mxu1  ;;  %v1841_v61 = vpop.f32.mrb[77].mxu0 }
 0x1fb   : > { %v2601_v46 = vadd.f32 %v2600_v25, %v2599_v54  ;;  %v1842_v62 = vadd.f32 %v1841_v61, %v1681_v30  ;;  %v2602_v63 = vpop.f32.mrb[78].mxu1  ;;  %v2676_v11 = vpop.f32.mrb[78].mxu0  ;;  %v1978_v30 = vadd.f32 (!%p2377_p13), %v3558_v29, %v1939_v49  ;;  %v1943_v54 = vld [vmem:[#allocation2 + $0x98] sm:$0xff] (!%p2377_p13)  ;;  %v1980_v25 = vadd.f32 (!%p2377_p13), %v3558_v29, %v1941_v52 }
 0x1fc   : > { %v2603_v0 = vpop.f32.mrb[79].mxu1  ;;  %v1844_v53 = vpop.f32.mrb[79].mxu0 }
 0x1fd   : > { %v1689_v39 = vadd.f32 %v2601_v46, %v3452_v1  ;;  %v1884_v40 = vadd.f32 %v1842_v62, %v537_v43  ;;  %v2604_v38 = vadd.f32 %v2603_v0, %v2602_v63  ;;  %v1845_v36 = vadd.f32 %v1844_v53, %v1684_v31  ;;  %v1924_v1 = vld [vmem:[#allocation2] sm:$0xff] (!%p2377_p13)  ;;  %v1945_v62 = vld [vmem:[#allocation2 + $0xa8] sm:$0xff] (!%p2377_p13)  ;;  %v1946_v0 = vld [vmem:[#allocation2 + $0xb0] sm:$0xff] (!%p2377_p13) }
 0x1fe   : > { %v1979_v31 = vadd.f32 (!%p2377_p13), %v3558_v29, %v1940_v20  ;;  %v1944_v43 = vld [vmem:[#allocation2 + $0xa0] sm:$0xff] (!%p2377_p13)  ;;  %v1981_v46 = vadd.f32 (!%p2377_p13), %v3558_v29, %v1942_v16 }
 0x1ff   : > { %v1850_v9 = vadd.f32 %v2675_v10, %v1689_v39  ;;  %1916 = vst [vmem:[#allocation2 + $0xe0] sm:$0xff] %v1884_v40  ;;  %v1692_v27 = vadd.f32 %v2604_v38, %v3454_v7  ;;  %v1885_v15 = vadd.f32 %v1845_v36, %v538_v21  ;;  %1923 = sbr.rel (%p2377_p13) target bundleno = 556 (0x22c), region = 66  ;;  %v1963_v7 = vadd.f32 (!%p2377_p13), %v3558_v29, %v1924_v1  ;;  %v1947_v39 = vld [vmem:[#allocation2 + $0xb8] sm:$0xff] (!%p2377_p13)  ;;  %v1948_v36 = vld [vmem:[#allocation2 + $0xc0] sm:$0xff] (!%p2377_p13) }
 0x200   : > { %v1983_v53 = vadd.f32 (!%p2377_p13), %v3558_v29, %v1944_v43  ;;  %v1984_v38 = vadd.f32 (!%p2377_p13), %v3558_v29, %v1945_v62  ;;  %v1951_v1 = vld [vmem:[#allocation2 + $0xd8] sm:$0xff] (!%p2377_p13) }
 0x201   : > { %v1886_v60 = vadd.f32 %v1850_v9, %v539_v59  ;;  %v1853_v4 = vadd.f32 %v2676_v11, %v1692_v27  ;;  %1917 = vst [vmem:[#allocation2 + $0xe8] sm:$0xff] %v1885_v15  ;;  %2905 = vtanh.f32 (!%p2377_p13), %v1963_v7  ;;  %v1982_v11 = vadd.f32 (!%p2377_p13), %v3558_v29, %v1943_v54  ;;  %v1949_v27 = vld [vmem:[#allocation2 + $0xc8] sm:$0xff] (!%p2377_p13) }
 0x202   : > { %2907 = vtanh.f32 (!%p2377_p13), %v1964_v18  ;;  %v1985_v9 = vadd.f32 (!%p2377_p13), %v3558_v29, %v1946_v0  ;;  %v1988_v7 = vadd.f32 (!%p2377_p13), %v3558_v29, %v1949_v27 }
 0x203   : > { %1918 = vst [vmem:[#allocation2 + $0xf0] sm:$0xff] %v1886_v60  ;;  %v1887_v22 = vadd.f32 %v1853_v4, %v540_v13  ;;  %2909 = vtanh.f32 (!%p2377_p13), %v1965_v35  ;;  %v1986_v13 = vadd.f32 (!%p2377_p13), %v3558_v29, %v1947_v39  ;;  %v1950_v60 = vld [vmem:[#allocation2 + $0xd0] sm:$0xff] (!%p2377_p13) }
 0x204   : > { %2911 = vtanh.f32 (!%p2377_p13), %v1966_v19  ;;  %v1989_v17 = vadd.f32 (!%p2377_p13), %v3558_v29, %v1950_v60  ;;  %v1990_v19 = vadd.f32 (!%p2377_p13), %v3558_v29, %v1951_v1 }
 0x205   : > { %1919 = vst [vmem:[#allocation2 + $0xf8] sm:$0xff] %v1887_v22  ;;  %2913 = vtanh.f32 (!%p2377_p13), %v1967_v26  ;;  %v1987_v22 = vadd.f32 (!%p2377_p13), %v3558_v29, %v1948_v36 }
 0x206   : > { %2915 = vtanh.f32 %v1968_v56  ;;  %v1952_v18 = vld [vmem:[#allocation2 + $0xe0] sm:$0xff] }
 0x207   : > { %2917 = vtanh.f32 %v1969_v28  ;;  %v1991_v26 = vadd.f32 %v3558_v29, %v1952_v18 }
 0x208   : > { %2919 = vtanh.f32 %v1970_v33  ;;  %v1953_v48 = vld [vmem:[#allocation2 + $0xe8] sm:$0xff] }
 0x209   : > { %2921 = vtanh.f32 %v1971_v37  ;;  %v1992_v50 = vadd.f32 %v3558_v29, %v1953_v48 }
 0x20a   : > { %2923 = vtanh.f32 %v1972_v42  ;;  %v1954_v23 = vld [vmem:[#allocation2 + $0xf0] sm:$0xff] }
 0x20b   : > { %v2906_v51 = vpop.eup %2905  ;;  %2925 = vtanh.f32 %v1973_v6  ;;  %v1993_v32 = vadd.f32 %v3558_v29, %v1954_v23 }
 0x20c   : > { %v2908_v58 = vpop.eup %2907  ;;  %2027 = vst [vmem:[%s3315_s30] sm:$0xff] %v2906_v51  ;;  %2927 = vtanh.f32 %v1974_v12  ;;  %v1955_v5 = vld [vmem:[#allocation2 + $0xf8] sm:$0xff] }
 0x20d   : > { %v2910_v2 = vpop.eup %2909  ;;  %2028 = vst [vmem:[%s3315_s30 + $0x8] sm:$0xff] %v2908_v58  ;;  %2929 = vtanh.f32 %v1975_v44  ;;  %v1994_v34 = vadd.f32 %v3558_v29, %v1955_v5 }
 0x20e   : > { %v2912_v10 = vpop.eup %2911  ;;  %2029 = vst [vmem:[%s3315_s30 + $0x10] sm:$0xff] %v2910_v2  ;;  %2931 = vtanh.f32 %v1976_v45 }
 0x20f   : > { %v2914_v61 = vpop.eup %2913  ;;  %2030 = vst [vmem:[%s3315_s30 + $0x18] sm:$0xff] %v2912_v10  ;;  %2933 = vtanh.f32 %v1977_v47 }
 0x210   : > { %v2916_v63 = vpop.eup %2915  ;;  %2031 = vst [vmem:[%s3315_s30 + $0x20] sm:$0xff] %v2914_v61  ;;  %2935 = vtanh.f32 %v1978_v30 }
 0x211   : > { %v2918_v21 = vpop.eup %2917  ;;  %2032 = vst [vmem:[%s3315_s30 + $0x28] sm:$0xff] %v2916_v63  ;;  %2937 = vtanh.f32 %v1979_v31 }
 0x212   : > { %v2920_v40 = vpop.eup %2919  ;;  %2033 = vst [vmem:[%s3315_s30 + $0x30] sm:$0xff] %v2918_v21  ;;  %2939 = vtanh.f32 %v1980_v25 }
 0x213   : > { %v2922_v59 = vpop.eup %2921  ;;  %2034 = vst [vmem:[%s3315_s30 + $0x38] sm:$0xff] %v2920_v40  ;;  %2941 = vtanh.f32 %v1981_v46 }
 0x214   : > { %v2924_v15 = vpop.eup %2923  ;;  %2035 = vst [vmem:[%s3315_s30 + $0x40] sm:$0xff] %v2922_v59  ;;  %2943 = vtanh.f32 %v1982_v11 }
 0x215   : > { %v2926_v4 = vpop.eup %2925  ;;  %2036 = vst [vmem:[%s3315_s30 + $0x48] sm:$0xff] %v2924_v15  ;;  %2945 = vtanh.f32 %v1983_v53 }
 0x216   : > { %v2928_v14 = vpop.eup %2927  ;;  %2037 = vst [vmem:[%s3315_s30 + $0x50] sm:$0xff] %v2926_v4  ;;  %2947 = vtanh.f32 %v1984_v38 }
 0x217   : > { %v2930_v3 = vpop.eup %2929  ;;  %2038 = vst [vmem:[%s3315_s30 + $0x58] sm:$0xff] %v2928_v14  ;;  %2949 = vtanh.f32 %v1985_v9 }
 0x218   : > { %v2932_v35 = vpop.eup %2931  ;;  %2039 = vst [vmem:[%s3315_s30 + $0x60] sm:$0xff] %v2930_v3  ;;  %2951 = vtanh.f32 %v1986_v13 }
 0x219   : > { %v2934_v24 = vpop.eup %2933  ;;  %2040 = vst [vmem:[%s3315_s30 + $0x68] sm:$0xff] %v2932_v35  ;;  %2953 = vtanh.f32 %v1987_v22 }
 0x21a   : > { %v2936_v56 = vpop.eup %2935  ;;  %2041 = vst [vmem:[%s3315_s30 + $0x70] sm:$0xff] %v2934_v24  ;;  %2955 = vtanh.f32 %v1988_v7 }
 0x21b   : > { %v2938_v28 = vpop.eup %2937  ;;  %2042 = vst [vmem:[%s3315_s30 + $0x78] sm:$0xff] %v2936_v56  ;;  %2957 = vtanh.f32 %v1989_v17 }
 0x21c   : > { %v2940_v33 = vpop.eup %2939  ;;  %2043 = vst [vmem:[%s3315_s30 + $0x80] sm:$0xff] %v2938_v28  ;;  %2959 = vtanh.f32 %v1990_v19 }
 0x21d   : > { %v2942_v37 = vpop.eup %2941  ;;  %2044 = vst [vmem:[%s3315_s30 + $0x88] sm:$0xff] %v2940_v33  ;;  %2961 = vtanh.f32 %v1991_v26 }
 0x21e   : > { %v2944_v8 = vpop.eup %2943  ;;  %2045 = vst [vmem:[%s3315_s30 + $0x90] sm:$0xff] %v2942_v37  ;;  %2963 = vtanh.f32 %v1992_v50 }
 0x21f   : > { %v2946_v42 = vpop.eup %2945  ;;  %2046 = vst [vmem:[%s3315_s30 + $0x98] sm:$0xff] %v2944_v8  ;;  %2965 = vtanh.f32 %v1993_v32 }
 0x220   : > { %v2948_v57 = vpop.eup %2947  ;;  %2047 = vst [vmem:[%s3315_s30 + $0xa0] sm:$0xff] %v2946_v42  ;;  %2967 = vtanh.f32 %v1994_v34 }
 0x221   : > { %v2950_v29 = vpop.eup %2949  ;;  %2048 = vst [vmem:[%s3315_s30 + $0xa8] sm:$0xff] %v2948_v57 }
 0x222   : > { %v2952_v6 = vpop.eup %2951  ;;  %2049 = vst [vmem:[%s3315_s30 + $0xb0] sm:$0xff] %v2950_v29 }
 0x223   : > { %v2954_v55 = vpop.eup %2953  ;;  %2050 = vst [vmem:[%s3315_s30 + $0xb8] sm:$0xff] %v2952_v6 }
 0x224   : > { %v2956_v12 = vpop.eup %2955  ;;  %2051 = vst [vmem:[%s3315_s30 + $0xc0] sm:$0xff] %v2954_v55 }
 0x225   : > { %v2958_v41 = vpop.eup %2957  ;;  %2052 = vst [vmem:[%s3315_s30 + $0xc8] sm:$0xff] %v2956_v12 }
 0x226   : > { %v2960_v44 = vpop.eup %2959  ;;  %2053 = vst [vmem:[%s3315_s30 + $0xd0] sm:$0xff] %v2958_v41 }
 0x227   : > { %v2962_v49 = vpop.eup %2961  ;;  %2054 = vst [vmem:[%s3315_s30 + $0xd8] sm:$0xff] %v2960_v44 }
 0x228   : > { %v2964_v45 = vpop.eup %2963  ;;  %2055 = vst [vmem:[%s3315_s30 + $0xe0] sm:$0xff] %v2962_v49 }
 0x229   : > { %v2966_v20 = vpop.eup %2965  ;;  %2056 = vst [vmem:[%s3315_s30 + $0xe8] sm:$0xff] %v2964_v45 }
 0x22a   : > { %v2968_v51 = vpop.eup %2967  ;;  %2057 = vst [vmem:[%s3315_s30 + $0xf0] sm:$0xff] %v2966_v20 }
 0x22b   : > { %2058 = vst [vmem:[%s3315_s30 + $0xf8] sm:$0xff] %v2968_v51 }
 0x22c PF: > { %s13_s18 = sadd.s32 1, %s3023_s18   ;;  %s3649_s12 = smov %s3003_s13 }
 0x22d   : > { %p10_p0 = scmp.ge.s32.totalorder %s13_s18, 12   ;;  %s3650_s13 = smov %s3097_s25 }
 0x22e   : > { %s3651_s14 = smov %s3015_s16  ;;  %s3652_s15 = smov %s3019_s17 }
 0x22f   : > { %s3653_s16 = smov %s3656_s19  ;;  %s3654_s17 = smov %s3660_s20 }
 0x230   :  { %12 = sbr.rel (!%p10_p0) target bundleno = 4 (0x4), region = 113 }

</bundles_post_ra>
